<compile_context>
chip_gen: v7x
topology: tpu7x:2x2x1
jax: 0.10.0
libtpu: 0.0.40
codegen_flags: <defaults>
</compile_context>

<pallas_src>
import functools

import jax
import jax.numpy as jnp
from jax.experimental import pallas as pl
from jax.experimental.pallas import tpu as pltpu


def _round_up(x, m):
    return (x + m - 1) // m * m


_SQRT1_2 = 0.7071067811865476


def _gelu_erf(x):
    # Exact (erf) GELU via the Abramowitz-Stegun 7.1.26 polynomial (|err| < 1.5e-7).
    # Uses only exp / mul / add / where so it lowers cleanly in Mosaic (no lax.erf).
    z = x * _SQRT1_2
    a = jnp.abs(z)
    t = 1.0 / (1.0 + 0.3275911 * a)
    poly = t * (0.254829592 + t * (-0.284496736 + t * (1.421413741
           + t * (-1.453152027 + t * 1.061405429))))
    erf_a = 1.0 - poly * jnp.exp(-a * a)
    erf_z = jnp.where(z >= 0.0, erf_a, -erf_a)
    return 0.5 * x * (1.0 + erf_z)


# ----------------------------------------------------------------------------
# Pallas kernels
# ----------------------------------------------------------------------------
def _matmul_kernel(x_ref, w_ref, b_ref, o_ref):
    # x: (tm, K) bf16, w: (K, tn) bf16, b: (1, tn) f32 -> o: (tm, tn) bf16
    acc = jnp.dot(x_ref[...], w_ref[...], preferred_element_type=jnp.float32)
    o_ref[...] = (acc + b_ref[...]).astype(o_ref.dtype)


def _matmul_res_kernel(x_ref, w_ref, b_ref, r_ref, o_ref):
    # Same as _matmul_kernel but with the residual add fused into the epilogue.
    acc = jnp.dot(x_ref[...], w_ref[...], preferred_element_type=jnp.float32)
    acc = acc + b_ref[...] + r_ref[...].astype(jnp.float32)
    o_ref[...] = acc.astype(o_ref.dtype)


def _ln_matmul_kernel(x_ref, g_ref, bln_ref, w_ref, b_ref, o_ref, *, gelu):
    # LayerNorm fused as a prologue on the (tm, K) block (K == C fits in one tile),
    # optional exact-erf GELU fused into the epilogue (for fc1).
    x = x_ref[...].astype(jnp.float32)
    mean = jnp.mean(x, axis=-1, keepdims=True)
    var = jnp.mean(jnp.square(x - mean), axis=-1, keepdims=True)
    xn = (x - mean) * jax.lax.rsqrt(var + 1e-5) * g_ref[...] + bln_ref[...]
    acc = jnp.dot(xn.astype(jnp.bfloat16), w_ref[...],
                  preferred_element_type=jnp.float32)
    acc = acc + b_ref[...]
    if gelu:
        acc = _gelu_erf(acc)
    o_ref[...] = acc.astype(o_ref.dtype)


def _layernorm_kernel(x_ref, g_ref, b_ref, o_ref):
    # Standalone LN (patch-embed post-norm only). Biased variance, eps=1e-5.
    x = x_ref[...].astype(jnp.float32)
    mean = jnp.mean(x, axis=-1, keepdims=True)
    var = jnp.mean(jnp.square(x - mean), axis=-1, keepdims=True)
    o_ref[...] = ((x - mean) * jax.lax.rsqrt(var + 1e-5) * g_ref[...]
                  + b_ref[...]).astype(o_ref.dtype)


def _spatial_attn_kernel(qkv_ref, o_ref, *, num_heads):
    # qkv: (cb, N, 3C) bf16 packed as [q | k | v], heads contiguous (dh each).
    # Softmax scale is already folded into the qkv weights. Exact softmax division.
    # Per-head outputs are cast to bf16 immediately (bounds live vregs); concat on the
    # lane dim avoids unaligned lane-slice stores to the output ref.
    qkv = qkv_ref[...]
    C = o_ref.shape[-1]
    dh = C // num_heads
    outs = []
    for h in range(num_heads):
        q = qkv[:, :, h * dh:(h + 1) * dh]
        k = qkv[:, :, C + h * dh:C + (h + 1) * dh]
        v = qkv[:, :, 2 * C + h * dh:2 * C + (h + 1) * dh]
        s = jnp.einsum("bnd,bmd->bnm", q, k, preferred_element_type=jnp.float32)
        s = s - jnp.max(s, axis=-1, keepdims=True)
        p = jnp.exp(s)
        p = p / jnp.sum(p, axis=-1, keepdims=True)
        o_h = jnp.einsum("bnm,bmd->bnd", p.astype(jnp.bfloat16), v,
                         preferred_element_type=jnp.float32)
        outs.append(o_h.astype(o_ref.dtype))
    o_ref[...] = jnp.concatenate(outs, axis=-1)


def _channel_attn_kernel(qkv_ref, o_ref, *, groups, scale):
    # PyTorch ChannelAttention: attn = softmax((q * N^-0.5)^T k); out[n,c] = sum_d attn[c,d] v[n,d].
    # The N^-0.5 scale is runtime (depends on token count), applied on the tiny (cg,cg) s.
    qkv = qkv_ref[...]
    C = o_ref.shape[-1]
    cg = C // groups
    outs = []
    for g in range(groups):
        q = qkv[:, :, g * cg:(g + 1) * cg]
        k = qkv[:, :, C + g * cg:C + (g + 1) * cg]
        v = qkv[:, :, 2 * C + g * cg:2 * C + (g + 1) * cg]
        s = jnp.einsum("bnc,bnd->bcd", q, k,
                       preferred_element_type=jnp.float32) * scale
        s = s - jnp.max(s, axis=-1, keepdims=True)
        p = jnp.exp(s)
        p = p / jnp.sum(p, axis=-1, keepdims=True)
        o_g = jnp.einsum("bnd,bcd->bnc", v, p.astype(jnp.bfloat16),
                         preferred_element_type=jnp.float32)
        outs.append(o_g.astype(o_ref.dtype))
    o_ref[...] = jnp.concatenate(outs, axis=-1)


def _dwconv3x3_kernel(x_ref, w_ref, b_ref, o_ref):
    # x: (1, H, W, C) bf16 (unpadded), w: (9, C) f32, b: (1, C) f32
    # o = x + dwconv3x3(x) + b  -- residual fused; the halo is built in VMEM from the
    # unpadded input (no host-side padded activation written to / re-read from HBM).
    H, W, C = o_ref.shape[1], o_ref.shape[2], o_ref.shape[3]
    x = x_ref[0]
    zrow = jnp.zeros((1, W, C), x.dtype)
    xv = jnp.concatenate([zrow, x, zrow], axis=0)            # (H+2, W, C)
    zcol = jnp.zeros((H + 2, 1, C), x.dtype)
    xp = jnp.concatenate([zcol, xv, zcol], axis=1)           # (H+2, W+2, C)
    acc = x.astype(jnp.float32) + b_ref[...]
    for dh in range(3):
        for dw in range(3):
            tap = w_ref[dh * 3 + dw:dh * 3 + dw + 1, :]       # (1, C)
            acc = acc + xp[dh:dh + H, dw:dw + W, :].astype(jnp.float32) * tap
    o_ref[0] = acc.astype(o_ref.dtype)


# ----------------------------------------------------------------------------
# Pallas wrappers
# ----------------------------------------------------------------------------
def fused_linear(x, lin, *, ln=None, residual=None, gelu=False):
    """x: (..., K) -> (..., N) bf16.  Full-K single-block matmul, f32 MXU accumulate.

    Optional fusions: LayerNorm prologue (`ln=(gamma, beta)` each (1, K) f32),
    residual add in the epilogue, exact-erf GELU in the epilogue."""
    shp = x.shape
    K = shp[-1]
    x2 = x.reshape(-1, K)
    if x2.dtype != jnp.bfloat16:
        x2 = x2.astype(jnp.bfloat16)
    M = x2.shape[0]
    N, tn = lin["n"], lin["tn"]
    Np = lin["w"].shape[1]
    tm = min(512, _round_up(M, 8))
    Mp = _round_up(M, tm)
    if Mp != M:
        x2 = jnp.pad(x2, ((0, Mp - M), (0, 0)))

    grid = (Mp // tm, Np // tn)
    x_spec = pl.BlockSpec((tm, K), lambda i, j: (i, 0))
    w_spec = pl.BlockSpec((K, tn), lambda i, j: (0, j))
    b_spec = pl.BlockSpec((1, tn), lambda i, j: (0, j))
    o_spec = pl.BlockSpec((tm, tn), lambda i, j: (i, j))
    out_shape = jax.ShapeDtypeStruct((Mp, Np), jnp.bfloat16)
    cparams = pltpu.CompilerParams(dimension_semantics=("parallel", "parallel"))

    if ln is not None:
        g, bln = ln
        vec_spec = pl.BlockSpec((1, K), lambda i, j: (0, 0))
        out = pl.pallas_call(
            functools.partial(_ln_matmul_kernel, gelu=gelu),
            out_shape=out_shape, grid=grid,
            in_specs=[x_spec, vec_spec, vec_spec, w_spec, b_spec],
            out_specs=o_spec, compiler_params=cparams,
        )(x2, g, bln, lin["w"], lin["b"])
    elif residual is not None:
        r2 = residual.reshape(-1, residual.shape[-1])
        if r2.dtype != jnp.bfloat16:
            r2 = r2.astype(jnp.bfloat16)
        if (Mp, Np) != r2.shape:
            r2 = jnp.pad(r2, ((0, Mp - M), (0, Np - N)))
        r_spec = pl.BlockSpec((tm, tn), lambda i, j: (i, j))
        out = pl.pallas_call(
            _matmul_res_kernel, out_shape=out_shape, grid=grid,
            in_specs=[x_spec, w_spec, b_spec, r_spec],
            out_specs=o_spec, compiler_params=cparams,
        )(x2, lin["w"], lin["b"], r2)
    else:
        out = pl.pallas_call(
            _matmul_kernel, out_shape=out_shape, grid=grid,
            in_specs=[x_spec, w_spec, b_spec],
            out_specs=o_spec, compiler_params=cparams,
        )(x2, lin["w"], lin["b"])
    return out[:M, :N].reshape(*shp[:-1], N)


def layernorm(x, g, b):
    shp = x.shape
    C = shp[-1]
    x2 = x.reshape(-1, C)
    if x2.dtype != jnp.bfloat16:
        x2 = x2.astype(jnp.bfloat16)
    M = x2.shape[0]
    tm = min(512, _round_up(M, 8))
    Mp = _round_up(M, tm)
    if Mp != M:
        x2 = jnp.pad(x2, ((0, Mp - M), (0, 0)))
    out = pl.pallas_call(
        _layernorm_kernel,
        out_shape=jax.ShapeDtypeStruct((Mp, C), jnp.bfloat16),
        grid=(Mp // tm,),
        in_specs=[pl.BlockSpec((tm, C), lambda i: (i, 0)),
                  pl.BlockSpec((1, C), lambda i: (0, 0)),
                  pl.BlockSpec((1, C), lambda i: (0, 0))],
        out_specs=pl.BlockSpec((tm, C), lambda i: (i, 0)),
        compiler_params=pltpu.CompilerParams(dimension_semantics=("parallel",)),
    )(x2, g, b)
    return out[:M].reshape(shp)


def spatial_attention_pallas(qkv, num_heads):
    """qkv: (Bw, N, 3C) bf16 packed; returns (Bw, N, C) bf16 multi-head window attention."""
    Bw, N, C3 = qkv.shape
    C = C3 // 3
    cb = min(Bw, 32)
    # keep the (cb, N, 4C) working set around ~2 MiB so v7x (64 MiB VMEM) stays happy
    while cb > 1 and cb * N * (C3 + C) * 2 > (2 << 20):
        cb //= 2
    Bp = _round_up(Bw, cb)
    if Bp != Bw:
        qkv = jnp.pad(qkv, ((0, Bp - Bw), (0, 0), (0, 0)))
    out = pl.pallas_call(
        functools.partial(_spatial_attn_kernel, num_heads=num_heads),
        out_shape=jax.ShapeDtypeStruct((Bp, N, C), jnp.bfloat16),
        grid=(Bp // cb,),
        in_specs=[pl.BlockSpec((cb, N, C3), lambda i: (i, 0, 0))],
        out_specs=pl.BlockSpec((cb, N, C), lambda i: (i, 0, 0)),
        compiler_params=pltpu.CompilerParams(dimension_semantics=("parallel",)),
    )(qkv)
    return out[:Bw]


def channel_attention_pallas(qkv, groups):
    """qkv: (B, N, 3C) bf16 packed; returns (B, N, C) bf16 channel attention."""
    B, N, C3 = qkv.shape
    C = C3 // 3
    scale = float(N) ** -0.5
    # TODO(synk): for very large N on v7x, tile N as a reduction axis with a (cg,cg)
    # accumulator instead of the single (1, N, 3C) block.
    out = pl.pallas_call(
        functools.partial(_channel_attn_kernel, groups=groups, scale=scale),
        out_shape=jax.ShapeDtypeStruct((B, N, C), jnp.bfloat16),
        grid=(B,),
        in_specs=[pl.BlockSpec((1, N, C3), lambda i: (i, 0, 0))],
        out_specs=pl.BlockSpec((1, N, C), lambda i: (i, 0, 0)),
        compiler_params=pltpu.CompilerParams(dimension_semantics=("parallel",)),
    )(qkv)
    return out


def dwconv3x3_residual(x, size, conv):
    """Returns x + DepthWiseConv3x3(x); halo + residual both fused in the kernel."""
    B, N, C = x.shape
    H, W = size
    xs = x.reshape(B, H, W, C)
    if xs.dtype != jnp.bfloat16:
        xs = xs.astype(jnp.bfloat16)
    out = pl.pallas_call(
        _dwconv3x3_kernel,
        out_shape=jax.ShapeDtypeStruct((B, H, W, C), jnp.bfloat16),
        grid=(B,),
        in_specs=[
            pl.BlockSpec((1, H, W, C), lambda i: (i, 0, 0, 0)),
            pl.BlockSpec((9, C), lambda i: (0, 0)),
            pl.BlockSpec((1, C), lambda i: (0, 0)),
        ],
        out_specs=pl.BlockSpec((1, H, W, C), lambda i: (i, 0, 0, 0)),
        compiler_params=pltpu.CompilerParams(dimension_semantics=("parallel",)),
    )(xs, conv["w"], conv["b"])
    return out.reshape(B, N, C)


# ----------------------------------------------------------------------------
# DaViT building blocks (JAX glue around the Pallas kernels)
# ----------------------------------------------------------------------------
def window_partition(x, ws):
    B, H, W, C = x.shape
    x = x.reshape(B, H // ws, ws, W // ws, ws, C)
    return x.transpose(0, 1, 3, 2, 4, 5).reshape(-1, ws, ws, C)


def window_reverse(windows, ws, H, W):
    B = windows.shape[0] // (H * W // ws // ws)
    x = windows.reshape(B, H // ws, W // ws, ws, ws, -1)
    return x.transpose(0, 1, 3, 2, 4, 5).reshape(B, H, W, -1)


def conv_embed(x_nhwc, p):
    """Patch-embedding conv: reshape-patchify (non-overlapping) or im2col (stem) + Pallas GEMM + LN."""
    k, s, pad = p["k"], p["stride"], p["pad"]
    B, H, W, Cin = x_nhwc.shape
    if x_nhwc.dtype != jnp.bfloat16:
        x_nhwc = x_nhwc.astype(jnp.bfloat16)
    if k == s and pad == 0 and H % k == 0 and W % k == 0:
        # Non-overlapping downsample (stages >= 1): pure reshape, no im2col blow-up.
        Ho, Wo = H // k, W // k
        patches = x_nhwc.reshape(B, Ho, k, Wo, k, Cin).transpose(0, 1, 3, 2, 4, 5)
        patches = patches.reshape(B * Ho * Wo, k * k * Cin)
    else:
        # TODO(synk): the overlapping 7x7 stem still uses a host-side im2col gather;
        # only run once per forward on the 3-channel input, GEMM + LN are Pallas.
        xp = jnp.pad(x_nhwc, ((0, 0), (pad, pad), (pad, pad), (0, 0)))
        Ho = (H + 2 * pad - k) // s + 1
        Wo = (W + 2 * pad - k) // s + 1
        cols = []
        for kh in range(k):
            for kw in range(k):
                cols.append(
                    xp[:, kh:kh + s * (Ho - 1) + 1:s, kw:kw + s * (Wo - 1) + 1:s, :])
        patches = jnp.stack(cols, axis=3).reshape(B * Ho * Wo, k * k * Cin)
    tokens = fused_linear(patches, p["proj"])                # (B*Ho*Wo, Cout) bf16
    Cout = p["proj"]["n"]
    tokens = layernorm(tokens.reshape(B, Ho * Wo, Cout), p["ng"], p["nb"])
    return tokens, (Ho, Wo)


def window_attention_block(x, size, p, ws):
    H, W = size
    B, L, C = x.shape
    # LayerNorm fused into the qkv projection; softmax scale pre-folded into qkv weights.
    qkv = fused_linear(x, p["qkv"], ln=p["attn_ln"])          # (B, L, 3C) bf16
    qkv_map = qkv.reshape(B, H, W, 3 * C)
    pad_b = (ws - H % ws) % ws
    pad_r = (ws - W % ws) % ws
    if pad_b or pad_r:
        # PyTorch zero-pads x *before* the qkv linear; padding the qkv map with the
        # (scale-folded) qkv bias reproduces that exactly since qkv(0) = bias.
        Hp, Wp = H + pad_b, W + pad_r
        fill = jnp.broadcast_to(p["qkv"]["b"][0, :3 * C].astype(qkv_map.dtype),
                                (B, Hp, Wp, 3 * C))
        qkv_map = jax.lax.dynamic_update_slice(fill, qkv_map, (0, 0, 0, 0))
    else:
        Hp, Wp = H, W
    qkv_win = window_partition(qkv_map, ws).reshape(-1, ws * ws, 3 * C)
    o = spatial_attention_pallas(qkv_win, p["num_heads"])      # (Bw, N, C) bf16
    # proj is per-token, so window_reverse/crop commute with it; doing them first lets
    # the residual add be fused into the proj matmul in token layout.
    o = window_reverse(o.reshape(-1, ws, ws, C), ws, Hp, Wp)[:, :H, :W, :]
    o = o.reshape(B, H * W, C)
    return fused_linear(o, p["proj"], residual=x)


def channel_attention_block(x, p):
    qkv = fused_linear(x, p["qkv"], ln=p["attn_ln"])           # (B, N, 3C) bf16
    o = channel_attention_pallas(qkv, p["groups"])
    return fused_linear(o, p["proj"], residual=x)


def mlp_block(x, p):
    h = fused_linear(x, p["fc1"], ln=p["ffn_ln"], gelu=True)   # LN + GEMM + GELU fused
    return fused_linear(h, p["fc2"], residual=x)               # GEMM + residual fused


def spatial_block(x, size, p, window_size):
    x = dwconv3x3_residual(x, size, p["conv1"])
    x = window_attention_block(x, size, p, window_size)
    x = dwconv3x3_residual(x, size, p["conv2"])
    x = mlp_block(x, p)
    return x


def channel_block(x, size, p):
    x = dwconv3x3_residual(x, size, p["conv1"])
    x = channel_attention_block(x, p)
    x = dwconv3x3_residual(x, size, p["conv2"])
    x = mlp_block(x, p)
    return x


def davit_forward(x_nchw, params, cfg):
    """Forward of DaViT.forward_features with out_indices == [] (returns {'res5'})."""
    B = x_nchw.shape[0]
    x_nhwc = jnp.transpose(x_nchw, (0, 2, 3, 1))  # NCHW -> NHWC
    size = (x_nhwc.shape[1], x_nhwc.shape[2])
    tokens = None
    for i, stage in enumerate(params["stages"]):
        if i > 0:
            H, W = size
            x_nhwc = tokens.reshape(B, H, W, -1)
        tokens, size = conv_embed(x_nhwc, stage["patch"])
        for blk in stage["blocks"]:
            tokens = spatial_block(tokens, size, blk["spatial"], cfg["window_size"])
            tokens = channel_block(tokens, size, blk["channel"])
    H, W = size
    out = tokens.reshape(B, H, W, -1).transpose(0, 3, 1, 2).astype(jnp.float32)
    return {"res5": out}


# ----------------------------------------------------------------------------
# Parameter init (f32, shapes per DaViT.__init__) + one-time runtime preparation
# ----------------------------------------------------------------------------
def _normal(key, shape, std=0.02):
    return std * jax.random.normal(key, shape, jnp.float32)


def init_davit_params(key, cfg):
    keys = iter(jax.random.split(key, 512))

    def nk():
        return next(keys)

    stages = []
    in_c = cfg["in_chans"]
    for i in range(len(cfg["embed_dims"])):
        dim = cfg["embed_dims"][i]
        k = cfg["patch_size"][i]
        patch = dict(
            k=k, stride=cfg["patch_stride"][i], pad=cfg["patch_padding"][i],
            w=_normal(nk(), (k, k, in_c, dim)),
            b=jnp.zeros((dim,), jnp.float32),
            ng=jnp.ones((dim,), jnp.float32),
            nb=jnp.zeros((dim,), jnp.float32),
        )
        hidden = int(dim * cfg["mlp_ratio"])
        blocks = []
        for _ in range(cfg["depths"][i]):
            def make_attn_block():
                return dict(
                    conv1_w=_normal(nk(), (3, 3, dim)), conv1_b=jnp.zeros((dim,), jnp.float32),
                    attn_ng=jnp.ones((dim,), jnp.float32), attn_nb=jnp.zeros((dim,), jnp.float32),
                    qkv_w=_normal(nk(), (dim, 3 * dim)), qkv_b=jnp.zeros((3 * dim,), jnp.float32),
                    proj_w=_normal(nk(), (dim, dim)), proj_b=jnp.zeros((dim,), jnp.float32),
                    conv2_w=_normal(nk(), (3, 3, dim)), conv2_b=jnp.zeros((dim,), jnp.float32),
                    ffn_ng=jnp.ones((dim,), jnp.float32), ffn_nb=jnp.zeros((dim,), jnp.float32),
                    fc1_w=_normal(nk(), (dim, hidden)), fc1_b=jnp.zeros((hidden,), jnp.float32),
                    fc2_w=_normal(nk(), (hidden, dim)), fc2_b=jnp.zeros((dim,), jnp.float32),
                )

            blocks.append(dict(spatial=make_attn_block(), channel=make_attn_block()))
        stages.append(dict(patch=patch, blocks=blocks))
        in_c = dim
    return dict(stages=stages)


def _prep_linear(w, b, q_scale=None, q_cols=None):
    """One-time weight prep: optional q-scale fold, bf16 cast, lane-pad to the tile."""
    K, N = w.shape
    w = w.astype(jnp.float32)
    b = b.astype(jnp.float32)
    if q_scale is not None:
        col = jnp.where(jnp.arange(N) < q_cols, jnp.float32(q_scale), jnp.float32(1.0))
        w = w * col[None, :]
        b = b * col
    tn = 256 if _round_up(N, 128) % 256 == 0 else 128
    Np = _round_up(N, tn)
    wp = jnp.pad(w, ((0, 0), (0, Np - N))).astype(jnp.bfloat16)
    bp = jnp.pad(b, (0, Np - N)).reshape(1, Np)
    return dict(w=wp, b=bp, n=N, tn=tn)


def prepare_params(raw, cfg):
    stages = []
    for i, st in enumerate(raw["stages"]):
        dim = cfg["embed_dims"][i]
        pt = st["patch"]
        k = pt["k"]
        cin = pt["w"].shape[2]
        cout = pt["w"].shape[3]
        patch = dict(
            k=k, stride=pt["stride"], pad=pt["pad"],
            proj=_prep_linear(pt["w"].reshape(k * k * cin, cout), pt["b"]),
            ng=pt["ng"].reshape(1, cout).astype(jnp.float32),
            nb=pt["nb"].reshape(1, cout).astype(jnp.float32),
        )

        def prep_attn_block(p, q_scale):
            return dict(
                conv1=dict(w=p["conv1_w"].reshape(9, dim).astype(jnp.float32),
                           b=p["conv1_b"].reshape(1, dim).astype(jnp.float32)),
                conv2=dict(w=p["conv2_w"].reshape(9, dim).astype(jnp.float32),
                           b=p["conv2_b"].reshape(1, dim).astype(jnp.float32)),
                attn_ln=(p["attn_ng"].reshape(1, dim).astype(jnp.float32),
                         p["attn_nb"].reshape(1, dim).astype(jnp.float32)),
                ffn_ln=(p["ffn_ng"].reshape(1, dim).astype(jnp.float32),
                        p["ffn_nb"].reshape(1, dim).astype(jnp.float32)),
                qkv=_prep_linear(p["qkv_w"], p["qkv_b"], q_scale=q_scale, q_cols=dim),
                proj=_prep_linear(p["proj_w"], p["proj_b"]),
                fc1=_prep_linear(p["fc1_w"], p["fc1_b"]),
                fc2=_prep_linear(p["fc2_w"], p["fc2_b"]),
            )

        blocks = []
        for blk in st["blocks"]:
            sp = prep_attn_block(blk["spatial"],
                                 float(dim // cfg["num_heads"][i]) ** -0.5)
            sp["num_heads"] = cfg["num_heads"][i]
            ch = prep_attn_block(blk["channel"], None)  # channel scale N^-0.5 is runtime
            ch["groups"] = cfg["num_groups"][i]
            blocks.append(dict(spatial=sp, channel=ch))
        stages.append(dict(patch=patch, blocks=blocks))
    return dict(stages=stages)


# ----------------------------------------------------------------------------
# Main
# ----------------------------------------------------------------------------
if __name__ == "__main__":
    # Small DaViT instantiation (2 stages, 1 block each), inference mode
    # (drop_path -> Identity, no checkpointing).
    cfg = dict(
        in_chans=3,
        depths=(1, 1),
        patch_size=(7, 2),
        patch_stride=(4, 2),
        patch_padding=(3, 0),
        embed_dims=(32, 64),
        num_heads=(2, 4),
        num_groups=(2, 4),
        window_size=4,
        mlp_ratio=4.0,
    )

    root = jax.random.PRNGKey(0)
    k_params, k_input = jax.random.split(root)
    raw_params = init_davit_params(k_params, cfg)
    rt_params = prepare_params(raw_params, cfg)   # bf16 / padded / scale-folded, once

    x = jax.random.normal(k_input, (2, 3, 32, 32), jnp.float32)  # NCHW like PyTorch

    fwd = jax.jit(lambda inp: davit_forward(inp, rt_params, cfg))
    outs = fwd(x)
    jax.block_until_ready(outs)

    res5 = outs["res5"]
    assert res5.shape == (2, 64, 4, 4), res5.shape
    assert bool(jnp.all(jnp.isfinite(res5)))
    print("KERNEL_OK")
</pallas_src>

<mosaic_0001>
module attributes {stable_mosaic.version = 11 : i64} {
  func.func @_matmul_kernel(%arg0: i32, %arg1: i32, %arg2: memref<128x147xbf16, #tpu.memory_space<vmem>>, %arg3: memref<147x128xbf16, #tpu.memory_space<vmem>>, %arg4: memref<1x128xf32, #tpu.memory_space<vmem>>, %arg5: memref<128x128xbf16, #tpu.memory_space<vmem>>) attributes {dimension_semantics = [#tpu.dimension_semantics<parallel>, #tpu.dimension_semantics<parallel>], iteration_bounds = array<i64: 1, 1>, scalar_prefetch = 0 : i64, scratch_operands = 0 : i64, tpu.core_type = #tpu.core_type<tc>, window_params = [{transform_indices = @transform_0, window_bounds = array<i64: 128, 147>}, {transform_indices = @transform_1, window_bounds = array<i64: 147, 128>}, {transform_indices = @transform_2, window_bounds = array<i64: 1, 128>}, {transform_indices = @transform_3, window_bounds = array<i64: 128, 128>}]} {
    %c0 = arith.constant 0 : index
    %c0_0 = arith.constant 0 : index
    %0 = vector.load %arg2[%c0, %c0_0] : memref<128x147xbf16, #tpu.memory_space<vmem>>, vector<128x147xbf16>
    %c0_1 = arith.constant 0 : index
    %c0_2 = arith.constant 0 : index
    %1 = vector.load %arg3[%c0_1, %c0_2] : memref<147x128xbf16, #tpu.memory_space<vmem>>, vector<147x128xbf16>
    %cst = arith.constant dense<0.000000e+00> : vector<128x128xf32>
    %2 = tpu.matmul %0, %1, %cst {dimension_numbers = #tpu.dot_dimension_numbers<[1], [0], [0], [1], [0, 0, 1, 1], [], []>} : vector<128x147xbf16>, vector<147x128xbf16>, vector<128x128xf32> -> vector<128x128xf32>
    %c0_3 = arith.constant 0 : index
    %c0_4 = arith.constant 0 : index
    %3 = vector.load %arg4[%c0_3, %c0_4] : memref<1x128xf32, #tpu.memory_space<vmem>>, vector<1x128xf32>
    %4 = vector.broadcast %3 : vector<1x128xf32> to vector<128x128xf32>
    %5 = arith.addf %2, %4 : vector<128x128xf32>
    %6 = arith.truncf %5 : vector<128x128xf32> to vector<128x128xbf16>
    %c0_5 = arith.constant 0 : index
    %c0_6 = arith.constant 0 : index
    %7 = vector.load %arg5[%c0_5, %c0_6] : memref<128x128xbf16, #tpu.memory_space<vmem>>, vector<128x128xbf16>
    tpu.vector_store %arg5[%c0_5, %c0_6], %6 {strides = array<i32>} : memref<128x128xbf16, #tpu.memory_space<vmem>>, vector<128x128xbf16>,
    return
  }
  func.func @transform_0(%arg0: i32, %arg1: i32) -> (i32, i32) {
    %c0_i32 = arith.constant 0 : i32
    %c0_i32_0 = arith.constant 0 : i32
    return %arg0, %c0_i32 : i32, i32
  }
  func.func @transform_1(%arg0: i32, %arg1: i32) -> (i32, i32) {
    %c0_i32 = arith.constant 0 : i32
    %c0_i32_0 = arith.constant 0 : i32
    return %c0_i32, %arg1 : i32, i32
  }
  func.func @transform_2(%arg0: i32, %arg1: i32) -> (i32, i32) {
    %c0_i32 = arith.constant 0 : i32
    %c0_i32_0 = arith.constant 0 : i32
    return %c0_i32, %arg1 : i32, i32
  }
  func.func @transform_3(%arg0: i32, %arg1: i32) -> (i32, i32) {
    %c0_i32 = arith.constant 0 : i32
    return %arg0, %arg1 : i32, i32
  }
}

module attributes {stable_mosaic.version = 11 : i64} {
  func.func @_layernorm_kernel(%arg0: i32, %arg1: memref<128x32xbf16, #tpu.memory_space<vmem>>, %arg2: memref<1x32xf32, #tpu.memory_space<vmem>>, %arg3: memref<1x32xf32, #tpu.memory_space<vmem>>, %arg4: memref<128x32xbf16, #tpu.memory_space<vmem>>) attributes {dimension_semantics = [#tpu.dimension_semantics<parallel>], iteration_bounds = array<i64: 1>, scalar_prefetch = 0 : i64, scratch_operands = 0 : i64, tpu.core_type = #tpu.core_type<tc>, window_params = [{transform_indices = @transform_0, window_bounds = array<i64: 128, 32>}, {pipeline_mode = #tpu.pipeline_mode<synchronous>, transform_indices = @transform_1, window_bounds = array<i64: 1, 32>}, {pipeline_mode = #tpu.pipeline_mode<synchronous>, transform_indices = @transform_2, window_bounds = array<i64: 1, 32>}, {transform_indices = @transform_3, window_bounds = array<i64: 128, 32>}]} {
    %c0 = arith.constant 0 : index
    %c0_0 = arith.constant 0 : index
    %0 = vector.load %arg1[%c0, %c0_0] : memref<128x32xbf16, #tpu.memory_space<vmem>>, vector<128x32xbf16>
    %1 = arith.extf %0 : vector<128x32xbf16> to vector<128x32xf32>
    %cst = arith.constant dense<0.000000e+00> : vector<128xf32>
    %2 = vector.multi_reduction <add>, %1, %cst [1] : vector<128x32xf32> to vector<128xf32>
    %3 = vector.shape_cast %2 : vector<128xf32> to vector<128x1xf32>
    %cst_1 = arith.constant 3.200000e+01 : f32
    %4 = vector.broadcast %cst_1 : f32 to vector<128x1xf32>
    %5 = arith.divf %3, %4 : vector<128x1xf32>
    %6 = vector.broadcast %5 : vector<128x1xf32> to vector<128x32xf32>
    %7 = arith.subf %1, %6 : vector<128x32xf32>
    %8 = arith.mulf %7, %7 : vector<128x32xf32>
    %cst_2 = arith.constant dense<0.000000e+00> : vector<128xf32>
    %9 = vector.multi_reduction <add>, %8, %cst_2 [1] : vector<128x32xf32> to vector<128xf32>
    %10 = vector.shape_cast %9 : vector<128xf32> to vector<128x1xf32>
    %cst_3 = arith.constant 3.200000e+01 : f32
    %11 = vector.broadcast %cst_3 : f32 to vector<128x1xf32>
    %12 = arith.divf %10, %11 : vector<128x1xf32>
    %13 = vector.broadcast %5 : vector<128x1xf32> to vector<128x32xf32>
    %14 = arith.subf %1, %13 : vector<128x32xf32>
    %cst_4 = arith.constant 9.99999974E-6 : f32
    %15 = vector.broadcast %cst_4 : f32 to vector<128x1xf32>
    %16 = arith.addf %12, %15 : vector<128x1xf32>
    %17 = math.rsqrt %16 : vector<128x1xf32>
    %18 = vector.broadcast %17 : vector<128x1xf32> to vector<128x32xf32>
    %19 = arith.mulf %14, %18 : vector<128x32xf32>
    %c0_5 = arith.constant 0 : index
    %c0_6 = arith.constant 0 : index
    %20 = vector.load %arg2[%c0_5, %c0_6] : memref<1x32xf32, #tpu.memory_space<vmem>>, vector<1x32xf32>
    %21 = vector.broadcast %20 : vector<1x32xf32> to vector<128x32xf32>
    %22 = arith.mulf %19, %21 : vector<128x32xf32>
    %c0_7 = arith.constant 0 : index
    %c0_8 = arith.constant 0 : index
    %23 = vector.load %arg3[%c0_7, %c0_8] : memref<1x32xf32, #tpu.memory_space<vmem>>, vector<1x32xf32>
    %24 = vector.broadcast %23 : vector<1x32xf32> to vector<128x32xf32>
    %25 = arith.addf %22, %24 : vector<128x32xf32>
    %26 = arith.truncf %25 : vector<128x32xf32> to vector<128x32xbf16>
    %c0_9 = arith.constant 0 : index
    %c0_10 = arith.constant 0 : index
    %27 = vector.load %arg4[%c0_9, %c0_10] : memref<128x32xbf16, #tpu.memory_space<vmem>>, vector<128x32xbf16>
    tpu.vector_store %arg4[%c0_9, %c0_10], %26 {strides = array<i32>} : memref<128x32xbf16, #tpu.memory_space<vmem>>, vector<128x32xbf16>,
    return
  }
  func.func @transform_0(%arg0: i32) -> (i32, i32) {
    %c0_i32 = arith.constant 0 : i32
    %c0_i32_0 = arith.constant 0 : i32
    return %arg0, %c0_i32 : i32, i32
  }
  func.func @transform_1(%arg0: i32) -> (i32, i32) {
    %c0_i32 = arith.constant 0 : i32
    %c0_i32_0 = arith.constant 0 : i32
    %c0_i32_1 = arith.constant 0 : i32
    return %c0_i32, %c0_i32_0 : i32, i32
  }
  func.func @transform_2(%arg0: i32) -> (i32, i32) {
    %c0_i32 = arith.constant 0 : i32
    %c0_i32_0 = arith.constant 0 : i32
    %c0_i32_1 = arith.constant 0 : i32
    return %c0_i32, %c0_i32_0 : i32, i32
  }
  func.func @transform_3(%arg0: i32) -> (i32, i32) {
    %c0_i32 = arith.constant 0 : i32
    %c0_i32_0 = arith.constant 0 : i32
    return %arg0, %c0_i32 : i32, i32
  }
}

module attributes {stable_mosaic.version = 11 : i64} {
  func.func @_dwconv3x3_kernel(%arg0: i32, %arg1: memref<1x8x8x32xbf16, #tpu.memory_space<vmem>>, %arg2: memref<9x32xf32, #tpu.memory_space<vmem>>, %arg3: memref<1x32xf32, #tpu.memory_space<vmem>>, %arg4: memref<1x8x8x32xbf16, #tpu.memory_space<vmem>>) attributes {dimension_semantics = [#tpu.dimension_semantics<parallel>], iteration_bounds = array<i64: 2>, scalar_prefetch = 0 : i64, scratch_operands = 0 : i64, tpu.core_type = #tpu.core_type<tc>, window_params = [{transform_indices = @transform_0, window_bounds = array<i64: 1, 8, 8, 32>}, {pipeline_mode = #tpu.pipeline_mode<synchronous>, transform_indices = @transform_1, window_bounds = array<i64: 9, 32>}, {pipeline_mode = #tpu.pipeline_mode<synchronous>, transform_indices = @transform_2, window_bounds = array<i64: 1, 32>}, {transform_indices = @transform_3, window_bounds = array<i64: 1, 8, 8, 32>}]} {
    %c0 = arith.constant 0 : index
    %c0_0 = arith.constant 0 : index
    %c0_1 = arith.constant 0 : index
    %c0_2 = arith.constant 0 : index
    %0 = vector.load %arg1[%c0, %c0_0, %c0_1, %c0_2] : memref<1x8x8x32xbf16, #tpu.memory_space<vmem>>, vector<1x8x8x32xbf16>
    %1 = vector.shape_cast %0 : vector<1x8x8x32xbf16> to vector<8x8x32xbf16>
    %cst = arith.constant 0.000000e+00 : bf16
    %2 = vector.broadcast %cst : bf16 to vector<1x8x32xbf16>
    %3 = tpu.concatenate %2, %1, %2 in 0 : vector<1x8x32xbf16>, vector<8x8x32xbf16>, vector<1x8x32xbf16> -> vector<10x8x32xbf16>
    %cst_3 = arith.constant 0.000000e+00 : bf16
    %4 = vector.broadcast %cst_3 : bf16 to vector<10x1x32xbf16>
    %5 = tpu.concatenate %4, %3, %4 in 1 : vector<10x1x32xbf16>, vector<10x8x32xbf16>, vector<10x1x32xbf16> -> vector<10x10x32xbf16>
    %6 = arith.extf %1 : vector<8x8x32xbf16> to vector<8x8x32xf32>
    %c0_4 = arith.constant 0 : index
    %c0_5 = arith.constant 0 : index
    %7 = vector.load %arg3[%c0_4, %c0_5] : memref<1x32xf32, #tpu.memory_space<vmem>>, vector<1x32xf32>
    %8 = vector.shape_cast %7 : vector<1x32xf32> to vector<1x1x32xf32>
    %9 = vector.broadcast %8 : vector<1x1x32xf32> to vector<8x8x32xf32>
    %10 = arith.addf %6, %9 : vector<8x8x32xf32>
    %c0_6 = arith.constant 0 : index
    %c0_7 = arith.constant 0 : index
    %11 = vector.load %arg2[%c0_6, %c0_7] : memref<9x32xf32, #tpu.memory_space<vmem>>, vector<1x32xf32>
    %12 = vector.extract_strided_slice %5 {offsets = [0, 0, 0], sizes = [8, 8, 32], strides = [1, 1, 1]} : vector<10x10x32xbf16> to vector<8x8x32xbf16>
    %13 = arith.extf %12 : vector<8x8x32xbf16> to vector<8x8x32xf32>
    %14 = vector.shape_cast %11 : vector<1x32xf32> to vector<1x1x32xf32>
    %15 = vector.broadcast %14 : vector<1x1x32xf32> to vector<8x8x32xf32>
    %16 = arith.mulf %13, %15 : vector<8x8x32xf32>
    %17 = arith.addf %10, %16 : vector<8x8x32xf32>
    %c1 = arith.constant 1 : index
    %c0_8 = arith.constant 0 : index
    %18 = vector.load %arg2[%c1, %c0_8] : memref<9x32xf32, #tpu.memory_space<vmem>>, vector<1x32xf32>
    %19 = vector.extract_strided_slice %5 {offsets = [0, 1, 0], sizes = [8, 8, 32], strides = [1, 1, 1]} : vector<10x10x32xbf16> to vector<8x8x32xbf16>
    %20 = arith.extf %19 : vector<8x8x32xbf16> to vector<8x8x32xf32>
    %21 = vector.shape_cast %18 : vector<1x32xf32> to vector<1x1x32xf32>
    %22 = vector.broadcast %21 : vector<1x1x32xf32> to vector<8x8x32xf32>
    %23 = arith.mulf %20, %22 : vector<8x8x32xf32>
    %24 = arith.addf %17, %23 : vector<8x8x32xf32>
    %c2 = arith.constant 2 : index
    %c0_9 = arith.constant 0 : index
    %25 = vector.load %arg2[%c2, %c0_9] : memref<9x32xf32, #tpu.memory_space<vmem>>, vector<1x32xf32>
    %26 = vector.extract_strided_slice %5 {offsets = [0, 2, 0], sizes = [8, 8, 32], strides = [1, 1, 1]} : vector<10x10x32xbf16> to vector<8x8x32xbf16>
    %27 = arith.extf %26 : vector<8x8x32xbf16> to vector<8x8x32xf32>
    %28 = vector.shape_cast %25 : vector<1x32xf32> to vector<1x1x32xf32>
    %29 = vector.broadcast %28 : vector<1x1x32xf32> to vector<8x8x32xf32>
    %30 = arith.mulf %27, %29 : vector<8x8x32xf32>
    %31 = arith.addf %24, %30 : vector<8x8x32xf32>
    %c3 = arith.constant 3 : index
    %c0_10 = arith.constant 0 : index
    %32 = vector.load %arg2[%c3, %c0_10] : memref<9x32xf32, #tpu.memory_space<vmem>>, vector<1x32xf32>
    %33 = vector.extract_strided_slice %5 {offsets = [1, 0, 0], sizes = [8, 8, 32], strides = [1, 1, 1]} : vector<10x10x32xbf16> to vector<8x8x32xbf16>
    %34 = arith.extf %33 : vector<8x8x32xbf16> to vector<8x8x32xf32>
    %35 = vector.shape_cast %32 : vector<1x32xf32> to vector<1x1x32xf32>
    %36 = vector.broadcast %35 : vector<1x1x32xf32> to vector<8x8x32xf32>
    %37 = arith.mulf %34, %36 : vector<8x8x32xf32>
    %38 = arith.addf %31, %37 : vector<8x8x32xf32>
    %c4 = arith.constant 4 : index
    %c0_11 = arith.constant 0 : index
    %39 = vector.load %arg2[%c4, %c0_11] : memref<9x32xf32, #tpu.memory_space<vmem>>, vector<1x32xf32>
    %40 = vector.extract_strided_slice %5 {offsets = [1, 1, 0], sizes = [8, 8, 32], strides = [1, 1, 1]} : vector<10x10x32xbf16> to vector<8x8x32xbf16>
    %41 = arith.extf %40 : vector<8x8x32xbf16> to vector<8x8x32xf32>
    %42 = vector.shape_cast %39 : vector<1x32xf32> to vector<1x1x32xf32>
    %43 = vector.broadcast %42 : vector<1x1x32xf32> to vector<8x8x32xf32>
    %44 = arith.mulf %41, %43 : vector<8x8x32xf32>
    %45 = arith.addf %38, %44 : vector<8x8x32xf32>
    %c5 = arith.constant 5 : index
    %c0_12 = arith.constant 0 : index
    %46 = vector.load %arg2[%c5, %c0_12] : memref<9x32xf32, #tpu.memory_space<vmem>>, vector<1x32xf32>
    %47 = vector.extract_strided_slice %5 {offsets = [1, 2, 0], sizes = [8, 8, 32], strides = [1, 1, 1]} : vector<10x10x32xbf16> to vector<8x8x32xbf16>
    %48 = arith.extf %47 : vector<8x8x32xbf16> to vector<8x8x32xf32>
    %49 = vector.shape_cast %46 : vector<1x32xf32> to vector<1x1x32xf32>
    %50 = vector.broadcast %49 : vector<1x1x32xf32> to vector<8x8x32xf32>
    %51 = arith.mulf %48, %50 : vector<8x8x32xf32>
    %52 = arith.addf %45, %51 : vector<8x8x32xf32>
    %c6 = arith.constant 6 : index
    %c0_13 = arith.constant 0 : index
    %53 = vector.load %arg2[%c6, %c0_13] : memref<9x32xf32, #tpu.memory_space<vmem>>, vector<1x32xf32>
    %54 = vector.extract_strided_slice %5 {offsets = [2, 0, 0], sizes = [8, 8, 32], strides = [1, 1, 1]} : vector<10x10x32xbf16> to vector<8x8x32xbf16>
    %55 = arith.extf %54 : vector<8x8x32xbf16> to vector<8x8x32xf32>
    %56 = vector.shape_cast %53 : vector<1x32xf32> to vector<1x1x32xf32>
    %57 = vector.broadcast %56 : vector<1x1x32xf32> to vector<8x8x32xf32>
    %58 = arith.mulf %55, %57 : vector<8x8x32xf32>
    %59 = arith.addf %52, %58 : vector<8x8x32xf32>
    %c7 = arith.constant 7 : index
    %c0_14 = arith.constant 0 : index
    %60 = vector.load %arg2[%c7, %c0_14] : memref<9x32xf32, #tpu.memory_space<vmem>>, vector<1x32xf32>
    %61 = vector.extract_strided_slice %5 {offsets = [2, 1, 0], sizes = [8, 8, 32], strides = [1, 1, 1]} : vector<10x10x32xbf16> to vector<8x8x32xbf16>
    %62 = arith.extf %61 : vector<8x8x32xbf16> to vector<8x8x32xf32>
    %63 = vector.shape_cast %60 : vector<1x32xf32> to vector<1x1x32xf32>
    %64 = vector.broadcast %63 : vector<1x1x32xf32> to vector<8x8x32xf32>
    %65 = arith.mulf %62, %64 : vector<8x8x32xf32>
    %66 = arith.addf %59, %65 : vector<8x8x32xf32>
    %c8 = arith.constant 8 : index
    %c0_15 = arith.constant 0 : index
    %67 = vector.load %arg2[%c8, %c0_15] : memref<9x32xf32, #tpu.memory_space<vmem>>, vector<1x32xf32>
    %68 = vector.extract_strided_slice %5 {offsets = [2, 2, 0], sizes = [8, 8, 32], strides = [1, 1, 1]} : vector<10x10x32xbf16> to vector<8x8x32xbf16>
    %69 = arith.extf %68 : vector<8x8x32xbf16> to vector<8x8x32xf32>
    %70 = vector.shape_cast %67 : vector<1x32xf32> to vector<1x1x32xf32>
    %71 = vector.broadcast %70 : vector<1x1x32xf32> to vector<8x8x32xf32>
    %72 = arith.mulf %69, %71 : vector<8x8x32xf32>
    %73 = arith.addf %66, %72 : vector<8x8x32xf32>
    %74 = arith.truncf %73 : vector<8x8x32xf32> to vector<8x8x32xbf16>
    %c0_16 = arith.constant 0 : index
    %c0_17 = arith.constant 0 : index
    %c0_18 = arith.constant 0 : index
    %c0_19 = arith.constant 0 : index
    %75 = vector.load %arg4[%c0_16, %c0_17, %c0_18, %c0_19] : memref<1x8x8x32xbf16, #tpu.memory_space<vmem>>, vector<1x8x8x32xbf16>
    %76 = vector.shape_cast %75 : vector<1x8x8x32xbf16> to vector<8x8x32xbf16>
    %77 = vector.shape_cast %74 : vector<8x8x32xbf16> to vector<1x8x8x32xbf16>
    tpu.vector_store %arg4[%c0_16, %c0_17, %c0_18, %c0_19], %77 {strides = array<i32>} : memref<1x8x8x32xbf16, #tpu.memory_space<vmem>>, vector<1x8x8x32xbf16>,
    return
  }
  func.func @transform_0(%arg0: i32) -> (i32, i32, i32, i32) {
    %c0_i32 = arith.constant 0 : i32
    %c0_i32_0 = arith.constant 0 : i32
    %c0_i32_1 = arith.constant 0 : i32
    %c0_i32_2 = arith.constant 0 : i32
    return %arg0, %c0_i32, %c0_i32_0, %c0_i32_1 : i32, i32, i32, i32
  }
  func.func @transform_1(%arg0: i32) -> (i32, i32) {
    %c0_i32 = arith.constant 0 : i32
    %c0_i32_0 = arith.constant 0 : i32
    %c0_i32_1 = arith.constant 0 : i32
    return %c0_i32, %c0_i32_0 : i32, i32
  }
  func.func @transform_2(%arg0: i32) -> (i32, i32) {
    %c0_i32 = arith.constant 0 : i32
    %c0_i32_0 = arith.constant 0 : i32
    %c0_i32_1 = arith.constant 0 : i32
    return %c0_i32, %c0_i32_0 : i32, i32
  }
  func.func @transform_3(%arg0: i32) -> (i32, i32, i32, i32) {
    %c0_i32 = arith.constant 0 : i32
    %c0_i32_0 = arith.constant 0 : i32
    %c0_i32_1 = arith.constant 0 : i32
    %c0_i32_2 = arith.constant 0 : i32
    return %arg0, %c0_i32, %c0_i32_0, %c0_i32_1 : i32, i32, i32, i32
  }
}

module attributes {stable_mosaic.version = 11 : i64} {
  func.func @_ln_matmul_kernel(%arg0: i32, %arg1: i32, %arg2: memref<128x32xbf16, #tpu.memory_space<vmem>>, %arg3: memref<1x32xf32, #tpu.memory_space<vmem>>, %arg4: memref<1x32xf32, #tpu.memory_space<vmem>>, %arg5: memref<32x128xbf16, #tpu.memory_space<vmem>>, %arg6: memref<1x128xf32, #tpu.memory_space<vmem>>, %arg7: memref<128x128xbf16, #tpu.memory_space<vmem>>) attributes {dimension_semantics = [#tpu.dimension_semantics<parallel>, #tpu.dimension_semantics<parallel>], iteration_bounds = array<i64: 1, 1>, scalar_prefetch = 0 : i64, scratch_operands = 0 : i64, tpu.core_type = #tpu.core_type<tc>, window_params = [{transform_indices = @transform_0, window_bounds = array<i64: 128, 32>}, {pipeline_mode = #tpu.pipeline_mode<synchronous>, transform_indices = @transform_1, window_bounds = array<i64: 1, 32>}, {pipeline_mode = #tpu.pipeline_mode<synchronous>, transform_indices = @transform_2, window_bounds = array<i64: 1, 32>}, {transform_indices = @transform_3, window_bounds = array<i64: 32, 128>}, {transform_indices = @transform_4, window_bounds = array<i64: 1, 128>}, {transform_indices = @transform_5, window_bounds = array<i64: 128, 128>}]} {
    %c0 = arith.constant 0 : index
    %c0_0 = arith.constant 0 : index
    %0 = vector.load %arg2[%c0, %c0_0] : memref<128x32xbf16, #tpu.memory_space<vmem>>, vector<128x32xbf16>
    %1 = arith.extf %0 : vector<128x32xbf16> to vector<128x32xf32>
    %cst = arith.constant dense<0.000000e+00> : vector<128xf32>
    %2 = vector.multi_reduction <add>, %1, %cst [1] : vector<128x32xf32> to vector<128xf32>
    %3 = vector.shape_cast %2 : vector<128xf32> to vector<128x1xf32>
    %cst_1 = arith.constant 3.200000e+01 : f32
    %4 = vector.broadcast %cst_1 : f32 to vector<128x1xf32>
    %5 = arith.divf %3, %4 : vector<128x1xf32>
    %6 = vector.broadcast %5 : vector<128x1xf32> to vector<128x32xf32>
    %7 = arith.subf %1, %6 : vector<128x32xf32>
    %8 = arith.mulf %7, %7 : vector<128x32xf32>
    %cst_2 = arith.constant dense<0.000000e+00> : vector<128xf32>
    %9 = vector.multi_reduction <add>, %8, %cst_2 [1] : vector<128x32xf32> to vector<128xf32>
    %10 = vector.shape_cast %9 : vector<128xf32> to vector<128x1xf32>
    %cst_3 = arith.constant 3.200000e+01 : f32
    %11 = vector.broadcast %cst_3 : f32 to vector<128x1xf32>
    %12 = arith.divf %10, %11 : vector<128x1xf32>
    %13 = vector.broadcast %5 : vector<128x1xf32> to vector<128x32xf32>
    %14 = arith.subf %1, %13 : vector<128x32xf32>
    %cst_4 = arith.constant 9.99999974E-6 : f32
    %15 = vector.broadcast %cst_4 : f32 to vector<128x1xf32>
    %16 = arith.addf %12, %15 : vector<128x1xf32>
    %17 = math.rsqrt %16 : vector<128x1xf32>
    %18 = vector.broadcast %17 : vector<128x1xf32> to vector<128x32xf32>
    %19 = arith.mulf %14, %18 : vector<128x32xf32>
    %c0_5 = arith.constant 0 : index
    %c0_6 = arith.constant 0 : index
    %20 = vector.load %arg3[%c0_5, %c0_6] : memref<1x32xf32, #tpu.memory_space<vmem>>, vector<1x32xf32>
    %21 = vector.broadcast %20 : vector<1x32xf32> to vector<128x32xf32>
    %22 = arith.mulf %19, %21 : vector<128x32xf32>
    %c0_7 = arith.constant 0 : index
    %c0_8 = arith.constant 0 : index
    %23 = vector.load %arg4[%c0_7, %c0_8] : memref<1x32xf32, #tpu.memory_space<vmem>>, vector<1x32xf32>
    %24 = vector.broadcast %23 : vector<1x32xf32> to vector<128x32xf32>
    %25 = arith.addf %22, %24 : vector<128x32xf32>
    %26 = arith.truncf %25 : vector<128x32xf32> to vector<128x32xbf16>
    %c0_9 = arith.constant 0 : index
    %c0_10 = arith.constant 0 : index
    %27 = vector.load %arg5[%c0_9, %c0_10] : memref<32x128xbf16, #tpu.memory_space<vmem>>, vector<32x128xbf16>
    %cst_11 = arith.constant dense<0.000000e+00> : vector<128x128xf32>
    %28 = tpu.matmul %26, %27, %cst_11 {dimension_numbers = #tpu.dot_dimension_numbers<[1], [0], [0], [1], [0, 0, 1, 1], [], []>} : vector<128x32xbf16>, vector<32x128xbf16>, vector<128x128xf32> -> vector<128x128xf32>
    %c0_12 = arith.constant 0 : index
    %c0_13 = arith.constant 0 : index
    %29 = vector.load %arg6[%c0_12, %c0_13] : memref<1x128xf32, #tpu.memory_space<vmem>>, vector<1x128xf32>
    %30 = vector.broadcast %29 : vector<1x128xf32> to vector<128x128xf32>
    %31 = arith.addf %28, %30 : vector<128x128xf32>
    %32 = arith.truncf %31 : vector<128x128xf32> to vector<128x128xbf16>
    %c0_14 = arith.constant 0 : index
    %c0_15 = arith.constant 0 : index
    %33 = vector.load %arg7[%c0_14, %c0_15] : memref<128x128xbf16, #tpu.memory_space<vmem>>, vector<128x128xbf16>
    tpu.vector_store %arg7[%c0_14, %c0_15], %32 {strides = array<i32>} : memref<128x128xbf16, #tpu.memory_space<vmem>>, vector<128x128xbf16>,
    return
  }
  func.func @transform_0(%arg0: i32, %arg1: i32) -> (i32, i32) {
    %c0_i32 = arith.constant 0 : i32
    %c0_i32_0 = arith.constant 0 : i32
    return %arg0, %c0_i32 : i32, i32
  }
  func.func @transform_1(%arg0: i32, %arg1: i32) -> (i32, i32) {
    %c0_i32 = arith.constant 0 : i32
    %c0_i32_0 = arith.constant 0 : i32
    %c0_i32_1 = arith.constant 0 : i32
    return %c0_i32, %c0_i32_0 : i32, i32
  }
  func.func @transform_2(%arg0: i32, %arg1: i32) -> (i32, i32) {
    %c0_i32 = arith.constant 0 : i32
    %c0_i32_0 = arith.constant 0 : i32
    %c0_i32_1 = arith.constant 0 : i32
    return %c0_i32, %c0_i32_0 : i32, i32
  }
  func.func @transform_3(%arg0: i32, %arg1: i32) -> (i32, i32) {
    %c0_i32 = arith.constant 0 : i32
    %c0_i32_0 = arith.constant 0 : i32
    return %c0_i32, %arg1 : i32, i32
  }
  func.func @transform_4(%arg0: i32, %arg1: i32) -> (i32, i32) {
    %c0_i32 = arith.constant 0 : i32
    %c0_i32_0 = arith.constant 0 : i32
    return %c0_i32, %arg1 : i32, i32
  }
  func.func @transform_5(%arg0: i32, %arg1: i32) -> (i32, i32) {
    %c0_i32 = arith.constant 0 : i32
    return %arg0, %arg1 : i32, i32
  }
}

module attributes {stable_mosaic.version = 11 : i64} {
  func.func @_spatial_attn_kernel(%arg0: i32, %arg1: memref<8x16x96xbf16, #tpu.memory_space<vmem>>, %arg2: memref<8x16x32xbf16, #tpu.memory_space<vmem>>) attributes {dimension_semantics = [#tpu.dimension_semantics<parallel>], iteration_bounds = array<i64: 1>, scalar_prefetch = 0 : i64, scratch_operands = 0 : i64, tpu.core_type = #tpu.core_type<tc>, window_params = [{transform_indices = @transform_0, window_bounds = array<i64: 8, 16, 96>}, {transform_indices = @transform_1, window_bounds = array<i64: 8, 16, 32>}]} {
    %c0 = arith.constant 0 : index
    %c0_0 = arith.constant 0 : index
    %c0_1 = arith.constant 0 : index
    %0 = vector.load %arg1[%c0, %c0_0, %c0_1] : memref<8x16x96xbf16, #tpu.memory_space<vmem>>, vector<8x16x96xbf16>
    %1 = vector.extract_strided_slice %0 {offsets = [0, 0, 0], sizes = [8, 16, 16], strides = [1, 1, 1]} : vector<8x16x96xbf16> to vector<8x16x16xbf16>
    %2 = vector.extract_strided_slice %0 {offsets = [0, 0, 32], sizes = [8, 16, 16], strides = [1, 1, 1]} : vector<8x16x96xbf16> to vector<8x16x16xbf16>
    %3 = vector.extract_strided_slice %0 {offsets = [0, 0, 64], sizes = [8, 16, 16], strides = [1, 1, 1]} : vector<8x16x96xbf16> to vector<8x16x16xbf16>
    "tpu.trace_start"() <{level = 10 : i32, message = "bnd,bmd->bnm"}> : () -> ()
    %cst = arith.constant dense<0.000000e+00> : vector<8x16x16xf32>
    %4 = tpu.matmul %1, %2, %cst {dimension_numbers = #tpu.dot_dimension_numbers<[2], [2], [1], [1], [0, 0, 0, 1, 1, 1], [0], [0]>} : vector<8x16x16xbf16>, vector<8x16x16xbf16>, vector<8x16x16xf32> -> vector<8x16x16xf32>
    "tpu.trace_stop"() : () -> ()
    %cst_2 = arith.constant dense<0xFF800000> : vector<8x16xf32>
    %5 = vector.multi_reduction <maximumf>, %4, %cst_2 [2] : vector<8x16x16xf32> to vector<8x16xf32>
    %6 = vector.shape_cast %5 : vector<8x16xf32> to vector<8x16x1xf32>
    %7 = vector.broadcast %6 : vector<8x16x1xf32> to vector<8x16x16xf32>
    %8 = arith.subf %4, %7 : vector<8x16x16xf32>
    %9 = math.exp %8 : vector<8x16x16xf32>
    %cst_3 = arith.constant dense<0.000000e+00> : vector<8x16xf32>
    %10 = vector.multi_reduction <add>, %9, %cst_3 [2] : vector<8x16x16xf32> to vector<8x16xf32>
    %11 = vector.shape_cast %10 : vector<8x16xf32> to vector<8x16x1xf32>
    %12 = vector.broadcast %11 : vector<8x16x1xf32> to vector<8x16x16xf32>
    %13 = arith.divf %9, %12 : vector<8x16x16xf32>
    %14 = arith.truncf %13 : vector<8x16x16xf32> to vector<8x16x16xbf16>
    "tpu.trace_start"() <{level = 10 : i32, message = "bnm,bmd->bnd"}> : () -> ()
    %cst_4 = arith.constant dense<0.000000e+00> : vector<8x16x16xf32>
    %15 = tpu.matmul %14, %3, %cst_4 {dimension_numbers = #tpu.dot_dimension_numbers<[2], [1], [1], [2], [0, 0, 0, 1, 1, 2], [0], [0]>} : vector<8x16x16xbf16>, vector<8x16x16xbf16>, vector<8x16x16xf32> -> vector<8x16x16xf32>
    "tpu.trace_stop"() : () -> ()
    %16 = arith.truncf %15 : vector<8x16x16xf32> to vector<8x16x16xbf16>
    %17 = vector.extract_strided_slice %0 {offsets = [0, 0, 16], sizes = [8, 16, 16], strides = [1, 1, 1]} : vector<8x16x96xbf16> to vector<8x16x16xbf16>
    %18 = vector.extract_strided_slice %0 {offsets = [0, 0, 48], sizes = [8, 16, 16], strides = [1, 1, 1]} : vector<8x16x96xbf16> to vector<8x16x16xbf16>
    %19 = vector.extract_strided_slice %0 {offsets = [0, 0, 80], sizes = [8, 16, 16], strides = [1, 1, 1]} : vector<8x16x96xbf16> to vector<8x16x16xbf16>
    "tpu.trace_start"() <{level = 10 : i32, message = "bnd,bmd->bnm"}> : () -> ()
    %cst_5 = arith.constant dense<0.000000e+00> : vector<8x16x16xf32>
    %20 = tpu.matmul %17, %18, %cst_5 {dimension_numbers = #tpu.dot_dimension_numbers<[2], [2], [1], [1], [0, 0, 0, 1, 1, 1], [0], [0]>} : vector<8x16x16xbf16>, vector<8x16x16xbf16>, vector<8x16x16xf32> -> vector<8x16x16xf32>
    "tpu.trace_stop"() : () -> ()
    %cst_6 = arith.constant dense<0xFF800000> : vector<8x16xf32>
    %21 = vector.multi_reduction <maximumf>, %20, %cst_6 [2] : vector<8x16x16xf32> to vector<8x16xf32>
    %22 = vector.shape_cast %21 : vector<8x16xf32> to vector<8x16x1xf32>
    %23 = vector.broadcast %22 : vector<8x16x1xf32> to vector<8x16x16xf32>
    %24 = arith.subf %20, %23 : vector<8x16x16xf32>
    %25 = math.exp %24 : vector<8x16x16xf32>
    %cst_7 = arith.constant dense<0.000000e+00> : vector<8x16xf32>
    %26 = vector.multi_reduction <add>, %25, %cst_7 [2] : vector<8x16x16xf32> to vector<8x16xf32>
    %27 = vector.shape_cast %26 : vector<8x16xf32> to vector<8x16x1xf32>
    %28 = vector.broadcast %27 : vector<8x16x1xf32> to vector<8x16x16xf32>
    %29 = arith.divf %25, %28 : vector<8x16x16xf32>
    %30 = arith.truncf %29 : vector<8x16x16xf32> to vector<8x16x16xbf16>
    "tpu.trace_start"() <{level = 10 : i32, message = "bnm,bmd->bnd"}> : () -> ()
    %cst_8 = arith.constant dense<0.000000e+00> : vector<8x16x16xf32>
    %31 = tpu.matmul %30, %19, %cst_8 {dimension_numbers = #tpu.dot_dimension_numbers<[2], [1], [1], [2], [0, 0, 0, 1, 1, 2], [0], [0]>} : vector<8x16x16xbf16>, vector<8x16x16xbf16>, vector<8x16x16xf32> -> vector<8x16x16xf32>
    "tpu.trace_stop"() : () -> ()
    %32 = arith.truncf %31 : vector<8x16x16xf32> to vector<8x16x16xbf16>
    %33 = tpu.concatenate %16, %32 in 2 : vector<8x16x16xbf16>, vector<8x16x16xbf16> -> vector<8x16x32xbf16>
    %c0_9 = arith.constant 0 : index
    %c0_10 = arith.constant 0 : index
    %c0_11 = arith.constant 0 : index
    %34 = vector.load %arg2[%c0_9, %c0_10, %c0_11] : memref<8x16x32xbf16, #tpu.memory_space<vmem>>, vector<8x16x32xbf16>
    tpu.vector_store %arg2[%c0_9, %c0_10, %c0_11], %33 {strides = array<i32>} : memref<8x16x32xbf16, #tpu.memory_space<vmem>>, vector<8x16x32xbf16>,
    return
  }
  func.func @transform_0(%arg0: i32) -> (i32, i32, i32) {
    %c0_i32 = arith.constant 0 : i32
    %c0_i32_0 = arith.constant 0 : i32
    %c0_i32_1 = arith.constant 0 : i32
    return %arg0, %c0_i32, %c0_i32_0 : i32, i32, i32
  }
  func.func @transform_1(%arg0: i32) -> (i32, i32, i32) {
    %c0_i32 = arith.constant 0 : i32
    %c0_i32_0 = arith.constant 0 : i32
    %c0_i32_1 = arith.constant 0 : i32
    return %arg0, %c0_i32, %c0_i32_0 : i32, i32, i32
  }
}

module attributes {stable_mosaic.version = 11 : i64} {
  func.func @_matmul_res_kernel(%arg0: i32, %arg1: i32, %arg2: memref<128x32xbf16, #tpu.memory_space<vmem>>, %arg3: memref<32x128xbf16, #tpu.memory_space<vmem>>, %arg4: memref<1x128xf32, #tpu.memory_space<vmem>>, %arg5: memref<128x128xbf16, #tpu.memory_space<vmem>>, %arg6: memref<128x128xbf16, #tpu.memory_space<vmem>>) attributes {dimension_semantics = [#tpu.dimension_semantics<parallel>, #tpu.dimension_semantics<parallel>], iteration_bounds = array<i64: 1, 1>, scalar_prefetch = 0 : i64, scratch_operands = 0 : i64, tpu.core_type = #tpu.core_type<tc>, window_params = [{transform_indices = @transform_0, window_bounds = array<i64: 128, 32>}, {transform_indices = @transform_1, window_bounds = array<i64: 32, 128>}, {transform_indices = @transform_2, window_bounds = array<i64: 1, 128>}, {transform_indices = @transform_3, window_bounds = array<i64: 128, 128>}, {transform_indices = @transform_4, window_bounds = array<i64: 128, 128>}]} {
    %c0 = arith.constant 0 : index
    %c0_0 = arith.constant 0 : index
    %0 = vector.load %arg2[%c0, %c0_0] : memref<128x32xbf16, #tpu.memory_space<vmem>>, vector<128x32xbf16>
    %c0_1 = arith.constant 0 : index
    %c0_2 = arith.constant 0 : index
    %1 = vector.load %arg3[%c0_1, %c0_2] : memref<32x128xbf16, #tpu.memory_space<vmem>>, vector<32x128xbf16>
    %cst = arith.constant dense<0.000000e+00> : vector<128x128xf32>
    %2 = tpu.matmul %0, %1, %cst {dimension_numbers = #tpu.dot_dimension_numbers<[1], [0], [0], [1], [0, 0, 1, 1], [], []>} : vector<128x32xbf16>, vector<32x128xbf16>, vector<128x128xf32> -> vector<128x128xf32>
    %c0_3 = arith.constant 0 : index
    %c0_4 = arith.constant 0 : index
    %3 = vector.load %arg4[%c0_3, %c0_4] : memref<1x128xf32, #tpu.memory_space<vmem>>, vector<1x128xf32>
    %4 = vector.broadcast %3 : vector<1x128xf32> to vector<128x128xf32>
    %5 = arith.addf %2, %4 : vector<128x128xf32>
    %c0_5 = arith.constant 0 : index
    %c0_6 = arith.constant 0 : index
    %6 = vector.load %arg5[%c0_5, %c0_6] : memref<128x128xbf16, #tpu.memory_space<vmem>>, vector<128x128xbf16>
    %7 = arith.extf %6 : vector<128x128xbf16> to vector<128x128xf32>
    %8 = arith.addf %5, %7 : vector<128x128xf32>
    %9 = arith.truncf %8 : vector<128x128xf32> to vector<128x128xbf16>
    %c0_7 = arith.constant 0 : index
    %c0_8 = arith.constant 0 : index
    %10 = vector.load %arg6[%c0_7, %c0_8] : memref<128x128xbf16, #tpu.memory_space<vmem>>, vector<128x128xbf16>
    tpu.vector_store %arg6[%c0_7, %c0_8], %9 {strides = array<i32>} : memref<128x128xbf16, #tpu.memory_space<vmem>>, vector<128x128xbf16>,
    return
  }
  func.func @transform_0(%arg0: i32, %arg1: i32) -> (i32, i32) {
    %c0_i32 = arith.constant 0 : i32
    %c0_i32_0 = arith.constant 0 : i32
    return %arg0, %c0_i32 : i32, i32
  }
  func.func @transform_1(%arg0: i32, %arg1: i32) -> (i32, i32) {
    %c0_i32 = arith.constant 0 : i32
    %c0_i32_0 = arith.constant 0 : i32
    return %c0_i32, %arg1 : i32, i32
  }
  func.func @transform_2(%arg0: i32, %arg1: i32) -> (i32, i32) {
    %c0_i32 = arith.constant 0 : i32
    %c0_i32_0 = arith.constant 0 : i32
    return %c0_i32, %arg1 : i32, i32
  }
  func.func @transform_3(%arg0: i32, %arg1: i32) -> (i32, i32) {
    %c0_i32 = arith.constant 0 : i32
    return %arg0, %arg1 : i32, i32
  }
  func.func @transform_4(%arg0: i32, %arg1: i32) -> (i32, i32) {
    %c0_i32 = arith.constant 0 : i32
    return %arg0, %arg1 : i32, i32
  }
}

module attributes {stable_mosaic.version = 11 : i64} {
  func.func @_ln_matmul_kernel(%arg0: i32, %arg1: i32, %arg2: memref<128x32xbf16, #tpu.memory_space<vmem>>, %arg3: memref<1x32xf32, #tpu.memory_space<vmem>>, %arg4: memref<1x32xf32, #tpu.memory_space<vmem>>, %arg5: memref<32x128xbf16, #tpu.memory_space<vmem>>, %arg6: memref<1x128xf32, #tpu.memory_space<vmem>>, %arg7: memref<128x128xbf16, #tpu.memory_space<vmem>>) attributes {dimension_semantics = [#tpu.dimension_semantics<parallel>, #tpu.dimension_semantics<parallel>], iteration_bounds = array<i64: 1, 1>, scalar_prefetch = 0 : i64, scratch_operands = 0 : i64, tpu.core_type = #tpu.core_type<tc>, window_params = [{transform_indices = @transform_0, window_bounds = array<i64: 128, 32>}, {pipeline_mode = #tpu.pipeline_mode<synchronous>, transform_indices = @transform_1, window_bounds = array<i64: 1, 32>}, {pipeline_mode = #tpu.pipeline_mode<synchronous>, transform_indices = @transform_2, window_bounds = array<i64: 1, 32>}, {transform_indices = @transform_3, window_bounds = array<i64: 32, 128>}, {transform_indices = @transform_4, window_bounds = array<i64: 1, 128>}, {transform_indices = @transform_5, window_bounds = array<i64: 128, 128>}]} {
    %c0 = arith.constant 0 : index
    %c0_0 = arith.constant 0 : index
    %0 = vector.load %arg2[%c0, %c0_0] : memref<128x32xbf16, #tpu.memory_space<vmem>>, vector<128x32xbf16>
    %1 = arith.extf %0 : vector<128x32xbf16> to vector<128x32xf32>
    %cst = arith.constant dense<0.000000e+00> : vector<128xf32>
    %2 = vector.multi_reduction <add>, %1, %cst [1] : vector<128x32xf32> to vector<128xf32>
    %3 = vector.shape_cast %2 : vector<128xf32> to vector<128x1xf32>
    %cst_1 = arith.constant 3.200000e+01 : f32
    %4 = vector.broadcast %cst_1 : f32 to vector<128x1xf32>
    %5 = arith.divf %3, %4 : vector<128x1xf32>
    %6 = vector.broadcast %5 : vector<128x1xf32> to vector<128x32xf32>
    %7 = arith.subf %1, %6 : vector<128x32xf32>
    %8 = arith.mulf %7, %7 : vector<128x32xf32>
    %cst_2 = arith.constant dense<0.000000e+00> : vector<128xf32>
    %9 = vector.multi_reduction <add>, %8, %cst_2 [1] : vector<128x32xf32> to vector<128xf32>
    %10 = vector.shape_cast %9 : vector<128xf32> to vector<128x1xf32>
    %cst_3 = arith.constant 3.200000e+01 : f32
    %11 = vector.broadcast %cst_3 : f32 to vector<128x1xf32>
    %12 = arith.divf %10, %11 : vector<128x1xf32>
    %13 = vector.broadcast %5 : vector<128x1xf32> to vector<128x32xf32>
    %14 = arith.subf %1, %13 : vector<128x32xf32>
    %cst_4 = arith.constant 9.99999974E-6 : f32
    %15 = vector.broadcast %cst_4 : f32 to vector<128x1xf32>
    %16 = arith.addf %12, %15 : vector<128x1xf32>
    %17 = math.rsqrt %16 : vector<128x1xf32>
    %18 = vector.broadcast %17 : vector<128x1xf32> to vector<128x32xf32>
    %19 = arith.mulf %14, %18 : vector<128x32xf32>
    %c0_5 = arith.constant 0 : index
    %c0_6 = arith.constant 0 : index
    %20 = vector.load %arg3[%c0_5, %c0_6] : memref<1x32xf32, #tpu.memory_space<vmem>>, vector<1x32xf32>
    %21 = vector.broadcast %20 : vector<1x32xf32> to vector<128x32xf32>
    %22 = arith.mulf %19, %21 : vector<128x32xf32>
    %c0_7 = arith.constant 0 : index
    %c0_8 = arith.constant 0 : index
    %23 = vector.load %arg4[%c0_7, %c0_8] : memref<1x32xf32, #tpu.memory_space<vmem>>, vector<1x32xf32>
    %24 = vector.broadcast %23 : vector<1x32xf32> to vector<128x32xf32>
    %25 = arith.addf %22, %24 : vector<128x32xf32>
    %26 = arith.truncf %25 : vector<128x32xf32> to vector<128x32xbf16>
    %c0_9 = arith.constant 0 : index
    %c0_10 = arith.constant 0 : index
    %27 = vector.load %arg5[%c0_9, %c0_10] : memref<32x128xbf16, #tpu.memory_space<vmem>>, vector<32x128xbf16>
    %cst_11 = arith.constant dense<0.000000e+00> : vector<128x128xf32>
    %28 = tpu.matmul %26, %27, %cst_11 {dimension_numbers = #tpu.dot_dimension_numbers<[1], [0], [0], [1], [0, 0, 1, 1], [], []>} : vector<128x32xbf16>, vector<32x128xbf16>, vector<128x128xf32> -> vector<128x128xf32>
    %c0_12 = arith.constant 0 : index
    %c0_13 = arith.constant 0 : index
    %29 = vector.load %arg6[%c0_12, %c0_13] : memref<1x128xf32, #tpu.memory_space<vmem>>, vector<1x128xf32>
    %30 = vector.broadcast %29 : vector<1x128xf32> to vector<128x128xf32>
    %31 = arith.addf %28, %30 : vector<128x128xf32>
    %cst_14 = arith.constant 0.707106769 : f32
    %32 = vector.broadcast %cst_14 : f32 to vector<128x128xf32>
    %33 = arith.mulf %31, %32 : vector<128x128xf32>
    %34 = math.absf %33 : vector<128x128xf32>
    %cst_15 = arith.constant 0.327591091 : f32
    %35 = vector.broadcast %cst_15 : f32 to vector<128x128xf32>
    %36 = arith.mulf %35, %34 : vector<128x128xf32>
    %cst_16 = arith.constant 1.000000e+00 : f32
    %37 = vector.broadcast %cst_16 : f32 to vector<128x128xf32>
    %38 = arith.addf %37, %36 : vector<128x128xf32>
    %cst_17 = arith.constant 1.000000e+00 : f32
    %39 = vector.broadcast %cst_17 : f32 to vector<128x128xf32>
    %40 = arith.divf %39, %38 : vector<128x128xf32>
    %cst_18 = arith.constant 1.06140542 : f32
    %41 = vector.broadcast %cst_18 : f32 to vector<128x128xf32>
    %42 = arith.mulf %40, %41 : vector<128x128xf32>
    %cst_19 = arith.constant -1.45315206 : f32
    %43 = vector.broadcast %cst_19 : f32 to vector<128x128xf32>
    %44 = arith.addf %43, %42 : vector<128x128xf32>
    %45 = arith.mulf %40, %44 : vector<128x128xf32>
    %cst_20 = arith.constant 1.42141378 : f32
    %46 = vector.broadcast %cst_20 : f32 to vector<128x128xf32>
    %47 = arith.addf %46, %45 : vector<128x128xf32>
    %48 = arith.mulf %40, %47 : vector<128x128xf32>
    %cst_21 = arith.constant -0.284496725 : f32
    %49 = vector.broadcast %cst_21 : f32 to vector<128x128xf32>
    %50 = arith.addf %49, %48 : vector<128x128xf32>
    %51 = arith.mulf %40, %50 : vector<128x128xf32>
    %cst_22 = arith.constant 0.254829586 : f32
    %52 = vector.broadcast %cst_22 : f32 to vector<128x128xf32>
    %53 = arith.addf %52, %51 : vector<128x128xf32>
    %54 = arith.mulf %40, %53 : vector<128x128xf32>
    %cst_23 = arith.constant 0.000000e+00 : f32
    %55 = vector.broadcast %cst_23 : f32 to vector<128x128xf32>
    %56 = arith.subf %55, %34 : vector<128x128xf32>
    %57 = arith.mulf %56, %34 : vector<128x128xf32>
    %58 = math.exp %57 : vector<128x128xf32>
    %59 = arith.mulf %54, %58 : vector<128x128xf32>
    %cst_24 = arith.constant 1.000000e+00 : f32
    %60 = vector.broadcast %cst_24 : f32 to vector<128x128xf32>
    %61 = arith.subf %60, %59 : vector<128x128xf32>
    %cst_25 = arith.constant 0.000000e+00 : f32
    %62 = vector.broadcast %cst_25 : f32 to vector<128x128xf32>
    %63 = arith.cmpf oge, %33, %62 : vector<128x128xf32>
    %cst_26 = arith.constant 0.000000e+00 : f32
    %64 = vector.broadcast %cst_26 : f32 to vector<128x128xf32>
    %65 = arith.subf %64, %61 : vector<128x128xf32>
    %66 = arith.select %63, %61, %65 : vector<128x128xi1>, vector<128x128xf32>
    %cst_27 = arith.constant 5.000000e-01 : f32
    %67 = vector.broadcast %cst_27 : f32 to vector<128x128xf32>
    %68 = arith.mulf %67, %31 : vector<128x128xf32>
    %cst_28 = arith.constant 1.000000e+00 : f32
    %69 = vector.broadcast %cst_28 : f32 to vector<128x128xf32>
    %70 = arith.addf %69, %66 : vector<128x128xf32>
    %71 = arith.mulf %68, %70 : vector<128x128xf32>
    %72 = arith.truncf %71 : vector<128x128xf32> to vector<128x128xbf16>
    %c0_29 = arith.constant 0 : index
    %c0_30 = arith.constant 0 : index
    %73 = vector.load %arg7[%c0_29, %c0_30] : memref<128x128xbf16, #tpu.memory_space<vmem>>, vector<128x128xbf16>
    tpu.vector_store %arg7[%c0_29, %c0_30], %72 {strides = array<i32>} : memref<128x128xbf16, #tpu.memory_space<vmem>>, vector<128x128xbf16>,
    return
  }
  func.func @transform_0(%arg0: i32, %arg1: i32) -> (i32, i32) {
    %c0_i32 = arith.constant 0 : i32
    %c0_i32_0 = arith.constant 0 : i32
    return %arg0, %c0_i32 : i32, i32
  }
  func.func @transform_1(%arg0: i32, %arg1: i32) -> (i32, i32) {
    %c0_i32 = arith.constant 0 : i32
    %c0_i32_0 = arith.constant 0 : i32
    %c0_i32_1 = arith.constant 0 : i32
    return %c0_i32, %c0_i32_0 : i32, i32
  }
  func.func @transform_2(%arg0: i32, %arg1: i32) -> (i32, i32) {
    %c0_i32 = arith.constant 0 : i32
    %c0_i32_0 = arith.constant 0 : i32
    %c0_i32_1 = arith.constant 0 : i32
    return %c0_i32, %c0_i32_0 : i32, i32
  }
  func.func @transform_3(%arg0: i32, %arg1: i32) -> (i32, i32) {
    %c0_i32 = arith.constant 0 : i32
    %c0_i32_0 = arith.constant 0 : i32
    return %c0_i32, %arg1 : i32, i32
  }
  func.func @transform_4(%arg0: i32, %arg1: i32) -> (i32, i32) {
    %c0_i32 = arith.constant 0 : i32
    %c0_i32_0 = arith.constant 0 : i32
    return %c0_i32, %arg1 : i32, i32
  }
  func.func @transform_5(%arg0: i32, %arg1: i32) -> (i32, i32) {
    %c0_i32 = arith.constant 0 : i32
    return %arg0, %arg1 : i32, i32
  }
}

module attributes {stable_mosaic.version = 11 : i64} {
  func.func @_matmul_res_kernel(%arg0: i32, %arg1: i32, %arg2: memref<128x128xbf16, #tpu.memory_space<vmem>>, %arg3: memref<128x128xbf16, #tpu.memory_space<vmem>>, %arg4: memref<1x128xf32, #tpu.memory_space<vmem>>, %arg5: memref<128x128xbf16, #tpu.memory_space<vmem>>, %arg6: memref<128x128xbf16, #tpu.memory_space<vmem>>) attributes {dimension_semantics = [#tpu.dimension_semantics<parallel>, #tpu.dimension_semantics<parallel>], iteration_bounds = array<i64: 1, 1>, scalar_prefetch = 0 : i64, scratch_operands = 0 : i64, tpu.core_type = #tpu.core_type<tc>, window_params = [{transform_indices = @transform_0, window_bounds = array<i64: 128, 128>}, {transform_indices = @transform_1, window_bounds = array<i64: 128, 128>}, {transform_indices = @transform_2, window_bounds = array<i64: 1, 128>}, {transform_indices = @transform_3, window_bounds = array<i64: 128, 128>}, {transform_indices = @transform_4, window_bounds = array<i64: 128, 128>}]} {
    %c0 = arith.constant 0 : index
    %c0_0 = arith.constant 0 : index
    %0 = vector.load %arg2[%c0, %c0_0] : memref<128x128xbf16, #tpu.memory_space<vmem>>, vector<128x128xbf16>
    %c0_1 = arith.constant 0 : index
    %c0_2 = arith.constant 0 : index
    %1 = vector.load %arg3[%c0_1, %c0_2] : memref<128x128xbf16, #tpu.memory_space<vmem>>, vector<128x128xbf16>
    %cst = arith.constant dense<0.000000e+00> : vector<128x128xf32>
    %2 = tpu.matmul %0, %1, %cst {dimension_numbers = #tpu.dot_dimension_numbers<[1], [0], [0], [1], [0, 0, 1, 1], [], []>} : vector<128x128xbf16>, vector<128x128xbf16>, vector<128x128xf32> -> vector<128x128xf32>
    %c0_3 = arith.constant 0 : index
    %c0_4 = arith.constant 0 : index
    %3 = vector.load %arg4[%c0_3, %c0_4] : memref<1x128xf32, #tpu.memory_space<vmem>>, vector<1x128xf32>
    %4 = vector.broadcast %3 : vector<1x128xf32> to vector<128x128xf32>
    %5 = arith.addf %2, %4 : vector<128x128xf32>
    %c0_5 = arith.constant 0 : index
    %c0_6 = arith.constant 0 : index
    %6 = vector.load %arg5[%c0_5, %c0_6] : memref<128x128xbf16, #tpu.memory_space<vmem>>, vector<128x128xbf16>
    %7 = arith.extf %6 : vector<128x128xbf16> to vector<128x128xf32>
    %8 = arith.addf %5, %7 : vector<128x128xf32>
    %9 = arith.truncf %8 : vector<128x128xf32> to vector<128x128xbf16>
    %c0_7 = arith.constant 0 : index
    %c0_8 = arith.constant 0 : index
    %10 = vector.load %arg6[%c0_7, %c0_8] : memref<128x128xbf16, #tpu.memory_space<vmem>>, vector<128x128xbf16>
    tpu.vector_store %arg6[%c0_7, %c0_8], %9 {strides = array<i32>} : memref<128x128xbf16, #tpu.memory_space<vmem>>, vector<128x128xbf16>,
    return
  }
  func.func @transform_0(%arg0: i32, %arg1: i32) -> (i32, i32) {
    %c0_i32 = arith.constant 0 : i32
    %c0_i32_0 = arith.constant 0 : i32
    return %arg0, %c0_i32 : i32, i32
  }
  func.func @transform_1(%arg0: i32, %arg1: i32) -> (i32, i32) {
    %c0_i32 = arith.constant 0 : i32
    %c0_i32_0 = arith.constant 0 : i32
    return %c0_i32, %arg1 : i32, i32
  }
  func.func @transform_2(%arg0: i32, %arg1: i32) -> (i32, i32) {
    %c0_i32 = arith.constant 0 : i32
    %c0_i32_0 = arith.constant 0 : i32
    return %c0_i32, %arg1 : i32, i32
  }
  func.func @transform_3(%arg0: i32, %arg1: i32) -> (i32, i32) {
    %c0_i32 = arith.constant 0 : i32
    return %arg0, %arg1 : i32, i32
  }
  func.func @transform_4(%arg0: i32, %arg1: i32) -> (i32, i32) {
    %c0_i32 = arith.constant 0 : i32
    return %arg0, %arg1 : i32, i32
  }
}

module attributes {stable_mosaic.version = 11 : i64} {
  func.func @_channel_attn_kernel(%arg0: i32, %arg1: memref<1x64x96xbf16, #tpu.memory_space<vmem>>, %arg2: memref<1x64x32xbf16, #tpu.memory_space<vmem>>) attributes {dimension_semantics = [#tpu.dimension_semantics<parallel>], iteration_bounds = array<i64: 2>, scalar_prefetch = 0 : i64, scratch_operands = 0 : i64, tpu.core_type = #tpu.core_type<tc>, window_params = [{transform_indices = @transform_0, window_bounds = array<i64: 1, 64, 96>}, {transform_indices = @transform_1, window_bounds = array<i64: 1, 64, 32>}]} {
    %c0 = arith.constant 0 : index
    %c0_0 = arith.constant 0 : index
    %c0_1 = arith.constant 0 : index
    %0 = vector.load %arg1[%c0, %c0_0, %c0_1] : memref<1x64x96xbf16, #tpu.memory_space<vmem>>, vector<1x64x96xbf16>
    %1 = vector.extract_strided_slice %0 {offsets = [0, 0, 0], sizes = [1, 64, 16], strides = [1, 1, 1]} : vector<1x64x96xbf16> to vector<1x64x16xbf16>
    %2 = vector.extract_strided_slice %0 {offsets = [0, 0, 32], sizes = [1, 64, 16], strides = [1, 1, 1]} : vector<1x64x96xbf16> to vector<1x64x16xbf16>
    %3 = vector.extract_strided_slice %0 {offsets = [0, 0, 64], sizes = [1, 64, 16], strides = [1, 1, 1]} : vector<1x64x96xbf16> to vector<1x64x16xbf16>
    "tpu.trace_start"() <{level = 10 : i32, message = "bnc,bnd->bcd"}> : () -> ()
    %cst = arith.constant dense<0.000000e+00> : vector<1x16x16xf32>
    %4 = tpu.matmul %1, %2, %cst {dimension_numbers = #tpu.dot_dimension_numbers<[1], [1], [2], [2], [0, 0, 0, 2, 1, 2], [0], [0]>} : vector<1x64x16xbf16>, vector<1x64x16xbf16>, vector<1x16x16xf32> -> vector<1x16x16xf32>
    "tpu.trace_stop"() : () -> ()
    %cst_2 = arith.constant 1.250000e-01 : f32
    %5 = vector.broadcast %cst_2 : f32 to vector<1x16x16xf32>
    %6 = arith.mulf %4, %5 : vector<1x16x16xf32>
    %cst_3 = arith.constant dense<0xFF800000> : vector<1x16xf32>
    %7 = vector.multi_reduction <maximumf>, %6, %cst_3 [2] : vector<1x16x16xf32> to vector<1x16xf32>
    %8 = vector.shape_cast %7 : vector<1x16xf32> to vector<1x16x1xf32>
    %9 = vector.broadcast %8 : vector<1x16x1xf32> to vector<1x16x16xf32>
    %10 = arith.subf %6, %9 : vector<1x16x16xf32>
    %11 = math.exp %10 : vector<1x16x16xf32>
    %cst_4 = arith.constant dense<0.000000e+00> : vector<1x16xf32>
    %12 = vector.multi_reduction <add>, %11, %cst_4 [2] : vector<1x16x16xf32> to vector<1x16xf32>
    %13 = vector.shape_cast %12 : vector<1x16xf32> to vector<1x16x1xf32>
    %14 = vector.broadcast %13 : vector<1x16x1xf32> to vector<1x16x16xf32>
    %15 = arith.divf %11, %14 : vector<1x16x16xf32>
    %16 = arith.truncf %15 : vector<1x16x16xf32> to vector<1x16x16xbf16>
    "tpu.trace_start"() <{level = 10 : i32, message = "bnd,bcd->bnc"}> : () -> ()
    %cst_5 = arith.constant dense<0.000000e+00> : vector<1x64x16xf32>
    %17 = tpu.matmul %3, %16, %cst_5 {dimension_numbers = #tpu.dot_dimension_numbers<[2], [2], [1], [1], [0, 0, 0, 1, 1, 1], [0], [0]>} : vector<1x64x16xbf16>, vector<1x16x16xbf16>, vector<1x64x16xf32> -> vector<1x64x16xf32>
    "tpu.trace_stop"() : () -> ()
    %18 = arith.truncf %17 : vector<1x64x16xf32> to vector<1x64x16xbf16>
    %19 = vector.extract_strided_slice %0 {offsets = [0, 0, 16], sizes = [1, 64, 16], strides = [1, 1, 1]} : vector<1x64x96xbf16> to vector<1x64x16xbf16>
    %20 = vector.extract_strided_slice %0 {offsets = [0, 0, 48], sizes = [1, 64, 16], strides = [1, 1, 1]} : vector<1x64x96xbf16> to vector<1x64x16xbf16>
    %21 = vector.extract_strided_slice %0 {offsets = [0, 0, 80], sizes = [1, 64, 16], strides = [1, 1, 1]} : vector<1x64x96xbf16> to vector<1x64x16xbf16>
    "tpu.trace_start"() <{level = 10 : i32, message = "bnc,bnd->bcd"}> : () -> ()
    %cst_6 = arith.constant dense<0.000000e+00> : vector<1x16x16xf32>
    %22 = tpu.matmul %19, %20, %cst_6 {dimension_numbers = #tpu.dot_dimension_numbers<[1], [1], [2], [2], [0, 0, 0, 2, 1, 2], [0], [0]>} : vector<1x64x16xbf16>, vector<1x64x16xbf16>, vector<1x16x16xf32> -> vector<1x16x16xf32>
    "tpu.trace_stop"() : () -> ()
    %cst_7 = arith.constant 1.250000e-01 : f32
    %23 = vector.broadcast %cst_7 : f32 to vector<1x16x16xf32>
    %24 = arith.mulf %22, %23 : vector<1x16x16xf32>
    %cst_8 = arith.constant dense<0xFF800000> : vector<1x16xf32>
    %25 = vector.multi_reduction <maximumf>, %24, %cst_8 [2] : vector<1x16x16xf32> to vector<1x16xf32>
    %26 = vector.shape_cast %25 : vector<1x16xf32> to vector<1x16x1xf32>
    %27 = vector.broadcast %26 : vector<1x16x1xf32> to vector<1x16x16xf32>
    %28 = arith.subf %24, %27 : vector<1x16x16xf32>
    %29 = math.exp %28 : vector<1x16x16xf32>
    %cst_9 = arith.constant dense<0.000000e+00> : vector<1x16xf32>
    %30 = vector.multi_reduction <add>, %29, %cst_9 [2] : vector<1x16x16xf32> to vector<1x16xf32>
    %31 = vector.shape_cast %30 : vector<1x16xf32> to vector<1x16x1xf32>
    %32 = vector.broadcast %31 : vector<1x16x1xf32> to vector<1x16x16xf32>
    %33 = arith.divf %29, %32 : vector<1x16x16xf32>
    %34 = arith.truncf %33 : vector<1x16x16xf32> to vector<1x16x16xbf16>
    "tpu.trace_start"() <{level = 10 : i32, message = "bnd,bcd->bnc"}> : () -> ()
    %cst_10 = arith.constant dense<0.000000e+00> : vector<1x64x16xf32>
    %35 = tpu.matmul %21, %34, %cst_10 {dimension_numbers = #tpu.dot_dimension_numbers<[2], [2], [1], [1], [0, 0, 0, 1, 1, 1], [0], [0]>} : vector<1x64x16xbf16>, vector<1x16x16xbf16>, vector<1x64x16xf32> -> vector<1x64x16xf32>
    "tpu.trace_stop"() : () -> ()
    %36 = arith.truncf %35 : vector<1x64x16xf32> to vector<1x64x16xbf16>
    %37 = tpu.concatenate %18, %36 in 2 : vector<1x64x16xbf16>, vector<1x64x16xbf16> -> vector<1x64x32xbf16>
    %c0_11 = arith.constant 0 : index
    %c0_12 = arith.constant 0 : index
    %c0_13 = arith.constant 0 : index
    %38 = vector.load %arg2[%c0_11, %c0_12, %c0_13] : memref<1x64x32xbf16, #tpu.memory_space<vmem>>, vector<1x64x32xbf16>
    tpu.vector_store %arg2[%c0_11, %c0_12, %c0_13], %37 {strides = array<i32>} : memref<1x64x32xbf16, #tpu.memory_space<vmem>>, vector<1x64x32xbf16>,
    return
  }
  func.func @transform_0(%arg0: i32) -> (i32, i32, i32) {
    %c0_i32 = arith.constant 0 : i32
    %c0_i32_0 = arith.constant 0 : i32
    %c0_i32_1 = arith.constant 0 : i32
    return %arg0, %c0_i32, %c0_i32_0 : i32, i32, i32
  }
  func.func @transform_1(%arg0: i32) -> (i32, i32, i32) {
    %c0_i32 = arith.constant 0 : i32
    %c0_i32_0 = arith.constant 0 : i32
    %c0_i32_1 = arith.constant 0 : i32
    return %arg0, %c0_i32, %c0_i32_0 : i32, i32, i32
  }
}

module attributes {stable_mosaic.version = 11 : i64} {
  func.func @_matmul_kernel(%arg0: i32, %arg1: i32, %arg2: memref<32x128xbf16, #tpu.memory_space<vmem>>, %arg3: memref<128x128xbf16, #tpu.memory_space<vmem>>, %arg4: memref<1x128xf32, #tpu.memory_space<vmem>>, %arg5: memref<32x128xbf16, #tpu.memory_space<vmem>>) attributes {dimension_semantics = [#tpu.dimension_semantics<parallel>, #tpu.dimension_semantics<parallel>], iteration_bounds = array<i64: 1, 1>, scalar_prefetch = 0 : i64, scratch_operands = 0 : i64, tpu.core_type = #tpu.core_type<tc>, window_params = [{transform_indices = @transform_0, window_bounds = array<i64: 32, 128>}, {transform_indices = @transform_1, window_bounds = array<i64: 128, 128>}, {transform_indices = @transform_2, window_bounds = array<i64: 1, 128>}, {transform_indices = @transform_3, window_bounds = array<i64: 32, 128>}]} {
    %c0 = arith.constant 0 : index
    %c0_0 = arith.constant 0 : index
    %0 = vector.load %arg2[%c0, %c0_0] : memref<32x128xbf16, #tpu.memory_space<vmem>>, vector<32x128xbf16>
    %c0_1 = arith.constant 0 : index
    %c0_2 = arith.constant 0 : index
    %1 = vector.load %arg3[%c0_1, %c0_2] : memref<128x128xbf16, #tpu.memory_space<vmem>>, vector<128x128xbf16>
    %cst = arith.constant dense<0.000000e+00> : vector<32x128xf32>
    %2 = tpu.matmul %0, %1, %cst {dimension_numbers = #tpu.dot_dimension_numbers<[1], [0], [0], [1], [0, 0, 1, 1], [], []>} : vector<32x128xbf16>, vector<128x128xbf16>, vector<32x128xf32> -> vector<32x128xf32>
    %c0_3 = arith.constant 0 : index
    %c0_4 = arith.constant 0 : index
    %3 = vector.load %arg4[%c0_3, %c0_4] : memref<1x128xf32, #tpu.memory_space<vmem>>, vector<1x128xf32>
    %4 = vector.broadcast %3 : vector<1x128xf32> to vector<32x128xf32>
    %5 = arith.addf %2, %4 : vector<32x128xf32>
    %6 = arith.truncf %5 : vector<32x128xf32> to vector<32x128xbf16>
    %c0_5 = arith.constant 0 : index
    %c0_6 = arith.constant 0 : index
    %7 = vector.load %arg5[%c0_5, %c0_6] : memref<32x128xbf16, #tpu.memory_space<vmem>>, vector<32x128xbf16>
    tpu.vector_store %arg5[%c0_5, %c0_6], %6 {strides = array<i32>} : memref<32x128xbf16, #tpu.memory_space<vmem>>, vector<32x128xbf16>,
    return
  }
  func.func @transform_0(%arg0: i32, %arg1: i32) -> (i32, i32) {
    %c0_i32 = arith.constant 0 : i32
    %c0_i32_0 = arith.constant 0 : i32
    return %arg0, %c0_i32 : i32, i32
  }
  func.func @transform_1(%arg0: i32, %arg1: i32) -> (i32, i32) {
    %c0_i32 = arith.constant 0 : i32
    %c0_i32_0 = arith.constant 0 : i32
    return %c0_i32, %arg1 : i32, i32
  }
  func.func @transform_2(%arg0: i32, %arg1: i32) -> (i32, i32) {
    %c0_i32 = arith.constant 0 : i32
    %c0_i32_0 = arith.constant 0 : i32
    return %c0_i32, %arg1 : i32, i32
  }
  func.func @transform_3(%arg0: i32, %arg1: i32) -> (i32, i32) {
    %c0_i32 = arith.constant 0 : i32
    return %arg0, %arg1 : i32, i32
  }
}

module attributes {stable_mosaic.version = 11 : i64} {
  func.func @_layernorm_kernel(%arg0: i32, %arg1: memref<32x64xbf16, #tpu.memory_space<vmem>>, %arg2: memref<1x64xf32, #tpu.memory_space<vmem>>, %arg3: memref<1x64xf32, #tpu.memory_space<vmem>>, %arg4: memref<32x64xbf16, #tpu.memory_space<vmem>>) attributes {dimension_semantics = [#tpu.dimension_semantics<parallel>], iteration_bounds = array<i64: 1>, scalar_prefetch = 0 : i64, scratch_operands = 0 : i64, tpu.core_type = #tpu.core_type<tc>, window_params = [{transform_indices = @transform_0, window_bounds = array<i64: 32, 64>}, {pipeline_mode = #tpu.pipeline_mode<synchronous>, transform_indices = @transform_1, window_bounds = array<i64: 1, 64>}, {pipeline_mode = #tpu.pipeline_mode<synchronous>, transform_indices = @transform_2, window_bounds = array<i64: 1, 64>}, {transform_indices = @transform_3, window_bounds = array<i64: 32, 64>}]} {
    %c0 = arith.constant 0 : index
    %c0_0 = arith.constant 0 : index
    %0 = vector.load %arg1[%c0, %c0_0] : memref<32x64xbf16, #tpu.memory_space<vmem>>, vector<32x64xbf16>
    %1 = arith.extf %0 : vector<32x64xbf16> to vector<32x64xf32>
    %cst = arith.constant dense<0.000000e+00> : vector<32xf32>
    %2 = vector.multi_reduction <add>, %1, %cst [1] : vector<32x64xf32> to vector<32xf32>
    %3 = vector.shape_cast %2 : vector<32xf32> to vector<32x1xf32>
    %cst_1 = arith.constant 6.400000e+01 : f32
    %4 = vector.broadcast %cst_1 : f32 to vector<32x1xf32>
    %5 = arith.divf %3, %4 : vector<32x1xf32>
    %6 = vector.broadcast %5 : vector<32x1xf32> to vector<32x64xf32>
    %7 = arith.subf %1, %6 : vector<32x64xf32>
    %8 = arith.mulf %7, %7 : vector<32x64xf32>
    %cst_2 = arith.constant dense<0.000000e+00> : vector<32xf32>
    %9 = vector.multi_reduction <add>, %8, %cst_2 [1] : vector<32x64xf32> to vector<32xf32>
    %10 = vector.shape_cast %9 : vector<32xf32> to vector<32x1xf32>
    %cst_3 = arith.constant 6.400000e+01 : f32
    %11 = vector.broadcast %cst_3 : f32 to vector<32x1xf32>
    %12 = arith.divf %10, %11 : vector<32x1xf32>
    %13 = vector.broadcast %5 : vector<32x1xf32> to vector<32x64xf32>
    %14 = arith.subf %1, %13 : vector<32x64xf32>
    %cst_4 = arith.constant 9.99999974E-6 : f32
    %15 = vector.broadcast %cst_4 : f32 to vector<32x1xf32>
    %16 = arith.addf %12, %15 : vector<32x1xf32>
    %17 = math.rsqrt %16 : vector<32x1xf32>
    %18 = vector.broadcast %17 : vector<32x1xf32> to vector<32x64xf32>
    %19 = arith.mulf %14, %18 : vector<32x64xf32>
    %c0_5 = arith.constant 0 : index
    %c0_6 = arith.constant 0 : index
    %20 = vector.load %arg2[%c0_5, %c0_6] : memref<1x64xf32, #tpu.memory_space<vmem>>, vector<1x64xf32>
    %21 = vector.broadcast %20 : vector<1x64xf32> to vector<32x64xf32>
    %22 = arith.mulf %19, %21 : vector<32x64xf32>
    %c0_7 = arith.constant 0 : index
    %c0_8 = arith.constant 0 : index
    %23 = vector.load %arg3[%c0_7, %c0_8] : memref<1x64xf32, #tpu.memory_space<vmem>>, vector<1x64xf32>
    %24 = vector.broadcast %23 : vector<1x64xf32> to vector<32x64xf32>
    %25 = arith.addf %22, %24 : vector<32x64xf32>
    %26 = arith.truncf %25 : vector<32x64xf32> to vector<32x64xbf16>
    %c0_9 = arith.constant 0 : index
    %c0_10 = arith.constant 0 : index
    %27 = vector.load %arg4[%c0_9, %c0_10] : memref<32x64xbf16, #tpu.memory_space<vmem>>, vector<32x64xbf16>
    tpu.vector_store %arg4[%c0_9, %c0_10], %26 {strides = array<i32>} : memref<32x64xbf16, #tpu.memory_space<vmem>>, vector<32x64xbf16>,
    return
  }
  func.func @transform_0(%arg0: i32) -> (i32, i32) {
    %c0_i32 = arith.constant 0 : i32
    %c0_i32_0 = arith.constant 0 : i32
    return %arg0, %c0_i32 : i32, i32
  }
  func.func @transform_1(%arg0: i32) -> (i32, i32) {
    %c0_i32 = arith.constant 0 : i32
    %c0_i32_0 = arith.constant 0 : i32
    %c0_i32_1 = arith.constant 0 : i32
    return %c0_i32, %c0_i32_0 : i32, i32
  }
  func.func @transform_2(%arg0: i32) -> (i32, i32) {
    %c0_i32 = arith.constant 0 : i32
    %c0_i32_0 = arith.constant 0 : i32
    %c0_i32_1 = arith.constant 0 : i32
    return %c0_i32, %c0_i32_0 : i32, i32
  }
  func.func @transform_3(%arg0: i32) -> (i32, i32) {
    %c0_i32 = arith.constant 0 : i32
    %c0_i32_0 = arith.constant 0 : i32
    return %arg0, %c0_i32 : i32, i32
  }
}

module attributes {stable_mosaic.version = 11 : i64} {
  func.func @_dwconv3x3_kernel(%arg0: i32, %arg1: memref<1x4x4x64xbf16, #tpu.memory_space<vmem>>, %arg2: memref<9x64xf32, #tpu.memory_space<vmem>>, %arg3: memref<1x64xf32, #tpu.memory_space<vmem>>, %arg4: memref<1x4x4x64xbf16, #tpu.memory_space<vmem>>) attributes {dimension_semantics = [#tpu.dimension_semantics<parallel>], iteration_bounds = array<i64: 2>, scalar_prefetch = 0 : i64, scratch_operands = 0 : i64, tpu.core_type = #tpu.core_type<tc>, window_params = [{transform_indices = @transform_0, window_bounds = array<i64: 1, 4, 4, 64>}, {pipeline_mode = #tpu.pipeline_mode<synchronous>, transform_indices = @transform_1, window_bounds = array<i64: 9, 64>}, {pipeline_mode = #tpu.pipeline_mode<synchronous>, transform_indices = @transform_2, window_bounds = array<i64: 1, 64>}, {transform_indices = @transform_3, window_bounds = array<i64: 1, 4, 4, 64>}]} {
    %c0 = arith.constant 0 : index
    %c0_0 = arith.constant 0 : index
    %c0_1 = arith.constant 0 : index
    %c0_2 = arith.constant 0 : index
    %0 = vector.load %arg1[%c0, %c0_0, %c0_1, %c0_2] : memref<1x4x4x64xbf16, #tpu.memory_space<vmem>>, vector<1x4x4x64xbf16>
    %1 = vector.shape_cast %0 : vector<1x4x4x64xbf16> to vector<4x4x64xbf16>
    %cst = arith.constant 0.000000e+00 : bf16
    %2 = vector.broadcast %cst : bf16 to vector<1x4x64xbf16>
    %3 = tpu.concatenate %2, %1, %2 in 0 : vector<1x4x64xbf16>, vector<4x4x64xbf16>, vector<1x4x64xbf16> -> vector<6x4x64xbf16>
    %cst_3 = arith.constant 0.000000e+00 : bf16
    %4 = vector.broadcast %cst_3 : bf16 to vector<6x1x64xbf16>
    %5 = tpu.concatenate %4, %3, %4 in 1 : vector<6x1x64xbf16>, vector<6x4x64xbf16>, vector<6x1x64xbf16> -> vector<6x6x64xbf16>
    %6 = arith.extf %1 : vector<4x4x64xbf16> to vector<4x4x64xf32>
    %c0_4 = arith.constant 0 : index
    %c0_5 = arith.constant 0 : index
    %7 = vector.load %arg3[%c0_4, %c0_5] : memref<1x64xf32, #tpu.memory_space<vmem>>, vector<1x64xf32>
    %8 = vector.shape_cast %7 : vector<1x64xf32> to vector<1x1x64xf32>
    %9 = vector.broadcast %8 : vector<1x1x64xf32> to vector<4x4x64xf32>
    %10 = arith.addf %6, %9 : vector<4x4x64xf32>
    %c0_6 = arith.constant 0 : index
    %c0_7 = arith.constant 0 : index
    %11 = vector.load %arg2[%c0_6, %c0_7] : memref<9x64xf32, #tpu.memory_space<vmem>>, vector<1x64xf32>
    %12 = vector.extract_strided_slice %5 {offsets = [0, 0, 0], sizes = [4, 4, 64], strides = [1, 1, 1]} : vector<6x6x64xbf16> to vector<4x4x64xbf16>
    %13 = arith.extf %12 : vector<4x4x64xbf16> to vector<4x4x64xf32>
    %14 = vector.shape_cast %11 : vector<1x64xf32> to vector<1x1x64xf32>
    %15 = vector.broadcast %14 : vector<1x1x64xf32> to vector<4x4x64xf32>
    %16 = arith.mulf %13, %15 : vector<4x4x64xf32>
    %17 = arith.addf %10, %16 : vector<4x4x64xf32>
    %c1 = arith.constant 1 : index
    %c0_8 = arith.constant 0 : index
    %18 = vector.load %arg2[%c1, %c0_8] : memref<9x64xf32, #tpu.memory_space<vmem>>, vector<1x64xf32>
    %19 = vector.extract_strided_slice %5 {offsets = [0, 1, 0], sizes = [4, 4, 64], strides = [1, 1, 1]} : vector<6x6x64xbf16> to vector<4x4x64xbf16>
    %20 = arith.extf %19 : vector<4x4x64xbf16> to vector<4x4x64xf32>
    %21 = vector.shape_cast %18 : vector<1x64xf32> to vector<1x1x64xf32>
    %22 = vector.broadcast %21 : vector<1x1x64xf32> to vector<4x4x64xf32>
    %23 = arith.mulf %20, %22 : vector<4x4x64xf32>
    %24 = arith.addf %17, %23 : vector<4x4x64xf32>
    %c2 = arith.constant 2 : index
    %c0_9 = arith.constant 0 : index
    %25 = vector.load %arg2[%c2, %c0_9] : memref<9x64xf32, #tpu.memory_space<vmem>>, vector<1x64xf32>
    %26 = vector.extract_strided_slice %5 {offsets = [0, 2, 0], sizes = [4, 4, 64], strides = [1, 1, 1]} : vector<6x6x64xbf16> to vector<4x4x64xbf16>
    %27 = arith.extf %26 : vector<4x4x64xbf16> to vector<4x4x64xf32>
    %28 = vector.shape_cast %25 : vector<1x64xf32> to vector<1x1x64xf32>
    %29 = vector.broadcast %28 : vector<1x1x64xf32> to vector<4x4x64xf32>
    %30 = arith.mulf %27, %29 : vector<4x4x64xf32>
    %31 = arith.addf %24, %30 : vector<4x4x64xf32>
    %c3 = arith.constant 3 : index
    %c0_10 = arith.constant 0 : index
    %32 = vector.load %arg2[%c3, %c0_10] : memref<9x64xf32, #tpu.memory_space<vmem>>, vector<1x64xf32>
    %33 = vector.extract_strided_slice %5 {offsets = [1, 0, 0], sizes = [4, 4, 64], strides = [1, 1, 1]} : vector<6x6x64xbf16> to vector<4x4x64xbf16>
    %34 = arith.extf %33 : vector<4x4x64xbf16> to vector<4x4x64xf32>
    %35 = vector.shape_cast %32 : vector<1x64xf32> to vector<1x1x64xf32>
    %36 = vector.broadcast %35 : vector<1x1x64xf32> to vector<4x4x64xf32>
    %37 = arith.mulf %34, %36 : vector<4x4x64xf32>
    %38 = arith.addf %31, %37 : vector<4x4x64xf32>
    %c4 = arith.constant 4 : index
    %c0_11 = arith.constant 0 : index
    %39 = vector.load %arg2[%c4, %c0_11] : memref<9x64xf32, #tpu.memory_space<vmem>>, vector<1x64xf32>
    %40 = vector.extract_strided_slice %5 {offsets = [1, 1, 0], sizes = [4, 4, 64], strides = [1, 1, 1]} : vector<6x6x64xbf16> to vector<4x4x64xbf16>
    %41 = arith.extf %40 : vector<4x4x64xbf16> to vector<4x4x64xf32>
    %42 = vector.shape_cast %39 : vector<1x64xf32> to vector<1x1x64xf32>
    %43 = vector.broadcast %42 : vector<1x1x64xf32> to vector<4x4x64xf32>
    %44 = arith.mulf %41, %43 : vector<4x4x64xf32>
    %45 = arith.addf %38, %44 : vector<4x4x64xf32>
    %c5 = arith.constant 5 : index
    %c0_12 = arith.constant 0 : index
    %46 = vector.load %arg2[%c5, %c0_12] : memref<9x64xf32, #tpu.memory_space<vmem>>, vector<1x64xf32>
    %47 = vector.extract_strided_slice %5 {offsets = [1, 2, 0], sizes = [4, 4, 64], strides = [1, 1, 1]} : vector<6x6x64xbf16> to vector<4x4x64xbf16>
    %48 = arith.extf %47 : vector<4x4x64xbf16> to vector<4x4x64xf32>
    %49 = vector.shape_cast %46 : vector<1x64xf32> to vector<1x1x64xf32>
    %50 = vector.broadcast %49 : vector<1x1x64xf32> to vector<4x4x64xf32>
    %51 = arith.mulf %48, %50 : vector<4x4x64xf32>
    %52 = arith.addf %45, %51 : vector<4x4x64xf32>
    %c6 = arith.constant 6 : index
    %c0_13 = arith.constant 0 : index
    %53 = vector.load %arg2[%c6, %c0_13] : memref<9x64xf32, #tpu.memory_space<vmem>>, vector<1x64xf32>
    %54 = vector.extract_strided_slice %5 {offsets = [2, 0, 0], sizes = [4, 4, 64], strides = [1, 1, 1]} : vector<6x6x64xbf16> to vector<4x4x64xbf16>
    %55 = arith.extf %54 : vector<4x4x64xbf16> to vector<4x4x64xf32>
    %56 = vector.shape_cast %53 : vector<1x64xf32> to vector<1x1x64xf32>
    %57 = vector.broadcast %56 : vector<1x1x64xf32> to vector<4x4x64xf32>
    %58 = arith.mulf %55, %57 : vector<4x4x64xf32>
    %59 = arith.addf %52, %58 : vector<4x4x64xf32>
    %c7 = arith.constant 7 : index
    %c0_14 = arith.constant 0 : index
    %60 = vector.load %arg2[%c7, %c0_14] : memref<9x64xf32, #tpu.memory_space<vmem>>, vector<1x64xf32>
    %61 = vector.extract_strided_slice %5 {offsets = [2, 1, 0], sizes = [4, 4, 64], strides = [1, 1, 1]} : vector<6x6x64xbf16> to vector<4x4x64xbf16>
    %62 = arith.extf %61 : vector<4x4x64xbf16> to vector<4x4x64xf32>
    %63 = vector.shape_cast %60 : vector<1x64xf32> to vector<1x1x64xf32>
    %64 = vector.broadcast %63 : vector<1x1x64xf32> to vector<4x4x64xf32>
    %65 = arith.mulf %62, %64 : vector<4x4x64xf32>
    %66 = arith.addf %59, %65 : vector<4x4x64xf32>
    %c8 = arith.constant 8 : index
    %c0_15 = arith.constant 0 : index
    %67 = vector.load %arg2[%c8, %c0_15] : memref<9x64xf32, #tpu.memory_space<vmem>>, vector<1x64xf32>
    %68 = vector.extract_strided_slice %5 {offsets = [2, 2, 0], sizes = [4, 4, 64], strides = [1, 1, 1]} : vector<6x6x64xbf16> to vector<4x4x64xbf16>
    %69 = arith.extf %68 : vector<4x4x64xbf16> to vector<4x4x64xf32>
    %70 = vector.shape_cast %67 : vector<1x64xf32> to vector<1x1x64xf32>
    %71 = vector.broadcast %70 : vector<1x1x64xf32> to vector<4x4x64xf32>
    %72 = arith.mulf %69, %71 : vector<4x4x64xf32>
    %73 = arith.addf %66, %72 : vector<4x4x64xf32>
    %74 = arith.truncf %73 : vector<4x4x64xf32> to vector<4x4x64xbf16>
    %c0_16 = arith.constant 0 : index
    %c0_17 = arith.constant 0 : index
    %c0_18 = arith.constant 0 : index
    %c0_19 = arith.constant 0 : index
    %75 = vector.load %arg4[%c0_16, %c0_17, %c0_18, %c0_19] : memref<1x4x4x64xbf16, #tpu.memory_space<vmem>>, vector<1x4x4x64xbf16>
    %76 = vector.shape_cast %75 : vector<1x4x4x64xbf16> to vector<4x4x64xbf16>
    %77 = vector.shape_cast %74 : vector<4x4x64xbf16> to vector<1x4x4x64xbf16>
    tpu.vector_store %arg4[%c0_16, %c0_17, %c0_18, %c0_19], %77 {strides = array<i32>} : memref<1x4x4x64xbf16, #tpu.memory_space<vmem>>, vector<1x4x4x64xbf16>,
    return
  }
  func.func @transform_0(%arg0: i32) -> (i32, i32, i32, i32) {
    %c0_i32 = arith.constant 0 : i32
    %c0_i32_0 = arith.constant 0 : i32
    %c0_i32_1 = arith.constant 0 : i32
    %c0_i32_2 = arith.constant 0 : i32
    return %arg0, %c0_i32, %c0_i32_0, %c0_i32_1 : i32, i32, i32, i32
  }
  func.func @transform_1(%arg0: i32) -> (i32, i32) {
    %c0_i32 = arith.constant 0 : i32
    %c0_i32_0 = arith.constant 0 : i32
    %c0_i32_1 = arith.constant 0 : i32
    return %c0_i32, %c0_i32_0 : i32, i32
  }
  func.func @transform_2(%arg0: i32) -> (i32, i32) {
    %c0_i32 = arith.constant 0 : i32
    %c0_i32_0 = arith.constant 0 : i32
    %c0_i32_1 = arith.constant 0 : i32
    return %c0_i32, %c0_i32_0 : i32, i32
  }
  func.func @transform_3(%arg0: i32) -> (i32, i32, i32, i32) {
    %c0_i32 = arith.constant 0 : i32
    %c0_i32_0 = arith.constant 0 : i32
    %c0_i32_1 = arith.constant 0 : i32
    %c0_i32_2 = arith.constant 0 : i32
    return %arg0, %c0_i32, %c0_i32_0, %c0_i32_1 : i32, i32, i32, i32
  }
}

module attributes {stable_mosaic.version = 11 : i64} {
  func.func @_spatial_attn_kernel(%arg0: i32, %arg1: memref<2x16x192xbf16, #tpu.memory_space<vmem>>, %arg2: memref<2x16x64xbf16, #tpu.memory_space<vmem>>) attributes {dimension_semantics = [#tpu.dimension_semantics<parallel>], iteration_bounds = array<i64: 1>, scalar_prefetch = 0 : i64, scratch_operands = 0 : i64, tpu.core_type = #tpu.core_type<tc>, window_params = [{transform_indices = @transform_0, window_bounds = array<i64: 2, 16, 192>}, {transform_indices = @transform_1, window_bounds = array<i64: 2, 16, 64>}]} {
    %c0 = arith.constant 0 : index
    %c0_0 = arith.constant 0 : index
    %c0_1 = arith.constant 0 : index
    %0 = vector.load %arg1[%c0, %c0_0, %c0_1] : memref<2x16x192xbf16, #tpu.memory_space<vmem>>, vector<2x16x192xbf16>
    %1 = vector.extract_strided_slice %0 {offsets = [0, 0, 0], sizes = [2, 16, 16], strides = [1, 1, 1]} : vector<2x16x192xbf16> to vector<2x16x16xbf16>
    %2 = vector.extract_strided_slice %0 {offsets = [0, 0, 64], sizes = [2, 16, 16], strides = [1, 1, 1]} : vector<2x16x192xbf16> to vector<2x16x16xbf16>
    %3 = vector.extract_strided_slice %0 {offsets = [0, 0, 128], sizes = [2, 16, 16], strides = [1, 1, 1]} : vector<2x16x192xbf16> to vector<2x16x16xbf16>
    "tpu.trace_start"() <{level = 10 : i32, message = "bnd,bmd->bnm"}> : () -> ()
    %cst = arith.constant dense<0.000000e+00> : vector<2x16x16xf32>
    %4 = tpu.matmul %1, %2, %cst {dimension_numbers = #tpu.dot_dimension_numbers<[2], [2], [1], [1], [0, 0, 0, 1, 1, 1], [0], [0]>} : vector<2x16x16xbf16>, vector<2x16x16xbf16>, vector<2x16x16xf32> -> vector<2x16x16xf32>
    "tpu.trace_stop"() : () -> ()
    %cst_2 = arith.constant dense<0xFF800000> : vector<2x16xf32>
    %5 = vector.multi_reduction <maximumf>, %4, %cst_2 [2] : vector<2x16x16xf32> to vector<2x16xf32>
    %6 = vector.shape_cast %5 : vector<2x16xf32> to vector<2x16x1xf32>
    %7 = vector.broadcast %6 : vector<2x16x1xf32> to vector<2x16x16xf32>
    %8 = arith.subf %4, %7 : vector<2x16x16xf32>
    %9 = math.exp %8 : vector<2x16x16xf32>
    %cst_3 = arith.constant dense<0.000000e+00> : vector<2x16xf32>
    %10 = vector.multi_reduction <add>, %9, %cst_3 [2] : vector<2x16x16xf32> to vector<2x16xf32>
    %11 = vector.shape_cast %10 : vector<2x16xf32> to vector<2x16x1xf32>
    %12 = vector.broadcast %11 : vector<2x16x1xf32> to vector<2x16x16xf32>
    %13 = arith.divf %9, %12 : vector<2x16x16xf32>
    %14 = arith.truncf %13 : vector<2x16x16xf32> to vector<2x16x16xbf16>
    "tpu.trace_start"() <{level = 10 : i32, message = "bnm,bmd->bnd"}> : () -> ()
    %cst_4 = arith.constant dense<0.000000e+00> : vector<2x16x16xf32>
    %15 = tpu.matmul %14, %3, %cst_4 {dimension_numbers = #tpu.dot_dimension_numbers<[2], [1], [1], [2], [0, 0, 0, 1, 1, 2], [0], [0]>} : vector<2x16x16xbf16>, vector<2x16x16xbf16>, vector<2x16x16xf32> -> vector<2x16x16xf32>
    "tpu.trace_stop"() : () -> ()
    %16 = arith.truncf %15 : vector<2x16x16xf32> to vector<2x16x16xbf16>
    %17 = vector.extract_strided_slice %0 {offsets = [0, 0, 16], sizes = [2, 16, 16], strides = [1, 1, 1]} : vector<2x16x192xbf16> to vector<2x16x16xbf16>
    %18 = vector.extract_strided_slice %0 {offsets = [0, 0, 80], sizes = [2, 16, 16], strides = [1, 1, 1]} : vector<2x16x192xbf16> to vector<2x16x16xbf16>
    %19 = vector.extract_strided_slice %0 {offsets = [0, 0, 144], sizes = [2, 16, 16], strides = [1, 1, 1]} : vector<2x16x192xbf16> to vector<2x16x16xbf16>
    "tpu.trace_start"() <{level = 10 : i32, message = "bnd,bmd->bnm"}> : () -> ()
    %cst_5 = arith.constant dense<0.000000e+00> : vector<2x16x16xf32>
    %20 = tpu.matmul %17, %18, %cst_5 {dimension_numbers = #tpu.dot_dimension_numbers<[2], [2], [1], [1], [0, 0, 0, 1, 1, 1], [0], [0]>} : vector<2x16x16xbf16>, vector<2x16x16xbf16>, vector<2x16x16xf32> -> vector<2x16x16xf32>
    "tpu.trace_stop"() : () -> ()
    %cst_6 = arith.constant dense<0xFF800000> : vector<2x16xf32>
    %21 = vector.multi_reduction <maximumf>, %20, %cst_6 [2] : vector<2x16x16xf32> to vector<2x16xf32>
    %22 = vector.shape_cast %21 : vector<2x16xf32> to vector<2x16x1xf32>
    %23 = vector.broadcast %22 : vector<2x16x1xf32> to vector<2x16x16xf32>
    %24 = arith.subf %20, %23 : vector<2x16x16xf32>
    %25 = math.exp %24 : vector<2x16x16xf32>
    %cst_7 = arith.constant dense<0.000000e+00> : vector<2x16xf32>
    %26 = vector.multi_reduction <add>, %25, %cst_7 [2] : vector<2x16x16xf32> to vector<2x16xf32>
    %27 = vector.shape_cast %26 : vector<2x16xf32> to vector<2x16x1xf32>
    %28 = vector.broadcast %27 : vector<2x16x1xf32> to vector<2x16x16xf32>
    %29 = arith.divf %25, %28 : vector<2x16x16xf32>
    %30 = arith.truncf %29 : vector<2x16x16xf32> to vector<2x16x16xbf16>
    "tpu.trace_start"() <{level = 10 : i32, message = "bnm,bmd->bnd"}> : () -> ()
    %cst_8 = arith.constant dense<0.000000e+00> : vector<2x16x16xf32>
    %31 = tpu.matmul %30, %19, %cst_8 {dimension_numbers = #tpu.dot_dimension_numbers<[2], [1], [1], [2], [0, 0, 0, 1, 1, 2], [0], [0]>} : vector<2x16x16xbf16>, vector<2x16x16xbf16>, vector<2x16x16xf32> -> vector<2x16x16xf32>
    "tpu.trace_stop"() : () -> ()
    %32 = arith.truncf %31 : vector<2x16x16xf32> to vector<2x16x16xbf16>
    %33 = vector.extract_strided_slice %0 {offsets = [0, 0, 32], sizes = [2, 16, 16], strides = [1, 1, 1]} : vector<2x16x192xbf16> to vector<2x16x16xbf16>
    %34 = vector.extract_strided_slice %0 {offsets = [0, 0, 96], sizes = [2, 16, 16], strides = [1, 1, 1]} : vector<2x16x192xbf16> to vector<2x16x16xbf16>
    %35 = vector.extract_strided_slice %0 {offsets = [0, 0, 160], sizes = [2, 16, 16], strides = [1, 1, 1]} : vector<2x16x192xbf16> to vector<2x16x16xbf16>
    "tpu.trace_start"() <{level = 10 : i32, message = "bnd,bmd->bnm"}> : () -> ()
    %cst_9 = arith.constant dense<0.000000e+00> : vector<2x16x16xf32>
    %36 = tpu.matmul %33, %34, %cst_9 {dimension_numbers = #tpu.dot_dimension_numbers<[2], [2], [1], [1], [0, 0, 0, 1, 1, 1], [0], [0]>} : vector<2x16x16xbf16>, vector<2x16x16xbf16>, vector<2x16x16xf32> -> vector<2x16x16xf32>
    "tpu.trace_stop"() : () -> ()
    %cst_10 = arith.constant dense<0xFF800000> : vector<2x16xf32>
    %37 = vector.multi_reduction <maximumf>, %36, %cst_10 [2] : vector<2x16x16xf32> to vector<2x16xf32>
    %38 = vector.shape_cast %37 : vector<2x16xf32> to vector<2x16x1xf32>
    %39 = vector.broadcast %38 : vector<2x16x1xf32> to vector<2x16x16xf32>
    %40 = arith.subf %36, %39 : vector<2x16x16xf32>
    %41 = math.exp %40 : vector<2x16x16xf32>
    %cst_11 = arith.constant dense<0.000000e+00> : vector<2x16xf32>
    %42 = vector.multi_reduction <add>, %41, %cst_11 [2] : vector<2x16x16xf32> to vector<2x16xf32>
    %43 = vector.shape_cast %42 : vector<2x16xf32> to vector<2x16x1xf32>
    %44 = vector.broadcast %43 : vector<2x16x1xf32> to vector<2x16x16xf32>
    %45 = arith.divf %41, %44 : vector<2x16x16xf32>
    %46 = arith.truncf %45 : vector<2x16x16xf32> to vector<2x16x16xbf16>
    "tpu.trace_start"() <{level = 10 : i32, message = "bnm,bmd->bnd"}> : () -> ()
    %cst_12 = arith.constant dense<0.000000e+00> : vector<2x16x16xf32>
    %47 = tpu.matmul %46, %35, %cst_12 {dimension_numbers = #tpu.dot_dimension_numbers<[2], [1], [1], [2], [0, 0, 0, 1, 1, 2], [0], [0]>} : vector<2x16x16xbf16>, vector<2x16x16xbf16>, vector<2x16x16xf32> -> vector<2x16x16xf32>
    "tpu.trace_stop"() : () -> ()
    %48 = arith.truncf %47 : vector<2x16x16xf32> to vector<2x16x16xbf16>
    %49 = vector.extract_strided_slice %0 {offsets = [0, 0, 48], sizes = [2, 16, 16], strides = [1, 1, 1]} : vector<2x16x192xbf16> to vector<2x16x16xbf16>
    %50 = vector.extract_strided_slice %0 {offsets = [0, 0, 112], sizes = [2, 16, 16], strides = [1, 1, 1]} : vector<2x16x192xbf16> to vector<2x16x16xbf16>
    %51 = vector.extract_strided_slice %0 {offsets = [0, 0, 176], sizes = [2, 16, 16], strides = [1, 1, 1]} : vector<2x16x192xbf16> to vector<2x16x16xbf16>
    "tpu.trace_start"() <{level = 10 : i32, message = "bnd,bmd->bnm"}> : () -> ()
    %cst_13 = arith.constant dense<0.000000e+00> : vector<2x16x16xf32>
    %52 = tpu.matmul %49, %50, %cst_13 {dimension_numbers = #tpu.dot_dimension_numbers<[2], [2], [1], [1], [0, 0, 0, 1, 1, 1], [0], [0]>} : vector<2x16x16xbf16>, vector<2x16x16xbf16>, vector<2x16x16xf32> -> vector<2x16x16xf32>
    "tpu.trace_stop"() : () -> ()
    %cst_14 = arith.constant dense<0xFF800000> : vector<2x16xf32>
    %53 = vector.multi_reduction <maximumf>, %52, %cst_14 [2] : vector<2x16x16xf32> to vector<2x16xf32>
    %54 = vector.shape_cast %53 : vector<2x16xf32> to vector<2x16x1xf32>
    %55 = vector.broadcast %54 : vector<2x16x1xf32> to vector<2x16x16xf32>
    %56 = arith.subf %52, %55 : vector<2x16x16xf32>
    %57 = math.exp %56 : vector<2x16x16xf32>
    %cst_15 = arith.constant dense<0.000000e+00> : vector<2x16xf32>
    %58 = vector.multi_reduction <add>, %57, %cst_15 [2] : vector<2x16x16xf32> to vector<2x16xf32>
    %59 = vector.shape_cast %58 : vector<2x16xf32> to vector<2x16x1xf32>
    %60 = vector.broadcast %59 : vector<2x16x1xf32> to vector<2x16x16xf32>
    %61 = arith.divf %57, %60 : vector<2x16x16xf32>
    %62 = arith.truncf %61 : vector<2x16x16xf32> to vector<2x16x16xbf16>
    "tpu.trace_start"() <{level = 10 : i32, message = "bnm,bmd->bnd"}> : () -> ()
    %cst_16 = arith.constant dense<0.000000e+00> : vector<2x16x16xf32>
    %63 = tpu.matmul %62, %51, %cst_16 {dimension_numbers = #tpu.dot_dimension_numbers<[2], [1], [1], [2], [0, 0, 0, 1, 1, 2], [0], [0]>} : vector<2x16x16xbf16>, vector<2x16x16xbf16>, vector<2x16x16xf32> -> vector<2x16x16xf32>
    "tpu.trace_stop"() : () -> ()
    %64 = arith.truncf %63 : vector<2x16x16xf32> to vector<2x16x16xbf16>
    %65 = tpu.concatenate %16, %32, %48, %64 in 2 : vector<2x16x16xbf16>, vector<2x16x16xbf16>, vector<2x16x16xbf16>, vector<2x16x16xbf16> -> vector<2x16x64xbf16>
    %c0_17 = arith.constant 0 : index
    %c0_18 = arith.constant 0 : index
    %c0_19 = arith.constant 0 : index
    %66 = vector.load %arg2[%c0_17, %c0_18, %c0_19] : memref<2x16x64xbf16, #tpu.memory_space<vmem>>, vector<2x16x64xbf16>
    tpu.vector_store %arg2[%c0_17, %c0_18, %c0_19], %65 {strides = array<i32>} : memref<2x16x64xbf16, #tpu.memory_space<vmem>>, vector<2x16x64xbf16>,
    return
  }
  func.func @transform_0(%arg0: i32) -> (i32, i32, i32) {
    %c0_i32 = arith.constant 0 : i32
    %c0_i32_0 = arith.constant 0 : i32
    %c0_i32_1 = arith.constant 0 : i32
    return %arg0, %c0_i32, %c0_i32_0 : i32, i32, i32
  }
  func.func @transform_1(%arg0: i32) -> (i32, i32, i32) {
    %c0_i32 = arith.constant 0 : i32
    %c0_i32_0 = arith.constant 0 : i32
    %c0_i32_1 = arith.constant 0 : i32
    return %arg0, %c0_i32, %c0_i32_0 : i32, i32, i32
  }
}

module attributes {stable_mosaic.version = 11 : i64} {
  func.func @_ln_matmul_kernel(%arg0: i32, %arg1: i32, %arg2: memref<32x64xbf16, #tpu.memory_space<vmem>>, %arg3: memref<1x64xf32, #tpu.memory_space<vmem>>, %arg4: memref<1x64xf32, #tpu.memory_space<vmem>>, %arg5: memref<64x256xbf16, #tpu.memory_space<vmem>>, %arg6: memref<1x256xf32, #tpu.memory_space<vmem>>, %arg7: memref<32x256xbf16, #tpu.memory_space<vmem>>) attributes {dimension_semantics = [#tpu.dimension_semantics<parallel>, #tpu.dimension_semantics<parallel>], iteration_bounds = array<i64: 1, 1>, scalar_prefetch = 0 : i64, scratch_operands = 0 : i64, tpu.core_type = #tpu.core_type<tc>, window_params = [{transform_indices = @transform_0, window_bounds = array<i64: 32, 64>}, {pipeline_mode = #tpu.pipeline_mode<synchronous>, transform_indices = @transform_1, window_bounds = array<i64: 1, 64>}, {pipeline_mode = #tpu.pipeline_mode<synchronous>, transform_indices = @transform_2, window_bounds = array<i64: 1, 64>}, {transform_indices = @transform_3, window_bounds = array<i64: 64, 256>}, {transform_indices = @transform_4, window_bounds = array<i64: 1, 256>}, {transform_indices = @transform_5, window_bounds = array<i64: 32, 256>}]} {
    %c0 = arith.constant 0 : index
    %c0_0 = arith.constant 0 : index
    %0 = vector.load %arg2[%c0, %c0_0] : memref<32x64xbf16, #tpu.memory_space<vmem>>, vector<32x64xbf16>
    %1 = arith.extf %0 : vector<32x64xbf16> to vector<32x64xf32>
    %cst = arith.constant dense<0.000000e+00> : vector<32xf32>
    %2 = vector.multi_reduction <add>, %1, %cst [1] : vector<32x64xf32> to vector<32xf32>
    %3 = vector.shape_cast %2 : vector<32xf32> to vector<32x1xf32>
    %cst_1 = arith.constant 6.400000e+01 : f32
    %4 = vector.broadcast %cst_1 : f32 to vector<32x1xf32>
    %5 = arith.divf %3, %4 : vector<32x1xf32>
    %6 = vector.broadcast %5 : vector<32x1xf32> to vector<32x64xf32>
    %7 = arith.subf %1, %6 : vector<32x64xf32>
    %8 = arith.mulf %7, %7 : vector<32x64xf32>
    %cst_2 = arith.constant dense<0.000000e+00> : vector<32xf32>
    %9 = vector.multi_reduction <add>, %8, %cst_2 [1] : vector<32x64xf32> to vector<32xf32>
    %10 = vector.shape_cast %9 : vector<32xf32> to vector<32x1xf32>
    %cst_3 = arith.constant 6.400000e+01 : f32
    %11 = vector.broadcast %cst_3 : f32 to vector<32x1xf32>
    %12 = arith.divf %10, %11 : vector<32x1xf32>
    %13 = vector.broadcast %5 : vector<32x1xf32> to vector<32x64xf32>
    %14 = arith.subf %1, %13 : vector<32x64xf32>
    %cst_4 = arith.constant 9.99999974E-6 : f32
    %15 = vector.broadcast %cst_4 : f32 to vector<32x1xf32>
    %16 = arith.addf %12, %15 : vector<32x1xf32>
    %17 = math.rsqrt %16 : vector<32x1xf32>
    %18 = vector.broadcast %17 : vector<32x1xf32> to vector<32x64xf32>
    %19 = arith.mulf %14, %18 : vector<32x64xf32>
    %c0_5 = arith.constant 0 : index
    %c0_6 = arith.constant 0 : index
    %20 = vector.load %arg3[%c0_5, %c0_6] : memref<1x64xf32, #tpu.memory_space<vmem>>, vector<1x64xf32>
    %21 = vector.broadcast %20 : vector<1x64xf32> to vector<32x64xf32>
    %22 = arith.mulf %19, %21 : vector<32x64xf32>
    %c0_7 = arith.constant 0 : index
    %c0_8 = arith.constant 0 : index
    %23 = vector.load %arg4[%c0_7, %c0_8] : memref<1x64xf32, #tpu.memory_space<vmem>>, vector<1x64xf32>
    %24 = vector.broadcast %23 : vector<1x64xf32> to vector<32x64xf32>
    %25 = arith.addf %22, %24 : vector<32x64xf32>
    %26 = arith.truncf %25 : vector<32x64xf32> to vector<32x64xbf16>
    %c0_9 = arith.constant 0 : index
    %c0_10 = arith.constant 0 : index
    %27 = vector.load %arg5[%c0_9, %c0_10] : memref<64x256xbf16, #tpu.memory_space<vmem>>, vector<64x256xbf16>
    %cst_11 = arith.constant dense<0.000000e+00> : vector<32x256xf32>
    %28 = tpu.matmul %26, %27, %cst_11 {dimension_numbers = #tpu.dot_dimension_numbers<[1], [0], [0], [1], [0, 0, 1, 1], [], []>} : vector<32x64xbf16>, vector<64x256xbf16>, vector<32x256xf32> -> vector<32x256xf32>
    %c0_12 = arith.constant 0 : index
    %c0_13 = arith.constant 0 : index
    %29 = vector.load %arg6[%c0_12, %c0_13] : memref<1x256xf32, #tpu.memory_space<vmem>>, vector<1x256xf32>
    %30 = vector.broadcast %29 : vector<1x256xf32> to vector<32x256xf32>
    %31 = arith.addf %28, %30 : vector<32x256xf32>
    %32 = arith.truncf %31 : vector<32x256xf32> to vector<32x256xbf16>
    %c0_14 = arith.constant 0 : index
    %c0_15 = arith.constant 0 : index
    %33 = vector.load %arg7[%c0_14, %c0_15] : memref<32x256xbf16, #tpu.memory_space<vmem>>, vector<32x256xbf16>
    tpu.vector_store %arg7[%c0_14, %c0_15], %32 {strides = array<i32>} : memref<32x256xbf16, #tpu.memory_space<vmem>>, vector<32x256xbf16>,
    return
  }
  func.func @transform_0(%arg0: i32, %arg1: i32) -> (i32, i32) {
    %c0_i32 = arith.constant 0 : i32
    %c0_i32_0 = arith.constant 0 : i32
    return %arg0, %c0_i32 : i32, i32
  }
  func.func @transform_1(%arg0: i32, %arg1: i32) -> (i32, i32) {
    %c0_i32 = arith.constant 0 : i32
    %c0_i32_0 = arith.constant 0 : i32
    %c0_i32_1 = arith.constant 0 : i32
    return %c0_i32, %c0_i32_0 : i32, i32
  }
  func.func @transform_2(%arg0: i32, %arg1: i32) -> (i32, i32) {
    %c0_i32 = arith.constant 0 : i32
    %c0_i32_0 = arith.constant 0 : i32
    %c0_i32_1 = arith.constant 0 : i32
    return %c0_i32, %c0_i32_0 : i32, i32
  }
  func.func @transform_3(%arg0: i32, %arg1: i32) -> (i32, i32) {
    %c0_i32 = arith.constant 0 : i32
    %c0_i32_0 = arith.constant 0 : i32
    return %c0_i32, %arg1 : i32, i32
  }
  func.func @transform_4(%arg0: i32, %arg1: i32) -> (i32, i32) {
    %c0_i32 = arith.constant 0 : i32
    %c0_i32_0 = arith.constant 0 : i32
    return %c0_i32, %arg1 : i32, i32
  }
  func.func @transform_5(%arg0: i32, %arg1: i32) -> (i32, i32) {
    %c0_i32 = arith.constant 0 : i32
    return %arg0, %arg1 : i32, i32
  }
}

module attributes {stable_mosaic.version = 11 : i64} {
  func.func @_matmul_res_kernel(%arg0: i32, %arg1: i32, %arg2: memref<32x64xbf16, #tpu.memory_space<vmem>>, %arg3: memref<64x128xbf16, #tpu.memory_space<vmem>>, %arg4: memref<1x128xf32, #tpu.memory_space<vmem>>, %arg5: memref<32x128xbf16, #tpu.memory_space<vmem>>, %arg6: memref<32x128xbf16, #tpu.memory_space<vmem>>) attributes {dimension_semantics = [#tpu.dimension_semantics<parallel>, #tpu.dimension_semantics<parallel>], iteration_bounds = array<i64: 1, 1>, scalar_prefetch = 0 : i64, scratch_operands = 0 : i64, tpu.core_type = #tpu.core_type<tc>, window_params = [{transform_indices = @transform_0, window_bounds = array<i64: 32, 64>}, {transform_indices = @transform_1, window_bounds = array<i64: 64, 128>}, {transform_indices = @transform_2, window_bounds = array<i64: 1, 128>}, {transform_indices = @transform_3, window_bounds = array<i64: 32, 128>}, {transform_indices = @transform_4, window_bounds = array<i64: 32, 128>}]} {
    %c0 = arith.constant 0 : index
    %c0_0 = arith.constant 0 : index
    %0 = vector.load %arg2[%c0, %c0_0] : memref<32x64xbf16, #tpu.memory_space<vmem>>, vector<32x64xbf16>
    %c0_1 = arith.constant 0 : index
    %c0_2 = arith.constant 0 : index
    %1 = vector.load %arg3[%c0_1, %c0_2] : memref<64x128xbf16, #tpu.memory_space<vmem>>, vector<64x128xbf16>
    %cst = arith.constant dense<0.000000e+00> : vector<32x128xf32>
    %2 = tpu.matmul %0, %1, %cst {dimension_numbers = #tpu.dot_dimension_numbers<[1], [0], [0], [1], [0, 0, 1, 1], [], []>} : vector<32x64xbf16>, vector<64x128xbf16>, vector<32x128xf32> -> vector<32x128xf32>
    %c0_3 = arith.constant 0 : index
    %c0_4 = arith.constant 0 : index
    %3 = vector.load %arg4[%c0_3, %c0_4] : memref<1x128xf32, #tpu.memory_space<vmem>>, vector<1x128xf32>
    %4 = vector.broadcast %3 : vector<1x128xf32> to vector<32x128xf32>
    %5 = arith.addf %2, %4 : vector<32x128xf32>
    %c0_5 = arith.constant 0 : index
    %c0_6 = arith.constant 0 : index
    %6 = vector.load %arg5[%c0_5, %c0_6] : memref<32x128xbf16, #tpu.memory_space<vmem>>, vector<32x128xbf16>
    %7 = arith.extf %6 : vector<32x128xbf16> to vector<32x128xf32>
    %8 = arith.addf %5, %7 : vector<32x128xf32>
    %9 = arith.truncf %8 : vector<32x128xf32> to vector<32x128xbf16>
    %c0_7 = arith.constant 0 : index
    %c0_8 = arith.constant 0 : index
    %10 = vector.load %arg6[%c0_7, %c0_8] : memref<32x128xbf16, #tpu.memory_space<vmem>>, vector<32x128xbf16>
    tpu.vector_store %arg6[%c0_7, %c0_8], %9 {strides = array<i32>} : memref<32x128xbf16, #tpu.memory_space<vmem>>, vector<32x128xbf16>,
    return
  }
  func.func @transform_0(%arg0: i32, %arg1: i32) -> (i32, i32) {
    %c0_i32 = arith.constant 0 : i32
    %c0_i32_0 = arith.constant 0 : i32
    return %arg0, %c0_i32 : i32, i32
  }
  func.func @transform_1(%arg0: i32, %arg1: i32) -> (i32, i32) {
    %c0_i32 = arith.constant 0 : i32
    %c0_i32_0 = arith.constant 0 : i32
    return %c0_i32, %arg1 : i32, i32
  }
  func.func @transform_2(%arg0: i32, %arg1: i32) -> (i32, i32) {
    %c0_i32 = arith.constant 0 : i32
    %c0_i32_0 = arith.constant 0 : i32
    return %c0_i32, %arg1 : i32, i32
  }
  func.func @transform_3(%arg0: i32, %arg1: i32) -> (i32, i32) {
    %c0_i32 = arith.constant 0 : i32
    return %arg0, %arg1 : i32, i32
  }
  func.func @transform_4(%arg0: i32, %arg1: i32) -> (i32, i32) {
    %c0_i32 = arith.constant 0 : i32
    return %arg0, %arg1 : i32, i32
  }
}

module attributes {stable_mosaic.version = 11 : i64} {
  func.func @_ln_matmul_kernel(%arg0: i32, %arg1: i32, %arg2: memref<32x64xbf16, #tpu.memory_space<vmem>>, %arg3: memref<1x64xf32, #tpu.memory_space<vmem>>, %arg4: memref<1x64xf32, #tpu.memory_space<vmem>>, %arg5: memref<64x256xbf16, #tpu.memory_space<vmem>>, %arg6: memref<1x256xf32, #tpu.memory_space<vmem>>, %arg7: memref<32x256xbf16, #tpu.memory_space<vmem>>) attributes {dimension_semantics = [#tpu.dimension_semantics<parallel>, #tpu.dimension_semantics<parallel>], iteration_bounds = array<i64: 1, 1>, scalar_prefetch = 0 : i64, scratch_operands = 0 : i64, tpu.core_type = #tpu.core_type<tc>, window_params = [{transform_indices = @transform_0, window_bounds = array<i64: 32, 64>}, {pipeline_mode = #tpu.pipeline_mode<synchronous>, transform_indices = @transform_1, window_bounds = array<i64: 1, 64>}, {pipeline_mode = #tpu.pipeline_mode<synchronous>, transform_indices = @transform_2, window_bounds = array<i64: 1, 64>}, {transform_indices = @transform_3, window_bounds = array<i64: 64, 256>}, {transform_indices = @transform_4, window_bounds = array<i64: 1, 256>}, {transform_indices = @transform_5, window_bounds = array<i64: 32, 256>}]} {
    %c0 = arith.constant 0 : index
    %c0_0 = arith.constant 0 : index
    %0 = vector.load %arg2[%c0, %c0_0] : memref<32x64xbf16, #tpu.memory_space<vmem>>, vector<32x64xbf16>
    %1 = arith.extf %0 : vector<32x64xbf16> to vector<32x64xf32>
    %cst = arith.constant dense<0.000000e+00> : vector<32xf32>
    %2 = vector.multi_reduction <add>, %1, %cst [1] : vector<32x64xf32> to vector<32xf32>
    %3 = vector.shape_cast %2 : vector<32xf32> to vector<32x1xf32>
    %cst_1 = arith.constant 6.400000e+01 : f32
    %4 = vector.broadcast %cst_1 : f32 to vector<32x1xf32>
    %5 = arith.divf %3, %4 : vector<32x1xf32>
    %6 = vector.broadcast %5 : vector<32x1xf32> to vector<32x64xf32>
    %7 = arith.subf %1, %6 : vector<32x64xf32>
    %8 = arith.mulf %7, %7 : vector<32x64xf32>
    %cst_2 = arith.constant dense<0.000000e+00> : vector<32xf32>
    %9 = vector.multi_reduction <add>, %8, %cst_2 [1] : vector<32x64xf32> to vector<32xf32>
    %10 = vector.shape_cast %9 : vector<32xf32> to vector<32x1xf32>
    %cst_3 = arith.constant 6.400000e+01 : f32
    %11 = vector.broadcast %cst_3 : f32 to vector<32x1xf32>
    %12 = arith.divf %10, %11 : vector<32x1xf32>
    %13 = vector.broadcast %5 : vector<32x1xf32> to vector<32x64xf32>
    %14 = arith.subf %1, %13 : vector<32x64xf32>
    %cst_4 = arith.constant 9.99999974E-6 : f32
    %15 = vector.broadcast %cst_4 : f32 to vector<32x1xf32>
    %16 = arith.addf %12, %15 : vector<32x1xf32>
    %17 = math.rsqrt %16 : vector<32x1xf32>
    %18 = vector.broadcast %17 : vector<32x1xf32> to vector<32x64xf32>
    %19 = arith.mulf %14, %18 : vector<32x64xf32>
    %c0_5 = arith.constant 0 : index
    %c0_6 = arith.constant 0 : index
    %20 = vector.load %arg3[%c0_5, %c0_6] : memref<1x64xf32, #tpu.memory_space<vmem>>, vector<1x64xf32>
    %21 = vector.broadcast %20 : vector<1x64xf32> to vector<32x64xf32>
    %22 = arith.mulf %19, %21 : vector<32x64xf32>
    %c0_7 = arith.constant 0 : index
    %c0_8 = arith.constant 0 : index
    %23 = vector.load %arg4[%c0_7, %c0_8] : memref<1x64xf32, #tpu.memory_space<vmem>>, vector<1x64xf32>
    %24 = vector.broadcast %23 : vector<1x64xf32> to vector<32x64xf32>
    %25 = arith.addf %22, %24 : vector<32x64xf32>
    %26 = arith.truncf %25 : vector<32x64xf32> to vector<32x64xbf16>
    %c0_9 = arith.constant 0 : index
    %c0_10 = arith.constant 0 : index
    %27 = vector.load %arg5[%c0_9, %c0_10] : memref<64x256xbf16, #tpu.memory_space<vmem>>, vector<64x256xbf16>
    %cst_11 = arith.constant dense<0.000000e+00> : vector<32x256xf32>
    %28 = tpu.matmul %26, %27, %cst_11 {dimension_numbers = #tpu.dot_dimension_numbers<[1], [0], [0], [1], [0, 0, 1, 1], [], []>} : vector<32x64xbf16>, vector<64x256xbf16>, vector<32x256xf32> -> vector<32x256xf32>
    %c0_12 = arith.constant 0 : index
    %c0_13 = arith.constant 0 : index
    %29 = vector.load %arg6[%c0_12, %c0_13] : memref<1x256xf32, #tpu.memory_space<vmem>>, vector<1x256xf32>
    %30 = vector.broadcast %29 : vector<1x256xf32> to vector<32x256xf32>
    %31 = arith.addf %28, %30 : vector<32x256xf32>
    %cst_14 = arith.constant 0.707106769 : f32
    %32 = vector.broadcast %cst_14 : f32 to vector<32x256xf32>
    %33 = arith.mulf %31, %32 : vector<32x256xf32>
    %34 = math.absf %33 : vector<32x256xf32>
    %cst_15 = arith.constant 0.327591091 : f32
    %35 = vector.broadcast %cst_15 : f32 to vector<32x256xf32>
    %36 = arith.mulf %35, %34 : vector<32x256xf32>
    %cst_16 = arith.constant 1.000000e+00 : f32
    %37 = vector.broadcast %cst_16 : f32 to vector<32x256xf32>
    %38 = arith.addf %37, %36 : vector<32x256xf32>
    %cst_17 = arith.constant 1.000000e+00 : f32
    %39 = vector.broadcast %cst_17 : f32 to vector<32x256xf32>
    %40 = arith.divf %39, %38 : vector<32x256xf32>
    %cst_18 = arith.constant 1.06140542 : f32
    %41 = vector.broadcast %cst_18 : f32 to vector<32x256xf32>
    %42 = arith.mulf %40, %41 : vector<32x256xf32>
    %cst_19 = arith.constant -1.45315206 : f32
    %43 = vector.broadcast %cst_19 : f32 to vector<32x256xf32>
    %44 = arith.addf %43, %42 : vector<32x256xf32>
    %45 = arith.mulf %40, %44 : vector<32x256xf32>
    %cst_20 = arith.constant 1.42141378 : f32
    %46 = vector.broadcast %cst_20 : f32 to vector<32x256xf32>
    %47 = arith.addf %46, %45 : vector<32x256xf32>
    %48 = arith.mulf %40, %47 : vector<32x256xf32>
    %cst_21 = arith.constant -0.284496725 : f32
    %49 = vector.broadcast %cst_21 : f32 to vector<32x256xf32>
    %50 = arith.addf %49, %48 : vector<32x256xf32>
    %51 = arith.mulf %40, %50 : vector<32x256xf32>
    %cst_22 = arith.constant 0.254829586 : f32
    %52 = vector.broadcast %cst_22 : f32 to vector<32x256xf32>
    %53 = arith.addf %52, %51 : vector<32x256xf32>
    %54 = arith.mulf %40, %53 : vector<32x256xf32>
    %cst_23 = arith.constant 0.000000e+00 : f32
    %55 = vector.broadcast %cst_23 : f32 to vector<32x256xf32>
    %56 = arith.subf %55, %34 : vector<32x256xf32>
    %57 = arith.mulf %56, %34 : vector<32x256xf32>
    %58 = math.exp %57 : vector<32x256xf32>
    %59 = arith.mulf %54, %58 : vector<32x256xf32>
    %cst_24 = arith.constant 1.000000e+00 : f32
    %60 = vector.broadcast %cst_24 : f32 to vector<32x256xf32>
    %61 = arith.subf %60, %59 : vector<32x256xf32>
    %cst_25 = arith.constant 0.000000e+00 : f32
    %62 = vector.broadcast %cst_25 : f32 to vector<32x256xf32>
    %63 = arith.cmpf oge, %33, %62 : vector<32x256xf32>
    %cst_26 = arith.constant 0.000000e+00 : f32
    %64 = vector.broadcast %cst_26 : f32 to vector<32x256xf32>
    %65 = arith.subf %64, %61 : vector<32x256xf32>
    %66 = arith.select %63, %61, %65 : vector<32x256xi1>, vector<32x256xf32>
    %cst_27 = arith.constant 5.000000e-01 : f32
    %67 = vector.broadcast %cst_27 : f32 to vector<32x256xf32>
    %68 = arith.mulf %67, %31 : vector<32x256xf32>
    %cst_28 = arith.constant 1.000000e+00 : f32
    %69 = vector.broadcast %cst_28 : f32 to vector<32x256xf32>
    %70 = arith.addf %69, %66 : vector<32x256xf32>
    %71 = arith.mulf %68, %70 : vector<32x256xf32>
    %72 = arith.truncf %71 : vector<32x256xf32> to vector<32x256xbf16>
    %c0_29 = arith.constant 0 : index
    %c0_30 = arith.constant 0 : index
    %73 = vector.load %arg7[%c0_29, %c0_30] : memref<32x256xbf16, #tpu.memory_space<vmem>>, vector<32x256xbf16>
    tpu.vector_store %arg7[%c0_29, %c0_30], %72 {strides = array<i32>} : memref<32x256xbf16, #tpu.memory_space<vmem>>, vector<32x256xbf16>,
    return
  }
  func.func @transform_0(%arg0: i32, %arg1: i32) -> (i32, i32) {
    %c0_i32 = arith.constant 0 : i32
    %c0_i32_0 = arith.constant 0 : i32
    return %arg0, %c0_i32 : i32, i32
  }
  func.func @transform_1(%arg0: i32, %arg1: i32) -> (i32, i32) {
    %c0_i32 = arith.constant 0 : i32
    %c0_i32_0 = arith.constant 0 : i32
    %c0_i32_1 = arith.constant 0 : i32
    return %c0_i32, %c0_i32_0 : i32, i32
  }
  func.func @transform_2(%arg0: i32, %arg1: i32) -> (i32, i32) {
    %c0_i32 = arith.constant 0 : i32
    %c0_i32_0 = arith.constant 0 : i32
    %c0_i32_1 = arith.constant 0 : i32
    return %c0_i32, %c0_i32_0 : i32, i32
  }
  func.func @transform_3(%arg0: i32, %arg1: i32) -> (i32, i32) {
    %c0_i32 = arith.constant 0 : i32
    %c0_i32_0 = arith.constant 0 : i32
    return %c0_i32, %arg1 : i32, i32
  }
  func.func @transform_4(%arg0: i32, %arg1: i32) -> (i32, i32) {
    %c0_i32 = arith.constant 0 : i32
    %c0_i32_0 = arith.constant 0 : i32
    return %c0_i32, %arg1 : i32, i32
  }
  func.func @transform_5(%arg0: i32, %arg1: i32) -> (i32, i32) {
    %c0_i32 = arith.constant 0 : i32
    return %arg0, %arg1 : i32, i32
  }
}

module attributes {stable_mosaic.version = 11 : i64} {
  func.func @_matmul_res_kernel(%arg0: i32, %arg1: i32, %arg2: memref<32x256xbf16, #tpu.memory_space<vmem>>, %arg3: memref<256x128xbf16, #tpu.memory_space<vmem>>, %arg4: memref<1x128xf32, #tpu.memory_space<vmem>>, %arg5: memref<32x128xbf16, #tpu.memory_space<vmem>>, %arg6: memref<32x128xbf16, #tpu.memory_space<vmem>>) attributes {dimension_semantics = [#tpu.dimension_semantics<parallel>, #tpu.dimension_semantics<parallel>], iteration_bounds = array<i64: 1, 1>, scalar_prefetch = 0 : i64, scratch_operands = 0 : i64, tpu.core_type = #tpu.core_type<tc>, window_params = [{transform_indices = @transform_0, window_bounds = array<i64: 32, 256>}, {transform_indices = @transform_1, window_bounds = array<i64: 256, 128>}, {transform_indices = @transform_2, window_bounds = array<i64: 1, 128>}, {transform_indices = @transform_3, window_bounds = array<i64: 32, 128>}, {transform_indices = @transform_4, window_bounds = array<i64: 32, 128>}]} {
    %c0 = arith.constant 0 : index
    %c0_0 = arith.constant 0 : index
    %0 = vector.load %arg2[%c0, %c0_0] : memref<32x256xbf16, #tpu.memory_space<vmem>>, vector<32x256xbf16>
    %c0_1 = arith.constant 0 : index
    %c0_2 = arith.constant 0 : index
    %1 = vector.load %arg3[%c0_1, %c0_2] : memref<256x128xbf16, #tpu.memory_space<vmem>>, vector<256x128xbf16>
    %cst = arith.constant dense<0.000000e+00> : vector<32x128xf32>
    %2 = tpu.matmul %0, %1, %cst {dimension_numbers = #tpu.dot_dimension_numbers<[1], [0], [0], [1], [0, 0, 1, 1], [], []>} : vector<32x256xbf16>, vector<256x128xbf16>, vector<32x128xf32> -> vector<32x128xf32>
    %c0_3 = arith.constant 0 : index
    %c0_4 = arith.constant 0 : index
    %3 = vector.load %arg4[%c0_3, %c0_4] : memref<1x128xf32, #tpu.memory_space<vmem>>, vector<1x128xf32>
    %4 = vector.broadcast %3 : vector<1x128xf32> to vector<32x128xf32>
    %5 = arith.addf %2, %4 : vector<32x128xf32>
    %c0_5 = arith.constant 0 : index
    %c0_6 = arith.constant 0 : index
    %6 = vector.load %arg5[%c0_5, %c0_6] : memref<32x128xbf16, #tpu.memory_space<vmem>>, vector<32x128xbf16>
    %7 = arith.extf %6 : vector<32x128xbf16> to vector<32x128xf32>
    %8 = arith.addf %5, %7 : vector<32x128xf32>
    %9 = arith.truncf %8 : vector<32x128xf32> to vector<32x128xbf16>
    %c0_7 = arith.constant 0 : index
    %c0_8 = arith.constant 0 : index
    %10 = vector.load %arg6[%c0_7, %c0_8] : memref<32x128xbf16, #tpu.memory_space<vmem>>, vector<32x128xbf16>
    tpu.vector_store %arg6[%c0_7, %c0_8], %9 {strides = array<i32>} : memref<32x128xbf16, #tpu.memory_space<vmem>>, vector<32x128xbf16>,
    return
  }
  func.func @transform_0(%arg0: i32, %arg1: i32) -> (i32, i32) {
    %c0_i32 = arith.constant 0 : i32
    %c0_i32_0 = arith.constant 0 : i32
    return %arg0, %c0_i32 : i32, i32
  }
  func.func @transform_1(%arg0: i32, %arg1: i32) -> (i32, i32) {
    %c0_i32 = arith.constant 0 : i32
    %c0_i32_0 = arith.constant 0 : i32
    return %c0_i32, %arg1 : i32, i32
  }
  func.func @transform_2(%arg0: i32, %arg1: i32) -> (i32, i32) {
    %c0_i32 = arith.constant 0 : i32
    %c0_i32_0 = arith.constant 0 : i32
    return %c0_i32, %arg1 : i32, i32
  }
  func.func @transform_3(%arg0: i32, %arg1: i32) -> (i32, i32) {
    %c0_i32 = arith.constant 0 : i32
    return %arg0, %arg1 : i32, i32
  }
  func.func @transform_4(%arg0: i32, %arg1: i32) -> (i32, i32) {
    %c0_i32 = arith.constant 0 : i32
    return %arg0, %arg1 : i32, i32
  }
}

module attributes {stable_mosaic.version = 11 : i64} {
  func.func @_channel_attn_kernel(%arg0: i32, %arg1: memref<1x16x192xbf16, #tpu.memory_space<vmem>>, %arg2: memref<1x16x64xbf16, #tpu.memory_space<vmem>>) attributes {dimension_semantics = [#tpu.dimension_semantics<parallel>], iteration_bounds = array<i64: 2>, scalar_prefetch = 0 : i64, scratch_operands = 0 : i64, tpu.core_type = #tpu.core_type<tc>, window_params = [{transform_indices = @transform_0, window_bounds = array<i64: 1, 16, 192>}, {transform_indices = @transform_1, window_bounds = array<i64: 1, 16, 64>}]} {
    %c0 = arith.constant 0 : index
    %c0_0 = arith.constant 0 : index
    %c0_1 = arith.constant 0 : index
    %0 = vector.load %arg1[%c0, %c0_0, %c0_1] : memref<1x16x192xbf16, #tpu.memory_space<vmem>>, vector<1x16x192xbf16>
    %1 = vector.extract_strided_slice %0 {offsets = [0, 0, 0], sizes = [1, 16, 16], strides = [1, 1, 1]} : vector<1x16x192xbf16> to vector<1x16x16xbf16>
    %2 = vector.extract_strided_slice %0 {offsets = [0, 0, 64], sizes = [1, 16, 16], strides = [1, 1, 1]} : vector<1x16x192xbf16> to vector<1x16x16xbf16>
    %3 = vector.extract_strided_slice %0 {offsets = [0, 0, 128], sizes = [1, 16, 16], strides = [1, 1, 1]} : vector<1x16x192xbf16> to vector<1x16x16xbf16>
    "tpu.trace_start"() <{level = 10 : i32, message = "bnc,bnd->bcd"}> : () -> ()
    %cst = arith.constant dense<0.000000e+00> : vector<1x16x16xf32>
    %4 = tpu.matmul %1, %2, %cst {dimension_numbers = #tpu.dot_dimension_numbers<[1], [1], [2], [2], [0, 0, 0, 2, 1, 2], [0], [0]>} : vector<1x16x16xbf16>, vector<1x16x16xbf16>, vector<1x16x16xf32> -> vector<1x16x16xf32>
    "tpu.trace_stop"() : () -> ()
    %cst_2 = arith.constant 2.500000e-01 : f32
    %5 = vector.broadcast %cst_2 : f32 to vector<1x16x16xf32>
    %6 = arith.mulf %4, %5 : vector<1x16x16xf32>
    %cst_3 = arith.constant dense<0xFF800000> : vector<1x16xf32>
    %7 = vector.multi_reduction <maximumf>, %6, %cst_3 [2] : vector<1x16x16xf32> to vector<1x16xf32>
    %8 = vector.shape_cast %7 : vector<1x16xf32> to vector<1x16x1xf32>
    %9 = vector.broadcast %8 : vector<1x16x1xf32> to vector<1x16x16xf32>
    %10 = arith.subf %6, %9 : vector<1x16x16xf32>
    %11 = math.exp %10 : vector<1x16x16xf32>
    %cst_4 = arith.constant dense<0.000000e+00> : vector<1x16xf32>
    %12 = vector.multi_reduction <add>, %11, %cst_4 [2] : vector<1x16x16xf32> to vector<1x16xf32>
    %13 = vector.shape_cast %12 : vector<1x16xf32> to vector<1x16x1xf32>
    %14 = vector.broadcast %13 : vector<1x16x1xf32> to vector<1x16x16xf32>
    %15 = arith.divf %11, %14 : vector<1x16x16xf32>
    %16 = arith.truncf %15 : vector<1x16x16xf32> to vector<1x16x16xbf16>
    "tpu.trace_start"() <{level = 10 : i32, message = "bnd,bcd->bnc"}> : () -> ()
    %cst_5 = arith.constant dense<0.000000e+00> : vector<1x16x16xf32>
    %17 = tpu.matmul %3, %16, %cst_5 {dimension_numbers = #tpu.dot_dimension_numbers<[2], [2], [1], [1], [0, 0, 0, 1, 1, 1], [0], [0]>} : vector<1x16x16xbf16>, vector<1x16x16xbf16>, vector<1x16x16xf32> -> vector<1x16x16xf32>
    "tpu.trace_stop"() : () -> ()
    %18 = arith.truncf %17 : vector<1x16x16xf32> to vector<1x16x16xbf16>
    %19 = vector.extract_strided_slice %0 {offsets = [0, 0, 16], sizes = [1, 16, 16], strides = [1, 1, 1]} : vector<1x16x192xbf16> to vector<1x16x16xbf16>
    %20 = vector.extract_strided_slice %0 {offsets = [0, 0, 80], sizes = [1, 16, 16], strides = [1, 1, 1]} : vector<1x16x192xbf16> to vector<1x16x16xbf16>
    %21 = vector.extract_strided_slice %0 {offsets = [0, 0, 144], sizes = [1, 16, 16], strides = [1, 1, 1]} : vector<1x16x192xbf16> to vector<1x16x16xbf16>
    "tpu.trace_start"() <{level = 10 : i32, message = "bnc,bnd->bcd"}> : () -> ()
    %cst_6 = arith.constant dense<0.000000e+00> : vector<1x16x16xf32>
    %22 = tpu.matmul %19, %20, %cst_6 {dimension_numbers = #tpu.dot_dimension_numbers<[1], [1], [2], [2], [0, 0, 0, 2, 1, 2], [0], [0]>} : vector<1x16x16xbf16>, vector<1x16x16xbf16>, vector<1x16x16xf32> -> vector<1x16x16xf32>
    "tpu.trace_stop"() : () -> ()
    %cst_7 = arith.constant 2.500000e-01 : f32
    %23 = vector.broadcast %cst_7 : f32 to vector<1x16x16xf32>
    %24 = arith.mulf %22, %23 : vector<1x16x16xf32>
    %cst_8 = arith.constant dense<0xFF800000> : vector<1x16xf32>
    %25 = vector.multi_reduction <maximumf>, %24, %cst_8 [2] : vector<1x16x16xf32> to vector<1x16xf32>
    %26 = vector.shape_cast %25 : vector<1x16xf32> to vector<1x16x1xf32>
    %27 = vector.broadcast %26 : vector<1x16x1xf32> to vector<1x16x16xf32>
    %28 = arith.subf %24, %27 : vector<1x16x16xf32>
    %29 = math.exp %28 : vector<1x16x16xf32>
    %cst_9 = arith.constant dense<0.000000e+00> : vector<1x16xf32>
    %30 = vector.multi_reduction <add>, %29, %cst_9 [2] : vector<1x16x16xf32> to vector<1x16xf32>
    %31 = vector.shape_cast %30 : vector<1x16xf32> to vector<1x16x1xf32>
    %32 = vector.broadcast %31 : vector<1x16x1xf32> to vector<1x16x16xf32>
    %33 = arith.divf %29, %32 : vector<1x16x16xf32>
    %34 = arith.truncf %33 : vector<1x16x16xf32> to vector<1x16x16xbf16>
    "tpu.trace_start"() <{level = 10 : i32, message = "bnd,bcd->bnc"}> : () -> ()
    %cst_10 = arith.constant dense<0.000000e+00> : vector<1x16x16xf32>
    %35 = tpu.matmul %21, %34, %cst_10 {dimension_numbers = #tpu.dot_dimension_numbers<[2], [2], [1], [1], [0, 0, 0, 1, 1, 1], [0], [0]>} : vector<1x16x16xbf16>, vector<1x16x16xbf16>, vector<1x16x16xf32> -> vector<1x16x16xf32>
    "tpu.trace_stop"() : () -> ()
    %36 = arith.truncf %35 : vector<1x16x16xf32> to vector<1x16x16xbf16>
    %37 = vector.extract_strided_slice %0 {offsets = [0, 0, 32], sizes = [1, 16, 16], strides = [1, 1, 1]} : vector<1x16x192xbf16> to vector<1x16x16xbf16>
    %38 = vector.extract_strided_slice %0 {offsets = [0, 0, 96], sizes = [1, 16, 16], strides = [1, 1, 1]} : vector<1x16x192xbf16> to vector<1x16x16xbf16>
    %39 = vector.extract_strided_slice %0 {offsets = [0, 0, 160], sizes = [1, 16, 16], strides = [1, 1, 1]} : vector<1x16x192xbf16> to vector<1x16x16xbf16>
    "tpu.trace_start"() <{level = 10 : i32, message = "bnc,bnd->bcd"}> : () -> ()
    %cst_11 = arith.constant dense<0.000000e+00> : vector<1x16x16xf32>
    %40 = tpu.matmul %37, %38, %cst_11 {dimension_numbers = #tpu.dot_dimension_numbers<[1], [1], [2], [2], [0, 0, 0, 2, 1, 2], [0], [0]>} : vector<1x16x16xbf16>, vector<1x16x16xbf16>, vector<1x16x16xf32> -> vector<1x16x16xf32>
    "tpu.trace_stop"() : () -> ()
    %cst_12 = arith.constant 2.500000e-01 : f32
    %41 = vector.broadcast %cst_12 : f32 to vector<1x16x16xf32>
    %42 = arith.mulf %40, %41 : vector<1x16x16xf32>
    %cst_13 = arith.constant dense<0xFF800000> : vector<1x16xf32>
    %43 = vector.multi_reduction <maximumf>, %42, %cst_13 [2] : vector<1x16x16xf32> to vector<1x16xf32>
    %44 = vector.shape_cast %43 : vector<1x16xf32> to vector<1x16x1xf32>
    %45 = vector.broadcast %44 : vector<1x16x1xf32> to vector<1x16x16xf32>
    %46 = arith.subf %42, %45 : vector<1x16x16xf32>
    %47 = math.exp %46 : vector<1x16x16xf32>
    %cst_14 = arith.constant dense<0.000000e+00> : vector<1x16xf32>
    %48 = vector.multi_reduction <add>, %47, %cst_14 [2] : vector<1x16x16xf32> to vector<1x16xf32>
    %49 = vector.shape_cast %48 : vector<1x16xf32> to vector<1x16x1xf32>
    %50 = vector.broadcast %49 : vector<1x16x1xf32> to vector<1x16x16xf32>
    %51 = arith.divf %47, %50 : vector<1x16x16xf32>
    %52 = arith.truncf %51 : vector<1x16x16xf32> to vector<1x16x16xbf16>
    "tpu.trace_start"() <{level = 10 : i32, message = "bnd,bcd->bnc"}> : () -> ()
    %cst_15 = arith.constant dense<0.000000e+00> : vector<1x16x16xf32>
    %53 = tpu.matmul %39, %52, %cst_15 {dimension_numbers = #tpu.dot_dimension_numbers<[2], [2], [1], [1], [0, 0, 0, 1, 1, 1], [0], [0]>} : vector<1x16x16xbf16>, vector<1x16x16xbf16>, vector<1x16x16xf32> -> vector<1x16x16xf32>
    "tpu.trace_stop"() : () -> ()
    %54 = arith.truncf %53 : vector<1x16x16xf32> to vector<1x16x16xbf16>
    %55 = vector.extract_strided_slice %0 {offsets = [0, 0, 48], sizes = [1, 16, 16], strides = [1, 1, 1]} : vector<1x16x192xbf16> to vector<1x16x16xbf16>
    %56 = vector.extract_strided_slice %0 {offsets = [0, 0, 112], sizes = [1, 16, 16], strides = [1, 1, 1]} : vector<1x16x192xbf16> to vector<1x16x16xbf16>
    %57 = vector.extract_strided_slice %0 {offsets = [0, 0, 176], sizes = [1, 16, 16], strides = [1, 1, 1]} : vector<1x16x192xbf16> to vector<1x16x16xbf16>
    "tpu.trace_start"() <{level = 10 : i32, message = "bnc,bnd->bcd"}> : () -> ()
    %cst_16 = arith.constant dense<0.000000e+00> : vector<1x16x16xf32>
    %58 = tpu.matmul %55, %56, %cst_16 {dimension_numbers = #tpu.dot_dimension_numbers<[1], [1], [2], [2], [0, 0, 0, 2, 1, 2], [0], [0]>} : vector<1x16x16xbf16>, vector<1x16x16xbf16>, vector<1x16x16xf32> -> vector<1x16x16xf32>
    "tpu.trace_stop"() : () -> ()
    %cst_17 = arith.constant 2.500000e-01 : f32
    %59 = vector.broadcast %cst_17 : f32 to vector<1x16x16xf32>
    %60 = arith.mulf %58, %59 : vector<1x16x16xf32>
    %cst_18 = arith.constant dense<0xFF800000> : vector<1x16xf32>
    %61 = vector.multi_reduction <maximumf>, %60, %cst_18 [2] : vector<1x16x16xf32> to vector<1x16xf32>
    %62 = vector.shape_cast %61 : vector<1x16xf32> to vector<1x16x1xf32>
    %63 = vector.broadcast %62 : vector<1x16x1xf32> to vector<1x16x16xf32>
    %64 = arith.subf %60, %63 : vector<1x16x16xf32>
    %65 = math.exp %64 : vector<1x16x16xf32>
    %cst_19 = arith.constant dense<0.000000e+00> : vector<1x16xf32>
    %66 = vector.multi_reduction <add>, %65, %cst_19 [2] : vector<1x16x16xf32> to vector<1x16xf32>
    %67 = vector.shape_cast %66 : vector<1x16xf32> to vector<1x16x1xf32>
    %68 = vector.broadcast %67 : vector<1x16x1xf32> to vector<1x16x16xf32>
    %69 = arith.divf %65, %68 : vector<1x16x16xf32>
    %70 = arith.truncf %69 : vector<1x16x16xf32> to vector<1x16x16xbf16>
    "tpu.trace_start"() <{level = 10 : i32, message = "bnd,bcd->bnc"}> : () -> ()
    %cst_20 = arith.constant dense<0.000000e+00> : vector<1x16x16xf32>
    %71 = tpu.matmul %57, %70, %cst_20 {dimension_numbers = #tpu.dot_dimension_numbers<[2], [2], [1], [1], [0, 0, 0, 1, 1, 1], [0], [0]>} : vector<1x16x16xbf16>, vector<1x16x16xbf16>, vector<1x16x16xf32> -> vector<1x16x16xf32>
    "tpu.trace_stop"() : () -> ()
    %72 = arith.truncf %71 : vector<1x16x16xf32> to vector<1x16x16xbf16>
    %73 = tpu.concatenate %18, %36, %54, %72 in 2 : vector<1x16x16xbf16>, vector<1x16x16xbf16>, vector<1x16x16xbf16>, vector<1x16x16xbf16> -> vector<1x16x64xbf16>
    %c0_21 = arith.constant 0 : index
    %c0_22 = arith.constant 0 : index
    %c0_23 = arith.constant 0 : index
    %74 = vector.load %arg2[%c0_21, %c0_22, %c0_23] : memref<1x16x64xbf16, #tpu.memory_space<vmem>>, vector<1x16x64xbf16>
    tpu.vector_store %arg2[%c0_21, %c0_22, %c0_23], %73 {strides = array<i32>} : memref<1x16x64xbf16, #tpu.memory_space<vmem>>, vector<1x16x64xbf16>,
    return
  }
  func.func @transform_0(%arg0: i32) -> (i32, i32, i32) {
    %c0_i32 = arith.constant 0 : i32
    %c0_i32_0 = arith.constant 0 : i32
    %c0_i32_1 = arith.constant 0 : i32
    return %arg0, %c0_i32, %c0_i32_0 : i32, i32, i32
  }
  func.func @transform_1(%arg0: i32) -> (i32, i32, i32) {
    %c0_i32 = arith.constant 0 : i32
    %c0_i32_0 = arith.constant 0 : i32
    %c0_i32_1 = arith.constant 0 : i32
    return %arg0, %c0_i32, %c0_i32_0 : i32, i32, i32
  }
}

</mosaic_0001>

<bundles_post_ra>
// kernel: _lambda_.33
= control target key start
LH: loop header
LB: loop body
LE: loop exit
PB: predicated region body
PF: predicated region fallthrough
CT: control target
= control target key end

     0   :  { %vm46_vm0 = vcmask 261120   ;;  %vm366_vm1 = vcmask 257024   ;;  %s842_s0 = inlined_call_operand.vmem [shape: bf16[128,32], index: 0, kind: input, shape index: {}]   ;;  %s843_s1 = inlined_call_operand.vmem [shape: f32[1,32], index: 1, kind: input, shape index: {}]   ;;  %s844_s2 = inlined_call_operand.vmem [shape: f32[1,32], index: 2, kind: input, shape index: {}]   ;;  %s845_s3 = inlined_call_operand.vmem [shape: bf16[128,32], index: 3, kind: output, shape index: {}]  }
   0x1   :  { %v515_v0 = vld [vmem:[%s842_s0] sm:$0xff]   ;;  %v520_v1 = vld [vmem:[%s842_s0 + $0x8] sm:$0xff]   ;;  %v529_v6 = vld [vmem:[%s842_s0 + $0x10] sm:$0xff]  }
   0x2   :  { %v423_v2 = vunpack.c.l.bf16 %v515_v0  ;;  %v427_v3 = vunpack.c.l.bf16 %v520_v1  ;;  %v424_v4 = vunpack.c.h.bf16 %v515_v0  ;;  %v428_v5 = vunpack.c.h.bf16 %v520_v1  ;;  %v544_v13 = vld [vmem:[%s842_s0 + $0x18] sm:$0xff]   ;;  %v557_v18 = vld [vmem:[%s842_s0 + $0x20] sm:$0xff]   ;;  %v570_v23 = vld [vmem:[%s842_s0 + $0x28] sm:$0xff]  }
   0x3   :  { %v431_v11 = vunpack.c.l.bf16 %v529_v6  ;;  %v432_v12 = vunpack.c.h.bf16 %v529_v6  ;;  %v435_v16 = vunpack.c.l.bf16 %v544_v13  ;;  %v436_v17 = vunpack.c.h.bf16 %v544_v13  ;;  %v583_v28 = vld [vmem:[%s842_s0 + $0x30] sm:$0xff]   ;;  %v596_v33 = vld [vmem:[%s842_s0 + $0x38] sm:$0xff]  }
   0x4   :  { %v47_v7 = vsel %vm46_vm0, %v423_v2, 0.0  ;;  %v53_v8 = vsel %vm46_vm0, %v427_v3, 0.0  ;;  %v50_v9 = vsel %vm46_vm0, %v424_v4, 0.0  ;;  %v56_v10 = vsel %vm46_vm0, %v428_v5, 0.0 }
   0x5   :  { %48 = vadd.xlane.f32.xlu0 %v47_v7  ;;  %54 = vadd.xlane.f32.xlu1 %v53_v8  ;;  %v59_v14 = vsel %vm46_vm0, %v431_v11, 0.0  ;;  %v62_v15 = vsel %vm46_vm0, %v432_v12, 0.0  ;;  %v65_v19 = vsel %vm46_vm0, %v435_v16, 0.0  ;;  %v68_v20 = vsel %vm46_vm0, %v436_v17, 0.0 }
   0x6   :  { %v439_v21 = vunpack.c.l.bf16 %v557_v18  ;;  %v440_v22 = vunpack.c.h.bf16 %v557_v18  ;;  %v443_v26 = vunpack.c.l.bf16 %v570_v23  ;;  %v444_v27 = vunpack.c.h.bf16 %v570_v23 }
   0x7   :  { %v447_v31 = vunpack.c.l.bf16 %v583_v28  ;;  %v448_v32 = vunpack.c.h.bf16 %v583_v28  ;;  %v451_v36 = vunpack.c.l.bf16 %v596_v33  ;;  %v452_v37 = vunpack.c.h.bf16 %v596_v33 }
   0x8   :  { %v71_v24 = vsel %vm46_vm0, %v439_v21, 0.0  ;;  %v74_v25 = vsel %vm46_vm0, %v440_v22, 0.0  ;;  %v77_v29 = vsel %vm46_vm0, %v443_v26, 0.0  ;;  %v80_v30 = vsel %vm46_vm0, %v444_v27, 0.0 }
   0x9   :  { %51 = vadd.xlane.f32.xlu0 %v50_v9  ;;  %57 = vadd.xlane.f32.xlu1 %v56_v10  ;;  %v83_v34 = vsel %vm46_vm0, %v447_v31, 0.0  ;;  %v86_v35 = vsel %vm46_vm0, %v448_v32, 0.0  ;;  %v89_v38 = vsel %vm46_vm0, %v451_v36, 0.0  ;;  %v92_v39 = vsel %vm46_vm0, %v452_v37, 0.0 }
   0xd   :  { %60 = vadd.xlane.f32.xlu0 %v59_v14  ;;  %63 = vadd.xlane.f32.xlu1 %v62_v15 }
  0x11   :  { %66 = vadd.xlane.f32.xlu0 %v65_v19  ;;  %69 = vadd.xlane.f32.xlu1 %v68_v20 }
  0x15   :  { %72 = vadd.xlane.f32.xlu0 %v71_v24  ;;  %75 = vadd.xlane.f32.xlu1 %v74_v25 }
  0x19   :  { %78 = vadd.xlane.f32.xlu0 %v77_v29  ;;  %81 = vadd.xlane.f32.xlu1 %v80_v30 }
  0x1d   :  { %84 = vadd.xlane.f32.xlu0 %v83_v34  ;;  %87 = vadd.xlane.f32.xlu1 %v86_v35 }
  0x21   :  { %90 = vadd.xlane.f32.xlu0 %v89_v38  ;;  %93 = vadd.xlane.f32.xlu1 %v92_v39 }
  0x92   :  { %v49_v40 = vpop.xlane.xlu0 %48  ;;  %v55_v41 = vpop.xlane.xlu1 %54 }
  0x93   :  { %v96_v42 = vmul.f32 0.03125, %v49_v40  ;;  %v98_v43 = vmul.f32 0.03125, %v55_v41 }
  0x95   :  { %v612_v44 = vsub.f32 %v423_v2, %v96_v42  ;;  %v614_v45 = vsub.f32 %v427_v3, %v98_v43 }
  0x96   :  { %v52_v46 = vpop.xlane.xlu0 %51  ;;  %v58_v47 = vpop.xlane.xlu1 %57 }
  0x97   :  { %v97_v48 = vmul.f32 0.03125, %v52_v46  ;;  %v99_v49 = vmul.f32 0.03125, %v58_v47  ;;  %v128_v50 = vmul.f32 %v612_v44, %v612_v44  ;;  %v130_v51 = vmul.f32 %v614_v45, %v614_v45 }
  0x99   :  { %v622_v52 = vsub.f32 %v424_v4, %v97_v48  ;;  %v626_v53 = vsub.f32 %v428_v5, %v99_v49  ;;  %v144_v54 = vsel %vm46_vm0, %v128_v50, 0.0  ;;  %v150_v57 = vsel %vm46_vm0, %v130_v51, 0.0 }
  0x9a   :  { %145 = vadd.xlane.f32.xlu0 %v144_v54  ;;  %v61_v55 = vpop.xlane.xlu0 %60  ;;  %v64_v56 = vpop.xlane.xlu1 %63 }
  0x9b   :  { %v100_v58 = vmul.f32 0.03125, %v61_v55  ;;  %v101_v59 = vmul.f32 0.03125, %v64_v56  ;;  %v129_v60 = vmul.f32 %v622_v52, %v622_v52  ;;  %v131_v61 = vmul.f32 %v626_v53, %v626_v53 }
  0x9d   :  { %v636_v62 = vsub.f32 %v431_v11, %v100_v58  ;;  %v640_v63 = vsub.f32 %v432_v12, %v101_v59  ;;  %v147_v0 = vsel %vm46_vm0, %v129_v60, 0.0  ;;  %v153_v3 = vsel %vm46_vm0, %v131_v61, 0.0 }
  0x9e   :  { %151 = vadd.xlane.f32.xlu0 %v150_v57  ;;  %148 = vadd.xlane.f32.xlu1 %v147_v0  ;;  %v67_v1 = vpop.xlane.xlu0 %66  ;;  %v70_v2 = vpop.xlane.xlu1 %69 }
  0x9f   :  { %v102_v4 = vmul.f32 0.03125, %v67_v1  ;;  %v103_v5 = vmul.f32 0.03125, %v70_v2  ;;  %v132_v7 = vmul.f32 %v636_v62, %v636_v62  ;;  %v133_v8 = vmul.f32 %v640_v63, %v640_v63 }
  0xa1   :  { %v650_v6 = vsub.f32 %v435_v16, %v102_v4  ;;  %v654_v9 = vsub.f32 %v436_v17, %v103_v5  ;;  %v156_v10 = vsel %vm46_vm0, %v132_v7, 0.0  ;;  %v159_v14 = vsel %vm46_vm0, %v133_v8, 0.0 }
  0xa2   :  { %154 = vadd.xlane.f32.xlu1 %v153_v3  ;;  %157 = vadd.xlane.f32.xlu0 %v156_v10  ;;  %v73_v11 = vpop.xlane.xlu0 %72  ;;  %v76_v12 = vpop.xlane.xlu1 %75 }
  0xa3   :  { %v104_v15 = vmul.f32 0.03125, %v73_v11  ;;  %v105_v19 = vmul.f32 0.03125, %v76_v12  ;;  %v134_v20 = vmul.f32 %v650_v6, %v650_v6  ;;  %v135_v16 = vmul.f32 %v654_v9, %v654_v9 }
  0xa5   :  { %v664_v13 = vsub.f32 %v439_v21, %v104_v15  ;;  %v668_v17 = vsub.f32 %v440_v22, %v105_v19  ;;  %v162_v24 = vsel %vm46_vm0, %v134_v20, 0.0  ;;  %v165_v30 = vsel %vm46_vm0, %v135_v16, 0.0 }
  0xa6   :  { %160 = vadd.xlane.f32.xlu1 %v159_v14  ;;  %163 = vadd.xlane.f32.xlu0 %v162_v24  ;;  %v79_v25 = vpop.xlane.xlu0 %78  ;;  %v82_v29 = vpop.xlane.xlu1 %81 }
  0xa7   :  { %v106_v34 = vmul.f32 0.03125, %v79_v25  ;;  %v107_v35 = vmul.f32 0.03125, %v82_v29  ;;  %v136_v38 = vmul.f32 %v664_v13, %v664_v13  ;;  %v137_v21 = vmul.f32 %v668_v17, %v668_v17  ;;  %v723_v29 = vld [vmem:[%s843_s1] ss:$0 sm:$0xff] }
  0xa9   :  { %v678_v18 = vsub.f32 %v443_v26, %v106_v34  ;;  %v682_v22 = vsub.f32 %v444_v27, %v107_v35  ;;  %v168_v39 = vsel %vm46_vm0, %v136_v38, 0.0  ;;  %v171_v42 = vsel %vm46_vm0, %v137_v21, 0.0 }
  0xaa   :  { %166 = vadd.xlane.f32.xlu1 %v165_v30  ;;  %169 = vadd.xlane.f32.xlu0 %v168_v39  ;;  %v85_v40 = vpop.xlane.xlu0 %84  ;;  %v88_v41 = vpop.xlane.xlu1 %87  ;;  %v729_v39 = vld [vmem:[%s844_s2] ss:$0 sm:$0xff] }
  0xab   :  { %v108_v43 = vmul.f32 0.03125, %v85_v40  ;;  %v109_v46 = vmul.f32 0.03125, %v88_v41  ;;  %v138_v47 = vmul.f32 %v678_v18, %v678_v18  ;;  %v139_v26 = vmul.f32 %v682_v22, %v682_v22 }
  0xad   :  { %v692_v23 = vsub.f32 %v447_v31, %v108_v43  ;;  %v696_v27 = vsub.f32 %v448_v32, %v109_v46  ;;  %v174_v48 = vsel %vm46_vm0, %v138_v47, 0.0  ;;  %v177_v51 = vsel %vm46_vm0, %v139_v26, 0.0 }
  0xae   :  { %172 = vadd.xlane.f32.xlu1 %v171_v42  ;;  %175 = vadd.xlane.f32.xlu0 %v174_v48  ;;  %v91_v49 = vpop.xlane.xlu0 %90  ;;  %v94_v50 = vpop.xlane.xlu1 %93 }
  0xaf   :  { %v110_v54 = vmul.f32 0.03125, %v91_v49  ;;  %v111_v55 = vmul.f32 0.03125, %v94_v50  ;;  %v140_v56 = vmul.f32 %v692_v23, %v692_v23  ;;  %v141_v31 = vmul.f32 %v696_v27, %v696_v27 }
  0xb1   :  { %v706_v28 = vsub.f32 %v451_v36, %v110_v54  ;;  %v710_v32 = vsub.f32 %v452_v37, %v111_v55  ;;  %v180_v57 = vsel %vm46_vm0, %v140_v56, 0.0  ;;  %v183_v58 = vsel %vm46_vm0, %v141_v31, 0.0 }
  0xb2   :  { %178 = vadd.xlane.f32.xlu1 %v177_v51  ;;  %181 = vadd.xlane.f32.xlu0 %v180_v57 }
  0xb3   :  { %v142_v59 = vmul.f32 %v706_v28, %v706_v28  ;;  %v143_v60 = vmul.f32 %v710_v32, %v710_v32 }
  0xb5   :  { %v186_v61 = vsel %vm46_vm0, %v142_v59, 0.0  ;;  %v189_v33 = vsel %vm46_vm0, %v143_v60, 0.0 }
  0xb6   :  { %184 = vadd.xlane.f32.xlu1 %v183_v58  ;;  %187 = vadd.xlane.f32.xlu0 %v186_v61 }
  0xba   :  { %190 = vadd.xlane.f32.xlu1 %v189_v33 }
 0x127   :  { %v146_v36 = vpop.xlane.xlu0 %145 }
 0x128   :  { %v192_v37 = vmul.f32 0.03125, %v146_v36 }
 0x12a   :  { %v208_v0 = vadd.f32 1e-05, %v192_v37 }
 0x12b   :  { %v149_v1 = vpop.xlane.xlu1 %148  ;;  %v152_v2 = vpop.xlane.xlu0 %151 }
 0x12c   :  { %460 = vrsqrt.f32 %v208_v0  ;;  %v193_v3 = vmul.f32 0.03125, %v149_v1  ;;  %v194_v4 = vmul.f32 0.03125, %v152_v2 }
 0x12e   :  { %v209_v5 = vadd.f32 1e-05, %v193_v3  ;;  %v210_v7 = vadd.f32 1e-05, %v194_v4 }
 0x12f   :  { %v155_v8 = vpop.xlane.xlu1 %154  ;;  %v158_v10 = vpop.xlane.xlu0 %157 }
 0x130   :  { %462 = vrsqrt.f32 %v209_v5  ;;  %v195_v11 = vmul.f32 0.03125, %v155_v8  ;;  %v196_v12 = vmul.f32 0.03125, %v158_v10 }
 0x131   :  { %464 = vrsqrt.f32 %v210_v7 }
 0x132   :  { %v211_v14 = vadd.f32 1e-05, %v195_v11  ;;  %v212_v15 = vadd.f32 1e-05, %v196_v12 }
 0x133   :  { %v161_v19 = vpop.xlane.xlu1 %160  ;;  %v164_v20 = vpop.xlane.xlu0 %163 }
 0x134   :  { %466 = vrsqrt.f32 %v211_v14  ;;  %v197_v16 = vmul.f32 0.03125, %v161_v19  ;;  %v198_v24 = vmul.f32 0.03125, %v164_v20 }
 0x135   :  { %468 = vrsqrt.f32 %v212_v15 }
 0x136   :  { %v461_v25 = vpop.eup %460  ;;  %v213_v30 = vadd.f32 1e-05, %v197_v16  ;;  %v214_v34 = vadd.f32 1e-05, %v198_v24 }
 0x137   :  { %v240_v35 = vmul.f32 %v461_v25, %v612_v44  ;;  %v167_v38 = vpop.xlane.xlu1 %166  ;;  %v170_v21 = vpop.xlane.xlu0 %169 }
 0x138   :  { %470 = vrsqrt.f32 %v213_v30  ;;  %v199_v40 = vmul.f32 0.03125, %v167_v38  ;;  %v200_v41 = vmul.f32 0.03125, %v170_v21 }
 0x139   :  { %v263_v42 = vmul.f32 %v723_v29, %v240_v35  ;;  %472 = vrsqrt.f32 %v214_v34 }
 0x13a   :  { %v463_v43 = vpop.eup %462  ;;  %v215_v46 = vadd.f32 1e-05, %v199_v40  ;;  %v216_v47 = vadd.f32 1e-05, %v200_v41 }
 0x13b   :  { %v465_v26 = vpop.eup %464  ;;  %v286_v44 = vadd.f32 %v729_v39, %v263_v42  ;;  %v241_v48 = vmul.f32 %v463_v43, %v622_v52  ;;  %v173_v49 = vpop.xlane.xlu1 %172 }
 0x13c   :  { %v176_v50 = vpop.xlane.xlu0 %175  ;;  %v242_v51 = vmul.f32 %v465_v26, %v614_v45  ;;  %474 = vrsqrt.f32 %v215_v46  ;;  %v201_v54 = vmul.f32 0.03125, %v173_v49 }
 0x13d   :  { %v202_v55 = vmul.f32 0.03125, %v176_v50  ;;  %v405_v56 = vpack.c.bf16 %v286_v44, %v286_v44  ;;  %v264_v31 = vmul.f32 %v723_v29, %v241_v48  ;;  %476 = vrsqrt.f32 %v216_v47 }
 0x13e   :  { %v467_v57 = vpop.eup %466  ;;  %v265_v58 = vmul.f32 %v723_v29, %v242_v51  ;;  %v217_v59 = vadd.f32 1e-05, %v201_v54 }
 0x13f   :  { %v218_v60 = vadd.f32 1e-05, %v202_v55  ;;  %v469_v61 = vpop.eup %468  ;;  %367 = vst.msk [vmem:[%s845_s3] sm:$0xf] %vm366_vm1, %v405_v56  ;;  %v287_v45 = vadd.f32 %v729_v39, %v264_v31  ;;  %v243_v52 = vmul.f32 %v467_v57, %v626_v53  ;;  %v179_v33 = vpop.xlane.xlu1 %178 }
 0x140   :  { %v182_v36 = vpop.xlane.xlu0 %181  ;;  %v288_v37 = vadd.f32 %v729_v39, %v265_v58  ;;  %v244_v0 = vmul.f32 %v469_v61, %v636_v62  ;;  %478 = vrsqrt.f32 %v217_v59  ;;  %v203_v1 = vmul.f32 0.03125, %v179_v33 }
 0x141   :  { %v406_v2 = vpack.c.bf16 %v287_v45, %v287_v45  ;;  %v266_v3 = vmul.f32 %v723_v29, %v243_v52  ;;  %480 = vrsqrt.f32 %v218_v60  ;;  %v204_v4 = vmul.f32 0.03125, %v182_v36 }
 0x142   :  { %v471_v5 = vpop.eup %470  ;;  %v407_v7 = vpack.c.bf16 %v288_v37, %v288_v37  ;;  %v267_v8 = vmul.f32 %v723_v29, %v244_v0  ;;  %v219_v10 = vadd.f32 1e-05, %v203_v1 }
 0x143   :  { %v473_v11 = vpop.eup %472  ;;  %368 = vst.msk [vmem:[%s845_s3 + $0x4] sm:$0xf] %vm366_vm1, %v406_v2  ;;  %v289_v53 = vadd.f32 %v729_v39, %v266_v3  ;;  %v245_v62 = vmul.f32 %v471_v5, %v640_v63  ;;  %v220_v12 = vadd.f32 1e-05, %v204_v4  ;;  %v185_v14 = vpop.xlane.xlu1 %184 }
 0x144   :  { %v188_v15 = vpop.xlane.xlu0 %187  ;;  %369 = vst.msk [vmem:[%s845_s3 + $0x8] sm:$0xf] %vm366_vm1, %v407_v7  ;;  %v290_v19 = vadd.f32 %v729_v39, %v267_v8  ;;  %v246_v20 = vmul.f32 %v473_v11, %v650_v6  ;;  %482 = vrsqrt.f32 %v219_v10  ;;  %v205_v16 = vmul.f32 0.03125, %v185_v14 }
 0x145   :  { %v408_v24 = vpack.c.bf16 %v289_v53, %v289_v53  ;;  %v268_v25 = vmul.f32 %v723_v29, %v245_v62  ;;  %484 = vrsqrt.f32 %v220_v12  ;;  %v206_v30 = vmul.f32 0.03125, %v188_v15 }
 0x146   :  { %v475_v63 = vpop.eup %474  ;;  %v409_v34 = vpack.c.bf16 %v290_v19, %v290_v19  ;;  %v269_v35 = vmul.f32 %v723_v29, %v246_v20  ;;  %v221_v38 = vadd.f32 1e-05, %v205_v16 }
 0x147   :  { %v477_v21 = vpop.eup %476  ;;  %370 = vst.msk [vmem:[%s845_s3 + $0xc] sm:$0xf] %vm366_vm1, %v408_v24  ;;  %v291_v6 = vadd.f32 %v729_v39, %v268_v25  ;;  %v247_v40 = vmul.f32 %v475_v63, %v654_v9  ;;  %v222_v41 = vadd.f32 1e-05, %v206_v30  ;;  %v191_v42 = vpop.xlane.xlu1 %190 }
 0x148   :  { %371 = vst.msk [vmem:[%s845_s3 + $0x10] sm:$0xf] %vm366_vm1, %v409_v34  ;;  %v292_v43 = vadd.f32 %v729_v39, %v269_v35  ;;  %v248_v46 = vmul.f32 %v477_v21, %v664_v13  ;;  %486 = vrsqrt.f32 %v221_v38  ;;  %v207_v47 = vmul.f32 0.03125, %v191_v42 }
 0x149   :  { %v410_v26 = vpack.c.bf16 %v291_v6, %v291_v6  ;;  %v270_v44 = vmul.f32 %v723_v29, %v247_v40  ;;  %488 = vrsqrt.f32 %v222_v41 }
 0x14a   :  { %v479_v48 = vpop.eup %478  ;;  %v411_v49 = vpack.c.bf16 %v292_v43, %v292_v43  ;;  %v271_v9 = vmul.f32 %v723_v29, %v248_v46  ;;  %v223_v50 = vadd.f32 1e-05, %v207_v47 }
 0x14b   :  { %v481_v51 = vpop.eup %480  ;;  %372 = vst.msk [vmem:[%s845_s3 + $0x14] sm:$0xf] %vm366_vm1, %v410_v26  ;;  %v293_v54 = vadd.f32 %v729_v39, %v270_v44  ;;  %v249_v13 = vmul.f32 %v479_v48, %v668_v17 }
 0x14c   :  { %373 = vst.msk [vmem:[%s845_s3 + $0x18] sm:$0xf] %vm366_vm1, %v411_v49  ;;  %v294_v55 = vadd.f32 %v729_v39, %v271_v9  ;;  %v250_v56 = vmul.f32 %v481_v51, %v678_v18  ;;  %490 = vrsqrt.f32 %v223_v50 }
 0x14d   :  { %v412_v31 = vpack.c.bf16 %v293_v54, %v293_v54  ;;  %v272_v57 = vmul.f32 %v723_v29, %v249_v13 }
 0x14e   :  { %v483_v58 = vpop.eup %482  ;;  %v413_v59 = vpack.c.bf16 %v294_v55, %v294_v55  ;;  %v273_v60 = vmul.f32 %v723_v29, %v250_v56 }
 0x14f   :  { %v485_v61 = vpop.eup %484  ;;  %374 = vst.msk [vmem:[%s845_s3 + $0x1c] sm:$0xf] %vm366_vm1, %v412_v31  ;;  %v295_v17 = vadd.f32 %v729_v39, %v272_v57  ;;  %v251_v45 = vmul.f32 %v483_v58, %v682_v22 }
 0x150   :  { %375 = vst.msk [vmem:[%s845_s3 + $0x20] sm:$0xf] %vm366_vm1, %v413_v59  ;;  %v296_v18 = vadd.f32 %v729_v39, %v273_v60  ;;  %v252_v52 = vmul.f32 %v485_v61, %v692_v23 }
 0x151   :  { %v414_v33 = vpack.c.bf16 %v295_v17, %v295_v17  ;;  %v274_v36 = vmul.f32 %v723_v29, %v251_v45 }
 0x152   :  { %v487_v37 = vpop.eup %486  ;;  %v415_v0 = vpack.c.bf16 %v296_v18, %v296_v18  ;;  %v275_v1 = vmul.f32 %v723_v29, %v252_v52 }
 0x153   :  { %v489_v2 = vpop.eup %488  ;;  %376 = vst.msk [vmem:[%s845_s3 + $0x24] sm:$0xf] %vm366_vm1, %v414_v33  ;;  %v297_v22 = vadd.f32 %v729_v39, %v274_v36  ;;  %v253_v3 = vmul.f32 %v487_v37, %v696_v27 }
 0x154   :  { %377 = vst.msk [vmem:[%s845_s3 + $0x28] sm:$0xf] %vm366_vm1, %v415_v0  ;;  %v298_v23 = vadd.f32 %v729_v39, %v275_v1  ;;  %v254_v4 = vmul.f32 %v489_v2, %v706_v28 }
 0x155   :  { %v416_v5 = vpack.c.bf16 %v297_v22, %v297_v22  ;;  %v276_v7 = vmul.f32 %v723_v29, %v253_v3 }
 0x156   :  { %v491_v8 = vpop.eup %490  ;;  %v417_v10 = vpack.c.bf16 %v298_v23, %v298_v23  ;;  %v277_v11 = vmul.f32 %v723_v29, %v254_v4 }
 0x157   :  { %378 = vst.msk [vmem:[%s845_s3 + $0x2c] sm:$0xf] %vm366_vm1, %v416_v5  ;;  %v299_v27 = vadd.f32 %v729_v39, %v276_v7  ;;  %v255_v53 = vmul.f32 %v491_v8, %v710_v32 }
 0x158   :  { %379 = vst.msk [vmem:[%s845_s3 + $0x30] sm:$0xf] %vm366_vm1, %v417_v10  ;;  %v300_v28 = vadd.f32 %v729_v39, %v277_v11 }
 0x159   :  { %v418_v62 = vpack.c.bf16 %v299_v27, %v299_v27  ;;  %v278_v12 = vmul.f32 %v723_v29, %v255_v53 }
 0x15a   :  { %v419_v14 = vpack.c.bf16 %v300_v28, %v300_v28 }
 0x15b   :  { %380 = vst.msk [vmem:[%s845_s3 + $0x34] sm:$0xf] %vm366_vm1, %v418_v62  ;;  %v301_v15 = vadd.f32 %v729_v39, %v278_v12 }
 0x15c   :  { %381 = vst.msk [vmem:[%s845_s3 + $0x38] sm:$0xf] %vm366_vm1, %v419_v14 }
 0x15d   :  { %v420_v32 = vpack.c.bf16 %v301_v15, %v301_v15 }
 0x15f   :  { %382 = vst.msk [vmem:[%s845_s3 + $0x3c] sm:$0xf] %vm366_vm1, %v420_v32 }

// kernel: _lambda_.32
= control target key start
LH: loop header
LB: loop body
LE: loop exit
PB: predicated region body
PF: predicated region fallthrough
CT: control target
= control target key end

     0   :  { %v569_v0 = vmov 0   ;;  %vm186_vm0 = vcmask 154624   ;;  %vm211_vm1 = vcmask 1040384   ;;  %vm212_vm2 = vcmask 1041408   ;;  %s704_s1 = inlined_call_operand.vmem [shape: bf16[147,128], index: 1, kind: input, shape index: {}]   ;;  %s705_s0 = inlined_call_operand.vmem [shape: bf16[128,147], index: 0, kind: input, shape index: {}]   ;;  %s706_s2 = inlined_call_operand.vmem [shape: f32[1,128], index: 2, kind: input, shape index: {}]   ;;  %s707_s3 = inlined_call_operand.vmem [shape: bf16[128,128], index: 3, kind: output, shape index: {}]  }
   0x1   :  { %218 = vmatprep.subr.bf16.mxu0 %v569_v0  ;;  %513 = vmatprep.subr.bf16.mxu1 %v569_v0  ;;  %v535_v1 = vld [vmem:[%s704_s1] sm:$0xff]   ;;  %v536_v2 = vld [vmem:[%s704_s1 + $0x8] sm:$0xff]   ;;  %v537_v3 = vld [vmem:[%s704_s1 + $0x10] sm:$0xff]   ;;  %v570_v11 = vmov 65535  }
   0x2   :  { %219 = vmatpush1.bf16.msra.mxu0 %v535_v1  ;;  %523 = vmatpush1.bf16.msra.mxu1 %v535_v1  ;;  %v538_v4 = vld [vmem:[%s704_s1 + $0x18] sm:$0xff]   ;;  %v547_v5 = vld [vmem:[%s705_s0 + $0x4] ss:$8 sps:$4 sm:$0xff]   ;;  %v541_v9 = vld [vmem:[%s704_s1 + $0x30] sm:$0xff]   ;;  %v213_v12 = vsel %vm211_vm1, 4294967295, %v570_v11 }
   0x3   :  { %220 = vmatprep.subr.bf16.mxu0 %v569_v0  ;;  %514 = vmatprep.subr.bf16.mxu1 %v569_v0  ;;  %v550_v6 = vld [vmem:[%s705_s0 + $0x44] ss:$8 sps:$4 sm:$0xff]   ;;  %v542_v10 = vld [vmem:[%s704_s1 + $0x38] sm:$0xff]   ;;  %v544_v14 = vld [vmem:[%s704_s1 + $0x48] ss:$0 sps:$4 sm:$0x33]  }
   0x4   :  { %426 = vmatprep.mubr.msk.bf16.mxu0 %vm186_vm0, %v547_v5  ;;  %v539_v7 = vld [vmem:[%s704_s1 + $0x20] sm:$0xff]   ;;  %430 = vmatprep.mubr.msk.bf16.mxu1 %vm186_vm0, %v550_v6  ;;  %v540_v8 = vld [vmem:[%s704_s1 + $0x28] sm:$0xff]   ;;  %v214_v15 = vsel %vm212_vm2, %v213_v12, 0  ;;  %v551_v19 = vld [vmem:[%s705_s0 + $0x14] ss:$8 sps:$4 sm:$0xff]  }
   0x5   :  { %v543_v13 = vld [vmem:[%s704_s1 + $0x40] sm:$0xff]   ;;  %v216_v16 = vand.u32 %v544_v14, %v214_v15  ;;  %v553_v20 = vld [vmem:[%s705_s0 + $0x54] ss:$8 sps:$4 sm:$0xff]   ;;  %v555_v21 = vld [vmem:[%s705_s0 + $0x10] ss:$8 sps:$4 sm:$0xff]  }
   0x6   :  { %221 = vmatpush1.bf16.msra.mxu0 %v536_v2  ;;  %524 = vmatpush1.bf16.msra.mxu1 %v536_v2  ;;  %v545_v17 = vld [vmem:[%s705_s0] ss:$8 sps:$4 sm:$0xff]   ;;  %v556_v22 = vld [vmem:[%s705_s0 + $0x50] ss:$8 sps:$4 sm:$0xff]   ;;  %v557_v23 = vld [vmem:[%s705_s0 + $0x24] ss:$8 sps:$4 sm:$0xff]  }
   0x7   :  { %222 = vmatprep.subr.bf16.mxu0 %v569_v0  ;;  %515 = vmatprep.subr.bf16.mxu1 %v569_v0  ;;  %v548_v18 = vld [vmem:[%s705_s0 + $0x40] ss:$8 sps:$4 sm:$0xff]   ;;  %v559_v24 = vld [vmem:[%s705_s0 + $0x64] ss:$8 sps:$4 sm:$0xff]   ;;  %v563_v27 = vld [vmem:[%s705_s0 + $0x34] ss:$8 sps:$4 sm:$0xff]  }
   0x8   :  { %v561_v25 = vld [vmem:[%s705_s0 + $0x20] ss:$8 sps:$4 sm:$0xff]   ;;  %v565_v28 = vld [vmem:[%s705_s0 + $0x74] ss:$8 sps:$4 sm:$0xff]   ;;  %v567_v29 = vld [vmem:[%s705_s0 + $0x30] ss:$8 sps:$4 sm:$0xff]  }
   0x9   :  { %v562_v26 = vld [vmem:[%s705_s0 + $0x60] ss:$8 sps:$4 sm:$0xff]   ;;  %v568_v30 = vld [vmem:[%s705_s0 + $0x70] ss:$8 sps:$4 sm:$0xff]  }
   0xa   :  { %223 = vmatpush1.bf16.msra.mxu0 %v537_v3  ;;  %525 = vmatpush1.bf16.msra.mxu1 %v537_v3  ;;  %v399_v31 = vld [vmem:[%s706_s2] ss:$0 sm:$0xff] }
   0xb   :  { %224 = vmatprep.subr.bf16.mxu0 %v569_v0  ;;  %516 = vmatprep.subr.bf16.mxu1 %v569_v0 }
   0xe   :  { %225 = vmatpush1.bf16.msra.mxu0 %v538_v4  ;;  %526 = vmatpush1.bf16.msra.mxu1 %v538_v4 }
   0xf   :  { %226 = vmatprep.subr.bf16.mxu0 %v569_v0  ;;  %517 = vmatprep.subr.bf16.mxu1 %v569_v0 }
  0x12   :  { %227 = vmatpush1.bf16.msra.mxu0 %v539_v7  ;;  %527 = vmatpush1.bf16.msra.mxu1 %v539_v7 }
  0x13   :  { %228 = vmatprep.subr.bf16.mxu0 %v569_v0  ;;  %518 = vmatprep.subr.bf16.mxu1 %v569_v0 }
  0x16   :  { %229 = vmatpush1.bf16.msra.mxu0 %v540_v8  ;;  %528 = vmatpush1.bf16.msra.mxu1 %v540_v8 }
  0x17   :  { %230 = vmatprep.subr.bf16.mxu0 %v569_v0  ;;  %519 = vmatprep.subr.bf16.mxu1 %v569_v0 }
  0x1a   :  { %231 = vmatpush1.bf16.msra.mxu0 %v541_v9  ;;  %529 = vmatpush1.bf16.msra.mxu1 %v541_v9 }
  0x1b   :  { %232 = vmatprep.subr.bf16.mxu0 %v569_v0  ;;  %520 = vmatprep.subr.bf16.mxu1 %v569_v0 }
  0x1e   :  { %233 = vmatpush1.bf16.msra.mxu0 %v542_v10  ;;  %530 = vmatpush1.bf16.msra.mxu1 %v542_v10 }
  0x1f   :  { %234 = vmatprep.subr.bf16.mxu0 %v569_v0  ;;  %521 = vmatprep.subr.bf16.mxu1 %v569_v0 }
  0x22   :  { %235 = vmatpush1.bf16.msra.mxu0 %v543_v13  ;;  %531 = vmatpush1.bf16.msra.mxu1 %v543_v13 }
  0x23   :  { %236 = vmatprep.subr.bf16.mxu0 %v569_v0  ;;  %522 = vmatprep.subr.bf16.mxu1 %v569_v0 }
  0x26   :  { %237 = vmatpush1.bf16.msra.mxu0 %v216_v16  ;;  %532 = vmatpush1.bf16.msra.mxu1 %v216_v16 }
  0x29   :  { %251 = vmatmul.mubr.bf16.vlgmr.msra.gmra.mrb[0].mxu0 %v545_v17  ;;  %283 = vmatmul.mubr.bf16.vlgmr.msra.gmra.mrb[0].mxu1 %v548_v18 }
  0x2a   :  { %427 = vmatprep.mubr.msk.bf16.mxu0 %vm186_vm0, %v551_v19  ;;  %431 = vmatprep.mubr.msk.bf16.mxu1 %vm186_vm0, %v553_v20 }
  0x31   :  { %259 = vmatmul.mubr.bf16.gmra.mrb[4].mxu0 %v555_v21  ;;  %291 = vmatmul.mubr.bf16.gmra.mrb[4].mxu1 %v556_v22 }
  0x32   :  { %428 = vmatprep.mubr.msk.bf16.mxu0 %vm186_vm0, %v557_v23  ;;  %432 = vmatprep.mubr.msk.bf16.mxu1 %vm186_vm0, %v559_v24 }
  0x39   :  { %267 = vmatmul.mubr.bf16.gmra.mrb[8].mxu0 %v561_v25  ;;  %299 = vmatmul.mubr.bf16.gmra.mrb[8].mxu1 %v562_v26 }
  0x3a   :  { %429 = vmatprep.mubr.msk.bf16.mxu0 %vm186_vm0, %v563_v27  ;;  %433 = vmatprep.mubr.msk.bf16.mxu1 %vm186_vm0, %v565_v28 }
  0x41   :  { %275 = vmatmul.mubr.bf16.gmra.mrb[12].mxu0 %v567_v29  ;;  %307 = vmatmul.mubr.bf16.gmra.mrb[12].mxu1 %v568_v30 }
  0xfc   :  { %v252_v32 = vpop.f32.mrb[0].mxu0  ;;  %v284_v33 = vpop.f32.mrb[0].mxu1 }
  0xfd   :  { %v254_v34 = vpop.f32.mrb[1].mxu0  ;;  %v286_v35 = vpop.f32.mrb[1].mxu1  ;;  %v253_v38 = vadd.f32 %v399_v31, %v252_v32  ;;  %v285_v39 = vadd.f32 %v399_v31, %v284_v33 }
  0xfe   :  { %v255_v36 = vpop.f32.mrb[2].mxu0  ;;  %v287_v37 = vpop.f32.mrb[2].mxu1 }
  0xff   :  { %v256_v40 = vadd.f32 %v399_v31, %v255_v36  ;;  %v288_v41 = vadd.f32 %v399_v31, %v287_v37  ;;  %v257_v42 = vpop.f32.mrb[3].mxu0  ;;  %v289_v43 = vpop.f32.mrb[3].mxu1 }
 0x101   :  { %v469_v44 = vpack.c.bf16 %v256_v40, %v253_v38  ;;  %v489_v45 = vpack.c.bf16 %v288_v41, %v285_v39 }
 0x103   :  { %470 = vst [vmem:[%s707_s3] sm:$0xff] %v469_v44   ;;  %509 = vst [vmem:[%s707_s3 + $0x20] sm:$0xff] %v489_v45  }
 0x104   :  { %v260_v46 = vpop.f32.mrb[4].mxu0  ;;  %v292_v47 = vpop.f32.mrb[4].mxu1 }
 0x105   :  { %v262_v48 = vpop.f32.mrb[5].mxu0  ;;  %v294_v49 = vpop.f32.mrb[5].mxu1  ;;  %v261_v52 = vadd.f32 %v399_v31, %v260_v46  ;;  %v293_v53 = vadd.f32 %v399_v31, %v292_v47 }
 0x106   :  { %v263_v50 = vpop.f32.mrb[6].mxu0  ;;  %v295_v51 = vpop.f32.mrb[6].mxu1 }
 0x107   :  { %v264_v54 = vadd.f32 %v399_v31, %v263_v50  ;;  %v296_v55 = vadd.f32 %v399_v31, %v295_v51  ;;  %v265_v56 = vpop.f32.mrb[7].mxu0  ;;  %v297_v57 = vpop.f32.mrb[7].mxu1 }
 0x109   :  { %v474_v58 = vpack.c.bf16 %v264_v54, %v261_v52  ;;  %v494_v59 = vpack.c.bf16 %v296_v55, %v293_v53 }
 0x10b   :  { %506 = vst [vmem:[%s707_s3 + $0x8] sm:$0xff] %v474_v58   ;;  %510 = vst [vmem:[%s707_s3 + $0x28] sm:$0xff] %v494_v59  }
 0x10c   :  { %v268_v60 = vpop.f32.mrb[8].mxu0  ;;  %v300_v61 = vpop.f32.mrb[8].mxu1 }
 0x10d   :  { %v270_v62 = vpop.f32.mrb[9].mxu0  ;;  %v302_v63 = vpop.f32.mrb[9].mxu1  ;;  %v269_v2 = vadd.f32 %v399_v31, %v268_v60  ;;  %v301_v3 = vadd.f32 %v399_v31, %v300_v61 }
 0x10e   :  { %v271_v0 = vpop.f32.mrb[10].mxu0  ;;  %v303_v1 = vpop.f32.mrb[10].mxu1 }
 0x10f   :  { %v272_v4 = vadd.f32 %v399_v31, %v271_v0  ;;  %v304_v5 = vadd.f32 %v399_v31, %v303_v1  ;;  %v273_v6 = vpop.f32.mrb[11].mxu0  ;;  %v305_v7 = vpop.f32.mrb[11].mxu1 }
 0x111   :  { %v479_v8 = vpack.c.bf16 %v272_v4, %v269_v2  ;;  %v499_v9 = vpack.c.bf16 %v304_v5, %v301_v3 }
 0x113   :  { %507 = vst [vmem:[%s707_s3 + $0x10] sm:$0xff] %v479_v8   ;;  %511 = vst [vmem:[%s707_s3 + $0x30] sm:$0xff] %v499_v9  }
 0x114   :  { %v276_v10 = vpop.f32.mrb[12].mxu0  ;;  %v308_v11 = vpop.f32.mrb[12].mxu1 }
 0x115   :  { %v278_v12 = vpop.f32.mrb[13].mxu0  ;;  %v310_v13 = vpop.f32.mrb[13].mxu1  ;;  %v277_v16 = vadd.f32 %v399_v31, %v276_v10  ;;  %v309_v17 = vadd.f32 %v399_v31, %v308_v11 }
 0x116   :  { %v279_v14 = vpop.f32.mrb[14].mxu0  ;;  %v311_v15 = vpop.f32.mrb[14].mxu1 }
 0x117   :  { %v280_v18 = vadd.f32 %v399_v31, %v279_v14  ;;  %v312_v19 = vadd.f32 %v399_v31, %v311_v15  ;;  %v281_v20 = vpop.f32.mrb[15].mxu0  ;;  %v313_v21 = vpop.f32.mrb[15].mxu1 }
 0x119   :  { %v484_v22 = vpack.c.bf16 %v280_v18, %v277_v16  ;;  %v504_v23 = vpack.c.bf16 %v312_v19, %v309_v17 }
 0x11b   :  { %508 = vst [vmem:[%s707_s3 + $0x18] sm:$0xff] %v484_v22   ;;  %512 = vst [vmem:[%s707_s3 + $0x38] sm:$0xff] %v504_v23  }

// kernel: _lambda_.34
= control target key start
LH: loop header
LB: loop body
LE: loop exit
PB: predicated region body
PF: predicated region fallthrough
CT: control target
= control target key end

     0   :  { %s977_s12 = smov 0   ;;  %s1466_s0 = inlined_call_operand.vmem [shape: bf16[2,8,8,32], index: 0, kind: input, shape index: {}]   ;;  %s1467_s1 = inlined_call_operand.vmem [shape: f32[9,32], index: 1, kind: input, shape index: {}]   ;;  %s1468_s2 = inlined_call_operand.vmem [shape: f32[1,32], index: 2, kind: input, shape index: {}]   ;;  %s1469_s3 = inlined_call_operand.vmem [shape: bf16[2,8,8,32], index: 3, kind: output, shape index: {}]  }
   0x1 LB: > { %s916_s13 = sadd.s32 4294967295, %s954_s12   ;;  %p920_p0 = scmp.ge.s32.totalorder %s954_s12, 1  ;;  %s954_s12 = sphi %s977_s12, %s13_s12  }
   0x2   : > { %p137_p1 = scmp.lt.s32.totalorder %s954_s12, 3 }
   0x4   : > { %p138_p2 = pnand %p920_p0, %p137_p1 }
   0x5   : > { %p161_p3 = scmp.lt.s32.totalorder (!%p138_p2), %s916_s13, 1  ;;  %vm252_vm0 = vcmask (!%p138_p2), 1040384   ;;  %vm253_vm1 = vsmask.f32 (!%p138_p2), 256  ;;  %vm264_vm2 = vcmask (!%p138_p2), 1044480   ;;  %v956_v0 = vmov (!%p138_p2), 0  }
   0x6   : > { %141 = sbr.rel (%p138_p2) target bundleno = 133 (0x85), region = 32  ;;  %v183_v1 = vrot.slane (!%p138_p2), %v956_v0, 7  ;;  %vm985_vm3 = vmand (!%p138_p2), %vm252_vm0, %vm253_vm1  ;;  %vm265_vm4 = vsmask.f32 (!%p138_p2), 4352  ;;  %v1003_v6 = vld [vmem:[%s1467_s1] ss:$0 sm:$0xff] (!%p138_p2) }
   0x7   : > { %vm991_vm5 = vmand (!%p138_p2), %vm264_vm2, %vm265_vm4  ;;  %v1008_v7 = vld [vmem:[%s1467_s1 + $0x1] ss:$0 sm:$0xff] (!%p138_p2)  ;;  %v1020_v8 = vld [vmem:[%s1468_s2] ss:$0 sm:$0xff] (!%p138_p2)  ;;  %vm373_vm6 = vcmask (!%p138_p2), 1046528   ;;  %vm451_vm7 = vcmask (!%p138_p2), 1045504  }
   0x8   : > { %v255_v4 = vsel (!%p138_p2), %vm985_vm3, 0, %v183_v1  ;;  %v1031_v13 = vld [vmem:[%s1467_s1 + $0x2] ss:$0 sm:$0xff] (!%p138_p2)  ;;  %v1066_v48 = vld [vmem:[%s1467_s1 + $0x3] ss:$0 sm:$0xff] (!%p138_p2)  ;;  %vm852_vm8 = vcmask (!%p138_p2), 257024  }
   0x9   : > { %v267_v5 = vsel (!%p138_p2), %vm991_vm5, %v255_v4, 0  ;;  %v1075_v53 = vld [vmem:[%s1467_s1 + $0x4] ss:$0 sm:$0xff] (!%p138_p2)  ;;  %v1080_v54 = vld [vmem:[%s1467_s1 + $0x5] ss:$0 sm:$0xff] (!%p138_p2) }
   0xa   : > { %v1022_v9 = vunpack.c.l.bf16 (!%p138_p2), %v267_v5  ;;  %v1024_v10 = vunpack.c.h.bf16 (!%p138_p2), %v267_v5  ;;  %v1090_v60 = vld [vmem:[%s1467_s1 + $0x6] ss:$0 sm:$0xff] (!%p138_p2)  ;;  %v1095_v61 = vld [vmem:[%s1467_s1 + $0x7] ss:$0 sm:$0xff] (!%p138_p2) }
   0xc   : > { %v312_v16 = vmul.f32 (!%p138_p2), %v1003_v6, %v1022_v9  ;;  %v341_v17 = vmul.f32 (!%p138_p2), %v1008_v7, %v1022_v9  ;;  %v342_v18 = vmul.f32 (!%p138_p2), %v1008_v7, %v1024_v10  ;;  %v419_v26 = vmul.f32 (!%p138_p2), %v1031_v13, %v1022_v9 }
   0xd   : > { %s1475_s13 = smov (!%p161_p3, %s916_s13), 1  ;;  %v420_v30 = vmul.f32 %v1031_v13, %v1024_v10 }
   0xe   : > { %s937_s14 = sshll.u32 %s1475_s13, 5  ;;  %v374_v24 = vrot.slane %v341_v17, 1  ;;  %v375_v25 = vrot.slane %v342_v18, 1  ;;  %v452_v34 = vrot.slane %v419_v26, 2 }
   0xf   : > { %s1015_s21 = scalar_lea.vmem %s1466_s0, %s937_s14  ;;  %v453_v38 = vrot.slane %v420_v30, 2  ;;  %s1161_s16 = scalar_lea.vmem %s1469_s3, %s937_s14 }
  0x10   : > { %v172_v11 = vld [vmem:[%s1015_s21] sm:$0xf]  ;;  %v173_v12 = vld [vmem:[%s1015_s21 + $0x4] sm:$0xf]  ;;  %v1034_v14 = vld [vmem:[%s1015_s21 + $0x8] sm:$0xf]  ;;  %v376_v33 = vsel %vm373_vm6, %v374_v24, %v375_v25 }
  0x11   : > { %v276_v15 = vunpack.c.l.bf16 %v172_v11  ;;  %v188_v19 = vshrl.u32 %v172_v11, 16  ;;  %v191_v20 = vshll.u32 %v172_v11, 16  ;;  %v195_v21 = vshrl.u32 %v173_v12, 16  ;;  %v1046_v27 = vld [vmem:[%s1015_s21 + $0xc] sm:$0xf] }
  0x12   : > { %v198_v22 = vshll.u32 %v173_v12, 16  ;;  %v202_v31 = vshrl.u32 %v1034_v14, 16  ;;  %v205_v35 = vshll.u32 %v1034_v14, 16  ;;  %v277_v41 = vunpack.c.l.bf16 %v173_v12  ;;  %v1056_v44 = vld [vmem:[%s1015_s21 + $0x10] sm:$0xf] }
  0x13   : > { %v291_v23 = vadd.f32 %v1020_v8, %v276_v15  ;;  %v190_v28 = vrot.slane %v188_v19, 7  ;;  %v197_v29 = vrot.slane %v195_v21, 7  ;;  %v209_v42 = vshrl.u32 %v1046_v27, 16  ;;  %v1110_v15 = vld [vmem:[%s1467_s1 + $0x8] ss:$0 sm:$0xff] }
  0x14   : > { %v204_v39 = vrot.slane %v202_v31, 7  ;;  %v212_v43 = vshll.u32 %v1046_v27, 16  ;;  %v454_v47 = vsel %vm451_vm7, %v452_v34, %v453_v38  ;;  %v292_v55 = vadd.f32 %v1020_v8, %v277_v41 }
  0x15   : > { %v320_v32 = vadd.f32 %v312_v16, %v291_v23  ;;  %v193_v36 = vor.u32 %v191_v20, %v190_v28  ;;  %v200_v37 = vor.u32 %v198_v22, %v197_v29  ;;  %v1099_v63 = vrot.slane %v209_v42, 7 }
  0x16   : > { %v207_v49 = vor.u32 %v205_v35, %v204_v39  ;;  %v278_v0 = vunpack.c.l.bf16 %v1034_v14  ;;  %v216_v1 = vshrl.u32 %v1056_v44, 16 }
  0x17   : > { %v406_v40 = vadd.f32 %v376_v33, %v320_v32  ;;  %v256_v45 = vsel %vm985_vm3, 0, %v193_v36  ;;  %v257_v46 = vsel %vm985_vm3, 0, %v200_v37 }
  0x18   : > { %v268_v50 = vsel %vm991_vm5, %v256_v45, 0  ;;  %v269_v51 = vsel %vm991_vm5, %v257_v46, 0  ;;  %v258_v62 = vsel %vm985_vm3, 0, %v207_v49 }
  0x19   : > { %v484_v52 = vadd.f32 %v454_v47, %v406_v40  ;;  %v301_v56 = vunpack.c.l.bf16 %v268_v50  ;;  %v1083_v57 = vunpack.c.l.bf16 %v269_v51  ;;  %v330_v58 = vunpack.c.h.bf16 %v268_v50 }
  0x1a   : > { %v1085_v59 = vunpack.c.h.bf16 %v269_v51  ;;  %v270_v31 = vsel %vm991_vm5, %v258_v62, 0 }
  0x1b   : > { %v498_v4 = vmul.f32 %v1066_v48, %v301_v56  ;;  %v520_v5 = vmul.f32 %v1075_v53, %v301_v56  ;;  %v521_v11 = vmul.f32 %v1075_v53, %v330_v58  ;;  %v597_v12 = vmul.f32 %v1080_v54, %v301_v56 }
  0x1c   : > { %v598_v16 = vmul.f32 %v1080_v54, %v330_v58  ;;  %v674_v17 = vmul.f32 %v1090_v60, %v1083_v57  ;;  %v695_v18 = vmul.f32 %v1095_v61, %v1083_v57  ;;  %v696_v19 = vmul.f32 %v1095_v61, %v1085_v59 }
  0x1d   : > { %v506_v20 = vadd.f32 %v498_v4, %v484_v52  ;;  %v552_v21 = vrot.slane %v520_v5, 1  ;;  %v553_v22 = vrot.slane %v521_v11, 1  ;;  %v629_v23 = vrot.slane %v597_v12, 2 }
  0x1e   : > { %v630_v24 = vrot.slane %v598_v16, 2  ;;  %v727_v25 = vrot.slane %v695_v18, 1  ;;  %v728_v26 = vrot.slane %v696_v19, 1  ;;  %v772_v28 = vmul.f32 %v1110_v15, %v1083_v57 }
  0x1f   : > { %v554_v29 = vsel %vm373_vm6, %v552_v21, %v553_v22  ;;  %v773_v30 = vmul.f32 %v1110_v15, %v1085_v59  ;;  %v313_v32 = vmul.f32 %v1003_v6, %v301_v56  ;;  %v1129_v38 = vunpack.c.l.bf16 %v270_v31 }
  0x20   : > { %v584_v33 = vadd.f32 %v554_v29, %v506_v20  ;;  %v631_v34 = vsel %vm451_vm7, %v629_v23, %v630_v24  ;;  %v729_v35 = vsel %vm373_vm6, %v727_v25, %v728_v26  ;;  %v804_v36 = vrot.slane %v772_v28, 2 }
  0x21   : > { %v805_v37 = vrot.slane %v773_v30, 2  ;;  %v321_v39 = vadd.f32 %v313_v32, %v292_v55  ;;  %v1131_v40 = vunpack.c.h.bf16 %v270_v31  ;;  %v343_v42 = vmul.f32 %v1008_v7, %v301_v56 }
  0x22   : > { %v661_v41 = vadd.f32 %v631_v34, %v584_v33  ;;  %v344_v45 = vmul.f32 %v1008_v7, %v330_v58  ;;  %v421_v46 = vmul.f32 %v1031_v13, %v301_v56  ;;  %v422_v49 = vmul.f32 %v1031_v13, %v330_v58 }
  0x23   : > { %v806_v47 = vsel %vm451_vm7, %v804_v36, %v805_v37  ;;  %v499_v50 = vmul.f32 %v1066_v48, %v1083_v57  ;;  %v522_v51 = vmul.f32 %v1075_v53, %v1083_v57  ;;  %v377_v55 = vrot.slane %v343_v42, 1 }
  0x24   : > { %v682_v52 = vadd.f32 %v674_v17, %v661_v41  ;;  %v378_v62 = vrot.slane %v344_v45, 1  ;;  %v455_v4 = vrot.slane %v421_v46, 2  ;;  %v456_v5 = vrot.slane %v422_v49, 2 }
  0x25   : > { %v523_v11 = vmul.f32 %v1075_v53, %v1085_v59  ;;  %v555_v56 = vrot.slane %v522_v51, 1  ;;  %v599_v12 = vmul.f32 %v1080_v54, %v1083_v57  ;;  %v600_v18 = vmul.f32 %v1080_v54, %v1085_v59 }
  0x26   : > { %v759_v58 = vadd.f32 %v729_v35, %v682_v52  ;;  %v379_v16 = vsel %vm373_vm6, %v377_v55, %v378_v62  ;;  %v675_v17 = vmul.f32 %v1090_v60, %v1129_v38  ;;  %v457_v20 = vsel %vm451_vm7, %v455_v4, %v456_v5 }
  0x27   : > { %v407_v19 = vadd.f32 %v379_v16, %v321_v39  ;;  %v556_v21 = vrot.slane %v523_v11, 1  ;;  %v632_v22 = vrot.slane %v599_v12, 2  ;;  %v633_v24 = vrot.slane %v600_v18, 2 }
  0x28   : > { %v836_v23 = vadd.f32 %v806_v47, %v759_v58  ;;  %v697_v25 = vmul.f32 %v1095_v61, %v1129_v38  ;;  %v698_v26 = vmul.f32 %v1095_v61, %v1131_v40  ;;  %v774_v30 = vmul.f32 %v1110_v15, %v1129_v38 }
  0x29   : > { %v485_v28 = vadd.f32 %v457_v20, %v407_v19  ;;  %v557_v29 = vsel %vm373_vm6, %v555_v56, %v556_v21  ;;  %v775_v31 = vmul.f32 %v1110_v15, %v1131_v40  ;;  %v634_v33 = vsel %vm451_vm7, %v632_v22, %v633_v24 }
  0x2a   : > { %v844_v32 = vpack.c.bf16 %v836_v23, %v836_v23  ;;  %v730_v34 = vrot.slane %v697_v25, 1  ;;  %v731_v35 = vrot.slane %v698_v26, 1  ;;  %v807_v37 = vrot.slane %v774_v30, 2 }
  0x2b   : > { %v507_v36 = vadd.f32 %v499_v50, %v485_v28  ;;  %v808_v39 = vrot.slane %v775_v31, 2  ;;  %v214_v41 = vor.u32 %v212_v43, %v1099_v63  ;;  %v293_v45 = vadd.f32 %v1020_v8, %v278_v0 }
  0x2c   : > { %853 = vst.msk [vmem:[%s1161_s16] sm:$0xf] %vm852_vm8, %v844_v32  ;;  %v732_v42 = vsel %vm373_vm6, %v730_v34, %v731_v35  ;;  %v314_v46 = vmul.f32 %v1003_v6, %v1083_v57  ;;  %v345_v47 = vmul.f32 %v1008_v7, %v1083_v57  ;;  %v346_v63 = vmul.f32 %v1008_v7, %v1085_v59 }
  0x2d   : > { %v585_v49 = vadd.f32 %v557_v29, %v507_v36  ;;  %v809_v50 = vsel %vm451_vm7, %v807_v37, %v808_v39  ;;  %v259_v43 = vsel %vm985_vm3, 0, %v214_v41  ;;  %v423_v52 = vmul.f32 %v1031_v13, %v1083_v57 }
  0x2e   : > { %v271_v14 = vsel %vm991_vm5, %v259_v43, 0  ;;  %v322_v51 = vadd.f32 %v314_v46, %v293_v45  ;;  %v380_v0 = vrot.slane %v345_v47, 1  ;;  %v381_v5 = vrot.slane %v346_v63, 1 }
  0x2f   : > { %v662_v55 = vadd.f32 %v634_v33, %v585_v49  ;;  %v1191_v62 = vunpack.c.l.bf16 %v271_v14  ;;  %v1193_v4 = vunpack.c.h.bf16 %v271_v14  ;;  %v424_v11 = vmul.f32 %v1031_v13, %v1085_v59 }
  0x30   : > { %v458_v56 = vrot.slane %v423_v52, 2  ;;  %v500_v12 = vmul.f32 %v1066_v48, %v1129_v38  ;;  %v524_v58 = vmul.f32 %v1075_v53, %v1129_v38  ;;  %v382_v18 = vsel %vm373_vm6, %v380_v0, %v381_v5 }
  0x31   : > { %v683_v16 = vadd.f32 %v675_v17, %v662_v55  ;;  %v525_v57 = vmul.f32 %v1075_v53, %v1131_v40  ;;  %v601_v19 = vmul.f32 %v1080_v54, %v1129_v38  ;;  %v408_v20 = vadd.f32 %v382_v18, %v322_v51 }
  0x32   : > { %v459_v21 = vrot.slane %v424_v11, 2  ;;  %v558_v22 = vrot.slane %v524_v58, 1  ;;  %v602_v59 = vmul.f32 %v1080_v54, %v1131_v40  ;;  %v676_v17 = vmul.f32 %v1090_v60, %v1191_v62 }
  0x33   : > { %v760_v23 = vadd.f32 %v732_v42, %v683_v16  ;;  %v559_v24 = vrot.slane %v525_v57, 1  ;;  %v635_v25 = vrot.slane %v601_v19, 2  ;;  %v699_v29 = vmul.f32 %v1095_v61, %v1191_v62 }
  0x34   : > { %v460_v26 = vsel %vm451_vm7, %v458_v56, %v459_v21  ;;  %v636_v28 = vrot.slane %v602_v59, 2  ;;  %v700_v30 = vmul.f32 %v1095_v61, %v1193_v4  ;;  %v776_v34 = vmul.f32 %v1110_v15, %v1191_v62 }
  0x35   : > { %v837_v31 = vadd.f32 %v809_v50, %v760_v23  ;;  %v486_v32 = vadd.f32 %v460_v26, %v408_v20  ;;  %v560_v33 = vsel %vm373_vm6, %v558_v22, %v559_v24  ;;  %v733_v36 = vrot.slane %v699_v29, 1 }
  0x36   : > { %v637_v35 = vsel %vm451_vm7, %v635_v25, %v636_v28  ;;  %v734_v37 = vrot.slane %v700_v30, 1  ;;  %v777_v39 = vmul.f32 %v1110_v15, %v1193_v4  ;;  %v810_v45 = vrot.slane %v776_v34, 2 }
  0x37   : > { %v845_v41 = vpack.c.bf16 %v837_v31, %v837_v31  ;;  %v508_v42 = vadd.f32 %v500_v12, %v486_v32  ;;  %v218_v46 = vrot.slane %v216_v1, 7  ;;  %v219_v50 = vshll.u32 %v1056_v44, 16 }
  0x38   : > { %v735_v47 = vsel %vm373_vm6, %v733_v36, %v734_v37  ;;  %v811_v49 = vrot.slane %v777_v39, 2  ;;  %v279_v43 = vunpack.c.l.bf16 %v1046_v27  ;;  %v315_v14 = vmul.f32 %v1003_v6, %v1129_v38  ;;  %v1265_v36 = vld [vmem:[%s1015_s21 + $0x14] sm:$0xf] }
  0x39   : > { %854 = vst.msk [vmem:[%s1161_s16 + $0x4] sm:$0xf] %vm852_vm8, %v845_v41  ;;  %v586_v63 = vadd.f32 %v560_v33, %v508_v42  ;;  %v347_v51 = vmul.f32 %v1008_v7, %v1129_v38  ;;  %v348_v0 = vmul.f32 %v1008_v7, %v1131_v40  ;;  %v221_v52 = vor.u32 %v219_v50, %v218_v46 }
  0x3a   : > { %v812_v1 = vsel %vm451_vm7, %v810_v45, %v811_v49  ;;  %v294_v55 = vadd.f32 %v1020_v8, %v279_v43  ;;  %v425_v27 = vmul.f32 %v1031_v13, %v1129_v38  ;;  %v426_v12 = vmul.f32 %v1031_v13, %v1131_v40 }
  0x3b   : > { %v663_v5 = vadd.f32 %v637_v35, %v586_v63  ;;  %v383_v11 = vrot.slane %v347_v51, 1  ;;  %v384_v56 = vrot.slane %v348_v0, 1  ;;  %v260_v58 = vsel %vm985_vm3, 0, %v221_v52 }
  0x3c   : > { %v323_v16 = vadd.f32 %v315_v14, %v294_v55  ;;  %v461_v18 = vrot.slane %v425_v27, 2  ;;  %v501_v57 = vmul.f32 %v1066_v48, %v1191_v62  ;;  %v272_v20 = vsel %vm991_vm5, %v260_v58, 0 }
  0x3d   : > { %v684_v19 = vadd.f32 %v676_v17, %v663_v5  ;;  %v385_v38 = vsel %vm373_vm6, %v383_v11, %v384_v56  ;;  %v462_v21 = vrot.slane %v426_v12, 2  ;;  %v1247_v22 = vunpack.c.l.bf16 %v272_v20 }
  0x3e   : > { %v1249_v59 = vunpack.c.h.bf16 %v272_v20  ;;  %v409_v40 = vadd.f32 %v385_v38, %v323_v16  ;;  %v526_v23 = vmul.f32 %v1075_v53, %v1191_v62  ;;  %v527_v17 = vmul.f32 %v1075_v53, %v1193_v4 }
  0x3f   : > { %v761_v24 = vadd.f32 %v735_v47, %v684_v19  ;;  %v463_v25 = vsel %vm451_vm7, %v461_v18, %v462_v21  ;;  %v603_v26 = vmul.f32 %v1080_v54, %v1191_v62  ;;  %v604_v30 = vmul.f32 %v1080_v54, %v1193_v4 }
  0x40   : > { %v487_v28 = vadd.f32 %v463_v25, %v409_v40  ;;  %v561_v29 = vrot.slane %v526_v23, 1  ;;  %v677_v31 = vmul.f32 %v1090_v60, %v1247_v22  ;;  %v562_v33 = vrot.slane %v527_v17, 1 }
  0x41   : > { %v838_v32 = vadd.f32 %v812_v1, %v761_v24  ;;  %v638_v34 = vrot.slane %v603_v26, 2  ;;  %v701_v35 = vmul.f32 %v1095_v61, %v1247_v22  ;;  %v639_v39 = vrot.slane %v604_v30, 2 }
  0x42   : > { %v509_v37 = vadd.f32 %v501_v57, %v487_v28  ;;  %v702_v41 = vmul.f32 %v1095_v61, %v1249_v59  ;;  %v778_v42 = vmul.f32 %v1110_v15, %v1247_v22  ;;  %v563_v46 = vsel %vm373_vm6, %v561_v29, %v562_v33 }
  0x43   : > { %v846_v45 = vpack.c.bf16 %v838_v32, %v838_v32  ;;  %v736_v47 = vrot.slane %v701_v35, 1  ;;  %v779_v49 = vmul.f32 %v1110_v15, %v1249_v59  ;;  %v640_v43 = vsel %vm451_vm7, %v638_v34, %v639_v39  ;;  %v1312_v39 = vld [vmem:[%s1015_s21 + $0x18] sm:$0xf] }
  0x44   : > { %v587_v50 = vadd.f32 %v563_v46, %v509_v37  ;;  %v737_v63 = vrot.slane %v702_v41, 1  ;;  %v813_v14 = vrot.slane %v778_v42, 2  ;;  %v223_v0 = vshrl.u32 %v1265_v36, 16 }
  0x45   : > { %855 = vst.msk [vmem:[%s1161_s16 + $0x8] sm:$0xf] %vm852_vm8, %v846_v45  ;;  %v814_v51 = vrot.slane %v779_v49, 2  ;;  %v226_v1 = vshll.u32 %v1265_v36, 16  ;;  %v280_v52 = vunpack.c.l.bf16 %v1056_v44  ;;  %v316_v5 = vmul.f32 %v1003_v6, %v1191_v62 }
  0x46   : > { %v664_v55 = vadd.f32 %v640_v43, %v587_v50  ;;  %v738_v27 = vsel %vm373_vm6, %v736_v47, %v737_v63  ;;  %v349_v11 = vmul.f32 %v1008_v7, %v1191_v62  ;;  %v225_v12 = vrot.slane %v223_v0, 7 }
  0x47   : > { %v815_v56 = vsel %vm451_vm7, %v813_v14, %v814_v51  ;;  %v295_v58 = vadd.f32 %v1020_v8, %v280_v52  ;;  %v350_v16 = vmul.f32 %v1008_v7, %v1193_v4  ;;  %v427_v44 = vmul.f32 %v1031_v13, %v1191_v62 }
  0x48   : > { %v685_v18 = vadd.f32 %v677_v31, %v664_v55  ;;  %v386_v57 = vrot.slane %v349_v11, 1  ;;  %v428_v19 = vmul.f32 %v1031_v13, %v1193_v4  ;;  %v228_v20 = vor.u32 %v226_v1, %v225_v12 }
  0x49   : > { %v324_v38 = vadd.f32 %v316_v5, %v295_v58  ;;  %v387_v21 = vrot.slane %v350_v16, 1  ;;  %v502_v40 = vmul.f32 %v1066_v48, %v1247_v22  ;;  %v464_v24 = vrot.slane %v427_v44, 2 }
  0x4a   : > { %v762_v23 = vadd.f32 %v738_v27, %v685_v18  ;;  %v465_v25 = vrot.slane %v428_v19, 2  ;;  %v528_v17 = vmul.f32 %v1075_v53, %v1247_v22  ;;  %v261_v26 = vsel %vm985_vm3, 0, %v228_v20 }
  0x4b   : > { %v388_v62 = vsel %vm373_vm6, %v386_v57, %v387_v21  ;;  %v529_v4 = vmul.f32 %v1075_v53, %v1249_v59  ;;  %v605_v28 = vmul.f32 %v1080_v54, %v1247_v22  ;;  %v273_v30 = vsel %vm991_vm5, %v261_v26, 0 }
  0x4c   : > { %v839_v29 = vadd.f32 %v815_v56, %v762_v23  ;;  %v410_v31 = vadd.f32 %v388_v62, %v324_v38  ;;  %v466_v32 = vsel %vm451_vm7, %v464_v24, %v465_v25  ;;  %v1307_v33 = vunpack.c.l.bf16 %v273_v30 }
  0x4d   : > { %v1309_v34 = vunpack.c.h.bf16 %v273_v30  ;;  %v564_v35 = vrot.slane %v528_v17, 1  ;;  %v565_v37 = vrot.slane %v529_v4, 1  ;;  %v606_v45 = vmul.f32 %v1080_v54, %v1249_v59 }
  0x4e   : > { %v847_v41 = vpack.c.bf16 %v839_v29, %v839_v29  ;;  %v488_v42 = vadd.f32 %v466_v32, %v410_v31  ;;  %v641_v46 = vrot.slane %v605_v28, 2  ;;  %v678_v49 = vmul.f32 %v1090_v60, %v1307_v33 }
  0x4f   : > { %v566_v47 = vsel %vm373_vm6, %v564_v35, %v565_v37  ;;  %v703_v50 = vmul.f32 %v1095_v61, %v1307_v33  ;;  %v704_v43 = vmul.f32 %v1095_v61, %v1309_v34  ;;  %v642_v14 = vrot.slane %v606_v45, 2 }
  0x50   : > { %856 = vst.msk [vmem:[%s1161_s16 + $0xc] sm:$0xf] %vm852_vm8, %v847_v41  ;;  %v510_v63 = vadd.f32 %v502_v40, %v488_v42  ;;  %v780_v51 = vmul.f32 %v1110_v15, %v1307_v33  ;;  %v781_v0 = vmul.f32 %v1110_v15, %v1309_v34  ;;  %v230_v55 = vshrl.u32 %v1312_v39, 16 }
  0x51   : > { %v739_v1 = vrot.slane %v703_v50, 1  ;;  %v740_v52 = vrot.slane %v704_v43, 1  ;;  %v233_v27 = vshll.u32 %v1312_v39, 16  ;;  %v643_v11 = vsel %vm451_vm7, %v641_v46, %v642_v14  ;;  %v1371_v14 = vld [vmem:[%s1015_s21 + $0x1c] sm:$0xf] }
  0x52   : > { %v588_v5 = vadd.f32 %v566_v47, %v510_v63  ;;  %v816_v56 = vrot.slane %v780_v51, 2  ;;  %v817_v12 = vrot.slane %v781_v0, 2  ;;  %v232_v16 = vrot.slane %v230_v55, 7 }
  0x53   : > { %v741_v58 = vsel %vm373_vm6, %v739_v1, %v740_v52  ;;  %v281_v18 = vunpack.c.l.bf16 %v1265_v36  ;;  %v317_v57 = vmul.f32 %v1003_v6, %v1247_v22  ;;  %v351_v20 = vmul.f32 %v1008_v7, %v1247_v22 }
  0x54   : > { %v665_v44 = vadd.f32 %v643_v11, %v588_v5  ;;  %v818_v19 = vsel %vm451_vm7, %v816_v56, %v817_v12  ;;  %v352_v38 = vmul.f32 %v1008_v7, %v1249_v59  ;;  %v235_v21 = vor.u32 %v233_v27, %v232_v16 }
  0x55   : > { %v296_v40 = vadd.f32 %v1020_v8, %v281_v18  ;;  %v429_v23 = vmul.f32 %v1031_v13, %v1247_v22  ;;  %v430_v36 = vmul.f32 %v1031_v13, %v1249_v59  ;;  %v389_v25 = vrot.slane %v351_v20, 1 }
  0x56   : > { %v686_v24 = vadd.f32 %v678_v49, %v665_v44  ;;  %v390_v17 = vrot.slane %v352_v38, 1  ;;  %v503_v26 = vmul.f32 %v1066_v48, %v1307_v33  ;;  %v262_v62 = vsel %vm985_vm3, 0, %v235_v21 }
  0x57   : > { %v325_v4 = vadd.f32 %v317_v57, %v296_v40  ;;  %v467_v28 = vrot.slane %v429_v23, 2  ;;  %v468_v29 = vrot.slane %v430_v36, 2  ;;  %v274_v22 = vsel %vm991_vm5, %v262_v62, 0 }
  0x58   : > { %v763_v30 = vadd.f32 %v741_v58, %v686_v24  ;;  %v391_v31 = vsel %vm373_vm6, %v389_v25, %v390_v17  ;;  %v530_v59 = vmul.f32 %v1075_v53, %v1307_v33  ;;  %v1355_v32 = vunpack.c.l.bf16 %v274_v22 }
  0x59   : > { %v1357_v35 = vunpack.c.h.bf16 %v274_v22  ;;  %v411_v37 = vadd.f32 %v391_v31, %v325_v4  ;;  %v469_v41 = vsel %vm451_vm7, %v467_v28, %v468_v29  ;;  %v531_v45 = vmul.f32 %v1075_v53, %v1309_v34 }
  0x5a   : > { %v840_v42 = vadd.f32 %v818_v19, %v763_v30  ;;  %v567_v46 = vrot.slane %v530_v59, 1  ;;  %v607_v47 = vmul.f32 %v1080_v54, %v1307_v33  ;;  %v608_v50 = vmul.f32 %v1080_v54, %v1309_v34 }
  0x5b   : > { %v489_v49 = vadd.f32 %v469_v41, %v411_v37  ;;  %v679_v43 = vmul.f32 %v1090_v60, %v1355_v32  ;;  %v705_v63 = vmul.f32 %v1095_v61, %v1355_v32  ;;  %v568_v0 = vrot.slane %v531_v45, 1 }
  0x5c   : > { %v848_v51 = vpack.c.bf16 %v840_v42, %v840_v42  ;;  %v644_v1 = vrot.slane %v607_v47, 2  ;;  %v706_v52 = vmul.f32 %v1095_v61, %v1357_v35  ;;  %v645_v27 = vrot.slane %v608_v50, 2 }
  0x5d   : > { %v511_v55 = vadd.f32 %v503_v26, %v489_v49  ;;  %v742_v5 = vrot.slane %v705_v63, 1  ;;  %v782_v11 = vmul.f32 %v1110_v15, %v1355_v32  ;;  %v569_v56 = vsel %vm373_vm6, %v567_v46, %v568_v0 }
  0x5e   : > { %857 = vst.msk [vmem:[%s1161_s16 + $0x10] sm:$0xf] %vm852_vm8, %v848_v51  ;;  %v743_v12 = vrot.slane %v706_v52, 1  ;;  %v783_v58 = vmul.f32 %v1110_v15, %v1357_v35  ;;  %v237_v16 = vshrl.u32 %v1371_v14, 16  ;;  %v646_v57 = vsel %vm451_vm7, %v644_v1, %v645_v27 }
  0x5f   : > { %v589_v18 = vadd.f32 %v569_v56, %v511_v55  ;;  %v819_v44 = vrot.slane %v782_v11, 2  ;;  %v240_v19 = vshll.u32 %v1371_v14, 16  ;;  %v282_v40 = vunpack.c.l.bf16 %v1312_v39 }
  0x60   : > { %v744_v20 = vsel %vm373_vm6, %v742_v5, %v743_v12  ;;  %v820_v38 = vrot.slane %v783_v58, 2  ;;  %v239_v21 = vrot.slane %v237_v16, 7  ;;  %v318_v36 = vmul.f32 %v1003_v6, %v1307_v33 }
  0x61   : > { %v666_v23 = vadd.f32 %v646_v57, %v589_v18  ;;  %v353_v24 = vmul.f32 %v1008_v7, %v1307_v33  ;;  %v354_v25 = vmul.f32 %v1008_v7, %v1309_v34  ;;  %v297_v62 = vadd.f32 %v1020_v8, %v282_v40 }
  0x62   : > { %v821_v17 = vsel %vm451_vm7, %v819_v44, %v820_v38  ;;  %v242_v26 = vor.u32 %v240_v19, %v239_v21  ;;  %v431_v4 = vmul.f32 %v1031_v13, %v1307_v33  ;;  %v432_v30 = vmul.f32 %v1031_v13, %v1309_v34 }
  0x63   : > { %v687_v28 = vadd.f32 %v679_v43, %v666_v23  ;;  %v392_v39 = vrot.slane %v353_v24, 1  ;;  %v393_v29 = vrot.slane %v354_v25, 1  ;;  %v326_v31 = vadd.f32 %v318_v36, %v297_v62 }
  0x64   : > { %v263_v22 = vsel %vm985_vm3, 0, %v242_v26  ;;  %v470_v59 = vrot.slane %v431_v4, 2  ;;  %v504_v37 = vmul.f32 %v1066_v48, %v1355_v32  ;;  %v471_v45 = vrot.slane %v432_v30, 2 }
  0x65   : > { %v764_v41 = vadd.f32 %v744_v20, %v687_v28  ;;  %v275_v42 = vsel %vm991_vm5, %v263_v22, 0  ;;  %v394_v33 = vsel %vm373_vm6, %v392_v39, %v393_v29  ;;  %v532_v34 = vmul.f32 %v1075_v53, %v1355_v32 }
  0x66   : > { %v412_v46 = vadd.f32 %v394_v33, %v326_v31  ;;  %v493_v47 = vunpack.c.l.bf16 %v275_v42  ;;  %v515_v49 = vunpack.c.h.bf16 %v275_v42  ;;  %v472_v50 = vsel %vm451_vm7, %v470_v59, %v471_v45 }
  0x67   : > { %v841_v2 = vadd.f32 %v821_v17, %v764_v41  ;;  %v533_v43 = vmul.f32 %v1075_v53, %v1357_v35  ;;  %v609_v3 = vmul.f32 %v1080_v54, %v1355_v32  ;;  %v570_v51 = vrot.slane %v532_v34, 1 }
  0x68   : > { %v490_v63 = vadd.f32 %v472_v50, %v412_v46  ;;  %v610_v0 = vmul.f32 %v1080_v54, %v1357_v35  ;;  %v680_v1 = vmul.f32 %v1090_v60, %v493_v47  ;;  %v707_v5 = vmul.f32 %v1095_v61, %v493_v47 }
  0x69   : > { %v849_v52 = vpack.c.bf16 %v841_v2, %v841_v2  ;;  %v571_v55 = vrot.slane %v533_v43, 1  ;;  %v647_v27 = vrot.slane %v609_v3, 2  ;;  %v708_v12 = vmul.f32 %v1095_v61, %v515_v49 }
  0x6a   : > { %v512_v11 = vadd.f32 %v504_v37, %v490_v63  ;;  %v648_v56 = vrot.slane %v610_v0, 2  ;;  %v784_v58 = vmul.f32 %v1110_v15, %v493_v47  ;;  %v745_v18 = vrot.slane %v707_v5, 1 }
  0x6b   : > { %858 = vst.msk [vmem:[%s1161_s16 + $0x14] sm:$0xf] %vm852_vm8, %v849_v52  ;;  %v572_v16 = vsel %vm373_vm6, %v570_v51, %v571_v55  ;;  %v785_v57 = vmul.f32 %v1110_v15, %v515_v49  ;;  %v283_v44 = vunpack.c.l.bf16 %v1371_v14  ;;  %v746_v38 = vrot.slane %v708_v12, 1 }
  0x6c   : > { %v590_v19 = vadd.f32 %v572_v16, %v512_v11  ;;  %v649_v20 = vsel %vm451_vm7, %v647_v27, %v648_v56  ;;  %v822_v21 = vrot.slane %v784_v58, 2  ;;  %v319_v36 = vmul.f32 %v1003_v6, %v1355_v32 }
  0x6d   : > { %v823_v40 = vrot.slane %v785_v57, 2  ;;  %v298_v23 = vadd.f32 %v1020_v8, %v283_v44  ;;  %v355_v24 = vmul.f32 %v1008_v7, %v1355_v32  ;;  %v356_v17 = vmul.f32 %v1008_v7, %v1357_v35 }
  0x6e   : > { %v667_v25 = vadd.f32 %v649_v20, %v590_v19  ;;  %v433_v14 = vmul.f32 %v1031_v13, %v1355_v32  ;;  %v747_v26 = vsel %vm373_vm6, %v745_v18, %v746_v38  ;;  %v434_v8 = vmul.f32 %v1031_v13, %v1357_v35 }
  0x6f   : > { %v327_v62 = vadd.f32 %v319_v36, %v298_v23  ;;  %v395_v4 = vrot.slane %v355_v24, 1  ;;  %v824_v6 = vsel %vm451_vm7, %v822_v21, %v823_v40  ;;  %v396_v39 = vrot.slane %v356_v17, 1 }
  0x70   : > { %v688_v28 = vadd.f32 %v680_v1, %v667_v25  ;;  %v473_v29 = vrot.slane %v433_v14, 2  ;;  %v474_v30 = vrot.slane %v434_v8, 2  ;;  %v534_v22 = vmul.f32 %v1075_v53, %v493_v47 }
  0x71   : > { %v535_v7 = vmul.f32 %v1075_v53, %v515_v49  ;;  %v611_v31 = vmul.f32 %v1080_v54, %v493_v47  ;;  %v397_v59 = vsel %vm373_vm6, %v395_v4, %v396_v39  ;;  %v505_v37 = vmul.f32 %v1066_v48, %v493_v47 }
  0x72   : > { %v765_v32 = vadd.f32 %v747_v26, %v688_v28  ;;  %v612_v41 = vmul.f32 %v1080_v54, %v515_v49  ;;  %v413_v13 = vadd.f32 %v397_v59, %v327_v62  ;;  %v475_v35 = vsel %vm451_vm7, %v473_v29, %v474_v30 }
  0x73   : > { %v573_v42 = vrot.slane %v534_v22, 1  ;;  %v574_v33 = vrot.slane %v535_v7, 1  ;;  %v650_v46 = vrot.slane %v611_v31, 2  ;;  %v709_v53 = vmul.f32 %v1095_v61, %v1022_v9 }
  0x74   : > { %v842_v45 = vadd.f32 %v824_v6, %v765_v32  ;;  %v651_v34 = vrot.slane %v612_v41, 2  ;;  %v491_v2 = vadd.f32 %v475_v35, %v413_v13  ;;  %v710_v50 = vmul.f32 %v1095_v61, %v1024_v10 }
  0x75   : > { %v575_v48 = vsel %vm373_vm6, %v573_v42, %v574_v33  ;;  %v786_v54 = vmul.f32 %v1110_v15, %v1022_v9  ;;  %v787_v47 = vmul.f32 %v1110_v15, %v1024_v10  ;;  %v748_v63 = vrot.slane %v709_v53, 1 }
  0x76   : > { %v850_v43 = vpack.c.bf16 %v842_v45, %v842_v45  ;;  %v513_v49 = vadd.f32 %v505_v37, %v491_v2  ;;  %v652_v3 = vsel %vm451_vm7, %v650_v46, %v651_v34  ;;  %v749_v51 = vrot.slane %v710_v50, 1 }
  0x77   : > { %v681_v61 = vmul.f32 %v1090_v60, %v1022_v9  ;;  %v825_v1 = vrot.slane %v786_v54, 2  ;;  %v826_v52 = vrot.slane %v787_v47, 2 }
  0x78   : > { %859 = vst.msk [vmem:[%s1161_s16 + $0x18] sm:$0xf] %vm852_vm8, %v850_v43  ;;  %v591_v0 = vadd.f32 %v575_v48, %v513_v49  ;;  %v750_v27 = vsel %vm373_vm6, %v748_v63, %v749_v51 }
  0x79   : > { %v827_v10 = vsel %vm451_vm7, %v825_v1, %v826_v52 }
  0x7a   : > { %v668_v55 = vadd.f32 %v652_v3, %v591_v0 }
  0x7c   : > { %v689_v5 = vadd.f32 %v681_v61, %v668_v55 }
  0x7e   : > { %v766_v15 = vadd.f32 %v750_v27, %v689_v5 }
  0x80   : > { %v843_v11 = vadd.f32 %v827_v10, %v766_v15 }
  0x82   : > { %v851_v56 = vpack.c.bf16 %v843_v11, %v843_v11 }
  0x84   : > { %860 = vst.msk [vmem:[%s1161_s16 + $0x1c] sm:$0xf] %vm852_vm8, %v851_v56 }
  0x85 PF: > { %s13_s12 = sadd.s32 1, %s954_s12  }
  0x86   : > { %p10_p4 = scmp.ge.s32.totalorder %s13_s12, 4  }
  0x88   :  { %12 = sbr.rel (!%p10_p4) target bundleno = 1 (0x1), region = 62 }

// kernel: _lambda_.35
= control target key start
LH: loop header
LB: loop body
LE: loop exit
PB: predicated region body
PF: predicated region fallthrough
CT: control target
= control target key end

     0   :  { %vm53_vm0 = vcmask 261120   ;;  %s1081_s0 = inlined_call_operand.vmem [shape: bf16[128,32], index: 0, kind: input, shape index: {}]   ;;  %s1082_s3 = inlined_call_operand.vmem [shape: bf16[32,128], index: 3, kind: input, shape index: {}]   ;;  %s1083_s1 = inlined_call_operand.vmem [shape: f32[1,32], index: 1, kind: input, shape index: {}]   ;;  %s1084_s2 = inlined_call_operand.vmem [shape: f32[1,32], index: 2, kind: input, shape index: {}]   ;;  %s1085_s4 = inlined_call_operand.vmem [shape: f32[1,128], index: 4, kind: input, shape index: {}]   ;;  %s1086_s5 = inlined_call_operand.vmem [shape: bf16[128,128], index: 5, kind: output, shape index: {}]  }
   0x1   :  { %v777_v0 = vld [vmem:[%s1081_s0] sm:$0xff]   ;;  %v791_v6 = vld [vmem:[%s1081_s0 + $0x8] sm:$0xff]   ;;  %v819_v18 = vld [vmem:[%s1081_s0 + $0x10] sm:$0xff]  }
   0x2   :  { %v782_v1 = vld [vmem:[%s1081_s0 + $0x20] sm:$0xff]   ;;  %v592_v2 = vunpack.c.l.bf16 %v777_v0  ;;  %v593_v4 = vunpack.c.h.bf16 %v777_v0  ;;  %v596_v11 = vunpack.c.l.bf16 %v791_v6  ;;  %v597_v12 = vunpack.c.h.bf16 %v791_v6  ;;  %v806_v13 = vld [vmem:[%s1081_s0 + $0x28] sm:$0xff]   ;;  %v832_v23 = vld [vmem:[%s1081_s0 + $0x30] sm:$0xff]  }
   0x3   :  { %v608_v3 = vunpack.c.l.bf16 %v782_v1  ;;  %v609_v5 = vunpack.c.h.bf16 %v782_v1  ;;  %v612_v16 = vunpack.c.l.bf16 %v806_v13  ;;  %v613_v17 = vunpack.c.h.bf16 %v806_v13  ;;  %v845_v28 = vld [vmem:[%s1081_s0 + $0x18] sm:$0xff]  }
   0x4   :  { %v54_v7 = vsel %vm53_vm0, %v592_v2, 0.0  ;;  %v57_v9 = vsel %vm53_vm0, %v593_v4, 0.0  ;;  %v60_v14 = vsel %vm53_vm0, %v596_v11, 0.0  ;;  %v63_v15 = vsel %vm53_vm0, %v597_v12, 0.0  ;;  %v858_v33 = vld [vmem:[%s1081_s0 + $0x38] sm:$0xff]  }
   0x5   :  { %v78_v8 = vsel %vm53_vm0, %v608_v3, 0.0  ;;  %55 = vadd.xlane.f32.xlu0 %v54_v7  ;;  %v81_v10 = vsel %vm53_vm0, %v609_v5, 0.0  ;;  %v84_v19 = vsel %vm53_vm0, %v612_v16, 0.0  ;;  %v87_v20 = vsel %vm53_vm0, %v613_v17, 0.0 }
   0x6   :  { %79 = vadd.xlane.f32.xlu1 %v78_v8  ;;  %v600_v21 = vunpack.c.l.bf16 %v819_v18  ;;  %v601_v22 = vunpack.c.h.bf16 %v819_v18  ;;  %v616_v26 = vunpack.c.l.bf16 %v832_v23  ;;  %v617_v27 = vunpack.c.h.bf16 %v832_v23 }
   0x7   :  { %v604_v31 = vunpack.c.l.bf16 %v845_v28  ;;  %v605_v32 = vunpack.c.h.bf16 %v845_v28  ;;  %v620_v36 = vunpack.c.l.bf16 %v858_v33  ;;  %v621_v37 = vunpack.c.h.bf16 %v858_v33 }
   0x8   :  { %v66_v24 = vsel %vm53_vm0, %v600_v21, 0.0  ;;  %v69_v25 = vsel %vm53_vm0, %v601_v22, 0.0  ;;  %v90_v29 = vsel %vm53_vm0, %v616_v26, 0.0  ;;  %v93_v30 = vsel %vm53_vm0, %v617_v27, 0.0 }
   0x9   :  { %58 = vadd.xlane.f32.xlu0 %v57_v9  ;;  %v72_v34 = vsel %vm53_vm0, %v604_v31, 0.0  ;;  %v75_v35 = vsel %vm53_vm0, %v605_v32, 0.0  ;;  %v96_v38 = vsel %vm53_vm0, %v620_v36, 0.0  ;;  %v99_v39 = vsel %vm53_vm0, %v621_v37, 0.0 }
   0xa   :  { %82 = vadd.xlane.f32.xlu1 %v81_v10 }
   0xd   :  { %61 = vadd.xlane.f32.xlu0 %v60_v14 }
   0xe   :  { %64 = vadd.xlane.f32.xlu1 %v63_v15 }
  0x11   :  { %85 = vadd.xlane.f32.xlu0 %v84_v19 }
  0x12   :  { %88 = vadd.xlane.f32.xlu1 %v87_v20 }
  0x15   :  { %67 = vadd.xlane.f32.xlu0 %v66_v24 }
  0x16   :  { %70 = vadd.xlane.f32.xlu1 %v69_v25 }
  0x19   :  { %91 = vadd.xlane.f32.xlu0 %v90_v29 }
  0x1a   :  { %94 = vadd.xlane.f32.xlu1 %v93_v30 }
  0x1d   :  { %73 = vadd.xlane.f32.xlu0 %v72_v34 }
  0x1e   :  { %76 = vadd.xlane.f32.xlu1 %v75_v35 }
  0x21   :  { %97 = vadd.xlane.f32.xlu0 %v96_v38 }
  0x22   :  { %100 = vadd.xlane.f32.xlu1 %v99_v39 }
  0x92   :  { %v56_v40 = vpop.xlane.xlu0 %55 }
  0x93   :  { %v80_v41 = vpop.xlane.xlu1 %79  ;;  %v103_v42 = vmul.f32 0.03125, %v56_v40 }
  0x94   :  { %v111_v43 = vmul.f32 0.03125, %v80_v41 }
  0x95   :  { %v874_v44 = vsub.f32 %v592_v2, %v103_v42 }
  0x96   :  { %v876_v45 = vsub.f32 %v608_v3, %v111_v43  ;;  %v59_v46 = vpop.xlane.xlu0 %58 }
  0x97   :  { %v83_v47 = vpop.xlane.xlu1 %82  ;;  %v104_v48 = vmul.f32 0.03125, %v59_v46  ;;  %v135_v50 = vmul.f32 %v874_v44, %v874_v44 }
  0x98   :  { %v112_v49 = vmul.f32 0.03125, %v83_v47  ;;  %v143_v51 = vmul.f32 %v876_v45, %v876_v45 }
  0x99   :  { %v884_v52 = vsub.f32 %v593_v4, %v104_v48  ;;  %v151_v54 = vsel %vm53_vm0, %v135_v50, 0.0 }
  0x9a   :  { %v888_v53 = vsub.f32 %v609_v5, %v112_v49  ;;  %152 = vadd.xlane.f32.xlu0 %v151_v54  ;;  %v62_v55 = vpop.xlane.xlu0 %61  ;;  %v175_v57 = vsel %vm53_vm0, %v143_v51, 0.0 }
  0x9b   :  { %v65_v56 = vpop.xlane.xlu1 %64  ;;  %v105_v58 = vmul.f32 0.03125, %v62_v55  ;;  %v136_v60 = vmul.f32 %v884_v52, %v884_v52 }
  0x9c   :  { %v106_v59 = vmul.f32 0.03125, %v65_v56  ;;  %v144_v61 = vmul.f32 %v888_v53, %v888_v53 }
  0x9d   :  { %v898_v62 = vsub.f32 %v596_v11, %v105_v58  ;;  %v154_v0 = vsel %vm53_vm0, %v136_v60, 0.0 }
  0x9e   :  { %v902_v63 = vsub.f32 %v597_v12, %v106_v59  ;;  %176 = vadd.xlane.f32.xlu0 %v175_v57  ;;  %155 = vadd.xlane.f32.xlu1 %v154_v0  ;;  %v86_v1 = vpop.xlane.xlu0 %85  ;;  %v178_v3 = vsel %vm53_vm0, %v144_v61, 0.0 }
  0x9f   :  { %v89_v2 = vpop.xlane.xlu1 %88  ;;  %v113_v4 = vmul.f32 0.03125, %v86_v1  ;;  %v137_v7 = vmul.f32 %v898_v62, %v898_v62 }
  0xa0   :  { %v114_v5 = vmul.f32 0.03125, %v89_v2  ;;  %v138_v8 = vmul.f32 %v902_v63, %v902_v63 }
  0xa1   :  { %v912_v6 = vsub.f32 %v612_v16, %v113_v4  ;;  %v157_v10 = vsel %vm53_vm0, %v137_v7, 0.0 }
  0xa2   :  { %v916_v9 = vsub.f32 %v613_v17, %v114_v5  ;;  %179 = vadd.xlane.f32.xlu1 %v178_v3  ;;  %158 = vadd.xlane.f32.xlu0 %v157_v10  ;;  %v68_v11 = vpop.xlane.xlu0 %67  ;;  %v160_v14 = vsel %vm53_vm0, %v138_v8, 0.0 }
  0xa3   :  { %v71_v12 = vpop.xlane.xlu1 %70  ;;  %v107_v15 = vmul.f32 0.03125, %v68_v11  ;;  %v145_v20 = vmul.f32 %v912_v6, %v912_v6 }
  0xa4   :  { %v108_v19 = vmul.f32 0.03125, %v71_v12  ;;  %v146_v16 = vmul.f32 %v916_v9, %v916_v9 }
  0xa5   :  { %v926_v13 = vsub.f32 %v600_v21, %v107_v15  ;;  %v181_v24 = vsel %vm53_vm0, %v145_v20, 0.0 }
  0xa6   :  { %v930_v17 = vsub.f32 %v601_v22, %v108_v19  ;;  %161 = vadd.xlane.f32.xlu1 %v160_v14  ;;  %182 = vadd.xlane.f32.xlu0 %v181_v24  ;;  %v92_v25 = vpop.xlane.xlu0 %91  ;;  %v184_v30 = vsel %vm53_vm0, %v146_v16, 0.0 }
  0xa7   :  { %v95_v29 = vpop.xlane.xlu1 %94  ;;  %v115_v34 = vmul.f32 0.03125, %v92_v25  ;;  %v139_v38 = vmul.f32 %v926_v13, %v926_v13 }
  0xa8   :  { %v116_v35 = vmul.f32 0.03125, %v95_v29  ;;  %v140_v21 = vmul.f32 %v930_v17, %v930_v17 }
  0xa9   :  { %v940_v18 = vsub.f32 %v616_v26, %v115_v34  ;;  %v163_v39 = vsel %vm53_vm0, %v139_v38, 0.0 }
  0xaa   :  { %v944_v22 = vsub.f32 %v617_v27, %v116_v35  ;;  %185 = vadd.xlane.f32.xlu1 %v184_v30  ;;  %164 = vadd.xlane.f32.xlu0 %v163_v39  ;;  %v74_v40 = vpop.xlane.xlu0 %73  ;;  %v166_v42 = vsel %vm53_vm0, %v140_v21, 0.0 }
  0xab   :  { %v77_v41 = vpop.xlane.xlu1 %76  ;;  %v109_v43 = vmul.f32 0.03125, %v74_v40  ;;  %v147_v47 = vmul.f32 %v940_v18, %v940_v18 }
  0xac   :  { %v110_v46 = vmul.f32 0.03125, %v77_v41  ;;  %v148_v26 = vmul.f32 %v944_v22, %v944_v22 }
  0xad   :  { %v954_v23 = vsub.f32 %v604_v31, %v109_v43  ;;  %v187_v48 = vsel %vm53_vm0, %v147_v47, 0.0 }
  0xae   :  { %v958_v27 = vsub.f32 %v605_v32, %v110_v46  ;;  %167 = vadd.xlane.f32.xlu1 %v166_v42  ;;  %188 = vadd.xlane.f32.xlu0 %v187_v48  ;;  %v98_v49 = vpop.xlane.xlu0 %97  ;;  %v190_v51 = vsel %vm53_vm0, %v148_v26, 0.0  ;;  %v992_v42 = vld [vmem:[%s1083_s1] ss:$0 sm:$0xff] }
  0xaf   :  { %v101_v50 = vpop.xlane.xlu1 %100  ;;  %v117_v54 = vmul.f32 0.03125, %v98_v49  ;;  %v141_v56 = vmul.f32 %v954_v23, %v954_v23 }
  0xb0   :  { %v118_v55 = vmul.f32 0.03125, %v101_v50  ;;  %v142_v31 = vmul.f32 %v958_v27, %v958_v27 }
  0xb1   :  { %v968_v28 = vsub.f32 %v620_v36, %v117_v54  ;;  %v169_v57 = vsel %vm53_vm0, %v141_v56, 0.0  ;;  %v710_v36 = vld [vmem:[%s1082_s3] sm:$0xff]  }
  0xb2   :  { %v972_v32 = vsub.f32 %v621_v37, %v118_v55  ;;  %191 = vadd.xlane.f32.xlu1 %v190_v51  ;;  %170 = vadd.xlane.f32.xlu0 %v169_v57  ;;  %v172_v58 = vsel %vm53_vm0, %v142_v31, 0.0  ;;  %v711_v37 = vld [vmem:[%s1082_s3 + $0x8] sm:$0xff]   ;;  %v999_v55 = vld [vmem:[%s1084_s2] ss:$0 sm:$0xff] }
  0xb3   :  { %v149_v59 = vmul.f32 %v968_v28, %v968_v28  ;;  %686 = vmatprep.subr.bf16.mxu0 %v710_v36  ;;  %706 = vmatprep.subr.bf16.mxu1 %v710_v36 }
  0xb4   :  { %v150_v60 = vmul.f32 %v972_v32, %v972_v32  ;;  %687 = vmatpush3.bf16.msra.mxu0 %v710_v36  ;;  %708 = vmatpush3.bf16.msra.mxu1 %v710_v36 }
  0xb5   :  { %v193_v61 = vsel %vm53_vm0, %v149_v59, 0.0  ;;  %688 = vmatprep.subr.bf16.mxu0 %v711_v37  ;;  %707 = vmatprep.subr.bf16.mxu1 %v711_v37 }
  0xb6   :  { %173 = vadd.xlane.f32.xlu1 %v172_v58  ;;  %194 = vadd.xlane.f32.xlu0 %v193_v61  ;;  %v196_v33 = vsel %vm53_vm0, %v150_v60, 0.0 }
  0xb8   :  { %689 = vmatpush3.bf16.msra.mxu0 %v711_v37  ;;  %709 = vmatpush3.bf16.msra.mxu1 %v711_v37 }
  0xba   :  { %197 = vadd.xlane.f32.xlu1 %v196_v33 }
 0x127   :  { %v153_v0 = vpop.xlane.xlu0 %152 }
 0x128   :  { %v199_v1 = vmul.f32 0.03125, %v153_v0 }
 0x12a   :  { %v215_v2 = vadd.f32 1e-05, %v199_v1 }
 0x12b   :  { %v156_v3 = vpop.xlane.xlu1 %155  ;;  %v177_v4 = vpop.xlane.xlu0 %176 }
 0x12c   :  { %712 = vrsqrt.f32 %v215_v2  ;;  %v200_v5 = vmul.f32 0.03125, %v156_v3  ;;  %v207_v7 = vmul.f32 0.03125, %v177_v4 }
 0x12e   :  { %v216_v8 = vadd.f32 1e-05, %v200_v5  ;;  %v223_v10 = vadd.f32 1e-05, %v207_v7 }
 0x12f   :  { %v180_v11 = vpop.xlane.xlu1 %179  ;;  %v159_v12 = vpop.xlane.xlu0 %158 }
 0x130   :  { %714 = vrsqrt.f32 %v216_v8  ;;  %v208_v14 = vmul.f32 0.03125, %v180_v11  ;;  %v201_v15 = vmul.f32 0.03125, %v159_v12 }
 0x131   :  { %716 = vrsqrt.f32 %v223_v10 }
 0x132   :  { %v224_v19 = vadd.f32 1e-05, %v208_v14  ;;  %v217_v20 = vadd.f32 1e-05, %v201_v15 }
 0x133   :  { %v162_v16 = vpop.xlane.xlu1 %161  ;;  %v183_v24 = vpop.xlane.xlu0 %182 }
 0x134   :  { %718 = vrsqrt.f32 %v224_v19  ;;  %v202_v25 = vmul.f32 0.03125, %v162_v16  ;;  %v209_v29 = vmul.f32 0.03125, %v183_v24 }
 0x135   :  { %720 = vrsqrt.f32 %v217_v20 }
 0x136   :  { %v713_v30 = vpop.eup %712  ;;  %v218_v34 = vadd.f32 1e-05, %v202_v25  ;;  %v225_v35 = vadd.f32 1e-05, %v209_v29 }
 0x137   :  { %v186_v38 = vpop.xlane.xlu1 %185  ;;  %v165_v21 = vpop.xlane.xlu0 %164  ;;  %v247_v39 = vmul.f32 %v713_v30, %v874_v44 }
 0x138   :  { %722 = vrsqrt.f32 %v218_v34  ;;  %v210_v40 = vmul.f32 0.03125, %v186_v38  ;;  %v203_v41 = vmul.f32 0.03125, %v165_v21 }
 0x139   :  { %724 = vrsqrt.f32 %v225_v35  ;;  %v270_v51 = vmul.f32 %v992_v42, %v247_v39 }
 0x13a   :  { %v715_v43 = vpop.eup %714  ;;  %v226_v46 = vadd.f32 1e-05, %v210_v40  ;;  %v219_v47 = vadd.f32 1e-05, %v203_v41 }
 0x13b   :  { %v717_v26 = vpop.eup %716  ;;  %v168_v48 = vpop.xlane.xlu1 %167  ;;  %v248_v50 = vmul.f32 %v715_v43, %v884_v52  ;;  %v293_v33 = vadd.f32 %v999_v55, %v270_v51 }
 0x13c   :  { %v189_v49 = vpop.xlane.xlu0 %188  ;;  %726 = vrsqrt.f32 %v226_v46  ;;  %v204_v44 = vmul.f32 0.03125, %v168_v48  ;;  %v255_v56 = vmul.f32 %v717_v26, %v876_v45 }
 0x13d   :  { %v211_v54 = vmul.f32 0.03125, %v189_v49  ;;  %728 = vrsqrt.f32 %v219_v47  ;;  %v271_v31 = vmul.f32 %v992_v42, %v248_v50 }
 0x13e   :  { %v719_v57 = vpop.eup %718  ;;  %v220_v58 = vadd.f32 1e-05, %v204_v44  ;;  %v278_v0 = vmul.f32 %v992_v42, %v255_v56 }
 0x13f   :  { %v227_v59 = vadd.f32 1e-05, %v211_v54  ;;  %v721_v60 = vpop.eup %720  ;;  %v192_v52 = vpop.xlane.xlu1 %191  ;;  %v294_v36 = vadd.f32 %v999_v55, %v271_v31  ;;  %v256_v37 = vmul.f32 %v719_v57, %v888_v53 }
 0x140   :  { %v171_v61 = vpop.xlane.xlu0 %170  ;;  %v249_v1 = vmul.f32 %v721_v60, %v898_v62  ;;  %730 = vrsqrt.f32 %v220_v58  ;;  %v212_v45 = vmul.f32 0.03125, %v192_v52  ;;  %v301_v14 = vadd.f32 %v999_v55, %v278_v0 }
 0x141   :  { %v205_v2 = vmul.f32 0.03125, %v171_v61  ;;  %732 = vrsqrt.f32 %v227_v59  ;;  %v309_v3 = vpack.c.bf16 %v294_v36, %v293_v33  ;;  %v279_v4 = vmul.f32 %v992_v42, %v256_v37 }
 0x142   :  { %v723_v5 = vpop.eup %722  ;;  %v228_v7 = vadd.f32 1e-05, %v212_v45  ;;  %v272_v15 = vmul.f32 %v992_v42, %v249_v1 }
 0x143   :  { %v221_v8 = vadd.f32 1e-05, %v205_v2  ;;  %v725_v10 = vpop.eup %724  ;;  %v250_v11 = vmul.f32 %v723_v5, %v902_v63  ;;  %v174_v12 = vpop.xlane.xlu1 %173  ;;  %690 = vmatprep.mubr.msk.bf16.mxu0 %vm53_vm0, %v309_v3  ;;  %v302_v62 = vadd.f32 %v999_v55, %v279_v4 }
 0x144   :  { %v195_v53 = vpop.xlane.xlu0 %194  ;;  %v257_v19 = vmul.f32 %v725_v10, %v912_v6  ;;  %734 = vrsqrt.f32 %v228_v7  ;;  %v206_v20 = vmul.f32 0.03125, %v174_v12  ;;  %v295_v21 = vadd.f32 %v999_v55, %v272_v15  ;;  %v547_v12 = vld [vmem:[%s1085_s4] ss:$0 sm:$0xff] }
 0x145   :  { %v213_v16 = vmul.f32 0.03125, %v195_v53  ;;  %736 = vrsqrt.f32 %v221_v8  ;;  %v313_v24 = vpack.c.bf16 %v302_v62, %v301_v14  ;;  %v273_v25 = vmul.f32 %v992_v42, %v250_v11 }
 0x146   :  { %v727_v63 = vpop.eup %726  ;;  %v222_v29 = vadd.f32 1e-05, %v206_v20  ;;  %v280_v39 = vmul.f32 %v992_v42, %v257_v19 }
 0x147   :  { %v229_v30 = vadd.f32 1e-05, %v213_v16  ;;  %v729_v34 = vpop.eup %728  ;;  %v258_v35 = vmul.f32 %v727_v63, %v916_v9  ;;  %v198_v38 = vpop.xlane.xlu1 %197  ;;  %698 = vmatprep.mubr.msk.bf16.mxu1 %vm53_vm0, %v313_v24  ;;  %v296_v6 = vadd.f32 %v999_v55, %v273_v25 }
 0x148   :  { %v251_v40 = vmul.f32 %v729_v34, %v926_v13  ;;  %738 = vrsqrt.f32 %v222_v29  ;;  %v214_v41 = vmul.f32 0.03125, %v198_v38  ;;  %v303_v49 = vadd.f32 %v999_v55, %v280_v39 }
 0x149   :  { %740 = vrsqrt.f32 %v229_v30  ;;  %v310_v43 = vpack.c.bf16 %v296_v6, %v295_v21  ;;  %v281_v46 = vmul.f32 %v992_v42, %v258_v35 }
 0x14a   :  { %v731_v47 = vpop.eup %730  ;;  %v230_v26 = vadd.f32 1e-05, %v214_v41  ;;  %v274_v51 = vmul.f32 %v992_v42, %v251_v40 }
 0x14b   :  { %v733_v9 = vpop.eup %732  ;;  %v252_v48 = vmul.f32 %v731_v47, %v930_v17  ;;  %691 = vmatmul.mubr.msk.bf16.vlgmr.msra.gmra.mrb[0].mxu0 %vm53_vm0, %v310_v43  ;;  %v304_v50 = vadd.f32 %v999_v55, %v281_v46 }
 0x14c   :  { %v259_v13 = vmul.f32 %v733_v9, %v940_v18  ;;  %742 = vrsqrt.f32 %v230_v26  ;;  %v297_v17 = vadd.f32 %v999_v55, %v274_v51 }
 0x14d   :  { %v314_v44 = vpack.c.bf16 %v304_v50, %v303_v49  ;;  %v275_v54 = vmul.f32 %v992_v42, %v252_v48 }
 0x14e   :  { %v735_v56 = vpop.eup %734  ;;  %v282_v59 = vmul.f32 %v992_v42, %v259_v13 }
 0x14f   :  { %v737_v31 = vpop.eup %736  ;;  %v260_v57 = vmul.f32 %v735_v56, %v944_v22  ;;  %699 = vmatmul.mubr.msk.bf16.vlgmr.msra.gmra.mrb[0].mxu1 %vm53_vm0, %v314_v44  ;;  %v298_v58 = vadd.f32 %v999_v55, %v275_v54 }
 0x150   :  { %v253_v60 = vmul.f32 %v737_v31, %v954_v23  ;;  %v305_v22 = vadd.f32 %v999_v55, %v282_v59 }
 0x151   :  { %v311_v52 = vpack.c.bf16 %v298_v58, %v297_v17  ;;  %v283_v18 = vmul.f32 %v992_v42, %v260_v57 }
 0x152   :  { %v739_v61 = vpop.eup %738  ;;  %v276_v0 = vmul.f32 %v992_v42, %v253_v60 }
 0x153   :  { %v741_v33 = vpop.eup %740  ;;  %v254_v36 = vmul.f32 %v739_v61, %v958_v27  ;;  %694 = vmatprep.mubr.msk.bf16.mxu0 %vm53_vm0, %v311_v52  ;;  %v306_v37 = vadd.f32 %v999_v55, %v283_v18 }
 0x154   :  { %v261_v1 = vmul.f32 %v741_v33, %v968_v28  ;;  %v299_v27 = vadd.f32 %v999_v55, %v276_v0 }
 0x155   :  { %v315_v45 = vpack.c.bf16 %v306_v37, %v305_v22  ;;  %v277_v23 = vmul.f32 %v992_v42, %v254_v36 }
 0x156   :  { %v743_v2 = vpop.eup %742  ;;  %v284_v5 = vmul.f32 %v992_v42, %v261_v1 }
 0x157   :  { %v262_v3 = vmul.f32 %v743_v2, %v972_v32  ;;  %702 = vmatprep.mubr.msk.bf16.mxu1 %vm53_vm0, %v315_v45  ;;  %v300_v4 = vadd.f32 %v999_v55, %v277_v23 }
 0x158   :  { %v307_v28 = vadd.f32 %v999_v55, %v284_v5 }
 0x159   :  { %v312_v7 = vpack.c.bf16 %v300_v4, %v299_v27  ;;  %v285_v8 = vmul.f32 %v992_v42, %v262_v3 }
 0x15b   :  { %695 = vmatmul.mubr.msk.bf16.gmra.mrb[4].mxu0 %vm53_vm0, %v312_v7  ;;  %v308_v10 = vadd.f32 %v999_v55, %v285_v8 }
 0x15d   :  { %v316_v11 = vpack.c.bf16 %v308_v10, %v307_v28 }
 0x15f   :  { %703 = vmatmul.mubr.msk.bf16.gmra.mrb[4].mxu1 %vm53_vm0, %v316_v11 }
 0x21e   :  { %v692_v32 = vpop.f32.mrb[0].mxu0 }
 0x21f   :  { %v398_v53 = vpop.f32.mrb[1].mxu0  ;;  %v407_v62 = vadd.f32 %v692_v32, %v547_v12 }
 0x220   :  { %v693_v14 = vpop.f32.mrb[2].mxu0  ;;  %v399_v42 = vadd.f32 %v547_v12, %v398_v53 }
 0x221   :  { %v410_v15 = vadd.f32 %v693_v14, %v547_v12  ;;  %v401_v19 = vpop.f32.mrb[3].mxu0 }
 0x222   :  { %v402_v20 = vadd.f32 %v547_v12, %v401_v19  ;;  %v700_v16 = vpop.f32.mrb[0].mxu1 }
 0x223   :  { %v630_v24 = vpack.c.bf16 %v410_v15, %v407_v62  ;;  %v430_v25 = vpop.f32.mrb[1].mxu1  ;;  %v439_v29 = vadd.f32 %v700_v16, %v547_v12 }
 0x224   :  { %v625_v63 = vpack.c.bf16 %v402_v20, %v399_v42  ;;  %v701_v55 = vpop.f32.mrb[2].mxu1  ;;  %v431_v35 = vadd.f32 %v547_v12, %v430_v25 }
 0x225   :  { %669 = vst [vmem:[%s1086_s5 + $0x8] sm:$0xff] %v630_v24   ;;  %v442_v30 = vadd.f32 %v701_v55, %v547_v12  ;;  %v433_v34 = vpop.f32.mrb[3].mxu1 }
 0x226   :  { %626 = vst [vmem:[%s1086_s5] sm:$0xff] %v625_v63   ;;  %v434_v38 = vadd.f32 %v547_v12, %v433_v34 }
 0x227   :  { %v650_v21 = vpack.c.bf16 %v442_v30, %v439_v29 }
 0x228   :  { %v645_v6 = vpack.c.bf16 %v434_v38, %v431_v35 }
 0x229   :  { %673 = vst [vmem:[%s1086_s5 + $0x28] sm:$0xff] %v650_v21  }
 0x22a   :  { %672 = vst [vmem:[%s1086_s5 + $0x20] sm:$0xff] %v645_v6  }
 0x22e   :  { %v696_v39 = vpop.f32.mrb[4].mxu0 }
 0x22f   :  { %v414_v40 = vpop.f32.mrb[5].mxu0  ;;  %v423_v43 = vadd.f32 %v696_v39, %v547_v12 }
 0x230   :  { %v697_v41 = vpop.f32.mrb[6].mxu0  ;;  %v415_v26 = vadd.f32 %v547_v12, %v414_v40 }
 0x231   :  { %v426_v46 = vadd.f32 %v697_v41, %v547_v12  ;;  %v417_v47 = vpop.f32.mrb[7].mxu0 }
 0x232   :  { %v418_v9 = vadd.f32 %v547_v12, %v417_v47  ;;  %v704_v48 = vpop.f32.mrb[4].mxu1 }
 0x233   :  { %v640_v49 = vpack.c.bf16 %v426_v46, %v423_v43  ;;  %v446_v50 = vpop.f32.mrb[5].mxu1  ;;  %v455_v44 = vadd.f32 %v704_v48, %v547_v12 }
 0x234   :  { %v635_v51 = vpack.c.bf16 %v418_v9, %v415_v26  ;;  %v705_v13 = vpop.f32.mrb[6].mxu1  ;;  %v447_v31 = vadd.f32 %v547_v12, %v446_v50 }
 0x235   :  { %671 = vst [vmem:[%s1086_s5 + $0x18] sm:$0xff] %v640_v49   ;;  %v458_v54 = vadd.f32 %v705_v13, %v547_v12  ;;  %v449_v56 = vpop.f32.mrb[7].mxu1 }
 0x236   :  { %670 = vst [vmem:[%s1086_s5 + $0x10] sm:$0xff] %v635_v51   ;;  %v450_v57 = vadd.f32 %v547_v12, %v449_v56 }
 0x237   :  { %v660_v17 = vpack.c.bf16 %v458_v54, %v455_v44 }
 0x238   :  { %v655_v58 = vpack.c.bf16 %v450_v57, %v447_v31 }
 0x239   :  { %675 = vst [vmem:[%s1086_s5 + $0x38] sm:$0xff] %v660_v17  }
 0x23a   :  { %674 = vst [vmem:[%s1086_s5 + $0x30] sm:$0xff] %v655_v58  }

// kernel: _lambda_.37
= control target key start
LH: loop header
LB: loop body
LE: loop exit
PB: predicated region body
PF: predicated region fallthrough
CT: control target
= control target key end

     0   :  { %vm97_vm0 = vcmask 261120   ;;  %s664_s1 = inlined_call_operand.vmem [shape: bf16[32,128], index: 1, kind: input, shape index: {}]   ;;  %s665_s0 = inlined_call_operand.vmem [shape: bf16[128,32], index: 0, kind: input, shape index: {}]   ;;  %s666_s3 = inlined_call_operand.vmem [shape: bf16[128,128], index: 3, kind: input, shape index: {}]   ;;  %s667_s2 = inlined_call_operand.vmem [shape: f32[1,128], index: 2, kind: input, shape index: {}]   ;;  %s668_s4 = inlined_call_operand.vmem [shape: bf16[128,128], index: 4, kind: output, shape index: {}]  }
   0x1   :  { %v522_v0 = vld [vmem:[%s664_s1] sm:$0xff]   ;;  %v523_v1 = vld [vmem:[%s664_s1 + $0x8] sm:$0xff]   ;;  %v528_v6 = vld [vmem:[%s665_s0 + $0x10] sm:$0xff]  }
   0x2   :  { %498 = vmatprep.subr.bf16.mxu0 %v522_v0  ;;  %518 = vmatprep.subr.bf16.mxu1 %v522_v0  ;;  %v524_v2 = vld [vmem:[%s665_s0] sm:$0xff]   ;;  %v526_v4 = vld [vmem:[%s665_s0 + $0x8] sm:$0xff]   ;;  %v529_v7 = vld [vmem:[%s665_s0 + $0x30] sm:$0xff]  }
   0x3   :  { %499 = vmatpush3.bf16.msra.mxu0 %v522_v0  ;;  %520 = vmatpush3.bf16.msra.mxu1 %v522_v0  ;;  %v525_v3 = vld [vmem:[%s665_s0 + $0x20] sm:$0xff]   ;;  %v527_v5 = vld [vmem:[%s665_s0 + $0x28] sm:$0xff]   ;;  %v530_v8 = vld [vmem:[%s665_s0 + $0x18] sm:$0xff]  }
   0x4   :  { %500 = vmatprep.subr.bf16.mxu0 %v523_v1  ;;  %519 = vmatprep.subr.bf16.mxu1 %v523_v1  ;;  %v531_v9 = vld [vmem:[%s665_s0 + $0x38] sm:$0xff]   ;;  %v474_v10 = vld [vmem:[%s666_s3 + $0x8] sm:$0xff]   ;;  %v403_v12 = vld [vmem:[%s666_s3] sm:$0xff]  }
   0x5   :  { %502 = vmatprep.mubr.msk.bf16.mxu0 %vm97_vm0, %v524_v2  ;;  %510 = vmatprep.mubr.msk.bf16.mxu1 %vm97_vm0, %v525_v3  ;;  %v478_v11 = vld [vmem:[%s666_s3 + $0x28] sm:$0xff]   ;;  %v477_v13 = vld [vmem:[%s666_s3 + $0x20] sm:$0xff]   ;;  %v408_v16 = vunpack.c.l.bf16 %v474_v10  ;;  %v404_v19 = vunpack.c.l.bf16 %v403_v12  ;;  %v409_v25 = vunpack.c.h.bf16 %v474_v10  ;;  %v405_v31 = vunpack.c.h.bf16 %v403_v12  ;;  %v476_v39 = vld [vmem:[%s666_s3 + $0x18] sm:$0xff]  }
   0x6   :  { %v610_v14 = vld [vmem:[%s667_s2] ss:$0 sm:$0xff]  ;;  %v424_v18 = vunpack.c.l.bf16 %v478_v11  ;;  %v420_v20 = vunpack.c.l.bf16 %v477_v13  ;;  %v425_v26 = vunpack.c.h.bf16 %v478_v11  ;;  %v421_v32 = vunpack.c.h.bf16 %v477_v13  ;;  %v480_v40 = vld [vmem:[%s666_s3 + $0x38] sm:$0xff]   ;;  %v475_v45 = vld [vmem:[%s666_s3 + $0x10] sm:$0xff]  }
   0x7   :  { %501 = vmatpush3.bf16.msra.mxu0 %v523_v1  ;;  %521 = vmatpush3.bf16.msra.mxu1 %v523_v1  ;;  %v479_v46 = vld [vmem:[%s666_s3 + $0x30] sm:$0xff]   ;;  %v416_v53 = vunpack.c.l.bf16 %v476_v39  ;;  %v432_v54 = vunpack.c.l.bf16 %v480_v40  ;;  %v412_v59 = vunpack.c.l.bf16 %v475_v45  ;;  %v417_v1 = vunpack.c.h.bf16 %v476_v39 }
   0x8   :  { %v428_v60 = vunpack.c.l.bf16 %v479_v46  ;;  %v433_v2 = vunpack.c.h.bf16 %v480_v40 }
   0xa   :  { %503 = vmatmul.mubr.msk.bf16.vlgmr.msra.gmra.mrb[0].mxu0 %vm97_vm0, %v526_v4  ;;  %511 = vmatmul.mubr.msk.bf16.vlgmr.msra.gmra.mrb[0].mxu1 %vm97_vm0, %v527_v5 }
   0xb   :  { %506 = vmatprep.mubr.msk.bf16.mxu0 %vm97_vm0, %v528_v6  ;;  %514 = vmatprep.mubr.msk.bf16.mxu1 %vm97_vm0, %v529_v7  ;;  %v413_v7 = vunpack.c.h.bf16 %v475_v45 }
  0x12   :  { %507 = vmatmul.mubr.msk.bf16.gmra.mrb[4].mxu0 %vm97_vm0, %v530_v8  ;;  %515 = vmatmul.mubr.msk.bf16.gmra.mrb[4].mxu1 %vm97_vm0, %v531_v9  ;;  %v429_v8 = vunpack.c.h.bf16 %v479_v46 }
  0xdd   :  { %v504_v15 = vpop.f32.mrb[0].mxu0  ;;  %v512_v17 = vpop.f32.mrb[0].mxu1 }
  0xde   :  { %v165_v21 = vadd.f32 %v504_v15, %v610_v14  ;;  %v197_v22 = vadd.f32 %v512_v17, %v610_v14  ;;  %v156_v23 = vpop.f32.mrb[1].mxu0  ;;  %v188_v24 = vpop.f32.mrb[1].mxu1 }
  0xdf   :  { %v157_v27 = vadd.f32 %v610_v14, %v156_v23  ;;  %v189_v28 = vadd.f32 %v610_v14, %v188_v24  ;;  %v505_v29 = vpop.f32.mrb[2].mxu0  ;;  %v513_v30 = vpop.f32.mrb[2].mxu1 }
  0xe0   :  { %v168_v33 = vadd.f32 %v505_v29, %v610_v14  ;;  %v200_v34 = vadd.f32 %v513_v30, %v610_v14  ;;  %v159_v35 = vpop.f32.mrb[3].mxu0  ;;  %v191_v36 = vpop.f32.mrb[3].mxu1  ;;  %v253_v41 = vadd.f32 %v408_v16, %v165_v21  ;;  %v261_v42 = vadd.f32 %v424_v18, %v197_v22 }
  0xe1   :  { %v160_v37 = vadd.f32 %v610_v14, %v159_v35  ;;  %v192_v38 = vadd.f32 %v610_v14, %v191_v36  ;;  %v251_v47 = vadd.f32 %v404_v19, %v157_v27  ;;  %v259_v48 = vadd.f32 %v420_v20, %v189_v28 }
  0xe2   :  { %v254_v43 = vadd.f32 %v409_v25, %v168_v33  ;;  %v262_v44 = vadd.f32 %v425_v26, %v200_v34 }
  0xe3   :  { %v252_v49 = vadd.f32 %v405_v31, %v160_v37  ;;  %v260_v50 = vadd.f32 %v421_v32, %v192_v38 }
  0xe4   :  { %v442_v51 = vpack.c.bf16 %v254_v43, %v253_v41  ;;  %v462_v52 = vpack.c.bf16 %v262_v44, %v261_v42 }
  0xe5   :  { %v437_v55 = vpack.c.bf16 %v252_v49, %v251_v47  ;;  %v457_v56 = vpack.c.bf16 %v260_v50, %v259_v48  ;;  %v508_v57 = vpop.f32.mrb[4].mxu0  ;;  %v516_v58 = vpop.f32.mrb[4].mxu1 }
  0xe6   :  { %481 = vst [vmem:[%s668_s4 + $0x8] sm:$0xff] %v442_v51   ;;  %485 = vst [vmem:[%s668_s4 + $0x28] sm:$0xff] %v462_v52   ;;  %v181_v61 = vadd.f32 %v508_v57, %v610_v14  ;;  %v213_v62 = vadd.f32 %v516_v58, %v610_v14  ;;  %v172_v63 = vpop.f32.mrb[5].mxu0  ;;  %v204_v0 = vpop.f32.mrb[5].mxu1 }
  0xe7   :  { %438 = vst [vmem:[%s668_s4] sm:$0xff] %v437_v55   ;;  %484 = vst [vmem:[%s668_s4 + $0x20] sm:$0xff] %v457_v56   ;;  %v173_v3 = vadd.f32 %v610_v14, %v172_v63  ;;  %v205_v4 = vadd.f32 %v610_v14, %v204_v0  ;;  %v509_v5 = vpop.f32.mrb[6].mxu0  ;;  %v517_v6 = vpop.f32.mrb[6].mxu1 }
  0xe8   :  { %v184_v9 = vadd.f32 %v509_v5, %v610_v14  ;;  %v216_v10 = vadd.f32 %v517_v6, %v610_v14  ;;  %v175_v11 = vpop.f32.mrb[7].mxu0  ;;  %v207_v12 = vpop.f32.mrb[7].mxu1  ;;  %v257_v16 = vadd.f32 %v416_v53, %v181_v61  ;;  %v265_v17 = vadd.f32 %v432_v54, %v213_v62 }
  0xe9   :  { %v176_v13 = vadd.f32 %v610_v14, %v175_v11  ;;  %v208_v15 = vadd.f32 %v610_v14, %v207_v12  ;;  %v255_v20 = vadd.f32 %v412_v59, %v173_v3  ;;  %v263_v21 = vadd.f32 %v428_v60, %v205_v4 }
  0xea   :  { %v258_v18 = vadd.f32 %v417_v1, %v184_v9  ;;  %v266_v19 = vadd.f32 %v433_v2, %v216_v10 }
  0xeb   :  { %v256_v22 = vadd.f32 %v413_v7, %v176_v13  ;;  %v264_v23 = vadd.f32 %v429_v8, %v208_v15 }
  0xec   :  { %v452_v24 = vpack.c.bf16 %v258_v18, %v257_v16  ;;  %v472_v25 = vpack.c.bf16 %v266_v19, %v265_v17 }
  0xed   :  { %v447_v26 = vpack.c.bf16 %v256_v22, %v255_v20  ;;  %v467_v27 = vpack.c.bf16 %v264_v23, %v263_v21 }
  0xee   :  { %483 = vst [vmem:[%s668_s4 + $0x18] sm:$0xff] %v452_v24   ;;  %487 = vst [vmem:[%s668_s4 + $0x38] sm:$0xff] %v472_v25  }
  0xef   :  { %482 = vst [vmem:[%s668_s4 + $0x10] sm:$0xff] %v447_v26   ;;  %486 = vst [vmem:[%s668_s4 + $0x30] sm:$0xff] %v467_v27  }

// kernel: _lambda_.36
= control target key start
LH: loop header
LB: loop body
LE: loop exit
PB: predicated region body
PF: predicated region fallthrough
CT: control target
= control target key end

     0   :  { %v2590_v1 = vmov 0.0   ;;  %vm2591_vm0 = vmmov 0   ;;  %s2592_s10 = smov 96   ;;  %s2593_s23 = smov 64   ;;  %vm32_vm1 = vcmask 130048   ;;  %vm2106_vm2 = vcmask 257024   ;;  %s3354_s0 = inlined_call_operand.vmem [shape: bf16[8,16,96], index: 0, kind: input, shape index: {}]   ;;  %s3355_s1 = inlined_call_operand.vmem [shape: bf16[8,16,32], index: 1, kind: output, shape index: {}]  }
   0x1   :  { %v2611_v0 = vld [vmem:[%s3354_s0] sm:$0xff]   ;;  %2247 = vmatprep.subr.bf16.mxu0 %v2590_v1  ;;  %2253 = vmatprep.subr.bf16.mxu1 %v2590_v1  ;;  %v2618_v2 = vld [vmem:[%s3354_s0 + $0x8] sm:$0xff]   ;;  %v2628_v3 = vld [vmem:[%s3354_s0 + $0x10] sm:$0xff]   ;;  %s2594_s24 = smov 80   ;;  %s2595_s25 = smov 112  }
   0x2   :  { %2249 = vmatprep.mubr.msk.bf16.mxu0 %vm2591_vm0, %v2590_v1  ;;  %2255 = vmatprep.mubr.msk.bf16.mxu1 %vm2591_vm0, %v2590_v1  ;;  %v2634_v4 = vld [vmem:[%s3354_s0 + $0x18] sm:$0xff]   ;;  %v2640_v5 = vld [vmem:[%s3354_s0 + $0x20] sm:$0xff]   ;;  %v2646_v6 = vld [vmem:[%s3354_s0 + $0x28] sm:$0xff]   ;;  %s2596_s26 = smov 48  }
   0x3   :  { %30 = vrot.lane.b32.xlu0 %v2611_v0, %s2592_s10  ;;  %139 = vrot.lane.b32.xlu1 %v2628_v3, %s2592_s10  ;;  %v2652_v7 = vld [vmem:[%s3354_s0 + $0x30] sm:$0xff]   ;;  %v2658_v8 = vld [vmem:[%s3354_s0 + $0x38] sm:$0xff]  }
   0x7   :  { %85 = vrot.lane.b32.xlu0 %v2618_v2, %s2592_s10  ;;  %193 = vrot.lane.b32.xlu1 %v2634_v4, %s2592_s10 }
   0xb   :  { %247 = vrot.lane.b32.xlu0 %v2640_v5, %s2592_s10  ;;  %301 = vrot.lane.b32.xlu1 %v2646_v6, %s2592_s10 }
   0xf   :  { %355 = vrot.lane.b32.xlu0 %v2652_v7, %s2592_s10  ;;  %409 = vrot.lane.b32.xlu1 %v2658_v8, %s2592_s10 }
  0x13   :  { %642 = vrot.lane.b32.xlu1 %v2611_v0, %s2593_s23 }
  0x75   :  { %v31_v9 = vpop.permute.xlu0 %30  ;;  %v140_v11 = vpop.permute.xlu1 %139 }
  0x76   :  { %v37_v10 = vsel %vm32_vm1, %v31_v9, 0  ;;  %v145_v14 = vsel %vm32_vm1, %v140_v11, 0 }
  0x77   :  { %2248 = vmatpush3.bf16.xpose.msra.mxu0 %v37_v10 }
  0x78   :  { %2259 = vmatprep.subr.bf16.mxu0 %v2590_v1 }
  0x79   :  { %v86_v12 = vpop.permute.xlu0 %85  ;;  %v194_v15 = vpop.permute.xlu1 %193 }
  0x7a   :  { %v91_v13 = vsel %vm32_vm1, %v86_v12, 0  ;;  %v199_v16 = vsel %vm32_vm1, %v194_v15, 0 }
  0x7b   :  { %2254 = vmatpush3.bf16.xpose.msra.mxu1 %v91_v13 }
  0x7c   :  { %2265 = vmatprep.subr.bf16.mxu1 %v2590_v1 }
  0x7d   :  { %v248_v17 = vpop.permute.xlu0 %247  ;;  %v302_v19 = vpop.permute.xlu1 %301 }
  0x7e   :  { %2250 = vmatmul.mubr.msk.bf16.vlgmr.msra.gmra.mrb[0].mxu0 %vm32_vm1, %v2611_v0  ;;  %v253_v18 = vsel %vm32_vm1, %v248_v17, 0  ;;  %v307_v20 = vsel %vm32_vm1, %v302_v19, 0 }
  0x7f   :  { %2260 = vmatpush3.bf16.xpose.msra.mxu0 %v145_v14  ;;  %2261 = vmatprep.mubr.msk.bf16.mxu0 %vm2591_vm0, %v2590_v1 }
  0x80   :  { %2271 = vmatprep.subr.bf16.mxu0 %v2590_v1 }
  0x81   :  { %v356_v21 = vpop.permute.xlu0 %355  ;;  %v410_v23 = vpop.permute.xlu1 %409 }
  0x82   :  { %2256 = vmatmul.mubr.msk.bf16.vlgmr.msra.gmra.mrb[0].mxu1 %vm32_vm1, %v2618_v2  ;;  %v361_v22 = vsel %vm32_vm1, %v356_v21, 0  ;;  %v415_v24 = vsel %vm32_vm1, %v410_v23, 0 }
  0x83   :  { %2266 = vmatpush3.bf16.xpose.msra.mxu1 %v199_v16  ;;  %2267 = vmatprep.mubr.msk.bf16.mxu1 %vm2591_vm0, %v2590_v1 }
  0x84   :  { %2277 = vmatprep.subr.bf16.mxu1 %v2590_v1 }
  0x85   :  { %v643_v25 = vpop.permute.xlu1 %642 }
  0x86   :  { %2262 = vmatmul.mubr.msk.bf16.vlgmr.msra.gmra.mrb[4].mxu0 %vm32_vm1, %v2628_v3 }
  0x87   :  { %2272 = vmatpush3.bf16.xpose.msra.mxu0 %v253_v18  ;;  %2273 = vmatprep.mubr.msk.bf16.mxu0 %vm2591_vm0, %v2590_v1 }
  0x88   :  { %2283 = vmatprep.subr.bf16.mxu0 %v2590_v1 }
  0x8a   :  { %2268 = vmatmul.mubr.msk.bf16.vlgmr.msra.gmra.mrb[4].mxu1 %vm32_vm1, %v2634_v4 }
  0x8b   :  { %2278 = vmatpush3.bf16.xpose.msra.mxu1 %v307_v20  ;;  %2279 = vmatprep.mubr.msk.bf16.mxu1 %vm2591_vm0, %v2590_v1 }
  0x8c   :  { %2289 = vmatprep.subr.bf16.mxu1 %v2590_v1 }
  0x8e   :  { %2274 = vmatmul.mubr.msk.bf16.vlgmr.msra.gmra.mrb[8].mxu0 %vm32_vm1, %v2640_v5 }
  0x8f   :  { %2284 = vmatpush3.bf16.xpose.msra.mxu0 %v361_v22  ;;  %2285 = vmatprep.mubr.msk.bf16.mxu0 %vm2591_vm0, %v2590_v1 }
  0x90   :  { %2295 = vmatprep.subr.bf16.mxu0 %v2590_v1 }
  0x92   :  { %2280 = vmatmul.mubr.msk.bf16.vlgmr.msra.gmra.mrb[8].mxu1 %vm32_vm1, %v2646_v6 }
  0x93   :  { %2290 = vmatpush3.bf16.xpose.msra.mxu1 %v415_v24  ;;  %2291 = vmatprep.mubr.msk.bf16.mxu1 %vm2591_vm0, %v2590_v1 }
  0x94   :  { %2301 = vmatprep.subr.bf16.mxu1 %v2590_v1 }
  0x96   :  { %2286 = vmatmul.mubr.msk.bf16.vlgmr.msra.gmra.mrb[12].mxu0 %vm32_vm1, %v2652_v7 }
  0x97   :  { %2297 = vmatprep.mubr.msk.bf16.mxu0 %vm2591_vm0, %v2590_v1  ;;  %2296 = vmatpush3.bf16.msra.mxu0 %v643_v25 }
  0x98   :  { %2307 = vmatprep.subr.bf16.mxu0 %v2590_v1 }
  0x9a   :  { %2292 = vmatmul.mubr.msk.bf16.vlgmr.msra.gmra.mrb[12].mxu1 %vm32_vm1, %v2658_v8 }
  0x9b   :  { %2303 = vmatprep.mubr.msk.bf16.mxu1 %vm2591_vm0, %v2590_v1 }
 0x151   :  { %v2713_v26 = vpop.f32.mrb[0].mxu0 }
 0x152   :  { %v2251_v27 = vpop.f32.mrb[1].mxu0  ;;  %v458_v28 = vsel %vm32_vm1, %v2713_v26, -inf }
 0x153   :  { %459 = vmax.xlane.f32.xlu0 %v458_v28  ;;  %v2717_v29 = vpop.f32.mrb[2].mxu0 }
 0x154   :  { %v2252_v30 = vpop.f32.mrb[3].mxu0  ;;  %v461_v31 = vsel %vm32_vm1, %v2717_v29, -inf }
 0x155   :  { %462 = vmax.xlane.f32.xlu1 %v461_v31  ;;  %v2721_v32 = vpop.f32.mrb[0].mxu1 }
 0x156   :  { %v2257_v33 = vpop.f32.mrb[1].mxu1  ;;  %v464_v34 = vsel %vm32_vm1, %v2721_v32, -inf }
 0x157   :  { %465 = vmax.xlane.f32.xlu0 %v464_v34  ;;  %v2725_v35 = vpop.f32.mrb[2].mxu1 }
 0x158   :  { %v2258_v36 = vpop.f32.mrb[3].mxu1  ;;  %v467_v40 = vsel %vm32_vm1, %v2725_v35, -inf }
 0x159   :  { %v2727_v37 = vpop.f32.mrb[4].mxu0 }
 0x15a   :  { %v2263_v38 = vpop.f32.mrb[5].mxu0  ;;  %v470_v39 = vsel %vm32_vm1, %v2727_v37, -inf }
 0x15b   :  { %471 = vmax.xlane.f32.xlu1 %v470_v39  ;;  %v2733_v41 = vpop.f32.mrb[6].mxu0  ;;  %468 = vmax.xlane.f32.xlu0 %v467_v40 }
 0x15c   :  { %v2264_v42 = vpop.f32.mrb[7].mxu0  ;;  %v473_v45 = vsel %vm32_vm1, %v2733_v41, -inf }
 0x15d   :  { %v2735_v43 = vpop.f32.mrb[4].mxu1 }
 0x15e   :  { %v2269_v44 = vpop.f32.mrb[5].mxu1  ;;  %v476_v46 = vsel %vm32_vm1, %v2735_v43, -inf }
 0x15f   :  { %474 = vmax.xlane.f32.xlu0 %v473_v45  ;;  %477 = vmax.xlane.f32.xlu1 %v476_v46  ;;  %v2741_v47 = vpop.f32.mrb[6].mxu1 }
 0x160   :  { %v2270_v48 = vpop.f32.mrb[7].mxu1  ;;  %v479_v51 = vsel %vm32_vm1, %v2741_v47, -inf }
 0x161   :  { %v2743_v49 = vpop.f32.mrb[8].mxu0 }
 0x162   :  { %v2275_v50 = vpop.f32.mrb[9].mxu0  ;;  %v482_v52 = vsel %vm32_vm1, %v2743_v49, -inf }
 0x163   :  { %480 = vmax.xlane.f32.xlu0 %v479_v51  ;;  %483 = vmax.xlane.f32.xlu1 %v482_v52  ;;  %v2749_v53 = vpop.f32.mrb[10].mxu0 }
 0x164   :  { %v2276_v54 = vpop.f32.mrb[11].mxu0  ;;  %v485_v58 = vsel %vm32_vm1, %v2749_v53, -inf }
 0x165   :  { %v2751_v55 = vpop.f32.mrb[8].mxu1 }
 0x166   :  { %v2281_v56 = vpop.f32.mrb[9].mxu1  ;;  %v488_v57 = vsel %vm32_vm1, %v2751_v55, -inf }
 0x167   :  { %v2757_v59 = vpop.f32.mrb[10].mxu1  ;;  %489 = vmax.xlane.f32.xlu1 %v488_v57  ;;  %486 = vmax.xlane.f32.xlu0 %v485_v58 }
 0x168   :  { %v2282_v60 = vpop.f32.mrb[11].mxu1  ;;  %v491_v63 = vsel %vm32_vm1, %v2757_v59, -inf }
 0x169   :  { %v2759_v61 = vpop.f32.mrb[12].mxu0 }
 0x16a   :  { %v2287_v62 = vpop.f32.mrb[13].mxu0  ;;  %v494_v9 = vsel %vm32_vm1, %v2759_v61, -inf }
 0x16b   :  { %492 = vmax.xlane.f32.xlu0 %v491_v63  ;;  %495 = vmax.xlane.f32.xlu1 %v494_v9  ;;  %v2765_v10 = vpop.f32.mrb[14].mxu0 }
 0x16c   :  { %v2288_v11 = vpop.f32.mrb[15].mxu0  ;;  %v497_v15 = vsel %vm32_vm1, %v2765_v10, -inf }
 0x16d   :  { %v2767_v12 = vpop.f32.mrb[12].mxu1 }
 0x16e   :  { %v2293_v13 = vpop.f32.mrb[13].mxu1  ;;  %v500_v14 = vsel %vm32_vm1, %v2767_v12, -inf }
 0x16f   :  { %v2773_v16 = vpop.f32.mrb[14].mxu1  ;;  %501 = vmax.xlane.f32.xlu1 %v500_v14  ;;  %498 = vmax.xlane.f32.xlu0 %v497_v15 }
 0x170   :  { %v2294_v17 = vpop.f32.mrb[15].mxu1  ;;  %v503_v18 = vsel %vm32_vm1, %v2773_v16, -inf }
 0x173   :  { %504 = vmax.xlane.f32.xlu0 %v503_v18 }
 0x180   :  { %736 = vrot.lane.b32.xlu1 %v2628_v3, %s2593_s23 }
 0x184   :  { %783 = vrot.lane.b32.xlu1 %v2634_v4, %s2593_s23 }
 0x188   :  { %877 = vrot.lane.b32.xlu1 %v2646_v6, %s2593_s23 }
 0x189   :  { %689 = vrot.lane.b32.xlu0 %v2618_v2, %s2593_s23 }
 0x18c   :  { %971 = vrot.lane.b32.xlu1 %v2658_v8, %s2593_s23 }
 0x18d   :  { %830 = vrot.lane.b32.xlu0 %v2640_v5, %s2593_s23 }
 0x191   :  { %924 = vrot.lane.b32.xlu0 %v2652_v7, %s2593_s23 }
 0x1e0   :  { %v460_v19 = vpop.xlane.xlu0 %459 }
 0x1e1   :  { %v506_v20 = vsub.f32 %v2713_v26, %v460_v19 }
 0x1e2   :  { %v463_v21 = vpop.xlane.xlu1 %462 }
 0x1e3   :  { %v522_v22 = vmul.f32 1.442695, %v506_v20  ;;  %v507_v23 = vsub.f32 %v2717_v29, %v463_v21 }
 0x1e4   :  { %v466_v24 = vpop.xlane.xlu0 %465 }
 0x1e5   :  { %2455 = vpow2.f32 %v522_v22  ;;  %v524_v25 = vmul.f32 1.442695, %v507_v23  ;;  %v508_v27 = vsub.f32 %v2721_v32, %v466_v24 }
 0x1e7   :  { %2457 = vpow2.f32 %v524_v25  ;;  %v526_v28 = vmul.f32 1.442695, %v508_v27 }
 0x1e8   :  { %v472_v30 = vpop.xlane.xlu1 %471  ;;  %v469_v31 = vpop.xlane.xlu0 %468 }
 0x1e9   :  { %2459 = vpow2.f32 %v526_v28  ;;  %v510_v33 = vsub.f32 %v2727_v37, %v472_v30  ;;  %v509_v34 = vsub.f32 %v2725_v35, %v469_v31 }
 0x1eb   :  { %v530_v36 = vmul.f32 1.442695, %v510_v33  ;;  %v528_v26 = vmul.f32 1.442695, %v509_v34 }
 0x1ec   :  { %v478_v38 = vpop.xlane.xlu1 %477  ;;  %v475_v39 = vpop.xlane.xlu0 %474 }
 0x1ed   :  { %2461 = vpow2.f32 %v530_v36  ;;  %v512_v29 = vsub.f32 %v2735_v43, %v478_v38  ;;  %v511_v40 = vsub.f32 %v2733_v41, %v475_v39 }
 0x1ee   :  { %2463 = vpow2.f32 %v528_v26 }
 0x1ef   :  { %v2798_v32 = vpop.eup %2455  ;;  %v534_v42 = vmul.f32 1.442695, %v512_v29  ;;  %v532_v44 = vmul.f32 1.442695, %v511_v40 }
 0x1f0   :  { %v484_v45 = vpop.xlane.xlu1 %483  ;;  %v481_v46 = vpop.xlane.xlu0 %480  ;;  %v554_v37 = vsel %vm32_vm1, %v2798_v32, 0.0 }
 0x1f1   :  { %v2802_v35 = vpop.eup %2457  ;;  %2465 = vpow2.f32 %v534_v42  ;;  %v514_v48 = vsub.f32 %v2743_v49, %v484_v45  ;;  %v513_v50 = vsub.f32 %v2741_v47, %v481_v46  ;;  %555 = vadd.xlane.f32.xlu1 %v554_v37 }
 0x1f2   :  { %2467 = vpow2.f32 %v532_v44  ;;  %v557_v41 = vsel %vm32_vm1, %v2802_v35, 0.0 }
 0x1f3   :  { %v2808_v43 = vpop.eup %2459  ;;  %v538_v51 = vmul.f32 1.442695, %v514_v48  ;;  %v536_v52 = vmul.f32 1.442695, %v513_v50  ;;  %558 = vadd.xlane.f32.xlu0 %v557_v41 }
 0x1f4   :  { %v490_v54 = vpop.xlane.xlu1 %489  ;;  %v487_v56 = vpop.xlane.xlu0 %486  ;;  %v560_v57 = vsel %vm32_vm1, %v2808_v43, 0.0 }
 0x1f5   :  { %2469 = vpow2.f32 %v538_v51  ;;  %v516_v49 = vsub.f32 %v2751_v55, %v490_v54  ;;  %v515_v47 = vsub.f32 %v2749_v53, %v487_v56  ;;  %561 = vadd.xlane.f32.xlu1 %v560_v57 }
 0x1f6   :  { %2471 = vpow2.f32 %v536_v52 }
 0x1f7   :  { %v2814_v58 = vpop.eup %2461  ;;  %v542_v60 = vmul.f32 1.442695, %v516_v49  ;;  %v540_v62 = vmul.f32 1.442695, %v515_v47 }
 0x1f8   :  { %v2816_v63 = vpop.eup %2463  ;;  %v496_v9 = vpop.xlane.xlu1 %495  ;;  %v566_v13 = vsel %vm32_vm1, %v2814_v58, 0.0 }
 0x1f9   :  { %v493_v11 = vpop.xlane.xlu0 %492  ;;  %2473 = vpow2.f32 %v542_v60  ;;  %v518_v14 = vsub.f32 %v2759_v61, %v496_v9  ;;  %567 = vadd.xlane.f32.xlu1 %v566_v13  ;;  %v563_v53 = vsel %vm32_vm1, %v2816_v63, 0.0 }
 0x1fa   :  { %v517_v55 = vsub.f32 %v2757_v59, %v493_v11  ;;  %2475 = vpow2.f32 %v540_v62  ;;  %564 = vadd.xlane.f32.xlu0 %v563_v53 }
 0x1fb   :  { %v2824_v15 = vpop.eup %2465  ;;  %v546_v17 = vmul.f32 1.442695, %v518_v14 }
 0x1fc   :  { %v544_v18 = vmul.f32 1.442695, %v517_v55  ;;  %v2826_v19 = vpop.eup %2467  ;;  %v502_v20 = vpop.xlane.xlu1 %501  ;;  %v572_v22 = vsel %vm32_vm1, %v2824_v15, 0.0 }
 0x1fd   :  { %v499_v21 = vpop.xlane.xlu0 %498  ;;  %2477 = vpow2.f32 %v546_v17  ;;  %v520_v59 = vsub.f32 %v2767_v12, %v502_v20  ;;  %573 = vadd.xlane.f32.xlu1 %v572_v22  ;;  %v569_v23 = vsel %vm32_vm1, %v2826_v19, 0.0 }
 0x1fe   :  { %v519_v61 = vsub.f32 %v2765_v10, %v499_v21  ;;  %2479 = vpow2.f32 %v544_v18  ;;  %570 = vadd.xlane.f32.xlu0 %v569_v23 }
 0x1ff   :  { %v2834_v24 = vpop.eup %2469  ;;  %v550_v25 = vmul.f32 1.442695, %v520_v59 }
 0x200   :  { %v548_v27 = vmul.f32 1.442695, %v519_v61  ;;  %v2836_v28 = vpop.eup %2471  ;;  %v578_v31 = vsel %vm32_vm1, %v2834_v24, 0.0 }
 0x201   :  { %v505_v30 = vpop.xlane.xlu0 %504  ;;  %2481 = vpow2.f32 %v550_v25  ;;  %579 = vadd.xlane.f32.xlu1 %v578_v31  ;;  %v575_v10 = vsel %vm32_vm1, %v2836_v28, 0.0 }
 0x202   :  { %v521_v12 = vsub.f32 %v2773_v16, %v505_v30  ;;  %2483 = vpow2.f32 %v548_v27  ;;  %576 = vadd.xlane.f32.xlu0 %v575_v10 }
 0x203   :  { %v2843_v33 = vpop.eup %2473 }
 0x204   :  { %v552_v34 = vmul.f32 1.442695, %v521_v12  ;;  %v2845_v36 = vpop.eup %2475  ;;  %v584_v26 = vsel %vm32_vm1, %v2843_v33, 0.0 }
 0x205   :  { %v690_v38 = vpop.permute.xlu0 %689  ;;  %585 = vadd.xlane.f32.xlu1 %v584_v26  ;;  %v581_v16 = vsel %vm32_vm1, %v2845_v36, 0.0 }
 0x206   :  { %2485 = vpow2.f32 %v552_v34  ;;  %2302 = vmatpush3.bf16.msra.mxu1 %v690_v38  ;;  %582 = vadd.xlane.f32.xlu0 %v581_v16 }
 0x207   :  { %2313 = vmatprep.subr.bf16.mxu1 %v2590_v1  ;;  %v2852_v39 = vpop.eup %2477 }
 0x208   :  { %v2854_v29 = vpop.eup %2479  ;;  %v590_v40 = vsel %vm32_vm1, %v2852_v39, 0.0 }
 0x209   :  { %591 = vadd.xlane.f32.xlu1 %v590_v40  ;;  %v587_v42 = vsel %vm32_vm1, %v2854_v29, 0.0  ;;  %v831_v51 = vpop.permute.xlu0 %830 }
 0x20a   :  { %588 = vadd.xlane.f32.xlu0 %v587_v42 }
 0x20b   :  { %v2860_v44 = vpop.eup %2481 }
 0x20c   :  { %v2862_v45 = vpop.eup %2483  ;;  %v596_v46 = vsel %vm32_vm1, %v2860_v44, 0.0 }
 0x20d   :  { %597 = vadd.xlane.f32.xlu1 %v596_v46  ;;  %v593_v37 = vsel %vm32_vm1, %v2862_v45, 0.0 }
 0x20e   :  { %594 = vadd.xlane.f32.xlu0 %v593_v37 }
 0x210   :  { %v2868_v48 = vpop.eup %2485 }
 0x211   :  { %v599_v50 = vsel %vm32_vm1, %v2868_v48, 0.0 }
 0x212   :  { %600 = vadd.xlane.f32.xlu0 %v599_v50 }
 0x21e   :  { %1079 = vrot.lane.b32.xlu1 %v2618_v2, %s2594_s24 }
 0x222   :  { %1077 = vrot.lane.b32.xlu1 %v2618_v2, %s2595_s25  ;;  %v737_v2 = vpop.permute.xlu1 %736 }
 0x226   :  { %1181 = vrot.lane.b32.xlu1 %v2634_v4, %s2594_s24 }
 0x228   :  { %1028 = vrot.lane.b32.xlu0 %v2611_v0, %s2594_s24 }
 0x22a   :  { %1179 = vrot.lane.b32.xlu1 %v2634_v4, %s2595_s25  ;;  %v784_v4 = vpop.permute.xlu1 %783 }
 0x22c   :  { %1026 = vrot.lane.b32.xlu0 %v2611_v0, %s2595_s25 }
 0x22e   :  { %1283 = vrot.lane.b32.xlu1 %v2646_v6, %s2594_s24  ;;  %v2888_v41 = vpop.permute.xlu1 %877 }
 0x230   :  { %1130 = vrot.lane.b32.xlu0 %v2628_v3, %s2594_s24 }
 0x232   :  { %1281 = vrot.lane.b32.xlu1 %v2646_v6, %s2595_s25  ;;  %v2890_v6 = vpop.permute.xlu1 %971 }
 0x234   :  { %1128 = vrot.lane.b32.xlu0 %v2628_v3, %s2595_s25  ;;  %v2892_v3 = vpop.permute.xlu0 %924 }
 0x236   :  { %1385 = vrot.lane.b32.xlu1 %v2658_v8, %s2594_s24 }
 0x238   :  { %1232 = vrot.lane.b32.xlu0 %v2640_v5, %s2594_s24 }
 0x23a   :  { %1383 = vrot.lane.b32.xlu1 %v2658_v8, %s2595_s25 }
 0x23c   :  { %1230 = vrot.lane.b32.xlu0 %v2640_v5, %s2595_s25 }
 0x23e   :  { %1618 = vrot.lane.b32.xlu1 %v2611_v0, %s2596_s26 }
 0x240   :  { %1334 = vrot.lane.b32.xlu0 %v2652_v7, %s2594_s24 }
 0x244   :  { %1332 = vrot.lane.b32.xlu0 %v2652_v7, %s2595_s25 }
 0x27e   :  { %v556_v52 = vpop.xlane.xlu1 %555 }
 0x27f   :  { %2487 = vrcp.f32 %v556_v52 }
 0x280   :  { %v559_v54 = vpop.xlane.xlu0 %558 }
 0x281   :  { %2489 = vrcp.f32 %v559_v54 }
 0x282   :  { %v562_v8 = vpop.xlane.xlu1 %561 }
 0x283   :  { %2491 = vrcp.f32 %v562_v8 }
 0x286   :  { %v568_v5 = vpop.xlane.xlu1 %567 }
 0x287   :  { %v565_v56 = vpop.xlane.xlu0 %564 }
 0x288   :  { %2493 = vrcp.f32 %v565_v56 }
 0x289   :  { %v2488_v57 = vpop.eup %2487  ;;  %2495 = vrcp.f32 %v568_v5 }
 0x28a   :  { %v574_v7 = vpop.xlane.xlu1 %573  ;;  %v603_v60 = vmul.f32 %v2488_v57, %v2798_v32 }
 0x28b   :  { %v2490_v49 = vpop.eup %2489  ;;  %v571_v47 = vpop.xlane.xlu0 %570 }
 0x28c   :  { %v605_v62 = vmul.f32 %v2490_v49, %v2802_v35  ;;  %2497 = vrcp.f32 %v571_v47 }
 0x28d   :  { %2499 = vrcp.f32 %v574_v7  ;;  %v2492_v14 = vpop.eup %2491 }
 0x28e   :  { %v580_v9 = vpop.xlane.xlu1 %579  ;;  %v634_v11 = vpack.c.bf16 %v605_v62, %v603_v60  ;;  %v607_v32 = vmul.f32 %v2492_v14, %v2808_v43 }
 0x28f   :  { %v577_v13 = vpop.xlane.xlu0 %576 }
 0x290   :  { %2501 = vrcp.f32 %v577_v13  ;;  %2298 = vmatmul.mubr.msk.bf16.vlgmr.msra.gmra.mrb[16].mxu0 %vm32_vm1, %v634_v11 }
 0x291   :  { %2308 = vmatpush3.bf16.msra.mxu0 %v737_v2  ;;  %2309 = vmatprep.mubr.msk.bf16.mxu0 %vm2591_vm0, %v2590_v1  ;;  %2503 = vrcp.f32 %v580_v9 }
 0x292   :  { %v2494_v55 = vpop.eup %2493  ;;  %v586_v53 = vpop.xlane.xlu1 %585  ;;  %2319 = vmatprep.subr.bf16.mxu0 %v2590_v1 }
 0x293   :  { %v609_v35 = vmul.f32 %v2494_v55, %v2816_v63  ;;  %v583_v17 = vpop.xlane.xlu0 %582  ;;  %v2496_v18 = vpop.eup %2495 }
 0x294   :  { %2505 = vrcp.f32 %v583_v17  ;;  %v611_v59 = vmul.f32 %v2496_v18, %v2814_v58 }
 0x295   :  { %v635_v20 = vpack.c.bf16 %v609_v35, %v607_v32  ;;  %2507 = vrcp.f32 %v586_v53 }
 0x296   :  { %v2498_v21 = vpop.eup %2497  ;;  %v592_v22 = vpop.xlane.xlu1 %591 }
 0x297   :  { %v613_v61 = vmul.f32 %v2498_v21, %v2826_v19  ;;  %2304 = vmatmul.mubr.msk.bf16.vlgmr.msra.gmra.mrb[16].mxu1 %vm32_vm1, %v635_v20  ;;  %v589_v23 = vpop.xlane.xlu0 %588  ;;  %v2500_v25 = vpop.eup %2499 }
 0x298   :  { %2314 = vmatpush3.bf16.msra.mxu1 %v784_v4  ;;  %2509 = vrcp.f32 %v589_v23  ;;  %2315 = vmatprep.mubr.msk.bf16.mxu1 %vm2591_vm0, %v2590_v1  ;;  %v615_v27 = vmul.f32 %v2500_v25, %v2824_v15 }
 0x299   :  { %v636_v43 = vpack.c.bf16 %v613_v61, %v611_v59  ;;  %2325 = vmatprep.subr.bf16.mxu1 %v2590_v1  ;;  %2511 = vrcp.f32 %v592_v22 }
 0x29a   :  { %v2502_v63 = vpop.eup %2501  ;;  %v598_v30 = vpop.xlane.xlu1 %597 }
 0x29b   :  { %v617_v58 = vmul.f32 %v2502_v63, %v2836_v28  ;;  %2310 = vmatmul.mubr.msk.bf16.vlgmr.msra.gmra.mrb[20].mxu0 %vm32_vm1, %v636_v43  ;;  %v595_v19 = vpop.xlane.xlu0 %594  ;;  %v2504_v31 = vpop.eup %2503 }
 0x29c   :  { %2320 = vmatpush3.bf16.msra.mxu0 %v831_v51  ;;  %2513 = vrcp.f32 %v595_v19  ;;  %2321 = vmatprep.mubr.msk.bf16.mxu0 %vm2591_vm0, %v2590_v1  ;;  %v619_v34 = vmul.f32 %v2504_v31, %v2834_v24 }
 0x29d   :  { %v637_v12 = vpack.c.bf16 %v617_v58, %v615_v27  ;;  %2331 = vmatprep.subr.bf16.mxu0 %v2590_v1  ;;  %2515 = vrcp.f32 %v598_v30 }
 0x29e   :  { %v2506_v10 = vpop.eup %2505  ;;  %v1080_v26 = vpop.permute.xlu1 %1079 }
 0x29f   :  { %v621_v15 = vmul.f32 %v2506_v10, %v2845_v36  ;;  %2316 = vmatmul.mubr.msk.bf16.vlgmr.msra.gmra.mrb[20].mxu1 %vm32_vm1, %v637_v12  ;;  %v601_v28 = vpop.xlane.xlu0 %600  ;;  %v2508_v38 = vpop.eup %2507  ;;  %v1085_v5 = vsel %vm32_vm1, %v1080_v26, 0 }
 0x2a0   :  { %2326 = vmatpush3.bf16.msra.mxu1 %v2888_v41  ;;  %2517 = vrcp.f32 %v601_v28  ;;  %2327 = vmatprep.mubr.msk.bf16.mxu1 %vm2591_vm0, %v2590_v1  ;;  %v623_v42 = vmul.f32 %v2508_v38, %v2843_v33 }
 0x2a1   :  { %v638_v16 = vpack.c.bf16 %v621_v15, %v619_v34  ;;  %2337 = vmatprep.subr.bf16.mxu1 %v2590_v1 }
 0x2a2   :  { %v2510_v40 = vpop.eup %2509  ;;  %v1078_v50 = vpop.permute.xlu1 %1077 }
 0x2a3   :  { %v625_v24 = vmul.f32 %v2510_v40, %v2854_v29  ;;  %2322 = vmatmul.mubr.msk.bf16.vlgmr.msra.gmra.mrb[24].mxu0 %vm32_vm1, %v638_v16  ;;  %v1029_v36 = vpop.permute.xlu0 %1028  ;;  %v2512_v46 = vpop.eup %2511 }
 0x2a4   :  { %2332 = vmatpush3.bf16.msra.mxu0 %v2892_v3  ;;  %2333 = vmatprep.mubr.msk.bf16.mxu0 %vm2591_vm0, %v2590_v1  ;;  %v627_v4 = vmul.f32 %v2512_v46, %v2852_v39  ;;  %v1034_v52 = vsel %vm32_vm1, %v1029_v36, 0 }
 0x2a5   :  { %v639_v37 = vpack.c.bf16 %v625_v24, %v623_v42  ;;  %2343 = vmatprep.subr.bf16.mxu0 %v2590_v1 }
 0x2a6   :  { %v2514_v2 = vpop.eup %2513  ;;  %v1182_v8 = vpop.permute.xlu1 %1181 }
 0x2a7   :  { %v629_v33 = vmul.f32 %v2514_v2, %v2862_v45  ;;  %2328 = vmatmul.mubr.msk.bf16.vlgmr.msra.gmra.mrb[24].mxu1 %vm32_vm1, %v639_v37  ;;  %v1027_v29 = vpop.permute.xlu0 %1026  ;;  %v2516_v41 = vpop.eup %2515  ;;  %v1187_v7 = vsel %vm32_vm1, %v1182_v8, 0 }
 0x2a8   :  { %2338 = vmatpush3.bf16.msra.mxu1 %v2890_v6  ;;  %2339 = vmatprep.mubr.msk.bf16.mxu1 %vm2591_vm0, %v2590_v1  ;;  %v631_v54 = vmul.f32 %v2516_v41, %v2860_v44 }
 0x2a9   :  { %v640_v51 = vpack.c.bf16 %v629_v33, %v627_v4  ;;  %2349 = vmatprep.subr.bf16.mxu1 %v2590_v1 }
 0x2aa   :  { %v2518_v3 = vpop.eup %2517  ;;  %v1180_v44 = vpop.permute.xlu1 %1179 }
 0x2ab   :  { %v633_v39 = vmul.f32 %v2518_v3, %v2868_v48  ;;  %2334 = vmatmul.mubr.msk.bf16.vlgmr.msra.gmra.mrb[28].mxu0 %vm32_vm1, %v640_v51  ;;  %v1131_v45 = vpop.permute.xlu0 %1130 }
 0x2ac   :  { %2345 = vmatprep.mubr.msk.bf16.mxu0 %vm2591_vm0, %v2590_v1  ;;  %v1136_v48 = vsel %vm32_vm1, %v1131_v45, 0 }
 0x2ad   :  { %2344 = vmatpush3.bf16.xpose.msra.mxu0 %v1034_v52  ;;  %v641_v6 = vpack.c.bf16 %v633_v39, %v631_v54 }
 0x2ae   :  { %2355 = vmatprep.subr.bf16.mxu0 %v2590_v1  ;;  %v1284_v49 = vpop.permute.xlu1 %1283 }
 0x2af   :  { %2340 = vmatmul.mubr.msk.bf16.vlgmr.msra.gmra.mrb[28].mxu1 %vm32_vm1, %v641_v6  ;;  %v1129_v56 = vpop.permute.xlu0 %1128  ;;  %v1289_v9 = vsel %vm32_vm1, %v1284_v49, 0 }
 0x2b0   :  { %2351 = vmatprep.mubr.msk.bf16.mxu1 %vm2591_vm0, %v2590_v1 }
 0x2b1   :  { %2350 = vmatpush3.bf16.xpose.msra.mxu1 %v1085_v5 }
 0x2b2   :  { %2361 = vmatprep.subr.bf16.mxu1 %v2590_v1  ;;  %v1282_v62 = vpop.permute.xlu1 %1281 }
 0x2b3   :  { %v1233_v57 = vpop.permute.xlu0 %1232 }
 0x2b4   :  { %2346 = vmatmul.mubr.msk.bf16.vlgmr.msra.gmra.mrb[32].mxu0 %vm32_vm1, %v1027_v29  ;;  %v1238_v60 = vsel %vm32_vm1, %v1233_v57, 0 }
 0x2b5   :  { %2356 = vmatpush3.bf16.xpose.msra.mxu0 %v1136_v48  ;;  %2357 = vmatprep.mubr.msk.bf16.mxu0 %vm2591_vm0, %v2590_v1 }
 0x2b6   :  { %2367 = vmatprep.subr.bf16.mxu0 %v2590_v1  ;;  %v1386_v14 = vpop.permute.xlu1 %1385 }
 0x2b7   :  { %v1231_v47 = vpop.permute.xlu0 %1230  ;;  %v1391_v55 = vsel %vm32_vm1, %v1386_v14, 0 }
 0x2b8   :  { %2352 = vmatmul.mubr.msk.bf16.vlgmr.msra.gmra.mrb[32].mxu1 %vm32_vm1, %v1078_v50 }
 0x2b9   :  { %2362 = vmatpush3.bf16.xpose.msra.mxu1 %v1187_v7  ;;  %2363 = vmatprep.mubr.msk.bf16.mxu1 %vm2591_vm0, %v2590_v1 }
 0x2ba   :  { %2373 = vmatprep.subr.bf16.mxu1 %v2590_v1  ;;  %v1384_v32 = vpop.permute.xlu1 %1383 }
 0x2bb   :  { %v1335_v11 = vpop.permute.xlu0 %1334 }
 0x2bc   :  { %2358 = vmatmul.mubr.msk.bf16.vlgmr.msra.gmra.mrb[36].mxu0 %vm32_vm1, %v1129_v56  ;;  %v1340_v13 = vsel %vm32_vm1, %v1335_v11, 0 }
 0x2bd   :  { %2368 = vmatpush3.bf16.xpose.msra.mxu0 %v1238_v60  ;;  %2369 = vmatprep.mubr.msk.bf16.mxu0 %vm2591_vm0, %v2590_v1 }
 0x2be   :  { %2379 = vmatprep.subr.bf16.mxu0 %v2590_v1  ;;  %v1619_v35 = vpop.permute.xlu1 %1618 }
 0x2bf   :  { %v1333_v53 = vpop.permute.xlu0 %1332 }
 0x2c0   :  { %2364 = vmatmul.mubr.msk.bf16.vlgmr.msra.gmra.mrb[36].mxu1 %vm32_vm1, %v1180_v44 }
 0x2c1   :  { %2374 = vmatpush3.bf16.xpose.msra.mxu1 %v1289_v9  ;;  %2375 = vmatprep.mubr.msk.bf16.mxu1 %vm2591_vm0, %v2590_v1 }
 0x2c2   :  { %2385 = vmatprep.subr.bf16.mxu1 %v2590_v1 }
 0x2c4   :  { %2370 = vmatmul.mubr.msk.bf16.vlgmr.msra.gmra.mrb[40].mxu0 %vm32_vm1, %v1231_v47 }
 0x2c5   :  { %2380 = vmatpush3.bf16.xpose.msra.mxu0 %v1340_v13  ;;  %2381 = vmatprep.mubr.msk.bf16.mxu0 %vm2591_vm0, %v2590_v1 }
 0x2c6   :  { %2391 = vmatprep.subr.bf16.mxu0 %v2590_v1 }
 0x2c8   :  { %2376 = vmatmul.mubr.msk.bf16.vlgmr.msra.gmra.mrb[40].mxu1 %vm32_vm1, %v1282_v62 }
 0x2c9   :  { %2386 = vmatpush3.bf16.xpose.msra.mxu1 %v1391_v55  ;;  %2387 = vmatprep.mubr.msk.bf16.mxu1 %vm2591_vm0, %v2590_v1 }
 0x2ca   :  { %2397 = vmatprep.subr.bf16.mxu1 %v2590_v1 }
 0x2cc   :  { %2382 = vmatmul.mubr.msk.bf16.vlgmr.msra.gmra.mrb[44].mxu0 %vm32_vm1, %v1333_v53 }
 0x2cd   :  { %2393 = vmatprep.mubr.msk.bf16.mxu0 %vm2591_vm0, %v2590_v1  ;;  %2392 = vmatpush3.bf16.msra.mxu0 %v1619_v35 }
 0x2ce   :  { %2403 = vmatprep.subr.bf16.mxu0 %v2590_v1 }
 0x2d0   :  { %2388 = vmatmul.mubr.msk.bf16.vlgmr.msra.gmra.mrb[44].mxu1 %vm32_vm1, %v1384_v32 }
 0x2d1   :  { %2399 = vmatprep.mubr.msk.bf16.mxu1 %vm2591_vm0, %v2590_v1 }
 0x363   :  { %v2986_v17 = vpop.f32.mrb[16].mxu0 }
 0x364   :  { %v2299_v18 = vpop.f32.mrb[17].mxu0 }
 0x365   :  { %v2988_v20 = vpop.f32.mrb[18].mxu0 }
 0x366   :  { %v1018_v21 = vpack.c.bf16 %v2988_v20, %v2986_v17  ;;  %v2300_v22 = vpop.f32.mrb[19].mxu0 }
 0x36a   :  { %v2992_v59 = vpop.f32.mrb[16].mxu1 }
 0x36b   :  { %v2305_v61 = vpop.f32.mrb[17].mxu1 }
 0x36c   :  { %v2994_v23 = vpop.f32.mrb[18].mxu1 }
 0x36d   :  { %v1019_v0 = vpack.c.bf16 %v2994_v23, %v2992_v59  ;;  %v2306_v25 = vpop.f32.mrb[19].mxu1 }
 0x36e   :  { %v2998_v43 = vpop.f32.mrb[20].mxu0 }
 0x36f   :  { %v2311_v63 = vpop.f32.mrb[21].mxu0 }
 0x370   :  { %v3000_v27 = vpop.f32.mrb[22].mxu0 }
 0x371   :  { %v1020_v58 = vpack.c.bf16 %v3000_v27, %v2998_v43  ;;  %v2312_v30 = vpop.f32.mrb[23].mxu0 }
 0x372   :  { %v3004_v19 = vpop.f32.mrb[20].mxu1 }
 0x373   :  { %v2317_v31 = vpop.f32.mrb[21].mxu1 }
 0x374   :  { %v3006_v12 = vpop.f32.mrb[22].mxu1 }
 0x375   :  { %v1021_v10 = vpack.c.bf16 %v3006_v12, %v3004_v19  ;;  %v2318_v34 = vpop.f32.mrb[23].mxu1 }
 0x376   :  { %v3010_v15 = vpop.f32.mrb[24].mxu0 }
 0x377   :  { %v2323_v28 = vpop.f32.mrb[25].mxu0 }
 0x378   :  { %v3012_v26 = vpop.f32.mrb[26].mxu0 }
 0x379   :  { %v1022_v38 = vpack.c.bf16 %v3012_v26, %v3010_v15  ;;  %v2324_v16 = vpop.f32.mrb[27].mxu0 }
 0x37a   :  { %v3016_v40 = vpop.f32.mrb[24].mxu1 }
 0x37b   :  { %v2329_v42 = vpop.f32.mrb[25].mxu1 }
 0x37c   :  { %v3018_v24 = vpop.f32.mrb[26].mxu1 }
 0x37d   :  { %v1023_v36 = vpack.c.bf16 %v3018_v24, %v3016_v40  ;;  %v2330_v46 = vpop.f32.mrb[27].mxu1 }
 0x37e   :  { %v3022_v37 = vpop.f32.mrb[28].mxu0 }
 0x37f   :  { %v2335_v50 = vpop.f32.mrb[29].mxu0 }
 0x380   :  { %v3024_v2 = vpop.f32.mrb[30].mxu0 }
 0x381   :  { %v1024_v4 = vpack.c.bf16 %v3024_v2, %v3022_v37  ;;  %v2336_v33 = vpop.f32.mrb[31].mxu0 }
 0x382   :  { %v3028_v29 = vpop.f32.mrb[28].mxu1 }
 0x383   :  { %v2341_v41 = vpop.f32.mrb[29].mxu1 }
 0x384   :  { %v3030_v51 = vpop.f32.mrb[30].mxu1 }
 0x385   :  { %v1025_v3 = vpack.c.bf16 %v3030_v51, %v3028_v29  ;;  %v2342_v52 = vpop.f32.mrb[31].mxu1 }
 0x387   :  { %v3034_v54 = vpop.f32.mrb[32].mxu0 }
 0x388   :  { %v2347_v39 = vpop.f32.mrb[33].mxu0  ;;  %v1434_v45 = vsel %vm32_vm1, %v3034_v54, -inf }
 0x389   :  { %1435 = vmax.xlane.f32.xlu0 %v1434_v45  ;;  %v3038_v8 = vpop.f32.mrb[34].mxu0 }
 0x38a   :  { %v2348_v6 = vpop.f32.mrb[35].mxu0  ;;  %v1437_v5 = vsel %vm32_vm1, %v3038_v8, -inf }
 0x38b   :  { %v3042_v56 = vpop.f32.mrb[32].mxu1  ;;  %1438 = vmax.xlane.f32.xlu1 %v1437_v5 }
 0x38c   :  { %v2353_v44 = vpop.f32.mrb[33].mxu1  ;;  %v1440_v48 = vsel %vm32_vm1, %v3042_v56, -inf }
 0x38d   :  { %v3046_v57 = vpop.f32.mrb[34].mxu1  ;;  %1441 = vmax.xlane.f32.xlu0 %v1440_v48 }
 0x38e   :  { %v2354_v7 = vpop.f32.mrb[35].mxu1  ;;  %v1443_v60 = vsel %vm32_vm1, %v3046_v57, -inf }
 0x38f   :  { %v3048_v49 = vpop.f32.mrb[36].mxu0 }
 0x390   :  { %v2359_v47 = vpop.f32.mrb[37].mxu0  ;;  %v1446_v62 = vsel %vm32_vm1, %v3048_v49, -inf }
 0x391   :  { %1444 = vmax.xlane.f32.xlu0 %v1443_v60  ;;  %1447 = vmax.xlane.f32.xlu1 %v1446_v62  ;;  %v3054_v9 = vpop.f32.mrb[38].mxu0  ;;  %v2583_v62 = vld [vmem:[%s3354_s0 + $0x10] sm:$0xff]  }
 0x392   :  { %v2360_v11 = vpop.f32.mrb[39].mxu0  ;;  %v1449_v53 = vsel %vm32_vm1, %v3054_v9, -inf }
 0x393   :  { %v3056_v13 = vpop.f32.mrb[36].mxu1  ;;  %v2584_v11 = vld [vmem:[%s3354_s0 + $0x18] sm:$0xff]  }
 0x394   :  { %v2365_v14 = vpop.f32.mrb[37].mxu1  ;;  %v1452_v55 = vsel %vm32_vm1, %v3056_v13, -inf }
 0x395   :  { %v3062_v32 = vpop.f32.mrb[38].mxu1  ;;  %1453 = vmax.xlane.f32.xlu1 %v1452_v55  ;;  %1450 = vmax.xlane.f32.xlu0 %v1449_v53  ;;  %v2585_v14 = vld [vmem:[%s3354_s0 + $0x28] sm:$0xff]   ;;  %v2587_v53 = vld [vmem:[%s3354_s0 + $0x20] sm:$0xff]  }
 0x396   :  { %v2366_v35 = vpop.f32.mrb[39].mxu1  ;;  %v1455_v61 = vsel %vm32_vm1, %v3062_v32, -inf  ;;  %v2586_v55 = vld [vmem:[%s3354_s0 + $0x8] sm:$0xff]  }
 0x397   :  { %v3064_v18 = vpop.f32.mrb[40].mxu0 }
 0x398   :  { %v2371_v22 = vpop.f32.mrb[41].mxu0  ;;  %v1458_v25 = vsel %vm32_vm1, %v3064_v18, -inf }
 0x399   :  { %1456 = vmax.xlane.f32.xlu0 %v1455_v61  ;;  %1459 = vmax.xlane.f32.xlu1 %v1458_v25  ;;  %v3070_v63 = vpop.f32.mrb[42].mxu0 }
 0x39a   :  { %v2372_v30 = vpop.f32.mrb[43].mxu0  ;;  %v1461_v16 = vsel %vm32_vm1, %v3070_v63, -inf }
 0x39b   :  { %v3072_v31 = vpop.f32.mrb[40].mxu1 }
 0x39c   :  { %v2377_v34 = vpop.f32.mrb[41].mxu1  ;;  %v1464_v28 = vsel %vm32_vm1, %v3072_v31, -inf }
 0x39d   :  { %v3078_v42 = vpop.f32.mrb[42].mxu1  ;;  %1465 = vmax.xlane.f32.xlu1 %v1464_v28  ;;  %1462 = vmax.xlane.f32.xlu0 %v1461_v16 }
 0x39e   :  { %v2378_v46 = vpop.f32.mrb[43].mxu1  ;;  %v1467_v41 = vsel %vm32_vm1, %v3078_v42, -inf }
 0x39f   :  { %v3080_v50 = vpop.f32.mrb[44].mxu0 }
 0x3a0   :  { %v2383_v33 = vpop.f32.mrb[45].mxu0  ;;  %v1470_v52 = vsel %vm32_vm1, %v3080_v50, -inf }
 0x3a1   :  { %1468 = vmax.xlane.f32.xlu0 %v1467_v41  ;;  %1471 = vmax.xlane.f32.xlu1 %v1470_v52  ;;  %v3086_v39 = vpop.f32.mrb[46].mxu0 }
 0x3a2   :  { %v2384_v45 = vpop.f32.mrb[47].mxu0  ;;  %v1473_v48 = vsel %vm32_vm1, %v3086_v39, -inf }
 0x3a3   :  { %v3088_v6 = vpop.f32.mrb[44].mxu1 }
 0x3a4   :  { %v2389_v5 = vpop.f32.mrb[45].mxu1  ;;  %v1476_v44 = vsel %vm32_vm1, %v3088_v6, -inf }
 0x3a5   :  { %v3094_v7 = vpop.f32.mrb[46].mxu1  ;;  %1477 = vmax.xlane.f32.xlu1 %v1476_v44  ;;  %1474 = vmax.xlane.f32.xlu0 %v1473_v48 }
 0x3a6   :  { %v2390_v47 = vpop.f32.mrb[47].mxu1  ;;  %v1479_v60 = vsel %vm32_vm1, %v3094_v7, -inf }
 0x3a9   :  { %1480 = vmax.xlane.f32.xlu0 %v1479_v60 }
 0x3b6   :  { %1712 = vrot.lane.b32.xlu1 %v2583_v62, %s2596_s26 }
 0x3ba   :  { %1759 = vrot.lane.b32.xlu1 %v2584_v11, %s2596_s26 }
 0x3be   :  { %1853 = vrot.lane.b32.xlu1 %v2585_v14, %s2596_s26 }
 0x3bf   :  { %1665 = vrot.lane.b32.xlu0 %v2586_v55, %s2596_s26 }
 0x3c3   :  { %1806 = vrot.lane.b32.xlu0 %v2587_v53, %s2596_s26 }
 0x416   :  { %v1436_v35 = vpop.xlane.xlu0 %1435 }
 0x417   :  { %v1482_v22 = vsub.f32 %v3034_v54, %v1436_v35 }
 0x418   :  { %v1439_v61 = vpop.xlane.xlu1 %1438 }
 0x419   :  { %v1498_v25 = vmul.f32 1.442695, %v1482_v22  ;;  %v1483_v30 = vsub.f32 %v3038_v8, %v1439_v61 }
 0x41a   :  { %v1442_v34 = vpop.xlane.xlu0 %1441 }
 0x41b   :  { %2519 = vpow2.f32 %v1498_v25  ;;  %v1500_v28 = vmul.f32 1.442695, %v1483_v30  ;;  %v1484_v16 = vsub.f32 %v3042_v56, %v1442_v34 }
 0x41d   :  { %2521 = vpow2.f32 %v1500_v28  ;;  %v1502_v46 = vmul.f32 1.442695, %v1484_v16 }
 0x41e   :  { %v1448_v33 = vpop.xlane.xlu1 %1447  ;;  %v1445_v41 = vpop.xlane.xlu0 %1444 }
 0x41f   :  { %2523 = vpow2.f32 %v1502_v46  ;;  %v1486_v52 = vsub.f32 %v3048_v49, %v1448_v33  ;;  %v1485_v45 = vsub.f32 %v3046_v57, %v1445_v41 }
 0x421   :  { %v1506_v5 = vmul.f32 1.442695, %v1486_v52  ;;  %v1504_v54 = vmul.f32 1.442695, %v1485_v45 }
 0x422   :  { %v1454_v44 = vpop.xlane.xlu1 %1453  ;;  %v1451_v48 = vpop.xlane.xlu0 %1450 }
 0x423   :  { %2525 = vpow2.f32 %v1506_v5  ;;  %v1488_v8 = vsub.f32 %v3056_v13, %v1454_v44  ;;  %v1487_v47 = vsub.f32 %v3054_v9, %v1451_v48 }
 0x424   :  { %2527 = vpow2.f32 %v1504_v54 }
 0x425   :  { %v3125_v56 = vpop.eup %2519  ;;  %v1510_v60 = vmul.f32 1.442695, %v1488_v8  ;;  %v1508_v62 = vmul.f32 1.442695, %v1487_v47 }
 0x426   :  { %v1460_v11 = vpop.xlane.xlu1 %1459  ;;  %v1457_v14 = vpop.xlane.xlu0 %1456  ;;  %v1530_v49 = vsel %vm32_vm1, %v3125_v56, 0.0 }
 0x427   :  { %v3129_v57 = vpop.eup %2521  ;;  %2529 = vpow2.f32 %v1510_v60  ;;  %v1490_v55 = vsub.f32 %v3064_v18, %v1460_v11  ;;  %v1489_v53 = vsub.f32 %v3062_v32, %v1457_v14  ;;  %1531 = vadd.xlane.f32.xlu1 %v1530_v49 }
 0x428   :  { %2531 = vpow2.f32 %v1508_v62  ;;  %v1533_v9 = vsel %vm32_vm1, %v3129_v57, 0.0 }
 0x429   :  { %v3135_v13 = vpop.eup %2523  ;;  %v1514_v35 = vmul.f32 1.442695, %v1490_v55  ;;  %v1512_v22 = vmul.f32 1.442695, %v1489_v53  ;;  %1534 = vadd.xlane.f32.xlu0 %v1533_v9 }
 0x42a   :  { %v1466_v61 = vpop.xlane.xlu1 %1465  ;;  %v1463_v25 = vpop.xlane.xlu0 %1462  ;;  %v1536_v30 = vsel %vm32_vm1, %v3135_v13, 0.0 }
 0x42b   :  { %2533 = vpow2.f32 %v1514_v35  ;;  %v1492_v18 = vsub.f32 %v3072_v31, %v1466_v61  ;;  %v1491_v32 = vsub.f32 %v3070_v63, %v1463_v25  ;;  %1537 = vadd.xlane.f32.xlu1 %v1536_v30 }
 0x42c   :  { %2535 = vpow2.f32 %v1512_v22 }
 0x42d   :  { %v3141_v34 = vpop.eup %2525  ;;  %v1518_v28 = vmul.f32 1.442695, %v1492_v18  ;;  %v1516_v16 = vmul.f32 1.442695, %v1491_v32 }
 0x42e   :  { %v3143_v46 = vpop.eup %2527  ;;  %v1472_v33 = vpop.xlane.xlu1 %1471  ;;  %v1542_v52 = vsel %vm32_vm1, %v3141_v34, 0.0 }
 0x42f   :  { %v1469_v41 = vpop.xlane.xlu0 %1468  ;;  %2537 = vpow2.f32 %v1518_v28  ;;  %v1494_v45 = vsub.f32 %v3080_v50, %v1472_v33  ;;  %1543 = vadd.xlane.f32.xlu1 %v1542_v52  ;;  %v1539_v63 = vsel %vm32_vm1, %v3143_v46, 0.0 }
 0x430   :  { %v1493_v31 = vsub.f32 %v3078_v42, %v1469_v41  ;;  %2539 = vpow2.f32 %v1516_v16  ;;  %1540 = vadd.xlane.f32.xlu0 %v1539_v63 }
 0x431   :  { %v3151_v5 = vpop.eup %2529  ;;  %v1522_v54 = vmul.f32 1.442695, %v1494_v45 }
 0x432   :  { %v1520_v44 = vmul.f32 1.442695, %v1493_v31  ;;  %v3153_v48 = vpop.eup %2531  ;;  %v1478_v8 = vpop.xlane.xlu1 %1477  ;;  %v1548_v60 = vsel %vm32_vm1, %v3151_v5, 0.0 }
 0x433   :  { %v1475_v47 = vpop.xlane.xlu0 %1474  ;;  %2541 = vpow2.f32 %v1522_v54  ;;  %v1496_v42 = vsub.f32 %v3088_v6, %v1478_v8  ;;  %1549 = vadd.xlane.f32.xlu1 %v1548_v60  ;;  %v1545_v62 = vsel %vm32_vm1, %v3153_v48, 0.0  ;;  %v2588_v54 = vld [vmem:[%s3354_s0 + $0x38] sm:$0xff]  }
 0x434   :  { %v1495_v50 = vsub.f32 %v3086_v39, %v1475_v47  ;;  %2543 = vpow2.f32 %v1520_v44  ;;  %1546 = vadd.xlane.f32.xlu0 %v1545_v62  ;;  %v2589_v44 = vld [vmem:[%s3354_s0 + $0x30] sm:$0xff]   ;;  %s2597_s0 = smov 16  }
 0x435   :  { %v3161_v11 = vpop.eup %2533  ;;  %v1526_v14 = vmul.f32 1.442695, %v1496_v42 }
 0x436   :  { %v1524_v49 = vmul.f32 1.442695, %v1495_v50  ;;  %v3163_v55 = vpop.eup %2535  ;;  %v1554_v9 = vsel %vm32_vm1, %v3161_v11, 0.0  ;;  %v1713_v8 = vpop.permute.xlu1 %1712 }
 0x437   :  { %v1481_v53 = vpop.xlane.xlu0 %1480  ;;  %2545 = vpow2.f32 %v1526_v14  ;;  %1555 = vadd.xlane.f32.xlu1 %v1554_v9  ;;  %v1551_v39 = vsel %vm32_vm1, %v3163_v55, 0.0 }
 0x438   :  { %v1497_v6 = vsub.f32 %v3094_v7, %v1481_v53  ;;  %2547 = vpow2.f32 %v1524_v49  ;;  %1552 = vadd.xlane.f32.xlu0 %v1551_v39 }
 0x439   :  { %v3170_v35 = vpop.eup %2537 }
 0x43a   :  { %v1528_v22 = vmul.f32 1.442695, %v1497_v6  ;;  %v3172_v61 = vpop.eup %2539  ;;  %v1560_v25 = vsel %vm32_vm1, %v3170_v35, 0.0  ;;  %v1760_v47 = vpop.permute.xlu1 %1759 }
 0x43b   :  { %v1666_v30 = vpop.permute.xlu0 %1665  ;;  %1561 = vadd.xlane.f32.xlu1 %v1560_v25  ;;  %v1557_v7 = vsel %vm32_vm1, %v3172_v61, 0.0 }
 0x43c   :  { %2549 = vpow2.f32 %v1528_v22  ;;  %2398 = vmatpush3.bf16.msra.mxu1 %v1666_v30  ;;  %1558 = vadd.xlane.f32.xlu0 %v1557_v7 }
 0x43d   :  { %2409 = vmatprep.subr.bf16.mxu1 %v2590_v1  ;;  %v3179_v18 = vpop.eup %2541 }
 0x43e   :  { %v3181_v32 = vpop.eup %2543  ;;  %v1566_v28 = vsel %vm32_vm1, %v3179_v18, 0.0  ;;  %v3207_v60 = vpop.permute.xlu1 %1853 }
 0x43f   :  { %1567 = vadd.xlane.f32.xlu1 %v1566_v28  ;;  %v1563_v16 = vsel %vm32_vm1, %v3181_v32, 0.0  ;;  %v1807_v42 = vpop.permute.xlu0 %1806 }
 0x440   :  { %1564 = vadd.xlane.f32.xlu0 %v1563_v16 }
 0x441   :  { %v3187_v33 = vpop.eup %2545 }
 0x442   :  { %v3189_v41 = vpop.eup %2547  ;;  %v1572_v52 = vsel %vm32_vm1, %v3187_v33, 0.0 }
 0x443   :  { %1573 = vadd.xlane.f32.xlu1 %v1572_v52  ;;  %v1569_v45 = vsel %vm32_vm1, %v3189_v41, 0.0 }
 0x444   :  { %1570 = vadd.xlane.f32.xlu0 %v1569_v45 }
 0x446   :  { %v3195_v31 = vpop.eup %2549 }
 0x447   :  { %v1575_v63 = vsel %vm32_vm1, %v3195_v31, 0.0 }
 0x448   :  { %1576 = vadd.xlane.f32.xlu0 %v1575_v63 }
 0x454   :  { %1947 = vrot.lane.b32.xlu1 %v2588_v54, %s2596_s26 }
 0x45e   :  { %1900 = vrot.lane.b32.xlu0 %v2589_v44, %s2596_s26 }
 0x4b4   :  { %v1532_v50 = vpop.xlane.xlu1 %1531 }
 0x4b5   :  { %2551 = vrcp.f32 %v1532_v50 }
 0x4b6   :  { %v1535_v62 = vpop.xlane.xlu0 %1534 }
 0x4b7   :  { %2553 = vrcp.f32 %v1535_v62 }
 0x4b8   :  { %v1538_v14 = vpop.xlane.xlu1 %1537 }
 0x4b9   :  { %2555 = vrcp.f32 %v1538_v14 }
 0x4bc   :  { %v1544_v49 = vpop.xlane.xlu1 %1543 }
 0x4bd   :  { %v1541_v53 = vpop.xlane.xlu0 %1540 }
 0x4be   :  { %2557 = vrcp.f32 %v1541_v53 }
 0x4bf   :  { %v2552_v9 = vpop.eup %2551  ;;  %2559 = vrcp.f32 %v1544_v49 }
 0x4c0   :  { %v1550_v6 = vpop.xlane.xlu1 %1549  ;;  %v1579_v25 = vmul.f32 %v2552_v9, %v3125_v56 }
 0x4c1   :  { %v2554_v39 = vpop.eup %2553  ;;  %v1547_v22 = vpop.xlane.xlu0 %1546 }
 0x4c2   :  { %v1581_v30 = vmul.f32 %v2554_v39, %v3129_v57  ;;  %2561 = vrcp.f32 %v1547_v22 }
 0x4c3   :  { %2563 = vrcp.f32 %v1550_v6  ;;  %v2556_v52 = vpop.eup %2555 }
 0x4c4   :  { %v1556_v7 = vpop.xlane.xlu1 %1555  ;;  %v1610_v28 = vpack.c.bf16 %v1581_v30, %v1579_v25  ;;  %v1583_v56 = vmul.f32 %v2556_v52, %v3135_v13 }
 0x4c5   :  { %v1553_v16 = vpop.xlane.xlu0 %1552 }
 0x4c6   :  { %2565 = vrcp.f32 %v1553_v16  ;;  %2394 = vmatmul.mubr.msk.bf16.vlgmr.msra.gmra.mrb[48].mxu0 %vm32_vm1, %v1610_v28 }
 0x4c7   :  { %2404 = vmatpush3.bf16.msra.mxu0 %v1713_v8  ;;  %2405 = vmatprep.mubr.msk.bf16.mxu0 %vm2591_vm0, %v2590_v1  ;;  %2567 = vrcp.f32 %v1556_v7 }
 0x4c8   :  { %v2558_v45 = vpop.eup %2557  ;;  %v1562_v63 = vpop.xlane.xlu1 %1561  ;;  %2415 = vmatprep.subr.bf16.mxu0 %v2590_v1 }
 0x4c9   :  { %v1585_v57 = vmul.f32 %v2558_v45, %v3143_v46  ;;  %v1559_v54 = vpop.xlane.xlu0 %1558  ;;  %v2560_v44 = vpop.eup %2559 }
 0x4ca   :  { %2569 = vrcp.f32 %v1559_v54  ;;  %v1587_v8 = vmul.f32 %v2560_v44, %v3141_v34 }
 0x4cb   :  { %v1611_v50 = vpack.c.bf16 %v1585_v57, %v1583_v56  ;;  %2571 = vrcp.f32 %v1562_v63 }
 0x4cc   :  { %v2562_v62 = vpop.eup %2561  ;;  %v1568_v14 = vpop.xlane.xlu1 %1567 }
 0x4cd   :  { %v1589_v49 = vmul.f32 %v2562_v62, %v3153_v48  ;;  %2400 = vmatmul.mubr.msk.bf16.vlgmr.msra.gmra.mrb[48].mxu1 %vm32_vm1, %v1611_v50  ;;  %v1565_v53 = vpop.xlane.xlu0 %1564  ;;  %v2564_v9 = vpop.eup %2563 }
 0x4ce   :  { %2410 = vmatpush3.bf16.msra.mxu1 %v1760_v47  ;;  %2573 = vrcp.f32 %v1565_v53  ;;  %2411 = vmatprep.mubr.msk.bf16.mxu1 %vm2591_vm0, %v2590_v1  ;;  %v1591_v6 = vmul.f32 %v2564_v9, %v3151_v5 }
 0x4cf   :  { %v1612_v13 = vpack.c.bf16 %v1589_v49, %v1587_v8  ;;  %2421 = vmatprep.subr.bf16.mxu1 %v2590_v1  ;;  %2575 = vrcp.f32 %v1568_v14 }
 0x4d0   :  { %v2566_v46 = vpop.eup %2565  ;;  %v1574_v39 = vpop.xlane.xlu1 %1573 }
 0x4d1   :  { %v1593_v34 = vmul.f32 %v2566_v46, %v3163_v55  ;;  %2406 = vmatmul.mubr.msk.bf16.vlgmr.msra.gmra.mrb[52].mxu0 %vm32_vm1, %v1612_v13  ;;  %v1571_v48 = vpop.xlane.xlu0 %1570  ;;  %v2568_v22 = vpop.eup %2567 }
 0x4d2   :  { %2416 = vmatpush3.bf16.msra.mxu0 %v1807_v42  ;;  %2577 = vrcp.f32 %v1571_v48  ;;  %2417 = vmatprep.mubr.msk.bf16.mxu0 %vm2591_vm0, %v2590_v1  ;;  %v1595_v30 = vmul.f32 %v2568_v22, %v3161_v11 }
 0x4d3   :  { %v1613_v47 = vpack.c.bf16 %v1593_v34, %v1591_v6  ;;  %2427 = vmatprep.subr.bf16.mxu0 %v2590_v1  ;;  %2579 = vrcp.f32 %v1574_v39 }
 0x4d4   :  { %v2570_v25 = vpop.eup %2569 }
 0x4d5   :  { %v1597_v5 = vmul.f32 %v2570_v25, %v3172_v61  ;;  %2412 = vmatmul.mubr.msk.bf16.vlgmr.msra.gmra.mrb[52].mxu1 %vm32_vm1, %v1613_v47  ;;  %v1577_v55 = vpop.xlane.xlu0 %1576  ;;  %v2572_v7 = vpop.eup %2571 }
 0x4d6   :  { %2422 = vmatpush3.bf16.msra.mxu1 %v3207_v60  ;;  %2581 = vrcp.f32 %v1577_v55  ;;  %2423 = vmatprep.mubr.msk.bf16.mxu1 %vm2591_vm0, %v2590_v1  ;;  %v1599_v16 = vmul.f32 %v2572_v7, %v3170_v35  ;;  %v1948_v60 = vpop.permute.xlu1 %1947 }
 0x4d7   :  { %v1614_v42 = vpack.c.bf16 %v1597_v5, %v1595_v30  ;;  %2433 = vmatprep.subr.bf16.mxu1 %v2590_v1 }
 0x4d8   :  { %v2574_v28 = vpop.eup %2573 }
 0x4d9   :  { %v1601_v11 = vmul.f32 %v2574_v28, %v3181_v32  ;;  %2418 = vmatmul.mubr.msk.bf16.vlgmr.msra.gmra.mrb[56].mxu0 %vm32_vm1, %v1614_v42  ;;  %v1901_v61 = vpop.permute.xlu0 %1900  ;;  %v2576_v52 = vpop.eup %2575 }
 0x4da   :  { %2428 = vmatpush3.bf16.msra.mxu0 %v1901_v61  ;;  %2429 = vmatprep.mubr.msk.bf16.mxu0 %vm2591_vm0, %v2590_v1  ;;  %v1603_v56 = vmul.f32 %v2576_v52, %v3179_v18 }
 0x4db   :  { %v1615_v45 = vpack.c.bf16 %v1601_v11, %v1599_v16 }
 0x4dc   :  { %v2578_v63 = vpop.eup %2577 }
 0x4dd   :  { %v1605_v57 = vmul.f32 %v2578_v63, %v3189_v41  ;;  %2424 = vmatmul.mubr.msk.bf16.vlgmr.msra.gmra.mrb[56].mxu1 %vm32_vm1, %v1615_v45  ;;  %v2580_v35 = vpop.eup %2579 }
 0x4de   :  { %2434 = vmatpush3.bf16.msra.mxu1 %v1948_v60  ;;  %2435 = vmatprep.mubr.msk.bf16.mxu1 %vm2591_vm0, %v2590_v1  ;;  %v1607_v44 = vmul.f32 %v2580_v35, %v3187_v33 }
 0x4df   :  { %v1616_v32 = vpack.c.bf16 %v1605_v57, %v1603_v56 }
 0x4e0   :  { %v2582_v54 = vpop.eup %2581 }
 0x4e1   :  { %v1609_v50 = vmul.f32 %v2582_v54, %v3195_v31  ;;  %2430 = vmatmul.mubr.msk.bf16.vlgmr.msra.gmra.mrb[60].mxu0 %vm32_vm1, %v1616_v32 }
 0x4e3   :  { %v1617_v62 = vpack.c.bf16 %v1609_v50, %v1607_v44 }
 0x4e5   :  { %2436 = vmatmul.mubr.msk.bf16.vlgmr.msra.gmra.mrb[60].mxu1 %vm32_vm1, %v1617_v62 }
 0x599   :  { %v1658_v18 = vpop.f32.mrb[48].mxu0 }
 0x59a   :  { %v2395_v41 = vpop.f32.mrb[49].mxu0 }
 0x59b   :  { %v1661_v14 = vpop.f32.mrb[50].mxu0 }
 0x59c   :  { %v1994_v8 = vpack.c.bf16 %v1661_v14, %v1658_v18  ;;  %v2396_v49 = vpop.f32.mrb[51].mxu0 }
 0x59e   :  { %2010 = vrot.lane.b32.xlu0 %v1994_v8, %s2597_s0 }
 0x5a0   :  { %v1705_v1 = vpop.f32.mrb[48].mxu1 }
 0x5a1   :  { %v2401_v53 = vpop.f32.mrb[49].mxu1 }
 0x5a2   :  { %v1708_v9 = vpop.f32.mrb[50].mxu1 }
 0x5a3   :  { %v1995_v13 = vpack.c.bf16 %v1708_v9, %v1705_v1  ;;  %v2402_v33 = vpop.f32.mrb[51].mxu1 }
 0x5a4   :  { %v1752_v46 = vpop.f32.mrb[52].mxu0 }
 0x5a5   :  { %2012 = vrot.lane.b32.xlu1 %v1995_v13, %s2597_s0  ;;  %v2407_v31 = vpop.f32.mrb[53].mxu0 }
 0x5a6   :  { %v1755_v6 = vpop.f32.mrb[54].mxu0 }
 0x5a7   :  { %v1996_v34 = vpack.c.bf16 %v1755_v6, %v1752_v46  ;;  %v2408_v39 = vpop.f32.mrb[55].mxu0 }
 0x5a8   :  { %v1799_v48 = vpop.f32.mrb[52].mxu1 }
 0x5a9   :  { %2014 = vrot.lane.b32.xlu0 %v1996_v34, %s2597_s0  ;;  %v2413_v22 = vpop.f32.mrb[53].mxu1 }
 0x5aa   :  { %v1802_v47 = vpop.f32.mrb[54].mxu1 }
 0x5ab   :  { %v1997_v25 = vpack.c.bf16 %v1802_v47, %v1799_v48  ;;  %v2414_v30 = vpop.f32.mrb[55].mxu1 }
 0x5ac   :  { %v1846_v5 = vpop.f32.mrb[56].mxu0 }
 0x5ad   :  { %2016 = vrot.lane.b32.xlu1 %v1997_v25, %s2597_s0  ;;  %v2419_v55 = vpop.f32.mrb[57].mxu0 }
 0x5ae   :  { %v1849_v7 = vpop.f32.mrb[58].mxu0 }
 0x5af   :  { %v1998_v42 = vpack.c.bf16 %v1849_v7, %v1846_v5  ;;  %v2420_v28 = vpop.f32.mrb[59].mxu0 }
 0x5b0   :  { %v1893_v16 = vpop.f32.mrb[56].mxu1 }
 0x5b1   :  { %2018 = vrot.lane.b32.xlu0 %v1998_v42, %s2597_s0  ;;  %v2425_v11 = vpop.f32.mrb[57].mxu1 }
 0x5b2   :  { %v1896_v61 = vpop.f32.mrb[58].mxu1 }
 0x5b3   :  { %v1999_v52 = vpack.c.bf16 %v1896_v61, %v1893_v16  ;;  %v2426_v60 = vpop.f32.mrb[59].mxu1 }
 0x5b4   :  { %v1940_v45 = vpop.f32.mrb[60].mxu0 }
 0x5b5   :  { %2020 = vrot.lane.b32.xlu1 %v1999_v52, %s2597_s0  ;;  %v2431_v63 = vpop.f32.mrb[61].mxu0 }
 0x5b6   :  { %v1943_v56 = vpop.f32.mrb[62].mxu0 }
 0x5b7   :  { %v2000_v57 = vpack.c.bf16 %v1943_v56, %v1940_v45  ;;  %v2432_v35 = vpop.f32.mrb[63].mxu0 }
 0x5b8   :  { %v1987_v32 = vpop.f32.mrb[60].mxu1 }
 0x5b9   :  { %v2437_v54 = vpop.f32.mrb[61].mxu1  ;;  %2022 = vrot.lane.b32.xlu0 %v2000_v57, %s2597_s0 }
 0x5ba   :  { %v1990_v44 = vpop.f32.mrb[62].mxu1 }
 0x5bb   :  { %v2001_v50 = vpack.c.bf16 %v1990_v44, %v1987_v32  ;;  %v2438_v62 = vpop.f32.mrb[63].mxu1 }
 0x5bd   :  { %2024 = vrot.lane.b32.xlu1 %v2001_v50, %s2597_s0 }
 0x610   :  { %v2011_v18 = vpop.permute.xlu0 %2010 }
 0x611   :  { %v2028_v41 = vsel %vm32_vm1, %v1018_v21, %v2011_v18 }
 0x612   :  { %v2167_v14 = vcombine.low %v2028_v41, %v2028_v41  ;;  %v2168_v8 = vcombine.high %v2028_v41, %v2028_v41 }
 0x614   :  { %2107 = vst.msk [vmem:[%s3355_s1] sm:$0xf] %vm2106_vm2, %v2167_v14  ;;  %2108 = vst.msk [vmem:[%s3355_s1 + $0x4] sm:$0xf] %vm2106_vm2, %v2168_v8 }
 0x617   :  { %v2013_v49 = vpop.permute.xlu1 %2012 }
 0x618   :  { %v2031_v17 = vsel %vm32_vm1, %v1019_v0, %v2013_v49 }
 0x619   :  { %v2169_v20 = vcombine.low %v2031_v17, %v2031_v17  ;;  %v2170_v21 = vcombine.high %v2031_v17, %v2031_v17 }
 0x61b   :  { %2109 = vst.msk [vmem:[%s3355_s1 + $0x8] sm:$0xf] %vm2106_vm2, %v2169_v20  ;;  %2110 = vst.msk [vmem:[%s3355_s1 + $0xc] sm:$0xf] %vm2106_vm2, %v2170_v21  ;;  %v2015_v1 = vpop.permute.xlu0 %2014 }
 0x61c   :  { %v2034_v59 = vsel %vm32_vm1, %v1020_v58, %v2015_v1 }
 0x61d   :  { %v2171_v23 = vcombine.low %v2034_v59, %v2034_v59  ;;  %v2172_v0 = vcombine.high %v2034_v59, %v2034_v59 }
 0x61f   :  { %2111 = vst.msk [vmem:[%s3355_s1 + $0x10] sm:$0xf] %vm2106_vm2, %v2171_v23  ;;  %2112 = vst.msk [vmem:[%s3355_s1 + $0x14] sm:$0xf] %vm2106_vm2, %v2172_v0  ;;  %v2017_v53 = vpop.permute.xlu1 %2016 }
 0x620   :  { %v2037_v43 = vsel %vm32_vm1, %v1021_v10, %v2017_v53 }
 0x621   :  { %v2173_v27 = vcombine.low %v2037_v43, %v2037_v43  ;;  %v2174_v58 = vcombine.high %v2037_v43, %v2037_v43 }
 0x623   :  { %2113 = vst.msk [vmem:[%s3355_s1 + $0x18] sm:$0xf] %vm2106_vm2, %v2173_v27  ;;  %2114 = vst.msk [vmem:[%s3355_s1 + $0x1c] sm:$0xf] %vm2106_vm2, %v2174_v58  ;;  %v2019_v9 = vpop.permute.xlu0 %2018 }
 0x624   :  { %v2040_v19 = vsel %vm32_vm1, %v1022_v38, %v2019_v9 }
 0x625   :  { %v2175_v12 = vcombine.low %v2040_v19, %v2040_v19  ;;  %v2176_v10 = vcombine.high %v2040_v19, %v2040_v19 }
 0x627   :  { %2115 = vst.msk [vmem:[%s3355_s1 + $0x20] sm:$0xf] %vm2106_vm2, %v2175_v12  ;;  %2116 = vst.msk [vmem:[%s3355_s1 + $0x24] sm:$0xf] %vm2106_vm2, %v2176_v10  ;;  %v2021_v13 = vpop.permute.xlu1 %2020 }
 0x628   :  { %v2043_v15 = vsel %vm32_vm1, %v1023_v36, %v2021_v13 }
 0x629   :  { %v2177_v26 = vcombine.low %v2043_v15, %v2043_v15  ;;  %v2178_v38 = vcombine.high %v2043_v15, %v2043_v15 }
 0x62b   :  { %2117 = vst.msk [vmem:[%s3355_s1 + $0x28] sm:$0xf] %vm2106_vm2, %v2177_v26  ;;  %2118 = vst.msk [vmem:[%s3355_s1 + $0x2c] sm:$0xf] %vm2106_vm2, %v2178_v38  ;;  %v2023_v33 = vpop.permute.xlu0 %2022 }
 0x62c   :  { %v2046_v40 = vsel %vm32_vm1, %v1024_v4, %v2023_v33 }
 0x62d   :  { %v2179_v24 = vcombine.low %v2046_v40, %v2046_v40  ;;  %v2180_v36 = vcombine.high %v2046_v40, %v2046_v40 }
 0x62f   :  { %2119 = vst.msk [vmem:[%s3355_s1 + $0x30] sm:$0xf] %vm2106_vm2, %v2179_v24  ;;  %2120 = vst.msk [vmem:[%s3355_s1 + $0x34] sm:$0xf] %vm2106_vm2, %v2180_v36  ;;  %v2025_v46 = vpop.permute.xlu1 %2024 }
 0x630   :  { %v2049_v37 = vsel %vm32_vm1, %v1025_v3, %v2025_v46 }
 0x631   :  { %v2181_v2 = vcombine.low %v2049_v37, %v2049_v37  ;;  %v2182_v4 = vcombine.high %v2049_v37, %v2049_v37 }
 0x633   :  { %2121 = vst.msk [vmem:[%s3355_s1 + $0x38] sm:$0xf] %vm2106_vm2, %v2181_v2  ;;  %2122 = vst.msk [vmem:[%s3355_s1 + $0x3c] sm:$0xf] %vm2106_vm2, %v2182_v4 }

// kernel: _lambda_.40
= control target key start
LH: loop header
LB: loop body
LE: loop exit
PB: predicated region body
PF: predicated region fallthrough
CT: control target
= control target key end

     0   :  { %s739_s1 = inlined_call_operand.vmem [shape: bf16[128,128], index: 1, kind: input, shape index: {}]   ;;  %s740_s0 = inlined_call_operand.vmem [shape: bf16[128,128], index: 0, kind: input, shape index: {}]   ;;  %s741_s3 = inlined_call_operand.vmem [shape: bf16[128,128], index: 3, kind: input, shape index: {}]   ;;  %s742_s2 = inlined_call_operand.vmem [shape: f32[1,128], index: 2, kind: input, shape index: {}]   ;;  %s743_s4 = inlined_call_operand.vmem [shape: bf16[128,128], index: 4, kind: output, shape index: {}]  }
   0x1   :  { %v581_v0 = vld [vmem:[%s739_s1] sm:$0xff]   ;;  %v582_v1 = vld [vmem:[%s739_s1 + $0x8] sm:$0xff]   ;;  %v583_v2 = vld [vmem:[%s739_s1 + $0x10] sm:$0xff]  }
   0x2   :  { %533 = vmatprep.subr.bf16.mxu0 %v581_v0  ;;  %565 = vmatprep.subr.bf16.mxu1 %v581_v0  ;;  %v584_v3 = vld [vmem:[%s739_s1 + $0x18] sm:$0xff]   ;;  %v589_v4 = vld [vmem:[%s740_s0] sm:$0xff]   ;;  %v586_v7 = vld [vmem:[%s739_s1 + $0x28] sm:$0xff]  }
   0x3   :  { %534 = vmatpush3.bf16.msra.mxu0 %v581_v0  ;;  %573 = vmatpush3.bf16.msra.mxu1 %v581_v0  ;;  %v590_v5 = vld [vmem:[%s740_s0 + $0x20] sm:$0xff]   ;;  %v587_v8 = vld [vmem:[%s739_s1 + $0x30] sm:$0xff]   ;;  %v588_v9 = vld [vmem:[%s739_s1 + $0x38] sm:$0xff]  }
   0x4   :  { %535 = vmatprep.subr.bf16.mxu0 %v582_v1  ;;  %566 = vmatprep.subr.bf16.mxu1 %v582_v1  ;;  %v585_v6 = vld [vmem:[%s739_s1 + $0x20] sm:$0xff]   ;;  %v591_v10 = vld [vmem:[%s740_s0 + $0x8] sm:$0xff]   ;;  %v593_v12 = vld [vmem:[%s740_s0 + $0x10] sm:$0xff]  }
   0x5   :  { %549 = vmatprep.mubr.bf16.mxu0 %v589_v4  ;;  %557 = vmatprep.mubr.bf16.mxu1 %v590_v5  ;;  %v592_v11 = vld [vmem:[%s740_s0 + $0x28] sm:$0xff]   ;;  %v594_v13 = vld [vmem:[%s740_s0 + $0x30] sm:$0xff]   ;;  %v595_v14 = vld [vmem:[%s740_s0 + $0x18] sm:$0xff]  }
   0x6   :  { %v596_v15 = vld [vmem:[%s740_s0 + $0x38] sm:$0xff]   ;;  %v503_v16 = vld [vmem:[%s741_s3 + $0x8] sm:$0xff]   ;;  %v432_v18 = vld [vmem:[%s741_s3] sm:$0xff]  }
   0x7   :  { %536 = vmatpush3.bf16.msra.mxu0 %v582_v1  ;;  %574 = vmatpush3.bf16.msra.mxu1 %v582_v1  ;;  %v507_v17 = vld [vmem:[%s741_s3 + $0x28] sm:$0xff]   ;;  %v506_v19 = vld [vmem:[%s741_s3 + $0x20] sm:$0xff]   ;;  %v437_v22 = vunpack.c.l.bf16 %v503_v16  ;;  %v433_v25 = vunpack.c.l.bf16 %v432_v18  ;;  %v438_v31 = vunpack.c.h.bf16 %v503_v16  ;;  %v434_v37 = vunpack.c.h.bf16 %v432_v18  ;;  %v505_v45 = vld [vmem:[%s741_s3 + $0x18] sm:$0xff]  }
   0x8   :  { %537 = vmatprep.subr.bf16.mxu0 %v583_v2  ;;  %567 = vmatprep.subr.bf16.mxu1 %v583_v2  ;;  %v685_v20 = vld [vmem:[%s742_s2] ss:$0 sm:$0xff]  ;;  %v453_v24 = vunpack.c.l.bf16 %v507_v17  ;;  %v449_v26 = vunpack.c.l.bf16 %v506_v19  ;;  %v454_v32 = vunpack.c.h.bf16 %v507_v17  ;;  %v450_v38 = vunpack.c.h.bf16 %v506_v19  ;;  %v509_v46 = vld [vmem:[%s741_s3 + $0x38] sm:$0xff]   ;;  %v504_v51 = vld [vmem:[%s741_s3 + $0x10] sm:$0xff]  }
   0x9   :  { %v508_v52 = vld [vmem:[%s741_s3 + $0x30] sm:$0xff]   ;;  %v445_v59 = vunpack.c.l.bf16 %v505_v45  ;;  %v461_v60 = vunpack.c.l.bf16 %v509_v46  ;;  %v441_v1 = vunpack.c.l.bf16 %v504_v51 }
   0xb   :  { %538 = vmatpush3.bf16.msra.mxu0 %v583_v2  ;;  %575 = vmatpush3.bf16.msra.mxu1 %v583_v2  ;;  %v457_v2 = vunpack.c.l.bf16 %v508_v52 }
   0xc   :  { %539 = vmatprep.subr.bf16.mxu0 %v584_v3  ;;  %568 = vmatprep.subr.bf16.mxu1 %v584_v3 }
   0xf   :  { %540 = vmatpush3.bf16.msra.mxu0 %v584_v3  ;;  %576 = vmatpush3.bf16.msra.mxu1 %v584_v3 }
  0x10   :  { %541 = vmatprep.subr.bf16.mxu0 %v585_v6  ;;  %569 = vmatprep.subr.bf16.mxu1 %v585_v6 }
  0x13   :  { %542 = vmatpush3.bf16.msra.mxu0 %v585_v6  ;;  %577 = vmatpush3.bf16.msra.mxu1 %v585_v6 }
  0x14   :  { %543 = vmatprep.subr.bf16.mxu0 %v586_v7  ;;  %570 = vmatprep.subr.bf16.mxu1 %v586_v7 }
  0x17   :  { %544 = vmatpush3.bf16.msra.mxu0 %v586_v7  ;;  %578 = vmatpush3.bf16.msra.mxu1 %v586_v7  ;;  %v446_v7 = vunpack.c.h.bf16 %v505_v45 }
  0x18   :  { %545 = vmatprep.subr.bf16.mxu0 %v587_v8  ;;  %571 = vmatprep.subr.bf16.mxu1 %v587_v8 }
  0x1b   :  { %546 = vmatpush3.bf16.msra.mxu0 %v587_v8  ;;  %579 = vmatpush3.bf16.msra.mxu1 %v587_v8  ;;  %v462_v8 = vunpack.c.h.bf16 %v509_v46 }
  0x1c   :  { %547 = vmatprep.subr.bf16.mxu0 %v588_v9  ;;  %572 = vmatprep.subr.bf16.mxu1 %v588_v9 }
  0x1f   :  { %548 = vmatpush3.bf16.msra.mxu0 %v588_v9  ;;  %580 = vmatpush3.bf16.msra.mxu1 %v588_v9 }
  0x22   :  { %550 = vmatmul.mubr.bf16.vlgmr.msra.gmra.mrb[0].mxu0 %v591_v10  ;;  %558 = vmatmul.mubr.bf16.vlgmr.msra.gmra.mrb[0].mxu1 %v592_v11 }
  0x23   :  { %553 = vmatprep.mubr.bf16.mxu0 %v593_v12  ;;  %561 = vmatprep.mubr.bf16.mxu1 %v594_v13  ;;  %v442_v13 = vunpack.c.h.bf16 %v504_v51 }
  0x2a   :  { %554 = vmatmul.mubr.bf16.gmra.mrb[4].mxu0 %v595_v14  ;;  %562 = vmatmul.mubr.bf16.gmra.mrb[4].mxu1 %v596_v15  ;;  %v458_v14 = vunpack.c.h.bf16 %v508_v52 }
  0xf5   :  { %v551_v21 = vpop.f32.mrb[0].mxu0  ;;  %v559_v23 = vpop.f32.mrb[0].mxu1 }
  0xf6   :  { %v196_v27 = vadd.f32 %v551_v21, %v685_v20  ;;  %v228_v28 = vadd.f32 %v559_v23, %v685_v20  ;;  %v187_v29 = vpop.f32.mrb[1].mxu0  ;;  %v219_v30 = vpop.f32.mrb[1].mxu1 }
  0xf7   :  { %v188_v33 = vadd.f32 %v685_v20, %v187_v29  ;;  %v220_v34 = vadd.f32 %v685_v20, %v219_v30  ;;  %v552_v35 = vpop.f32.mrb[2].mxu0  ;;  %v560_v36 = vpop.f32.mrb[2].mxu1 }
  0xf8   :  { %v199_v39 = vadd.f32 %v552_v35, %v685_v20  ;;  %v231_v40 = vadd.f32 %v560_v36, %v685_v20  ;;  %v190_v41 = vpop.f32.mrb[3].mxu0  ;;  %v222_v42 = vpop.f32.mrb[3].mxu1  ;;  %v284_v47 = vadd.f32 %v437_v22, %v196_v27  ;;  %v292_v48 = vadd.f32 %v453_v24, %v228_v28 }
  0xf9   :  { %v191_v43 = vadd.f32 %v685_v20, %v190_v41  ;;  %v223_v44 = vadd.f32 %v685_v20, %v222_v42  ;;  %v282_v53 = vadd.f32 %v433_v25, %v188_v33  ;;  %v290_v54 = vadd.f32 %v449_v26, %v220_v34 }
  0xfa   :  { %v285_v49 = vadd.f32 %v438_v31, %v199_v39  ;;  %v293_v50 = vadd.f32 %v454_v32, %v231_v40 }
  0xfb   :  { %v283_v55 = vadd.f32 %v434_v37, %v191_v43  ;;  %v291_v56 = vadd.f32 %v450_v38, %v223_v44 }
  0xfc   :  { %v471_v57 = vpack.c.bf16 %v285_v49, %v284_v47  ;;  %v491_v58 = vpack.c.bf16 %v293_v50, %v292_v48 }
  0xfd   :  { %v466_v61 = vpack.c.bf16 %v283_v55, %v282_v53  ;;  %v486_v62 = vpack.c.bf16 %v291_v56, %v290_v54  ;;  %v555_v63 = vpop.f32.mrb[4].mxu0  ;;  %v563_v0 = vpop.f32.mrb[4].mxu1 }
  0xfe   :  { %510 = vst [vmem:[%s743_s4 + $0x8] sm:$0xff] %v471_v57   ;;  %514 = vst [vmem:[%s743_s4 + $0x28] sm:$0xff] %v491_v58   ;;  %v212_v3 = vadd.f32 %v555_v63, %v685_v20  ;;  %v244_v4 = vadd.f32 %v563_v0, %v685_v20  ;;  %v203_v5 = vpop.f32.mrb[5].mxu0  ;;  %v235_v6 = vpop.f32.mrb[5].mxu1 }
  0xff   :  { %467 = vst [vmem:[%s743_s4] sm:$0xff] %v466_v61   ;;  %513 = vst [vmem:[%s743_s4 + $0x20] sm:$0xff] %v486_v62   ;;  %v204_v9 = vadd.f32 %v685_v20, %v203_v5  ;;  %v236_v10 = vadd.f32 %v685_v20, %v235_v6  ;;  %v556_v11 = vpop.f32.mrb[6].mxu0  ;;  %v564_v12 = vpop.f32.mrb[6].mxu1 }
 0x100   :  { %v215_v15 = vadd.f32 %v556_v11, %v685_v20  ;;  %v247_v16 = vadd.f32 %v564_v12, %v685_v20  ;;  %v206_v17 = vpop.f32.mrb[7].mxu0  ;;  %v238_v18 = vpop.f32.mrb[7].mxu1  ;;  %v288_v22 = vadd.f32 %v445_v59, %v212_v3  ;;  %v296_v23 = vadd.f32 %v461_v60, %v244_v4 }
 0x101   :  { %v207_v19 = vadd.f32 %v685_v20, %v206_v17  ;;  %v239_v21 = vadd.f32 %v685_v20, %v238_v18  ;;  %v286_v26 = vadd.f32 %v441_v1, %v204_v9  ;;  %v294_v27 = vadd.f32 %v457_v2, %v236_v10 }
 0x102   :  { %v289_v24 = vadd.f32 %v446_v7, %v215_v15  ;;  %v297_v25 = vadd.f32 %v462_v8, %v247_v16 }
 0x103   :  { %v287_v28 = vadd.f32 %v442_v13, %v207_v19  ;;  %v295_v29 = vadd.f32 %v458_v14, %v239_v21 }
 0x104   :  { %v481_v30 = vpack.c.bf16 %v289_v24, %v288_v22  ;;  %v501_v31 = vpack.c.bf16 %v297_v25, %v296_v23 }
 0x105   :  { %v476_v32 = vpack.c.bf16 %v287_v28, %v286_v26  ;;  %v496_v33 = vpack.c.bf16 %v295_v29, %v294_v27 }
 0x106   :  { %512 = vst [vmem:[%s743_s4 + $0x18] sm:$0xff] %v481_v30   ;;  %516 = vst [vmem:[%s743_s4 + $0x38] sm:$0xff] %v501_v31  }
 0x107   :  { %511 = vst [vmem:[%s743_s4 + $0x10] sm:$0xff] %v476_v32   ;;  %515 = vst [vmem:[%s743_s4 + $0x30] sm:$0xff] %v496_v33  }

// kernel: _lambda_.39
= control target key start
LH: loop header
LB: loop body
LE: loop exit
PB: predicated region body
PF: predicated region fallthrough
CT: control target
= control target key end

     0   :  { %vm53_vm0 = vcmask 261120   ;;  %s1884_s0 = inlined_call_operand.vmem [shape: bf16[128,32], index: 0, kind: input, shape index: {}]   ;;  %s1885_s3 = inlined_call_operand.vmem [shape: bf16[32,128], index: 3, kind: input, shape index: {}]   ;;  %s1886_s1 = inlined_call_operand.vmem [shape: f32[1,32], index: 1, kind: input, shape index: {}]   ;;  %s1887_s2 = inlined_call_operand.vmem [shape: f32[1,32], index: 2, kind: input, shape index: {}]   ;;  %s1888_s4 = inlined_call_operand.vmem [shape: f32[1,128], index: 4, kind: input, shape index: {}]   ;;  %s1889_s5 = inlined_call_operand.vmem [shape: bf16[128,128], index: 5, kind: output, shape index: {}]  }
   0x1   :  { %v1273_v0 = vld [vmem:[%s1884_s0] sm:$0xff]   ;;  %v1287_v6 = vld [vmem:[%s1884_s0 + $0x8] sm:$0xff]   ;;  %v1315_v18 = vld [vmem:[%s1884_s0 + $0x10] sm:$0xff]  }
   0x2   :  { %v1278_v1 = vld [vmem:[%s1884_s0 + $0x20] sm:$0xff]   ;;  %v1024_v2 = vunpack.c.l.bf16 %v1273_v0  ;;  %v1025_v4 = vunpack.c.h.bf16 %v1273_v0  ;;  %v1028_v11 = vunpack.c.l.bf16 %v1287_v6  ;;  %v1029_v12 = vunpack.c.h.bf16 %v1287_v6  ;;  %v1302_v13 = vld [vmem:[%s1884_s0 + $0x28] sm:$0xff]   ;;  %v1328_v23 = vld [vmem:[%s1884_s0 + $0x30] sm:$0xff]  }
   0x3   :  { %v1040_v3 = vunpack.c.l.bf16 %v1278_v1  ;;  %v1041_v5 = vunpack.c.h.bf16 %v1278_v1  ;;  %v1044_v16 = vunpack.c.l.bf16 %v1302_v13  ;;  %v1045_v17 = vunpack.c.h.bf16 %v1302_v13  ;;  %v1341_v28 = vld [vmem:[%s1884_s0 + $0x18] sm:$0xff]  }
   0x4   :  { %v54_v7 = vsel %vm53_vm0, %v1024_v2, 0.0  ;;  %v57_v9 = vsel %vm53_vm0, %v1025_v4, 0.0  ;;  %v60_v14 = vsel %vm53_vm0, %v1028_v11, 0.0  ;;  %v63_v15 = vsel %vm53_vm0, %v1029_v12, 0.0  ;;  %v1354_v33 = vld [vmem:[%s1884_s0 + $0x38] sm:$0xff]  }
   0x5   :  { %v78_v8 = vsel %vm53_vm0, %v1040_v3, 0.0  ;;  %55 = vadd.xlane.f32.xlu0 %v54_v7  ;;  %v81_v10 = vsel %vm53_vm0, %v1041_v5, 0.0  ;;  %v84_v19 = vsel %vm53_vm0, %v1044_v16, 0.0  ;;  %v87_v20 = vsel %vm53_vm0, %v1045_v17, 0.0 }
   0x6   :  { %79 = vadd.xlane.f32.xlu1 %v78_v8  ;;  %v1032_v21 = vunpack.c.l.bf16 %v1315_v18  ;;  %v1033_v22 = vunpack.c.h.bf16 %v1315_v18  ;;  %v1048_v26 = vunpack.c.l.bf16 %v1328_v23  ;;  %v1049_v27 = vunpack.c.h.bf16 %v1328_v23 }
   0x7   :  { %v1036_v31 = vunpack.c.l.bf16 %v1341_v28  ;;  %v1037_v32 = vunpack.c.h.bf16 %v1341_v28  ;;  %v1052_v36 = vunpack.c.l.bf16 %v1354_v33  ;;  %v1053_v37 = vunpack.c.h.bf16 %v1354_v33 }
   0x8   :  { %v66_v24 = vsel %vm53_vm0, %v1032_v21, 0.0  ;;  %v69_v25 = vsel %vm53_vm0, %v1033_v22, 0.0  ;;  %v90_v29 = vsel %vm53_vm0, %v1048_v26, 0.0  ;;  %v93_v30 = vsel %vm53_vm0, %v1049_v27, 0.0 }
   0x9   :  { %58 = vadd.xlane.f32.xlu0 %v57_v9  ;;  %v72_v34 = vsel %vm53_vm0, %v1036_v31, 0.0  ;;  %v75_v35 = vsel %vm53_vm0, %v1037_v32, 0.0  ;;  %v96_v38 = vsel %vm53_vm0, %v1052_v36, 0.0  ;;  %v99_v39 = vsel %vm53_vm0, %v1053_v37, 0.0 }
   0xa   :  { %82 = vadd.xlane.f32.xlu1 %v81_v10 }
   0xd   :  { %61 = vadd.xlane.f32.xlu0 %v60_v14 }
   0xe   :  { %64 = vadd.xlane.f32.xlu1 %v63_v15 }
  0x11   :  { %85 = vadd.xlane.f32.xlu0 %v84_v19 }
  0x12   :  { %88 = vadd.xlane.f32.xlu1 %v87_v20 }
  0x15   :  { %67 = vadd.xlane.f32.xlu0 %v66_v24 }
  0x16   :  { %70 = vadd.xlane.f32.xlu1 %v69_v25 }
  0x19   :  { %91 = vadd.xlane.f32.xlu0 %v90_v29 }
  0x1a   :  { %94 = vadd.xlane.f32.xlu1 %v93_v30 }
  0x1d   :  { %73 = vadd.xlane.f32.xlu0 %v72_v34 }
  0x1e   :  { %76 = vadd.xlane.f32.xlu1 %v75_v35 }
  0x21   :  { %97 = vadd.xlane.f32.xlu0 %v96_v38 }
  0x22   :  { %100 = vadd.xlane.f32.xlu1 %v99_v39 }
  0x92   :  { %v56_v40 = vpop.xlane.xlu0 %55 }
  0x93   :  { %v80_v41 = vpop.xlane.xlu1 %79  ;;  %v103_v42 = vmul.f32 0.03125, %v56_v40 }
  0x94   :  { %v111_v43 = vmul.f32 0.03125, %v80_v41 }
  0x95   :  { %v1370_v44 = vsub.f32 %v1024_v2, %v103_v42 }
  0x96   :  { %v1372_v45 = vsub.f32 %v1040_v3, %v111_v43  ;;  %v59_v46 = vpop.xlane.xlu0 %58 }
  0x97   :  { %v83_v47 = vpop.xlane.xlu1 %82  ;;  %v104_v48 = vmul.f32 0.03125, %v59_v46  ;;  %v135_v50 = vmul.f32 %v1370_v44, %v1370_v44 }
  0x98   :  { %v112_v49 = vmul.f32 0.03125, %v83_v47  ;;  %v143_v51 = vmul.f32 %v1372_v45, %v1372_v45 }
  0x99   :  { %v1380_v52 = vsub.f32 %v1025_v4, %v104_v48  ;;  %v151_v54 = vsel %vm53_vm0, %v135_v50, 0.0 }
  0x9a   :  { %v1384_v53 = vsub.f32 %v1041_v5, %v112_v49  ;;  %152 = vadd.xlane.f32.xlu0 %v151_v54  ;;  %v62_v55 = vpop.xlane.xlu0 %61  ;;  %v175_v57 = vsel %vm53_vm0, %v143_v51, 0.0 }
  0x9b   :  { %v65_v56 = vpop.xlane.xlu1 %64  ;;  %v105_v58 = vmul.f32 0.03125, %v62_v55  ;;  %v136_v60 = vmul.f32 %v1380_v52, %v1380_v52 }
  0x9c   :  { %v106_v59 = vmul.f32 0.03125, %v65_v56  ;;  %v144_v61 = vmul.f32 %v1384_v53, %v1384_v53 }
  0x9d   :  { %v1394_v62 = vsub.f32 %v1028_v11, %v105_v58  ;;  %v154_v0 = vsel %vm53_vm0, %v136_v60, 0.0 }
  0x9e   :  { %v1398_v63 = vsub.f32 %v1029_v12, %v106_v59  ;;  %176 = vadd.xlane.f32.xlu0 %v175_v57  ;;  %155 = vadd.xlane.f32.xlu1 %v154_v0  ;;  %v86_v1 = vpop.xlane.xlu0 %85  ;;  %v178_v3 = vsel %vm53_vm0, %v144_v61, 0.0 }
  0x9f   :  { %v89_v2 = vpop.xlane.xlu1 %88  ;;  %v113_v4 = vmul.f32 0.03125, %v86_v1  ;;  %v137_v7 = vmul.f32 %v1394_v62, %v1394_v62 }
  0xa0   :  { %v114_v5 = vmul.f32 0.03125, %v89_v2  ;;  %v138_v8 = vmul.f32 %v1398_v63, %v1398_v63 }
  0xa1   :  { %v1408_v6 = vsub.f32 %v1044_v16, %v113_v4  ;;  %v157_v10 = vsel %vm53_vm0, %v137_v7, 0.0 }
  0xa2   :  { %v1412_v9 = vsub.f32 %v1045_v17, %v114_v5  ;;  %179 = vadd.xlane.f32.xlu1 %v178_v3  ;;  %158 = vadd.xlane.f32.xlu0 %v157_v10  ;;  %v68_v11 = vpop.xlane.xlu0 %67  ;;  %v160_v14 = vsel %vm53_vm0, %v138_v8, 0.0 }
  0xa3   :  { %v71_v12 = vpop.xlane.xlu1 %70  ;;  %v107_v15 = vmul.f32 0.03125, %v68_v11  ;;  %v145_v20 = vmul.f32 %v1408_v6, %v1408_v6 }
  0xa4   :  { %v108_v19 = vmul.f32 0.03125, %v71_v12  ;;  %v146_v16 = vmul.f32 %v1412_v9, %v1412_v9 }
  0xa5   :  { %v1422_v13 = vsub.f32 %v1032_v21, %v107_v15  ;;  %v181_v24 = vsel %vm53_vm0, %v145_v20, 0.0 }
  0xa6   :  { %v1426_v17 = vsub.f32 %v1033_v22, %v108_v19  ;;  %161 = vadd.xlane.f32.xlu1 %v160_v14  ;;  %182 = vadd.xlane.f32.xlu0 %v181_v24  ;;  %v92_v25 = vpop.xlane.xlu0 %91  ;;  %v184_v30 = vsel %vm53_vm0, %v146_v16, 0.0 }
  0xa7   :  { %v95_v29 = vpop.xlane.xlu1 %94  ;;  %v115_v34 = vmul.f32 0.03125, %v92_v25  ;;  %v139_v38 = vmul.f32 %v1422_v13, %v1422_v13 }
  0xa8   :  { %v116_v35 = vmul.f32 0.03125, %v95_v29  ;;  %v140_v21 = vmul.f32 %v1426_v17, %v1426_v17 }
  0xa9   :  { %v1436_v18 = vsub.f32 %v1048_v26, %v115_v34  ;;  %v163_v39 = vsel %vm53_vm0, %v139_v38, 0.0 }
  0xaa   :  { %v1440_v22 = vsub.f32 %v1049_v27, %v116_v35  ;;  %185 = vadd.xlane.f32.xlu1 %v184_v30  ;;  %164 = vadd.xlane.f32.xlu0 %v163_v39  ;;  %v74_v40 = vpop.xlane.xlu0 %73  ;;  %v166_v42 = vsel %vm53_vm0, %v140_v21, 0.0 }
  0xab   :  { %v77_v41 = vpop.xlane.xlu1 %76  ;;  %v109_v43 = vmul.f32 0.03125, %v74_v40  ;;  %v147_v47 = vmul.f32 %v1436_v18, %v1436_v18 }
  0xac   :  { %v110_v46 = vmul.f32 0.03125, %v77_v41  ;;  %v148_v26 = vmul.f32 %v1440_v22, %v1440_v22 }
  0xad   :  { %v1450_v23 = vsub.f32 %v1036_v31, %v109_v43  ;;  %v187_v48 = vsel %vm53_vm0, %v147_v47, 0.0 }
  0xae   :  { %v1454_v27 = vsub.f32 %v1037_v32, %v110_v46  ;;  %167 = vadd.xlane.f32.xlu1 %v166_v42  ;;  %188 = vadd.xlane.f32.xlu0 %v187_v48  ;;  %v98_v49 = vpop.xlane.xlu0 %97  ;;  %v190_v51 = vsel %vm53_vm0, %v148_v26, 0.0  ;;  %v1488_v42 = vld [vmem:[%s1886_s1] ss:$0 sm:$0xff] }
  0xaf   :  { %v101_v50 = vpop.xlane.xlu1 %100  ;;  %v117_v54 = vmul.f32 0.03125, %v98_v49  ;;  %v141_v56 = vmul.f32 %v1450_v23, %v1450_v23 }
  0xb0   :  { %v118_v55 = vmul.f32 0.03125, %v101_v50  ;;  %v142_v31 = vmul.f32 %v1454_v27, %v1454_v27 }
  0xb1   :  { %v1464_v28 = vsub.f32 %v1052_v36, %v117_v54  ;;  %v169_v57 = vsel %vm53_vm0, %v141_v56, 0.0  ;;  %v1142_v36 = vld [vmem:[%s1885_s3] sm:$0xff]  }
  0xb2   :  { %v1468_v32 = vsub.f32 %v1053_v37, %v118_v55  ;;  %191 = vadd.xlane.f32.xlu1 %v190_v51  ;;  %170 = vadd.xlane.f32.xlu0 %v169_v57  ;;  %v172_v58 = vsel %vm53_vm0, %v142_v31, 0.0  ;;  %v1143_v37 = vld [vmem:[%s1885_s3 + $0x8] sm:$0xff]   ;;  %v1495_v55 = vld [vmem:[%s1887_s2] ss:$0 sm:$0xff] }
  0xb3   :  { %v149_v59 = vmul.f32 %v1464_v28, %v1464_v28  ;;  %1118 = vmatprep.subr.bf16.mxu0 %v1142_v36  ;;  %1138 = vmatprep.subr.bf16.mxu1 %v1142_v36 }
  0xb4   :  { %v150_v60 = vmul.f32 %v1468_v32, %v1468_v32  ;;  %1119 = vmatpush3.bf16.msra.mxu0 %v1142_v36  ;;  %1140 = vmatpush3.bf16.msra.mxu1 %v1142_v36 }
  0xb5   :  { %v193_v61 = vsel %vm53_vm0, %v149_v59, 0.0  ;;  %1120 = vmatprep.subr.bf16.mxu0 %v1143_v37  ;;  %1139 = vmatprep.subr.bf16.mxu1 %v1143_v37 }
  0xb6   :  { %173 = vadd.xlane.f32.xlu1 %v172_v58  ;;  %194 = vadd.xlane.f32.xlu0 %v193_v61  ;;  %v196_v33 = vsel %vm53_vm0, %v150_v60, 0.0 }
  0xb8   :  { %1121 = vmatpush3.bf16.msra.mxu0 %v1143_v37  ;;  %1141 = vmatpush3.bf16.msra.mxu1 %v1143_v37 }
  0xba   :  { %197 = vadd.xlane.f32.xlu1 %v196_v33 }
 0x127   :  { %v153_v0 = vpop.xlane.xlu0 %152 }
 0x128   :  { %v199_v1 = vmul.f32 0.03125, %v153_v0 }
 0x12a   :  { %v215_v2 = vadd.f32 1e-05, %v199_v1 }
 0x12b   :  { %v156_v3 = vpop.xlane.xlu1 %155  ;;  %v177_v4 = vpop.xlane.xlu0 %176 }
 0x12c   :  { %1144 = vrsqrt.f32 %v215_v2  ;;  %v200_v5 = vmul.f32 0.03125, %v156_v3  ;;  %v207_v7 = vmul.f32 0.03125, %v177_v4 }
 0x12e   :  { %v216_v8 = vadd.f32 1e-05, %v200_v5  ;;  %v223_v10 = vadd.f32 1e-05, %v207_v7 }
 0x12f   :  { %v180_v11 = vpop.xlane.xlu1 %179  ;;  %v159_v12 = vpop.xlane.xlu0 %158 }
 0x130   :  { %1146 = vrsqrt.f32 %v216_v8  ;;  %v208_v14 = vmul.f32 0.03125, %v180_v11  ;;  %v201_v15 = vmul.f32 0.03125, %v159_v12 }
 0x131   :  { %1148 = vrsqrt.f32 %v223_v10 }
 0x132   :  { %v224_v19 = vadd.f32 1e-05, %v208_v14  ;;  %v217_v20 = vadd.f32 1e-05, %v201_v15 }
 0x133   :  { %v162_v16 = vpop.xlane.xlu1 %161  ;;  %v183_v24 = vpop.xlane.xlu0 %182 }
 0x134   :  { %1150 = vrsqrt.f32 %v224_v19  ;;  %v202_v25 = vmul.f32 0.03125, %v162_v16  ;;  %v209_v29 = vmul.f32 0.03125, %v183_v24 }
 0x135   :  { %1152 = vrsqrt.f32 %v217_v20 }
 0x136   :  { %v1145_v30 = vpop.eup %1144  ;;  %v218_v34 = vadd.f32 1e-05, %v202_v25  ;;  %v225_v35 = vadd.f32 1e-05, %v209_v29 }
 0x137   :  { %v186_v38 = vpop.xlane.xlu1 %185  ;;  %v165_v21 = vpop.xlane.xlu0 %164  ;;  %v247_v39 = vmul.f32 %v1145_v30, %v1370_v44 }
 0x138   :  { %1154 = vrsqrt.f32 %v218_v34  ;;  %v210_v40 = vmul.f32 0.03125, %v186_v38  ;;  %v203_v41 = vmul.f32 0.03125, %v165_v21 }
 0x139   :  { %1156 = vrsqrt.f32 %v225_v35  ;;  %v270_v51 = vmul.f32 %v1488_v42, %v247_v39 }
 0x13a   :  { %v1147_v43 = vpop.eup %1146  ;;  %v226_v46 = vadd.f32 1e-05, %v210_v40  ;;  %v219_v47 = vadd.f32 1e-05, %v203_v41 }
 0x13b   :  { %v1149_v26 = vpop.eup %1148  ;;  %v168_v48 = vpop.xlane.xlu1 %167  ;;  %v248_v50 = vmul.f32 %v1147_v43, %v1380_v52  ;;  %v293_v33 = vadd.f32 %v1495_v55, %v270_v51 }
 0x13c   :  { %v189_v49 = vpop.xlane.xlu0 %188  ;;  %1158 = vrsqrt.f32 %v226_v46  ;;  %v204_v44 = vmul.f32 0.03125, %v168_v48  ;;  %v255_v56 = vmul.f32 %v1149_v26, %v1372_v45 }
 0x13d   :  { %v211_v54 = vmul.f32 0.03125, %v189_v49  ;;  %1160 = vrsqrt.f32 %v219_v47  ;;  %v271_v31 = vmul.f32 %v1488_v42, %v248_v50 }
 0x13e   :  { %v1151_v57 = vpop.eup %1150  ;;  %v220_v58 = vadd.f32 1e-05, %v204_v44  ;;  %v278_v0 = vmul.f32 %v1488_v42, %v255_v56 }
 0x13f   :  { %v227_v59 = vadd.f32 1e-05, %v211_v54  ;;  %v1153_v60 = vpop.eup %1152  ;;  %v192_v52 = vpop.xlane.xlu1 %191  ;;  %v294_v36 = vadd.f32 %v1495_v55, %v271_v31  ;;  %v256_v37 = vmul.f32 %v1151_v57, %v1384_v53 }
 0x140   :  { %v171_v61 = vpop.xlane.xlu0 %170  ;;  %v249_v1 = vmul.f32 %v1153_v60, %v1394_v62  ;;  %1162 = vrsqrt.f32 %v220_v58  ;;  %v212_v45 = vmul.f32 0.03125, %v192_v52  ;;  %v301_v14 = vadd.f32 %v1495_v55, %v278_v0 }
 0x141   :  { %v205_v2 = vmul.f32 0.03125, %v171_v61  ;;  %1164 = vrsqrt.f32 %v227_v59  ;;  %v309_v3 = vpack.c.bf16 %v294_v36, %v293_v33  ;;  %v279_v4 = vmul.f32 %v1488_v42, %v256_v37 }
 0x142   :  { %v1155_v5 = vpop.eup %1154  ;;  %v228_v7 = vadd.f32 1e-05, %v212_v45  ;;  %v272_v15 = vmul.f32 %v1488_v42, %v249_v1 }
 0x143   :  { %v221_v8 = vadd.f32 1e-05, %v205_v2  ;;  %v1157_v10 = vpop.eup %1156  ;;  %v250_v11 = vmul.f32 %v1155_v5, %v1398_v63  ;;  %v174_v12 = vpop.xlane.xlu1 %173  ;;  %1122 = vmatprep.mubr.msk.bf16.mxu0 %vm53_vm0, %v309_v3  ;;  %v302_v62 = vadd.f32 %v1495_v55, %v279_v4 }
 0x144   :  { %v195_v53 = vpop.xlane.xlu0 %194  ;;  %v257_v19 = vmul.f32 %v1157_v10, %v1408_v6  ;;  %1166 = vrsqrt.f32 %v228_v7  ;;  %v206_v20 = vmul.f32 0.03125, %v174_v12  ;;  %v295_v21 = vadd.f32 %v1495_v55, %v272_v15 }
 0x145   :  { %v213_v16 = vmul.f32 0.03125, %v195_v53  ;;  %1168 = vrsqrt.f32 %v221_v8  ;;  %v313_v24 = vpack.c.bf16 %v302_v62, %v301_v14  ;;  %v273_v25 = vmul.f32 %v1488_v42, %v250_v11 }
 0x146   :  { %v1159_v63 = vpop.eup %1158  ;;  %v222_v29 = vadd.f32 1e-05, %v206_v20  ;;  %v280_v39 = vmul.f32 %v1488_v42, %v257_v19 }
 0x147   :  { %v229_v30 = vadd.f32 1e-05, %v213_v16  ;;  %v1161_v34 = vpop.eup %1160  ;;  %v258_v35 = vmul.f32 %v1159_v63, %v1412_v9  ;;  %v198_v38 = vpop.xlane.xlu1 %197  ;;  %1130 = vmatprep.mubr.msk.bf16.mxu1 %vm53_vm0, %v313_v24  ;;  %v296_v6 = vadd.f32 %v1495_v55, %v273_v25 }
 0x148   :  { %v251_v40 = vmul.f32 %v1161_v34, %v1422_v13  ;;  %1170 = vrsqrt.f32 %v222_v29  ;;  %v214_v41 = vmul.f32 0.03125, %v198_v38  ;;  %v303_v49 = vadd.f32 %v1495_v55, %v280_v39 }
 0x149   :  { %1172 = vrsqrt.f32 %v229_v30  ;;  %v310_v43 = vpack.c.bf16 %v296_v6, %v295_v21  ;;  %v281_v46 = vmul.f32 %v1488_v42, %v258_v35 }
 0x14a   :  { %v1163_v47 = vpop.eup %1162  ;;  %v230_v26 = vadd.f32 1e-05, %v214_v41  ;;  %v274_v51 = vmul.f32 %v1488_v42, %v251_v40 }
 0x14b   :  { %v1165_v9 = vpop.eup %1164  ;;  %v252_v48 = vmul.f32 %v1163_v47, %v1426_v17  ;;  %1123 = vmatmul.mubr.msk.bf16.vlgmr.msra.gmra.mrb[0].mxu0 %vm53_vm0, %v310_v43  ;;  %v304_v50 = vadd.f32 %v1495_v55, %v281_v46 }
 0x14c   :  { %v259_v13 = vmul.f32 %v1165_v9, %v1436_v18  ;;  %1174 = vrsqrt.f32 %v230_v26  ;;  %v297_v17 = vadd.f32 %v1495_v55, %v274_v51 }
 0x14d   :  { %v314_v44 = vpack.c.bf16 %v304_v50, %v303_v49  ;;  %v275_v54 = vmul.f32 %v1488_v42, %v252_v48 }
 0x14e   :  { %v1167_v56 = vpop.eup %1166  ;;  %v282_v59 = vmul.f32 %v1488_v42, %v259_v13 }
 0x14f   :  { %v1169_v31 = vpop.eup %1168  ;;  %v260_v57 = vmul.f32 %v1167_v56, %v1440_v22  ;;  %1131 = vmatmul.mubr.msk.bf16.vlgmr.msra.gmra.mrb[0].mxu1 %vm53_vm0, %v314_v44  ;;  %v298_v58 = vadd.f32 %v1495_v55, %v275_v54 }
 0x150   :  { %v253_v60 = vmul.f32 %v1169_v31, %v1450_v23  ;;  %v305_v22 = vadd.f32 %v1495_v55, %v282_v59 }
 0x151   :  { %v311_v52 = vpack.c.bf16 %v298_v58, %v297_v17  ;;  %v283_v18 = vmul.f32 %v1488_v42, %v260_v57 }
 0x152   :  { %v1171_v61 = vpop.eup %1170  ;;  %v276_v0 = vmul.f32 %v1488_v42, %v253_v60 }
 0x153   :  { %v1173_v33 = vpop.eup %1172  ;;  %v254_v36 = vmul.f32 %v1171_v61, %v1454_v27  ;;  %1126 = vmatprep.mubr.msk.bf16.mxu0 %vm53_vm0, %v311_v52  ;;  %v306_v37 = vadd.f32 %v1495_v55, %v283_v18 }
 0x154   :  { %v261_v1 = vmul.f32 %v1173_v33, %v1464_v28  ;;  %v299_v27 = vadd.f32 %v1495_v55, %v276_v0 }
 0x155   :  { %v315_v45 = vpack.c.bf16 %v306_v37, %v305_v22  ;;  %v277_v23 = vmul.f32 %v1488_v42, %v254_v36 }
 0x156   :  { %v1175_v2 = vpop.eup %1174  ;;  %v284_v5 = vmul.f32 %v1488_v42, %v261_v1 }
 0x157   :  { %v262_v3 = vmul.f32 %v1175_v2, %v1468_v32  ;;  %1134 = vmatprep.mubr.msk.bf16.mxu1 %vm53_vm0, %v315_v45  ;;  %v300_v4 = vadd.f32 %v1495_v55, %v277_v23  ;;  %v1553_v32 = vld [vmem:[%s1888_s4] ss:$0 sm:$0xff] }
 0x158   :  { %v307_v28 = vadd.f32 %v1495_v55, %v284_v5 }
 0x159   :  { %v312_v7 = vpack.c.bf16 %v300_v4, %v299_v27  ;;  %v285_v8 = vmul.f32 %v1488_v42, %v262_v3 }
 0x15b   :  { %1127 = vmatmul.mubr.msk.bf16.gmra.mrb[4].mxu0 %vm53_vm0, %v312_v7  ;;  %v308_v10 = vadd.f32 %v1495_v55, %v285_v8 }
 0x15d   :  { %v316_v11 = vpack.c.bf16 %v308_v10, %v307_v28 }
 0x15f   :  { %1135 = vmatmul.mubr.msk.bf16.gmra.mrb[4].mxu1 %vm53_vm0, %v316_v11 }
 0x21e   :  { %v1124_v12 = vpop.f32.mrb[0].mxu0 }
 0x21f   :  { %v407_v53 = vadd.f32 %v1124_v12, %v1553_v32  ;;  %v398_v14 = vpop.f32.mrb[1].mxu0 }
 0x220   :  { %v399_v42 = vadd.f32 %v1553_v32, %v398_v14  ;;  %v1125_v62 = vpop.f32.mrb[2].mxu0 }
 0x221   :  { %v1557_v15 = vmul.f32 0.70710677, %v407_v53  ;;  %v410_v19 = vadd.f32 %v1125_v62, %v1553_v32  ;;  %v401_v55 = vpop.f32.mrb[3].mxu0  ;;  %v1577_v44 = vmul.f32 0.5, %v407_v53 }
 0x222   :  { %v1560_v20 = vmul.f32 0.70710677, %v399_v42  ;;  %v402_v16 = vadd.f32 %v1553_v32, %v401_v55  ;;  %v1132_v24 = vpop.f32.mrb[0].mxu1  ;;  %v1582_v56 = vmul.f32 0.5, %v399_v42 }
 0x223   :  { %v479_v25 = vand.u32 2147483647, %v1557_v15  ;;  %v1564_v63 = vmul.f32 0.70710677, %v410_v19  ;;  %v430_v40 = vpop.f32.mrb[1].mxu1  ;;  %v1572_v50 = vadd.f32 %v1132_v24, %v1553_v32  ;;  %v1600_v37 = vmul.f32 0.5, %v410_v19 }
 0x224   :  { %v477_v29 = vand.u32 2147483647, %v1560_v20  ;;  %v1567_v30 = vmul.f32 0.70710677, %v402_v16  ;;  %v1133_v47 = vpop.f32.mrb[2].mxu1  ;;  %v1575_v51 = vadd.f32 %v1553_v32, %v430_v40  ;;  %v1617_v19 = vmul.f32 0.5, %v402_v16 }
 0x225   :  { %v495_v34 = vmul.f32 0.3275911, %v479_v25  ;;  %v480_v35 = vand.u32 2147483647, %v1564_v63  ;;  %v703_v41 = vsub.f32 0.0, %v479_v25  ;;  %v433_v9 = vpop.f32.mrb[3].mxu1  ;;  %v1580_v54 = vadd.f32 %v1133_v47, %v1553_v32 }
 0x226   :  { %v493_v38 = vmul.f32 0.3275911, %v477_v29  ;;  %v478_v21 = vand.u32 2147483647, %v1567_v30  ;;  %v701_v48 = vsub.f32 0.0, %v477_v29  ;;  %v1594_v60 = vadd.f32 %v1553_v32, %v433_v9 }
 0x227   :  { %v511_v6 = vadd.f32 1.0, %v495_v34  ;;  %v496_v39 = vmul.f32 0.3275911, %v480_v35  ;;  %v719_v13 = vmul.f32 %v703_v41, %v479_v25  ;;  %v1585_v31 = vmul.f32 0.70710677, %v1572_v50 }
 0x228   :  { %v509_v43 = vadd.f32 1.0, %v493_v38  ;;  %v494_v46 = vmul.f32 0.3275911, %v478_v21  ;;  %v1588_v57 = vmul.f32 0.70710677, %v1575_v51  ;;  %v717_v17 = vmul.f32 %v701_v48, %v477_v29 }
 0x229   :  { %1176 = vrcp.f32 %v511_v6  ;;  %v512_v26 = vadd.f32 1.0, %v496_v39  ;;  %v704_v58 = vsub.f32 0.0, %v480_v35  ;;  %v1591_v59 = vmul.f32 0.70710677, %v1580_v54 }
 0x22a   :  { %1178 = vrcp.f32 %v509_v43  ;;  %v510_v49 = vadd.f32 1.0, %v494_v46  ;;  %v702_v18 = vsub.f32 0.0, %v478_v21  ;;  %v487_v61 = vand.u32 2147483647, %v1585_v31 }
 0x22b   :  { %1180 = vrcp.f32 %v512_v26  ;;  %v485_v33 = vand.u32 2147483647, %v1588_v57  ;;  %v737_v22 = vmul.f32 1.442695, %v719_v13  ;;  %v488_v0 = vand.u32 2147483647, %v1591_v59 }
 0x22c   :  { %1182 = vrcp.f32 %v510_v49  ;;  %v503_v45 = vmul.f32 0.3275911, %v487_v61  ;;  %v711_v23 = vsub.f32 0.0, %v487_v61  ;;  %v733_v27 = vmul.f32 1.442695, %v717_v17 }
 0x22d   :  { %v501_v2 = vmul.f32 0.3275911, %v485_v33  ;;  %v709_v3 = vsub.f32 0.0, %v485_v33  ;;  %v720_v4 = vmul.f32 %v704_v58, %v480_v35  ;;  %v504_v5 = vmul.f32 0.3275911, %v488_v0 }
 0x22e   :  { %v1128_v52 = vpop.f32.mrb[4].mxu0  ;;  %v1606_v7 = vmul.f32 0.70710677, %v1594_v60  ;;  %v718_v28 = vmul.f32 %v702_v18, %v478_v21  ;;  %v519_v10 = vadd.f32 1.0, %v503_v45  ;;  %v712_v12 = vsub.f32 0.0, %v488_v0 }
 0x22f   :  { %v1598_v36 = vpop.f32.mrb[5].mxu0  ;;  %v517_v11 = vadd.f32 1.0, %v501_v2  ;;  %v727_v55 = vmul.f32 %v711_v23, %v487_v61  ;;  %v725_v34 = vmul.f32 %v709_v3, %v485_v33  ;;  %v520_v35 = vadd.f32 1.0, %v504_v5 }
 0x230   :  { %v1603_v1 = vpop.f32.mrb[6].mxu0  ;;  %v486_v24 = vand.u32 2147483647, %v1606_v7  ;;  %1184 = vrcp.f32 %v519_v10  ;;  %v739_v21 = vmul.f32 1.442695, %v720_v4  ;;  %v728_v41 = vmul.f32 %v712_v12, %v488_v0 }
 0x231   :  { %v1610_v53 = vpop.f32.mrb[7].mxu0  ;;  %1186 = vrcp.f32 %v517_v11  ;;  %v735_v16 = vmul.f32 1.442695, %v718_v28  ;;  %v753_v26 = vmul.f32 1.442695, %v727_v55  ;;  %v1635_v58 = vadd.f32 %v1128_v52, %v1553_v32 }
 0x232   :  { %v1612_v14 = vpop.f32.mrb[4].mxu1  ;;  %v502_v6 = vmul.f32 0.3275911, %v486_v24  ;;  %1188 = vpow2.f32 %v737_v22  ;;  %v749_v17 = vmul.f32 1.442695, %v725_v34  ;;  %v710_v0 = vsub.f32 0.0, %v486_v24 }
 0x233   :  { %v1608_v8 = vpop.eup %1176  ;;  %v1620_v25 = vpop.f32.mrb[5].mxu1  ;;  %1190 = vrcp.f32 %v520_v35  ;;  %v1639_v45 = vmul.f32 0.70710677, %v1635_v58  ;;  %v755_v4 = vmul.f32 1.442695, %v728_v41  ;;  %vm799_vm1 = vcmp.ge.f32.partialorder %v1557_v15, 0.0 }
 0x234   :  { %v1614_v42 = vpop.eup %1178  ;;  %v559_v62 = vmul.f32 1.0614054, %v1608_v8  ;;  %v1625_v43 = vpop.f32.mrb[6].mxu1  ;;  %v518_v9 = vadd.f32 1.0, %v502_v6  ;;  %1192 = vpow2.f32 %v733_v27  ;;  %vm797_vm2 = vcmp.ge.f32.partialorder %v1560_v20, 0.0 }
 0x235   :  { %v557_v29 = vmul.f32 1.0614054, %v1614_v42  ;;  %v1623_v39 = vpop.eup %1180  ;;  %v1629_v48 = vpop.f32.mrb[7].mxu1  ;;  %v1645_v27 = vand.u32 2147483647, %v1639_v45  ;;  %vm800_vm3 = vcmp.ge.f32.partialorder %v1564_v63, 0.0 }
 0x236   :  { %v575_v38 = vadd.f32 -1.4531521, %v559_v62  ;;  %v560_v47 = vmul.f32 1.0614054, %v1623_v39  ;;  %v1631_v49 = vpop.eup %1182  ;;  %1194 = vrcp.f32 %v518_v9  ;;  %v726_v62 = vmul.f32 %v710_v0, %v486_v24 }
 0x237   :  { %v573_v40 = vadd.f32 -1.4531521, %v557_v29  ;;  %v558_v33 = vmul.f32 1.0614054, %v1631_v49  ;;  %1196 = vpow2.f32 %v739_v21  ;;  %v499_v55 = vmul.f32 0.3275911, %v1645_v27 }
 0x238   :  { %v591_v46 = vmul.f32 %v1608_v8, %v575_v38  ;;  %v576_v61 = vadd.f32 -1.4531521, %v560_v47  ;;  %1198 = vpow2.f32 %v735_v16  ;;  %vm798_vm4 = vcmp.ge.f32.partialorder %v1567_v30, 0.0 }
 0x239   :  { %v589_v13 = vmul.f32 %v1614_v42, %v573_v40  ;;  %v574_v3 = vadd.f32 -1.4531521, %v558_v33  ;;  %1200 = vpow2.f32 %v753_v26  ;;  %v515_v41 = vadd.f32 1.0, %v499_v55 }
 0x23a   :  { %v607_v18 = vadd.f32 1.4214138, %v591_v46  ;;  %v592_v2 = vmul.f32 %v1623_v39, %v576_v61  ;;  %v1648_v11 = vpop.eup %1184  ;;  %1202 = vpow2.f32 %v749_v17  ;;  %v1664_v61 = vadd.f32 %v1553_v32, %v1598_v36 }
 0x23b   :  { %v605_v22 = vadd.f32 1.4214138, %v589_v13  ;;  %v590_v10 = vmul.f32 %v1631_v49, %v574_v3  ;;  %v1651_v29 = vpop.eup %1186  ;;  %v567_v21 = vmul.f32 1.0614054, %v1648_v11  ;;  %1204 = vpow2.f32 %v755_v4 }
 0x23c   :  { %v623_v23 = vmul.f32 %v1608_v8, %v607_v18  ;;  %v608_v28 = vadd.f32 1.4214138, %v592_v2  ;;  %v1189_v6 = vpop.eup %1188  ;;  %v565_v16 = vmul.f32 1.0614054, %v1651_v29  ;;  %v751_v18 = vmul.f32 1.442695, %v726_v62 }
 0x23d   :  { %v621_v52 = vmul.f32 %v1614_v42, %v605_v22  ;;  %v606_v38 = vadd.f32 1.4214138, %v590_v10  ;;  %v583_v26 = vadd.f32 -1.4531521, %v567_v21  ;;  %v1659_v9 = vpop.eup %1190  ;;  %1206 = vrcp.f32 %v515_v41 }
 0x23e   :  { %v639_v5 = vadd.f32 -0.28449672, %v623_v23  ;;  %v624_v35 = vmul.f32 %v1623_v39, %v608_v28  ;;  %v581_v17 = vadd.f32 -1.4531521, %v565_v16  ;;  %v1193_v33 = vpop.eup %1192  ;;  %1208 = vpow2.f32 %v751_v18 }
 0x23f   :  { %v637_v12 = vadd.f32 -0.28449672, %v621_v52  ;;  %v622_v47 = vmul.f32 %v1631_v49, %v606_v38  ;;  %v599_v2 = vmul.f32 %v1648_v11, %v583_v26  ;;  %vm807_vm5 = vcmp.ge.f32.partialorder %v1585_v31, 0.0 }
 0x240   :  { %v655_v34 = vmul.f32 %v1608_v8, %v639_v5  ;;  %v640_v24 = vadd.f32 -0.28449672, %v624_v35  ;;  %v1670_v3 = vpop.eup %1194  ;;  %v597_v4 = vmul.f32 %v1651_v29, %v581_v17  ;;  %v568_v5 = vmul.f32 1.0614054, %v1659_v9 }
 0x241   :  { %v653_v40 = vmul.f32 %v1614_v42, %v637_v12  ;;  %v638_v23 = vadd.f32 -0.28449672, %v622_v47  ;;  %v1197_v36 = vpop.eup %1196  ;;  %v615_v12 = vadd.f32 1.4214138, %v599_v2  ;;  %v566_v38 = vmul.f32 1.0614054, %v1670_v3 }
 0x242   :  { %v671_v46 = vadd.f32 0.2548296, %v655_v34  ;;  %v656_v0 = vmul.f32 %v1623_v39, %v640_v24  ;;  %v1199_v62 = vpop.eup %1198  ;;  %v613_v34 = vadd.f32 1.4214138, %v597_v4  ;;  %v584_v35 = vadd.f32 -1.4531521, %v568_v5 }
 0x243   :  { %v669_v13 = vadd.f32 0.2548296, %v653_v40  ;;  %v631_v41 = vmul.f32 %v1648_v11, %v615_v12  ;;  %v582_v26 = vadd.f32 -1.4531521, %v566_v38  ;;  %v707_v31 = vsub.f32 0.0, %v1645_v27 }
 0x244   :  { %v687_v22 = vmul.f32 %v1608_v8, %v671_v46  ;;  %v672_v10 = vadd.f32 0.2548296, %v656_v0  ;;  %v654_v8 = vmul.f32 %v1631_v49, %v638_v23  ;;  %v629_v24 = vmul.f32 %v1651_v29, %v613_v34 }
 0x245   :  { %v685_v52 = vmul.f32 %v1614_v42, %v669_v13  ;;  %v1201_v42 = vpop.eup %1200  ;;  %v600_v47 = vmul.f32 %v1659_v9, %v584_v35  ;;  %vm808_vm6 = vcmp.ge.f32.partialorder %v1591_v59, 0.0  ;;  %vm805_vm7 = vcmp.ge.f32.partialorder %v1588_v57, 0.0 }
 0x246   :  { %v767_v28 = vmul.f32 %v1189_v6, %v687_v22  ;;  %v688_v40 = vmul.f32 %v1623_v39, %v672_v10  ;;  %v670_v16 = vadd.f32 0.2548296, %v654_v8  ;;  %v1203_v6 = vpop.eup %1202  ;;  %v647_v22 = vadd.f32 -0.28449672, %v631_v41 }
 0x247   :  { %v765_v55 = vmul.f32 %v1193_v33, %v685_v52  ;;  %v1205_v0 = vpop.eup %1204  ;;  %v645_v39 = vadd.f32 -0.28449672, %v629_v24  ;;  %v616_v2 = vadd.f32 1.4214138, %v600_v47  ;;  %v598_v52 = vmul.f32 %v1670_v3, %v582_v26 }
 0x248   :  { %v783_v21 = vsub.f32 1.0, %v767_v28  ;;  %v768_v17 = vmul.f32 %v1197_v36, %v688_v40  ;;  %v686_v33 = vmul.f32 %v1631_v49, %v670_v16  ;;  %v663_v10 = vmul.f32 %v1648_v11, %v647_v22  ;;  %v1692_v40 = vpop.eup %1206 }
 0x249   :  { %v781_v46 = vsub.f32 1.0, %v765_v55  ;;  %v661_v49 = vmul.f32 %v1651_v29, %v645_v39  ;;  %v632_v12 = vmul.f32 %v1659_v9, %v616_v2  ;;  %v614_v16 = vadd.f32 1.4214138, %v598_v52 }
 0x24a   :  { %v815_v13 = vsub.f32 0.0, %v783_v21  ;;  %v784_v5 = vsub.f32 1.0, %v768_v17  ;;  %v766_v28 = vmul.f32 %v1199_v62, %v686_v33  ;;  %v679_v38 = vadd.f32 0.2548296, %v663_v10 }
 0x24b   :  { %v813_v23 = vsub.f32 0.0, %v781_v46  ;;  %v677_v15 = vadd.f32 0.2548296, %v661_v49  ;;  %v563_v18 = vmul.f32 1.0614054, %v1692_v40  ;;  %v1209_v49 = vpop.eup %1208  ;;  %v1743_v59 = vadd.f32 %v1553_v32, %v1610_v53 }
 0x24c   :  { %v831_v4 = vsel %vm799_vm1, %v783_v21, %v815_v13  ;;  %v816_v34 = vsub.f32 0.0, %v784_v5  ;;  %v782_v35 = vsub.f32 1.0, %v766_v28  ;;  %v648_v21 = vadd.f32 -0.28449672, %v632_v12 }
 0x24d   :  { %v863_v8 = vadd.f32 1.0, %v831_v4  ;;  %v829_v36 = vsel %vm797_vm2, %v781_v46, %v813_v23  ;;  %v695_v46 = vmul.f32 %v1648_v11, %v679_v38  ;;  %v693_v47 = vmul.f32 %v1651_v29, %v677_v15 }
 0x24e   :  { %v861_v55 = vadd.f32 1.0, %v829_v36  ;;  %v832_v20 = vsel %vm800_vm3, %v784_v5, %v816_v34  ;;  %v814_v41 = vsub.f32 0.0, %v782_v35  ;;  %v664_v26 = vmul.f32 %v1659_v9, %v648_v21 }
 0x24f   :  { %v879_v62 = vmul.f32 %v863_v8, %v1577_v44  ;;  %v864_v24 = vadd.f32 1.0, %v832_v20  ;;  %v630_v13 = vmul.f32 %v1670_v3, %v614_v16  ;;  %v775_v33 = vmul.f32 %v1201_v42, %v695_v46 }
 0x250   :  { %v830_v17 = vsel %vm798_vm4, %v782_v35, %v814_v41  ;;  %v1705_v44 = vmul.f32 0.70710677, %v1664_v61  ;;  %v773_v11 = vmul.f32 %v1203_v6, %v693_v47  ;;  %v680_v23 = vadd.f32 0.2548296, %v664_v26 }
 0x251   :  { %v880_v63 = vmul.f32 %v864_v24, %v1600_v37  ;;  %v862_v22 = vadd.f32 1.0, %v830_v17  ;;  %v877_v29 = vmul.f32 %v861_v55, %v1582_v56  ;;  %v791_v39 = vsub.f32 1.0, %v775_v33 }
 0x252   :  { %v646_v2 = vadd.f32 -0.28449672, %v630_v13  ;;  %v579_v52 = vadd.f32 -1.4531521, %v563_v18  ;;  %v789_v5 = vsub.f32 1.0, %v773_v11  ;;  %v696_v42 = vmul.f32 %v1659_v9, %v680_v23 }
 0x253   :  { %v1062_v4 = vpack.c.bf16 %v880_v63, %v879_v62  ;;  %v878_v30 = vmul.f32 %v862_v22, %v1617_v19  ;;  %v823_v28 = vsub.f32 0.0, %v791_v39  ;;  %v1714_v37 = vand.u32 2147483647, %v1705_v44 }
 0x254   :  { %v662_v10 = vmul.f32 %v1670_v3, %v646_v2  ;;  %v595_v8 = vmul.f32 %v1692_v40, %v579_v52  ;;  %v776_v6 = vmul.f32 %v1205_v0, %v696_v42  ;;  %v1721_v19 = vadd.f32 %v1603_v1, %v1553_v32 }
 0x255   :  { %1101 = vst [vmem:[%s1889_s5 + $0x8] sm:$0xff] %v1062_v4   ;;  %v1057_v56 = vpack.c.bf16 %v878_v30, %v877_v29  ;;  %v497_v36 = vmul.f32 0.3275911, %v1714_v37  ;;  %v839_v12 = vsel %vm807_vm5, %v791_v39, %v823_v28  ;;  %v821_v34 = vsub.f32 0.0, %v789_v5 }
 0x256   :  { %v678_v9 = vadd.f32 0.2548296, %v662_v10  ;;  %v792_v55 = vsub.f32 1.0, %v776_v6  ;;  %v611_v0 = vadd.f32 1.4214138, %v595_v8  ;;  %v855_v1 = vmul.f32 0.5, %v1572_v50 }
 0x257   :  { %1058 = vst [vmem:[%s1889_s5] sm:$0xff] %v1057_v56   ;;  %v513_v38 = vadd.f32 1.0, %v497_v36  ;;  %v1732_v21 = vmul.f32 0.70710677, %v1721_v19  ;;  %v871_v16 = vadd.f32 1.0, %v839_v12  ;;  %v837_v46 = vsel %vm805_vm7, %v789_v5, %v821_v34 }
 0x258   :  { %v694_v35 = vmul.f32 %v1670_v3, %v678_v9  ;;  %v824_v15 = vsub.f32 0.0, %v792_v55  ;;  %v856_v3 = vmul.f32 0.5, %v1580_v54  ;;  %v627_v47 = vmul.f32 %v1692_v40, %v611_v0 }
 0x259   :  { %1210 = vrcp.f32 %v513_v38  ;;  %v484_v41 = vand.u32 2147483647, %v1732_v21  ;;  %v853_v26 = vmul.f32 0.5, %v1575_v51  ;;  %v723_v13 = vmul.f32 %v707_v31, %v1645_v27 }
 0x25a   :  { %v774_v62 = vmul.f32 %v1209_v49, %v694_v35  ;;  %v840_v20 = vsel %vm808_vm6, %v792_v55, %v824_v15  ;;  %v887_v57 = vmul.f32 %v871_v16, %v855_v1  ;;  %v1747_v54 = vadd.f32 %v1612_v14, %v1553_v32 }
 0x25b   :  { %v872_v50 = vadd.f32 1.0, %v840_v20  ;;  %v500_v17 = vmul.f32 0.3275911, %v484_v41  ;;  %v869_v63 = vadd.f32 1.0, %v837_v46  ;;  %vm806_vm8 = vcmp.ge.f32.partialorder %v1606_v7, 0.0 }
 0x25c   :  { %v790_v24 = vsub.f32 1.0, %v774_v62  ;;  %v1751_v51 = vmul.f32 0.70710677, %v1743_v59  ;;  %v643_v23 = vadd.f32 -0.28449672, %v627_v47  ;;  %v854_v29 = vmul.f32 0.5, %v1594_v60 }
 0x25d   :  { %v888_v33 = vmul.f32 %v872_v50, %v856_v3  ;;  %v516_v22 = vadd.f32 1.0, %v500_v17  ;;  %v1754_v53 = vmul.f32 0.70710677, %v1747_v54  ;;  %v745_v7 = vmul.f32 1.442695, %v723_v13 }
 0x25e   :  { %v822_v18 = vsub.f32 0.0, %v790_v24  ;;  %v482_v14 = vand.u32 2147483647, %v1751_v51  ;;  %v885_v52 = vmul.f32 %v869_v63, %v853_v26  ;;  %v705_v30 = vsub.f32 0.0, %v1714_v37 }
 0x25f   :  { %v1082_v27 = vpack.c.bf16 %v888_v33, %v887_v57  ;;  %1212 = vrcp.f32 %v516_v22  ;;  %v491_v2 = vand.u32 2147483647, %v1754_v53  ;;  %v659_v60 = vmul.f32 %v1692_v40, %v643_v23 }
 0x260   :  { %v838_v11 = vsel %vm806_vm8, %v790_v24, %v822_v18  ;;  %v498_v5 = vmul.f32 0.3275911, %v482_v14  ;;  %1214 = vpow2.f32 %v745_v7  ;;  %v708_v6 = vsub.f32 0.0, %v484_v41 }
 0x261   :  { %v870_v39 = vadd.f32 1.0, %v838_v11  ;;  %1105 = vst [vmem:[%s1889_s5 + $0x28] sm:$0xff] %v1082_v27   ;;  %v507_v28 = vmul.f32 0.3275911, %v491_v2  ;;  %v1769_v36 = vadd.f32 %v1553_v32, %v1620_v25  ;;  %v721_v12 = vmul.f32 %v705_v30, %v1714_v37 }
 0x262   :  { %v514_v56 = vadd.f32 1.0, %v498_v5  ;;  %v1777_v55 = vadd.f32 %v1625_v43, %v1553_v32  ;;  %v675_v34 = vadd.f32 0.2548296, %v659_v60  ;;  %v724_v0 = vmul.f32 %v708_v6, %v484_v41 }
 0x263   :  { %v886_v4 = vmul.f32 %v870_v39, %v854_v29  ;;  %v1763_v42 = vpop.eup %1210  ;;  %v523_v9 = vadd.f32 1.0, %v507_v28  ;;  %v1780_v35 = vmul.f32 0.70710677, %v1769_v36  ;;  %v741_v31 = vmul.f32 1.442695, %v721_v12 }
 0x264   :  { %v561_v8 = vmul.f32 1.0614054, %v1763_v42  ;;  %1216 = vrcp.f32 %v514_v56  ;;  %v1785_v1 = vmul.f32 0.70710677, %v1777_v55  ;;  %v1791_v43 = vadd.f32 %v1553_v32, %v1629_v48 }
 0x265   :  { %v1077_v10 = vpack.c.bf16 %v886_v4, %v885_v52  ;;  %1218 = vrcp.f32 %v523_v9  ;;  %v489_v38 = vand.u32 2147483647, %v1780_v35  ;;  %v691_v16 = vmul.f32 %v1692_v40, %v675_v34 }
 0x266   :  { %v577_v49 = vadd.f32 -1.4531521, %v561_v8  ;;  %v706_v41 = vsub.f32 0.0, %v482_v14  ;;  %v492_v46 = vand.u32 2147483647, %v1785_v1  ;;  %1220 = vpow2.f32 %v741_v31 }
 0x267   :  { %1104 = vst [vmem:[%s1889_s5 + $0x20] sm:$0xff] %v1077_v10   ;;  %v505_v20 = vmul.f32 0.3275911, %v489_v38  ;;  %v1798_v50 = vmul.f32 0.70710677, %v1791_v43  ;;  %v715_v32 = vsub.f32 0.0, %v491_v2 }
 0x268   :  { %v593_v25 = vmul.f32 %v1763_v42, %v577_v49  ;;  %v747_v47 = vmul.f32 1.442695, %v724_v0  ;;  %v508_v48 = vmul.f32 0.3275911, %v492_v46  ;;  %v722_v22 = vmul.f32 %v706_v41, %v482_v14 }
 0x269   :  { %v1787_v15 = vpop.eup %1212  ;;  %v521_v26 = vadd.f32 1.0, %v505_v20  ;;  %v1802_v57 = vand.u32 2147483647, %v1798_v50  ;;  %v731_v4 = vmul.f32 %v715_v32, %v491_v2  ;;  %v713_v8 = vsub.f32 0.0, %v489_v38 }
 0x26a   :  { %v609_v37 = vadd.f32 1.4214138, %v593_v25  ;;  %v564_v62 = vmul.f32 1.0614054, %v1787_v15  ;;  %v1215_v17 = vpop.eup %1214  ;;  %v524_v27 = vadd.f32 1.0, %v508_v48  ;;  %v716_v34 = vsub.f32 0.0, %v492_v46 }
 0x26b   :  { %1222 = vrcp.f32 %v521_v26  ;;  %v771_v18 = vmul.f32 %v1215_v17, %v691_v16  ;;  %v506_v39 = vmul.f32 0.3275911, %v1802_v57  ;;  %v743_v14 = vmul.f32 1.442695, %v722_v22 }
 0x26c   :  { %v625_v3 = vmul.f32 %v1763_v42, %v609_v37  ;;  %v580_v24 = vadd.f32 -1.4531521, %v564_v62  ;;  %1224 = vpow2.f32 %v747_v47  ;;  %v761_v12 = vmul.f32 1.442695, %v731_v4 }
 0x26d   :  { %1226 = vrcp.f32 %v524_v27  ;;  %v522_v60 = vadd.f32 1.0, %v506_v39  ;;  %v787_v28 = vsub.f32 1.0, %v771_v18  ;;  %v1817_v2 = vmul.f32 0.5, %v1635_v58 }
 0x26e   :  { %v641_v13 = vadd.f32 -0.28449672, %v625_v3  ;;  %v596_v40 = vmul.f32 %v1787_v15, %v580_v24  ;;  %v1804_v33 = vpop.eup %1216  ;;  %vm803_vm9 = vcmp.ge.f32.partialorder %v1639_v45, 0.0  ;;  %vm804_vm10 = vcmp.ge.f32.partialorder %v1732_v21, 0.0 }
 0x26f   :  { %v1807_v11 = vpop.eup %1218  ;;  %v562_v29 = vmul.f32 1.0614054, %v1804_v33  ;;  %1228 = vrcp.f32 %v522_v60  ;;  %v819_v62 = vsub.f32 0.0, %v787_v28  ;;  %v732_v47 = vmul.f32 %v716_v34, %v492_v46 }
 0x270   :  { %v657_v63 = vmul.f32 %v1763_v42, %v641_v13  ;;  %v612_v23 = vadd.f32 1.4214138, %v596_v40  ;;  %v571_v52 = vmul.f32 1.0614054, %v1807_v11  ;;  %v1221_v37 = vpop.eup %1220  ;;  %1230 = vpow2.f32 %v743_v14 }
 0x271   :  { %v578_v5 = vadd.f32 -1.4531521, %v562_v29  ;;  %1232 = vpow2.f32 %v761_v12  ;;  %v714_v48 = vsub.f32 0.0, %v1802_v57  ;;  %vm801_vm11 = vcmp.ge.f32.partialorder %v1705_v44, 0.0 }
 0x272   :  { %v673_v7 = vadd.f32 0.2548296, %v657_v63  ;;  %v628_v30 = vmul.f32 %v1787_v15, %v612_v23  ;;  %v587_v10 = vadd.f32 -1.4531521, %v571_v52  ;;  %v763_v39 = vmul.f32 1.442695, %v732_v47 }
 0x273   :  { %v594_v9 = vmul.f32 %v1804_v33, %v578_v5  ;;  %v730_v5 = vmul.f32 %v714_v48, %v1802_v57  ;;  %vm802_vm12 = vcmp.ge.f32.partialorder %v1751_v51, 0.0  ;;  %v850_v51 = vmul.f32 0.5, %v1743_v59 }
 0x274   :  { %v689_v56 = vmul.f32 %v1763_v42, %v673_v7  ;;  %v644_v6 = vadd.f32 -0.28449672, %v628_v30  ;;  %v603_v49 = vmul.f32 %v1807_v11, %v587_v10  ;;  %v729_v42 = vmul.f32 %v713_v8, %v489_v38 }
 0x275   :  { %v610_v0 = vadd.f32 1.4214138, %v594_v9  ;;  %v1821_v16 = vpop.eup %1222  ;;  %v852_v38 = vmul.f32 0.5, %v1721_v19  ;;  %vm811_vm13 = vcmp.ge.f32.partialorder %v1754_v53, 0.0  ;;  %vm809_vm14 = vcmp.ge.f32.partialorder %v1780_v35, 0.0 }
 0x276   :  { %v660_v25 = vmul.f32 %v1787_v15, %v644_v6  ;;  %v619_v31 = vadd.f32 1.4214138, %v603_v49  ;;  %v769_v20 = vmul.f32 %v1221_v37, %v689_v56  ;;  %v569_v24 = vmul.f32 1.0614054, %v1821_v16  ;;  %v1225_v26 = vpop.eup %1224 }
 0x277   :  { %v626_v41 = vmul.f32 %v1804_v33, %v610_v0  ;;  %v1830_v17 = vpop.eup %1226  ;;  %v757_v63 = vmul.f32 1.442695, %v729_v42  ;;  %v759_v37 = vmul.f32 1.442695, %v730_v5  ;;  %vm812_vm15 = vcmp.ge.f32.partialorder %v1785_v1, 0.0 }
 0x278   :  { %v676_v3 = vadd.f32 0.2548296, %v660_v25  ;;  %v635_v58 = vmul.f32 %v1807_v11, %v619_v31  ;;  %v585_v18 = vadd.f32 -1.4531521, %v569_v24  ;;  %v785_v22 = vsub.f32 1.0, %v769_v20 }
 0x279   :  { %v642_v32 = vadd.f32 -0.28449672, %v626_v41  ;;  %v572_v46 = vmul.f32 1.0614054, %v1830_v17  ;;  %v1839_v7 = vpop.eup %1228  ;;  %1234 = vpow2.f32 %v757_v63  ;;  %v860_v53 = vmul.f32 0.5, %v1777_v55 }
 0x27a   :  { %v692_v13 = vmul.f32 %v1787_v15, %v676_v3  ;;  %v651_v40 = vadd.f32 -0.28449672, %v635_v58  ;;  %v835_v15 = vsel %vm803_vm9, %v787_v28, %v819_v62  ;;  %v601_v29 = vmul.f32 %v1821_v16, %v585_v18  ;;  %v1231_v6 = vpop.eup %1230 }
 0x27b   :  { %v658_v23 = vmul.f32 %v1804_v33, %v642_v32  ;;  %v588_v30 = vadd.f32 -1.4531521, %v572_v46  ;;  %v570_v10 = vmul.f32 1.0614054, %v1839_v7  ;;  %v817_v8 = vsub.f32 0.0, %v785_v22  ;;  %v1233_v31 = vpop.eup %1232 }
 0x27c   :  { %v772_v27 = vmul.f32 %v1225_v26, %v692_v13  ;;  %v667_v19 = vmul.f32 %v1807_v11, %v651_v40  ;;  %v617_v14 = vadd.f32 1.4214138, %v601_v29  ;;  %v867_v9 = vadd.f32 1.0, %v835_v15 }
 0x27d   :  { %v674_v4 = vadd.f32 0.2548296, %v658_v23  ;;  %v604_v56 = vmul.f32 %v1830_v17, %v588_v30  ;;  %v586_v34 = vadd.f32 -1.4531521, %v570_v10  ;;  %1236 = vpow2.f32 %v763_v39 }
 0x27e   :  { %v788_v52 = vsub.f32 1.0, %v772_v27  ;;  %v683_v60 = vadd.f32 0.2548296, %v667_v19  ;;  %v633_v12 = vmul.f32 %v1821_v16, %v617_v14  ;;  %v833_v20 = vsel %vm801_vm11, %v785_v22, %v817_v8 }
 0x27f   :  { %v690_v28 = vmul.f32 %v1804_v33, %v674_v4  ;;  %v620_v0 = vadd.f32 1.4214138, %v604_v56  ;;  %v602_v33 = vmul.f32 %v1839_v7, %v586_v34  ;;  %v883_v58 = vmul.f32 %v867_v9, %v1817_v2 }
 0x280   :  { %v820_v45 = vsub.f32 0.0, %v788_v52  ;;  %v699_v49 = vmul.f32 %v1807_v11, %v683_v60  ;;  %v649_v62 = vadd.f32 -0.28449672, %v633_v12  ;;  %1238 = vpow2.f32 %v759_v37 }
 0x281   :  { %v770_v25 = vmul.f32 %v1231_v6, %v690_v28  ;;  %v636_v41 = vmul.f32 %v1830_v17, %v620_v0  ;;  %v618_v47 = vadd.f32 1.4214138, %v602_v33  ;;  %v865_v32 = vadd.f32 1.0, %v833_v20 }
 0x282   :  { %v836_v57 = vsel %vm804_vm10, %v788_v52, %v820_v45  ;;  %v779_v11 = vmul.f32 %v1233_v31, %v699_v49  ;;  %v665_v24 = vmul.f32 %v1821_v16, %v649_v62  ;;  %v849_v18 = vmul.f32 0.5, %v1664_v61 }
 0x283   :  { %v868_v42 = vadd.f32 1.0, %v836_v57  ;;  %v786_v3 = vsub.f32 1.0, %v770_v25  ;;  %v652_v13 = vadd.f32 -0.28449672, %v636_v41  ;;  %v634_v44 = vmul.f32 %v1839_v7, %v618_v47 }
 0x284   :  { %v681_v40 = vadd.f32 0.2548296, %v665_v24  ;;  %v795_v22 = vsub.f32 1.0, %v779_v11  ;;  %v881_v19 = vmul.f32 %v865_v32, %v849_v18  ;;  %v859_v34 = vmul.f32 0.5, %v1747_v54 }
 0x285   :  { %v884_v21 = vmul.f32 %v868_v42, %v852_v38  ;;  %v818_v26 = vsub.f32 0.0, %v786_v3  ;;  %v668_v2 = vmul.f32 %v1830_v17, %v652_v13  ;;  %v1235_v38 = vpop.eup %1234  ;;  %v650_v46 = vadd.f32 -0.28449672, %v634_v44 }
 0x286   :  { %v697_v23 = vmul.f32 %v1821_v16, %v681_v40  ;;  %v827_v52 = vsub.f32 0.0, %v795_v22  ;;  %vm810_vm0 = vcmp.ge.f32.partialorder %v1798_v50, 0.0  ;;  %v857_v35 = vmul.f32 0.5, %v1769_v36 }
 0x287   :  { %v1072_v48 = vpack.c.bf16 %v884_v21, %v883_v58  ;;  %v834_v63 = vsel %vm802_vm12, %v786_v3, %v818_v26  ;;  %v684_v15 = vadd.f32 0.2548296, %v668_v2  ;;  %v666_v61 = vmul.f32 %v1839_v7, %v650_v46  ;;  %v1237_v30 = vpop.eup %1236 }
 0x288   :  { %v866_v27 = vadd.f32 1.0, %v834_v63  ;;  %v777_v39 = vmul.f32 %v1235_v38, %v697_v23  ;;  %v843_v45 = vsel %vm811_vm13, %v795_v22, %v827_v52  ;;  %v858_v42 = vmul.f32 0.5, %v1791_v43 }
 0x289   :  { %1103 = vst [vmem:[%s1889_s5 + $0x18] sm:$0xff] %v1072_v48   ;;  %v700_v4 = vmul.f32 %v1830_v17, %v684_v15  ;;  %v682_v14 = vadd.f32 0.2548296, %v666_v61  ;;  %v875_v6 = vadd.f32 1.0, %v843_v45 }
 0x28a   :  { %v882_v29 = vmul.f32 %v866_v27, %v850_v51  ;;  %v793_v60 = vsub.f32 1.0, %v777_v39  ;;  %v1239_v8 = vpop.eup %1238 }
 0x28b   :  { %v780_v10 = vmul.f32 %v1237_v30, %v700_v4  ;;  %v698_v16 = vmul.f32 %v1839_v7, %v682_v14  ;;  %v891_v0 = vmul.f32 %v875_v6, %v859_v34 }
 0x28c   :  { %v1067_v5 = vpack.c.bf16 %v882_v29, %v881_v19  ;;  %v825_v59 = vsub.f32 0.0, %v793_v60 }
 0x28d   :  { %v796_v28 = vsub.f32 1.0, %v780_v10  ;;  %v778_v56 = vmul.f32 %v1239_v8, %v698_v16 }
 0x28e   :  { %1102 = vst [vmem:[%s1889_s5 + $0x10] sm:$0xff] %v1067_v5   ;;  %v841_v9 = vsel %vm809_vm14, %v793_v60, %v825_v59 }
 0x28f   :  { %v828_v17 = vsub.f32 0.0, %v796_v28  ;;  %v794_v49 = vsub.f32 1.0, %v778_v56  ;;  %v873_v7 = vadd.f32 1.0, %v841_v9 }
 0x291   :  { %v844_v12 = vsel %vm812_vm15, %v796_v28, %v828_v17  ;;  %v826_v25 = vsub.f32 0.0, %v794_v49  ;;  %v889_v33 = vmul.f32 %v873_v7, %v857_v35 }
 0x292   :  { %v876_v57 = vadd.f32 1.0, %v844_v12 }
 0x293   :  { %v842_v31 = vsel %vm810_vm0, %v794_v49, %v826_v25 }
 0x294   :  { %v892_v37 = vmul.f32 %v876_v57, %v860_v53  ;;  %v874_v62 = vadd.f32 1.0, %v842_v31 }
 0x296   :  { %v1092_v1 = vpack.c.bf16 %v892_v37, %v891_v0  ;;  %v890_v20 = vmul.f32 %v874_v62, %v858_v42 }
 0x298   :  { %1107 = vst [vmem:[%s1889_s5 + $0x38] sm:$0xff] %v1092_v1   ;;  %v1087_v54 = vpack.c.bf16 %v890_v20, %v889_v33 }
 0x29a   :  { %1106 = vst [vmem:[%s1889_s5 + $0x30] sm:$0xff] %v1087_v54  }

// kernel: _lambda_.43
= control target key start
LH: loop header
LB: loop body
LE: loop exit
PB: predicated region body
PF: predicated region fallthrough
CT: control target
= control target key end

     0   :  { %s822_s6 = smov 0   ;;  %s968_s0 = inlined_call_operand.vmem [shape: bf16[2,64,96], index: 0, kind: input, shape index: {}]   ;;  %s969_s1 = inlined_call_operand.vmem [shape: bf16[2,64,32], index: 1, kind: output, shape index: {}]  }
   0x1 LB: > { %s658_s7 = sadd.s32 4294967295, %s802_s6   ;;  %p662_p0 = scmp.ge.s32.totalorder %s802_s6, 1  ;;  %s802_s6 = sphi %s822_s6, %s11_s6  }
   0x2   : > { %p87_p1 = scmp.lt.s32.totalorder %s802_s6, 3 }
   0x4   : > { %p88_p2 = pnand %p662_p0, %p87_p1 }
   0x5   : > { %p107_p3 = scmp.lt.s32.totalorder (!%p88_p2), %s658_s7, 1  ;;  %v804_v0 = vmov (!%p88_p2), 0.0   ;;  %s805_s12 = smov (!%p88_p2), 96   ;;  %vm806_vm0 = vmmov (!%p88_p2), 0   ;;  %vm178_vm1 = vcmask (!%p88_p2), 523264   ;;  %vm225_vm2 = vcmask (!%p88_p2), 130048  }
   0x6   : > { %91 = sbr.rel (%p88_p2) target bundleno = 1598 (0x63e), region = 24  ;;  %713 = vmatprep.subr.bf16.mxu0 (!%p88_p2), %v804_v0  ;;  %721 = vmatprep.mubr.msk.bf16.mxu0 (!%p88_p2), %vm806_vm0, %v804_v0  ;;  %s807_s13 = smov (!%p88_p2), 112   ;;  %vm594_vm3 = vcmask (!%p88_p2), 257024  }
   0x7   : > { %s808_s14 = smov (!%p88_p2), 80   ;;  %s809_s15 = smov (!%p88_p2), 64  }
   0x8   : > { %s810_s16 = smov (!%p88_p2), 48   ;;  %s811_s17 = smov (!%p88_p2), 16  }
   0xd   : > { %s971_s7 = smov (!%p107_p3, %s658_s7), 1 }
   0xe   : > { %s691_s8 = sshll.u32 %s971_s7, 5 }
   0xf   : > { %s111_s11 = scalar_lea.vmem %s968_s0, %s691_s8  ;;  %s116_s20 = scalar_lea.vmem %s969_s1, %s691_s8 }
  0x10   : > { %v839_v1 = vld [vmem:[%s111_s11] sm:$0xff]   ;;  %v841_v2 = vld [vmem:[%s111_s11 + $0x8] sm:$0xff]   ;;  %v844_v3 = vld [vmem:[%s111_s11 + $0x10] sm:$0xff]  }
  0x11   : > { %166 = vrot.lane.b32.xlu0 %v839_v1, %s805_s12  ;;  %170 = vrot.lane.b32.xlu1 %v844_v3, %s805_s12  ;;  %v849_v4 = vld [vmem:[%s111_s11 + $0x18] sm:$0xff]  }
  0x15   : > { %168 = vrot.lane.b32.xlu0 %v841_v2, %s805_s12  ;;  %172 = vrot.lane.b32.xlu1 %v849_v4, %s805_s12 }
  0x33   : > { %150 = vxpose.xlu0.c.b16.start [1/4] (short) (narrow) %v839_v1, 16 }
  0x37   : > { %151 = vxpose.xlu0.c.b16.cont [2/4] (short) (narrow) %v841_v2, 16 }
  0x3b   : > { %152 = vxpose.xlu0.c.b16.cont [3/4] (short) (narrow) %v844_v3, 16 }
  0x3f   : > { %153 = vxpose.xlu0.c.b16.end [4/4] (short) (narrow) %v849_v4, 16 }
  0x48   : > { %343 = vrot.lane.b32.xlu0 %v841_v2, %s807_s13 }
  0x4c   : > { %369 = vrot.lane.b32.xlu0 %v839_v1, %s808_s14 }
  0x50   : > { %253 = vrot.lane.b32.xlu0 %v844_v3, %s809_s15 }
  0x83   : > { %v167_v5 = vpop.permute.xlu0 %166  ;;  %v171_v7 = vpop.permute.xlu1 %170 }
  0x84   : > { %714 = vmatpush3.bf16.msra.mxu0 %v167_v5 }
  0x85   : > { %715 = vmatprep.subr.bf16.mxu0 %v804_v0 }
  0x87   : > { %v169_v6 = vpop.permute.xlu0 %168  ;;  %v173_v8 = vpop.permute.xlu1 %172 }
  0x88   : > { %716 = vmatpush3.bf16.msra.mxu0 %v169_v6 }
  0x89   : > { %717 = vmatprep.subr.bf16.mxu0 %v804_v0 }
  0x8c   : > { %718 = vmatpush3.bf16.msra.mxu0 %v171_v7 }
  0x8d   : > { %719 = vmatprep.subr.bf16.mxu0 %v804_v0 }
  0x90   : > { %720 = vmatpush3.bf16.msra.mxu0 %v173_v8 }
  0x99   : > { %v158_v9 = vpop.trf.xlu0 }
  0x9a   : > { %722 = vmatmul.mubr.msk.bf16.vlgmr.msra.gmra.mrb[0].mxu0 %vm178_vm1, %v158_v9 }
  0xba   : > { %v344_v29 = vpop.permute.xlu0 %343 }
  0xbe   : > { %v370_v32 = vpop.permute.xlu0 %369 }
  0xc2   : > { %v254_v33 = vpop.permute.xlu0 %253 }
 0x16d   : > { %v216_v10 = vpop.f32.mrb[0].mxu0 }
 0x16e   : > { %v223_v11 = vmul.f32 0.125, %v216_v10  ;;  %v723_v12 = vpop.f32.mrb[1].mxu0 }
 0x16f   : > { %v219_v13 = vpop.f32.mrb[2].mxu0 }
 0x170   : > { %v224_v14 = vmul.f32 0.125, %v219_v13  ;;  %v724_v15 = vpop.f32.mrb[3].mxu0  ;;  %v226_v16 = vsel %vm225_vm2, %v223_v11, -inf }
 0x171   : > { %227 = vmax.xlane.f32.xlu1 %v226_v16 }
 0x172   : > { %v229_v17 = vsel %vm225_vm2, %v224_v14, -inf }
 0x175   : > { %230 = vmax.xlane.f32.xlu1 %v229_v17 }
 0x186   : > { %341 = vrot.lane.b32.xlu1 %v839_v1, %s807_s13 }
 0x18a   : > { %345 = vrot.lane.b32.xlu1 %v844_v3, %s807_s13 }
 0x18e   : > { %347 = vrot.lane.b32.xlu1 %v849_v4, %s807_s13 }
 0x1fe   : > { %v228_v18 = vpop.xlane.xlu1 %227 }
 0x1ff   : > { %v232_v19 = vsub.f32 %v223_v11, %v228_v18 }
 0x201   : > { %v234_v20 = vmul.f32 1.442695, %v232_v19 }
 0x202   : > { %v231_v21 = vpop.xlane.xlu1 %230 }
 0x203   : > { %780 = vpow2.f32 %v234_v20  ;;  %v233_v22 = vsub.f32 %v224_v14, %v231_v21 }
 0x205   : > { %v236_v23 = vmul.f32 1.442695, %v233_v22 }
 0x206   : > { %v342_v28 = vpop.permute.xlu1 %341 }
 0x207   : > { %782 = vpow2.f32 %v236_v23 }
 0x20a   : > { %v346_v30 = vpop.permute.xlu1 %345 }
 0x20d   : > { %v781_v24 = vpop.eup %780 }
 0x20e   : > { %v238_v25 = vsel %vm225_vm2, %v781_v24, 0.0  ;;  %v348_v31 = vpop.permute.xlu1 %347 }
 0x20f   : > { %239 = vadd.xlane.f32.xlu1 %v238_v25 }
 0x211   : > { %v783_v26 = vpop.eup %782 }
 0x212   : > { %v241_v27 = vsel %vm225_vm2, %v783_v26, 0.0 }
 0x213   : > { %242 = vadd.xlane.f32.xlu0 %v241_v27 }
 0x220   : > { %249 = vrot.lane.b32.xlu1 %v839_v1, %s809_s15 }
 0x224   : > { %251 = vrot.lane.b32.xlu1 %v841_v2, %s809_s15 }
 0x228   : > { %371 = vrot.lane.b32.xlu1 %v841_v2, %s808_s14 }
 0x229   : > { %373 = vrot.lane.b32.xlu0 %v844_v3, %s808_s14 }
 0x22c   : > { %255 = vrot.lane.b32.xlu1 %v849_v4, %s809_s15 }
 0x230   : > { %375 = vrot.lane.b32.xlu1 %v849_v4, %s808_s14 }
 0x247   : > { %353 = vxpose.xlu0.c.b16.start [1/4] (short) (narrow) %v342_v28, 16 }
 0x24b   : > { %354 = vxpose.xlu0.c.b16.cont [2/4] (short) (narrow) %v344_v29, 16 }
 0x24f   : > { %355 = vxpose.xlu0.c.b16.cont [3/4] (short) (narrow) %v346_v30, 16 }
 0x253   : > { %356 = vxpose.xlu0.c.b16.end [4/4] (short) (narrow) %v348_v31, 16 }
 0x29c   : > { %v240_v34 = vpop.xlane.xlu1 %239 }
 0x29d   : > { %784 = vrcp.f32 %v240_v34 }
 0x2a0   : > { %v243_v35 = vpop.xlane.xlu0 %242  ;;  %v250_v36 = vpop.permute.xlu1 %249 }
 0x2a1   : > { %786 = vrcp.f32 %v243_v35  ;;  %727 = vmatprep.mubr.msk.bf16.mxu1 %vm225_vm2, %v250_v36 }
 0x2a4   : > { %v252_v43 = vpop.permute.xlu1 %251  ;;  %v374_v46 = vpop.permute.xlu0 %373 }
 0x2a7   : > { %v785_v37 = vpop.eup %784 }
 0x2a8   : > { %v245_v39 = vmul.f32 %v785_v37, %v781_v24  ;;  %v372_v44 = vpop.permute.xlu1 %371 }
 0x2ab   : > { %v787_v38 = vpop.eup %786 }
 0x2ac   : > { %v247_v40 = vmul.f32 %v787_v38, %v783_v26  ;;  %v256_v45 = vpop.permute.xlu1 %255 }
 0x2ad   : > { %v361_v48 = vpop.trf.xlu0 }
 0x2ae   : > { %v248_v41 = vpack.c.bf16 %v247_v40, %v245_v39 }
 0x2b0   : > { %757 = vmatprep.subr.msk.bf16.mxu1 %vm225_vm2, %v248_v41  ;;  %v270_v42 = vsel %vm225_vm2, %v248_v41, 0  ;;  %v376_v47 = vpop.permute.xlu1 %375 }
 0x2b1   : > { %726 = vmatpush3.bf16.xpose.msra.mxu1 %v270_v42 }
 0x2b2   : > { %735 = vmatprep.subr.bf16.mxu1 %v804_v0 }
 0x2b8   : > { %728 = vmatmul.mubr.msk.bf16.vlgmr.msra.gmra.mrb[0].mxu1 %vm225_vm2, %v252_v43 }
 0x2b9   : > { %731 = vmatprep.mubr.msk.bf16.mxu1 %vm225_vm2, %v254_v33  ;;  %736 = vmatpush3.bf16.msra.mxu1 %v370_v32 }
 0x2ba   : > { %737 = vmatprep.subr.bf16.mxu1 %v804_v0 }
 0x2bd   : > { %738 = vmatpush3.bf16.msra.mxu1 %v372_v44 }
 0x2be   : > { %739 = vmatprep.subr.bf16.mxu1 %v804_v0 }
 0x2c0   : > { %732 = vmatmul.mubr.msk.bf16.gmra.mrb[4].mxu1 %vm225_vm2, %v256_v45 }
 0x2c1   : > { %740 = vmatpush3.bf16.msra.mxu1 %v374_v46  ;;  %743 = vmatprep.mubr.msk.bf16.mxu1 %vm806_vm0, %v804_v0 }
 0x2c2   : > { %741 = vmatprep.subr.bf16.mxu1 %v804_v0 }
 0x2c5   : > { %742 = vmatpush3.bf16.msra.mxu1 %v376_v47 }
 0x2c8   : > { %744 = vmatmul.mubr.msk.bf16.vlgmr.msra.gmra.mrb[8].mxu1 %vm178_vm1, %v361_v48 }
 0x38b   : > { %v898_v49 = vpop.f32.mrb[0].mxu1 }
 0x38c   : > { %v900_v50 = vpop.f32.mrb[1].mxu1 }
 0x38d   : > { %v902_v51 = vpop.f32.mrb[2].mxu1 }
 0x38e   : > { %v338_v52 = vpack.c.bf16 %v902_v51, %v898_v49  ;;  %v906_v53 = vpop.f32.mrb[3].mxu1 }
 0x38f   : > { %v337_v54 = vpack.c.bf16 %v906_v53, %v900_v50 }
 0x393   : > { %v910_v55 = vpop.f32.mrb[4].mxu1 }
 0x394   : > { %v912_v56 = vpop.f32.mrb[5].mxu1 }
 0x395   : > { %v914_v57 = vpop.f32.mrb[6].mxu1 }
 0x396   : > { %v340_v58 = vpack.c.bf16 %v914_v57, %v910_v55  ;;  %v918_v59 = vpop.f32.mrb[7].mxu1 }
 0x397   : > { %v339_v60 = vpack.c.bf16 %v918_v59, %v912_v56 }
 0x39b   : > { %v418_v61 = vpop.f32.mrb[8].mxu1 }
 0x39c   : > { %v425_v62 = vmul.f32 0.125, %v418_v61  ;;  %v745_v63 = vpop.f32.mrb[9].mxu1 }
 0x39d   : > { %v421_v0 = vpop.f32.mrb[10].mxu1 }
 0x39e   : > { %v426_v5 = vmul.f32 0.125, %v421_v0  ;;  %v746_v6 = vpop.f32.mrb[11].mxu1  ;;  %v427_v7 = vsel %vm225_vm2, %v425_v62, -inf }
 0x39f   : > { %428 = vmax.xlane.f32.xlu1 %v427_v7 }
 0x3a0   : > { %v430_v8 = vsel %vm225_vm2, %v426_v5, -inf }
 0x3a3   : > { %431 = vmax.xlane.f32.xlu1 %v430_v8 }
 0x42c   : > { %v429_v9 = vpop.xlane.xlu1 %428 }
 0x42d   : > { %v433_v10 = vsub.f32 %v425_v62, %v429_v9 }
 0x42f   : > { %v435_v11 = vmul.f32 1.442695, %v433_v10 }
 0x430   : > { %v432_v12 = vpop.xlane.xlu1 %431 }
 0x431   : > { %788 = vpow2.f32 %v435_v11  ;;  %v434_v13 = vsub.f32 %v426_v5, %v432_v12 }
 0x433   : > { %v437_v14 = vmul.f32 1.442695, %v434_v13 }
 0x435   : > { %790 = vpow2.f32 %v437_v14 }
 0x43b   : > { %v789_v15 = vpop.eup %788 }
 0x43c   : > { %v439_v16 = vsel %vm225_vm2, %v789_v15, 0.0 }
 0x43d   : > { %440 = vadd.xlane.f32.xlu1 %v439_v16 }
 0x43f   : > { %v791_v17 = vpop.eup %790 }
 0x440   : > { %v442_v18 = vsel %vm225_vm2, %v791_v17, 0.0 }
 0x441   : > { %443 = vadd.xlane.f32.xlu0 %v442_v18 }
 0x44e   : > { %450 = vrot.lane.b32.xlu1 %v839_v1, %s810_s16 }
 0x452   : > { %454 = vrot.lane.b32.xlu1 %v844_v3, %s810_s16 }
 0x456   : > { %456 = vrot.lane.b32.xlu1 %v849_v4, %s810_s16 }
 0x457   : > { %452 = vrot.lane.b32.xlu0 %v841_v2, %s810_s16 }
 0x4ca   : > { %v441_v19 = vpop.xlane.xlu1 %440 }
 0x4cb   : > { %792 = vrcp.f32 %v441_v19 }
 0x4ce   : > { %v444_v20 = vpop.xlane.xlu0 %443  ;;  %v451_v21 = vpop.permute.xlu1 %450 }
 0x4cf   : > { %794 = vrcp.f32 %v444_v20  ;;  %749 = vmatprep.mubr.msk.bf16.mxu0 %vm225_vm2, %v451_v21 }
 0x4d2   : > { %v453_v3 = vpop.permute.xlu0 %452  ;;  %v455_v4 = vpop.permute.xlu1 %454 }
 0x4d5   : > { %v793_v22 = vpop.eup %792 }
 0x4d6   : > { %v446_v24 = vmul.f32 %v793_v22, %v789_v15  ;;  %v457_v2 = vpop.permute.xlu1 %456 }
 0x4d9   : > { %v795_v23 = vpop.eup %794 }
 0x4da   : > { %v448_v25 = vmul.f32 %v795_v23, %v791_v17 }
 0x4dc   : > { %v449_v26 = vpack.c.bf16 %v448_v25, %v446_v24 }
 0x4de   : > { %758 = vmatprep.subr.msk.bf16.mxu0 %vm225_vm2, %v449_v26  ;;  %v471_v1 = vsel %vm225_vm2, %v449_v26, 0 }
 0x4df   : > { %748 = vmatpush3.bf16.xpose.msra.mxu0 %v471_v1 }
 0x4e6   : > { %750 = vmatmul.mubr.msk.bf16.vlgmr.msra.gmra.mrb[4].mxu0 %vm225_vm2, %v453_v3 }
 0x4e7   : > { %753 = vmatprep.mubr.msk.bf16.mxu0 %vm225_vm2, %v455_v4 }
 0x4ee   : > { %754 = vmatmul.mubr.msk.bf16.gmra.mrb[8].mxu0 %vm225_vm2, %v457_v2 }
 0x5b9   : > { %v751_v27 = vpop.f32.mrb[4].mxu0 }
 0x5ba   : > { %v507_v28 = vpop.f32.mrb[5].mxu0 }
 0x5bb   : > { %v752_v29 = vpop.f32.mrb[6].mxu0 }
 0x5bc   : > { %v539_v30 = vpack.c.bf16 %v752_v29, %v751_v27  ;;  %v510_v31 = vpop.f32.mrb[7].mxu0 }
 0x5bd   : > { %v538_v32 = vpack.c.bf16 %v510_v31, %v507_v28 }
 0x5be   : > { %548 = vrot.lane.b32.xlu1 %v539_v30, %s811_s17 }
 0x5c1   : > { %v755_v33 = vpop.f32.mrb[8].mxu0 }
 0x5c2   : > { %546 = vrot.lane.b32.xlu1 %v538_v32, %s811_s17  ;;  %v523_v34 = vpop.f32.mrb[9].mxu0 }
 0x5c3   : > { %v756_v35 = vpop.f32.mrb[10].mxu0 }
 0x5c4   : > { %v541_v36 = vpack.c.bf16 %v756_v35, %v755_v33  ;;  %v526_v37 = vpop.f32.mrb[11].mxu0 }
 0x5c5   : > { %v540_v38 = vpack.c.bf16 %v526_v37, %v523_v34 }
 0x5c6   : > { %552 = vrot.lane.b32.xlu1 %v541_v36, %s811_s17 }
 0x5c7   : > { %550 = vrot.lane.b32.xlu0 %v540_v38, %s811_s17 }
 0x630   : > { %v549_v39 = vpop.permute.xlu1 %548 }
 0x631   : > { %v559_v40 = vsel %vm225_vm2, %v338_v52, %v549_v39 }
 0x632   : > { %v683_v41 = vcombine.low %v559_v40, %v559_v40  ;;  %v684_v42 = vcombine.high %v559_v40, %v559_v40 }
 0x634   : > { %597 = vst.msk [vmem:[%s116_s20 + $0x8] sm:$0xf] %vm594_vm3, %v683_v41  ;;  %598 = vst.msk [vmem:[%s116_s20 + $0xc] sm:$0xf] %vm594_vm3, %v684_v42  ;;  %v547_v43 = vpop.permute.xlu1 %546 }
 0x635   : > { %v556_v44 = vsel %vm225_vm2, %v337_v54, %v547_v43 }
 0x636   : > { %v681_v45 = vcombine.low %v556_v44, %v556_v44  ;;  %v682_v46 = vcombine.high %v556_v44, %v556_v44 }
 0x638   : > { %595 = vst.msk [vmem:[%s116_s20] sm:$0xf] %vm594_vm3, %v681_v45  ;;  %596 = vst.msk [vmem:[%s116_s20 + $0x4] sm:$0xf] %vm594_vm3, %v682_v46  ;;  %v553_v47 = vpop.permute.xlu1 %552 }
 0x639   : > { %v565_v48 = vsel %vm225_vm2, %v340_v58, %v553_v47  ;;  %v551_v49 = vpop.permute.xlu0 %550 }
 0x63a   : > { %v687_v51 = vcombine.low %v565_v48, %v565_v48  ;;  %v688_v52 = vcombine.high %v565_v48, %v565_v48  ;;  %v562_v50 = vsel %vm225_vm2, %v339_v60, %v551_v49 }
 0x63b   : > { %v685_v53 = vcombine.low %v562_v50, %v562_v50  ;;  %v686_v54 = vcombine.high %v562_v50, %v562_v50 }
 0x63c   : > { %601 = vst.msk [vmem:[%s116_s20 + $0x18] sm:$0xf] %vm594_vm3, %v687_v51  ;;  %602 = vst.msk [vmem:[%s116_s20 + $0x1c] sm:$0xf] %vm594_vm3, %v688_v52 }
 0x63d   : > { %599 = vst.msk [vmem:[%s116_s20 + $0x10] sm:$0xf] %vm594_vm3, %v685_v53  ;;  %600 = vst.msk [vmem:[%s116_s20 + $0x14] sm:$0xf] %vm594_vm3, %v686_v54 }
 0x63e PF: > { %s11_s6 = sadd.s32 1, %s802_s6  }
 0x63f   : > { %p8_p4 = scmp.ge.s32.totalorder %s11_s6, 4  }
 0x641   :  { %10 = sbr.rel (!%p8_p4) target bundleno = 1 (0x1), region = 54 }

// kernel: _lambda_.48
= control target key start
LH: loop header
LB: loop body
LE: loop exit
PB: predicated region body
PF: predicated region fallthrough
CT: control target
= control target key end

     0   :  { %s304_s1 = inlined_call_operand.vmem [shape: bf16[128,128], index: 1, kind: input, shape index: {}]   ;;  %s305_s0 = inlined_call_operand.vmem [shape: bf16[32,128], index: 0, kind: input, shape index: {}]   ;;  %s306_s2 = inlined_call_operand.vmem [shape: f32[1,128], index: 2, kind: input, shape index: {}]   ;;  %s307_s3 = inlined_call_operand.vmem [shape: bf16[32,128], index: 3, kind: output, shape index: {}]  }
   0x1   :  { %v235_v0 = vld [vmem:[%s304_s1] sm:$0xff]   ;;  %v236_v1 = vld [vmem:[%s304_s1 + $0x8] sm:$0xff]   ;;  %v237_v2 = vld [vmem:[%s304_s1 + $0x10] sm:$0xff]  }
   0x2   :  { %215 = vmatprep.subr.bf16.mxu0 %v235_v0  ;;  %v238_v3 = vld [vmem:[%s304_s1 + $0x18] sm:$0xff]   ;;  %v243_v4 = vld [vmem:[%s305_s0] sm:$0xff]   ;;  %v240_v6 = vld [vmem:[%s304_s1 + $0x28] sm:$0xff]  }
   0x3   :  { %216 = vmatpush3.bf16.msra.mxu0 %v235_v0  ;;  %231 = vmatprep.mubr.bf16.mxu0 %v243_v4  ;;  %v239_v5 = vld [vmem:[%s304_s1 + $0x20] sm:$0xff]   ;;  %v241_v7 = vld [vmem:[%s304_s1 + $0x30] sm:$0xff]   ;;  %v242_v8 = vld [vmem:[%s304_s1 + $0x38] sm:$0xff]  }
   0x4   :  { %217 = vmatprep.subr.bf16.mxu0 %v236_v1  ;;  %v244_v9 = vld [vmem:[%s305_s0 + $0x8] sm:$0xff]   ;;  %v175_v11 = vld [vmem:[%s306_s2] ss:$0 sm:$0xff] }
   0x7   :  { %218 = vmatpush3.bf16.msra.mxu0 %v236_v1 }
   0x8   :  { %219 = vmatprep.subr.bf16.mxu0 %v237_v2 }
   0xb   :  { %220 = vmatpush3.bf16.msra.mxu0 %v237_v2 }
   0xc   :  { %221 = vmatprep.subr.bf16.mxu0 %v238_v3 }
   0xf   :  { %222 = vmatpush3.bf16.msra.mxu0 %v238_v3 }
  0x10   :  { %223 = vmatprep.subr.bf16.mxu0 %v239_v5 }
  0x13   :  { %224 = vmatpush3.bf16.msra.mxu0 %v239_v5 }
  0x14   :  { %225 = vmatprep.subr.bf16.mxu0 %v240_v6 }
  0x17   :  { %226 = vmatpush3.bf16.msra.mxu0 %v240_v6 }
  0x18   :  { %227 = vmatprep.subr.bf16.mxu0 %v241_v7 }
  0x1b   :  { %228 = vmatpush3.bf16.msra.mxu0 %v241_v7 }
  0x1c   :  { %229 = vmatprep.subr.bf16.mxu0 %v242_v8 }
  0x1f   :  { %230 = vmatpush3.bf16.msra.mxu0 %v242_v8 }
  0x22   :  { %232 = vmatmul.mubr.bf16.vlgmr.msra.gmra.mrb[0].mxu0 %v244_v9 }
  0xf5   :  { %v233_v10 = vpop.f32.mrb[0].mxu0 }
  0xf6   :  { %v136_v12 = vpop.f32.mrb[1].mxu0  ;;  %v145_v14 = vadd.f32 %v233_v10, %v175_v11 }
  0xf7   :  { %v234_v13 = vpop.f32.mrb[2].mxu0  ;;  %v137_v17 = vadd.f32 %v175_v11, %v136_v12 }
  0xf8   :  { %v148_v15 = vadd.f32 %v234_v13, %v175_v11  ;;  %v139_v16 = vpop.f32.mrb[3].mxu0 }
  0xf9   :  { %v140_v18 = vadd.f32 %v175_v11, %v139_v16 }
  0xfa   :  { %v202_v19 = vpack.c.bf16 %v148_v15, %v145_v14 }
  0xfb   :  { %v197_v20 = vpack.c.bf16 %v140_v18, %v137_v17 }
  0xfc   :  { %204 = vst [vmem:[%s307_s3 + $0x8] sm:$0xff] %v202_v19  }
  0xfd   :  { %198 = vst [vmem:[%s307_s3] sm:$0xff] %v197_v20  }

// kernel: _lambda_.49
= control target key start
LH: loop header
LB: loop body
LE: loop exit
PB: predicated region body
PF: predicated region fallthrough
CT: control target
= control target key end

     0   :  { %vm22_vm0 = vcmask 523264   ;;  %vm114_vm1 = vcmask 519168   ;;  %s206_s0 = inlined_call_operand.vmem [shape: bf16[32,64], index: 0, kind: input, shape index: {}]   ;;  %s207_s1 = inlined_call_operand.vmem [shape: f32[1,64], index: 1, kind: input, shape index: {}]   ;;  %s208_s2 = inlined_call_operand.vmem [shape: f32[1,64], index: 2, kind: input, shape index: {}]   ;;  %s209_s3 = inlined_call_operand.vmem [shape: bf16[32,64], index: 3, kind: output, shape index: {}]  }
   0x1   :  { %v134_v0 = vld [vmem:[%s206_s0] sm:$0xff]   ;;  %v141_v1 = vld [vmem:[%s206_s0 + $0x8] sm:$0xff]  }
   0x2   :  { %v135_v2 = vunpack.c.l.bf16 %v134_v0  ;;  %v139_v3 = vunpack.c.l.bf16 %v141_v1  ;;  %v136_v4 = vunpack.c.h.bf16 %v134_v0  ;;  %v140_v5 = vunpack.c.h.bf16 %v141_v1  ;;  %v123_v43 = vld [vmem:[%s207_s1] ss:$0 sm:$0xff] }
   0x3   :  { %v124_v45 = vld [vmem:[%s208_s2] ss:$0 sm:$0xff] }
   0x4   :  { %v23_v6 = vsel %vm22_vm0, %v135_v2, 0.0  ;;  %v29_v7 = vsel %vm22_vm0, %v139_v3, 0.0  ;;  %v26_v8 = vsel %vm22_vm0, %v136_v4, 0.0  ;;  %v32_v9 = vsel %vm22_vm0, %v140_v5, 0.0 }
   0x5   :  { %24 = vadd.xlane.f32.xlu0 %v23_v6  ;;  %30 = vadd.xlane.f32.xlu1 %v29_v7 }
   0x9   :  { %27 = vadd.xlane.f32.xlu0 %v26_v8  ;;  %33 = vadd.xlane.f32.xlu1 %v32_v9 }
  0x92   :  { %v25_v10 = vpop.xlane.xlu0 %24  ;;  %v31_v11 = vpop.xlane.xlu1 %30 }
  0x93   :  { %v36_v12 = vmul.f32 0.015625, %v25_v10  ;;  %v38_v13 = vmul.f32 0.015625, %v31_v11 }
  0x95   :  { %v40_v14 = vsub.f32 %v135_v2, %v36_v12  ;;  %v42_v15 = vsub.f32 %v139_v3, %v38_v13 }
  0x96   :  { %v28_v16 = vpop.xlane.xlu0 %27  ;;  %v34_v17 = vpop.xlane.xlu1 %33 }
  0x97   :  { %v37_v18 = vmul.f32 0.015625, %v28_v16  ;;  %v39_v19 = vmul.f32 0.015625, %v34_v17  ;;  %v44_v20 = vmul.f32 %v40_v14, %v40_v14  ;;  %v46_v21 = vmul.f32 %v42_v15, %v42_v15 }
  0x99   :  { %v41_v22 = vsub.f32 %v136_v4, %v37_v18  ;;  %v43_v23 = vsub.f32 %v140_v5, %v39_v19  ;;  %v48_v24 = vsel %vm22_vm0, %v44_v20, 0.0  ;;  %v54_v25 = vsel %vm22_vm0, %v46_v21, 0.0 }
  0x9a   :  { %49 = vadd.xlane.f32.xlu0 %v48_v24 }
  0x9b   :  { %v45_v26 = vmul.f32 %v41_v22, %v41_v22  ;;  %v47_v27 = vmul.f32 %v43_v23, %v43_v23 }
  0x9d   :  { %v51_v28 = vsel %vm22_vm0, %v45_v26, 0.0  ;;  %v57_v29 = vsel %vm22_vm0, %v47_v27, 0.0 }
  0x9e   :  { %55 = vadd.xlane.f32.xlu0 %v54_v25  ;;  %52 = vadd.xlane.f32.xlu1 %v51_v28 }
  0xa2   :  { %58 = vadd.xlane.f32.xlu1 %v57_v29 }
 0x127   :  { %v50_v30 = vpop.xlane.xlu0 %49 }
 0x128   :  { %v60_v31 = vmul.f32 0.015625, %v50_v30 }
 0x12a   :  { %v64_v32 = vadd.f32 1e-05, %v60_v31 }
 0x12b   :  { %v53_v33 = vpop.xlane.xlu1 %52  ;;  %v56_v34 = vpop.xlane.xlu0 %55 }
 0x12c   :  { %142 = vrsqrt.f32 %v64_v32  ;;  %v61_v35 = vmul.f32 0.015625, %v53_v33  ;;  %v62_v36 = vmul.f32 0.015625, %v56_v34 }
 0x12e   :  { %v65_v37 = vadd.f32 1e-05, %v61_v35  ;;  %v66_v38 = vadd.f32 1e-05, %v62_v36 }
 0x12f   :  { %v59_v39 = vpop.xlane.xlu1 %58 }
 0x130   :  { %144 = vrsqrt.f32 %v65_v37  ;;  %v63_v40 = vmul.f32 0.015625, %v59_v39 }
 0x131   :  { %146 = vrsqrt.f32 %v66_v38 }
 0x132   :  { %v67_v41 = vadd.f32 1e-05, %v63_v40 }
 0x134   :  { %148 = vrsqrt.f32 %v67_v41 }
 0x136   :  { %v143_v42 = vpop.eup %142 }
 0x137   :  { %v72_v44 = vmul.f32 %v143_v42, %v40_v14 }
 0x139   :  { %v83_v46 = vmul.f32 %v123_v43, %v72_v44 }
 0x13a   :  { %v145_v47 = vpop.eup %144 }
 0x13b   :  { %v147_v48 = vpop.eup %146  ;;  %v94_v49 = vadd.f32 %v124_v45, %v83_v46  ;;  %v73_v50 = vmul.f32 %v145_v47, %v41_v22 }
 0x13c   :  { %v74_v51 = vmul.f32 %v147_v48, %v42_v15 }
 0x13d   :  { %v129_v52 = vpack.c.bf16 %v94_v49, %v94_v49  ;;  %v84_v53 = vmul.f32 %v123_v43, %v73_v50 }
 0x13e   :  { %v149_v54 = vpop.eup %148  ;;  %v85_v55 = vmul.f32 %v123_v43, %v74_v51 }
 0x13f   :  { %115 = vst.msk [vmem:[%s209_s3] sm:$0xf] %vm114_vm1, %v129_v52  ;;  %v95_v56 = vadd.f32 %v124_v45, %v84_v53  ;;  %v75_v57 = vmul.f32 %v149_v54, %v43_v23 }
 0x140   :  { %v96_v58 = vadd.f32 %v124_v45, %v85_v55 }
 0x141   :  { %v130_v59 = vpack.c.bf16 %v95_v56, %v95_v56  ;;  %v86_v60 = vmul.f32 %v123_v43, %v75_v57 }
 0x142   :  { %v131_v61 = vpack.c.bf16 %v96_v58, %v96_v58 }
 0x143   :  { %116 = vst.msk [vmem:[%s209_s3 + $0x4] sm:$0xf] %vm114_vm1, %v130_v59  ;;  %v97_v62 = vadd.f32 %v124_v45, %v86_v60 }
 0x144   :  { %117 = vst.msk [vmem:[%s209_s3 + $0x8] sm:$0xf] %vm114_vm1, %v131_v61 }
 0x145   :  { %v132_v63 = vpack.c.bf16 %v97_v62, %v97_v62 }
 0x147   :  { %118 = vst.msk [vmem:[%s209_s3 + $0xc] sm:$0xf] %vm114_vm1, %v132_v63 }

// kernel: _lambda_.50
= control target key start
LH: loop header
LB: loop body
LE: loop exit
PB: predicated region body
PF: predicated region fallthrough
CT: control target
= control target key end

     0   :  { %s692_s12 = smov 0   ;;  %s939_s0 = inlined_call_operand.vmem [shape: bf16[2,4,4,64], index: 0, kind: input, shape index: {}]   ;;  %s940_s1 = inlined_call_operand.vmem [shape: f32[9,64], index: 1, kind: input, shape index: {}]   ;;  %s941_s2 = inlined_call_operand.vmem [shape: f32[1,64], index: 2, kind: input, shape index: {}]   ;;  %s942_s3 = inlined_call_operand.vmem [shape: bf16[2,4,4,64], index: 3, kind: output, shape index: {}]  }
   0x1 LB: > { %s607_s13 = sadd.s32 4294967295, %s669_s12   ;;  %p611_p0 = scmp.ge.s32.totalorder %s669_s12, 1  ;;  %s669_s12 = sphi %s692_s12, %s13_s12  }
   0x2   : > { %p137_p1 = scmp.lt.s32.totalorder %s669_s12, 3 }
   0x4   : > { %p138_p2 = pnand %p611_p0, %p137_p1 }
   0x5   : > { %p161_p3 = scmp.lt.s32.totalorder (!%p138_p2), %s607_s13, 1  ;;  %vm216_vm0 = vcmask (!%p138_p2), 1040384   ;;  %vm217_vm1 = vsmask.f32 (!%p138_p2), 256  ;;  %vm224_vm2 = vcmask (!%p138_p2), 1042432   ;;  %v671_v0 = vmov (!%p138_p2), 0  }
   0x6   : > { %141 = sbr.rel (%p138_p2) target bundleno = 78 (0x4e), region = 32  ;;  %v179_v1 = vrot.slane (!%p138_p2), %v671_v0, 7  ;;  %vm700_vm3 = vmand (!%p138_p2), %vm216_vm0, %vm217_vm1  ;;  %vm225_vm4 = vsmask.f32 (!%p138_p2), 2304  ;;  %v616_v19 = vld [vmem:[%s941_s2] ss:$0 sm:$0xff] (!%p138_p2) }
   0x7   : > { %vm707_vm5 = vmand (!%p138_p2), %vm224_vm2, %vm225_vm4  ;;  %v618_v28 = vld [vmem:[%s940_s1 + $0x1] ss:$0 sm:$0xff] (!%p138_p2)  ;;  %vm282_vm6 = vcmask (!%p138_p2), 1046532   ;;  %v617_v36 = vld [vmem:[%s940_s1] ss:$0 sm:$0xff] (!%p138_p2)  ;;  %vm325_vm7 = vcmask (!%p138_p2), 1041408  }
   0x8   : > { %v219_v4 = vsel (!%p138_p2), %vm700_vm3, 0, %v179_v1  ;;  %vm326_vm8 = vcmask (!%p138_p2), 1045508   ;;  %v755_v49 = vld [vmem:[%s940_s1 + $0x2] ss:$0 sm:$0xff] (!%p138_p2)  ;;  %vm767_vm9 = vmor (!%p138_p2), %vm224_vm2, %vm282_vm6  ;;  %vm547_vm11 = vcmask (!%p138_p2), 517120  }
   0x9   : > { %v227_v5 = vsel (!%p138_p2), %vm707_vm5, %v219_v4, 0  ;;  %vm798_vm10 = vmor (!%p138_p2), %vm325_vm7, %vm326_vm8 }
   0xa   : > { %v721_v9 = vunpack.c.l.bf16 (!%p138_p2), %v227_v5 }
   0xc   : > { %v269_v40 = vmul.f32 (!%p138_p2), %v618_v28, %v721_v9  ;;  %v256_v48 = vmul.f32 (!%p138_p2), %v617_v36, %v721_v9  ;;  %v313_v62 = vmul.f32 (!%p138_p2), %v755_v49, %v721_v9 }
   0xd   : > { %s952_s13 = smov (!%p161_p3, %s607_s13), 1 }
   0xe   : > { %s652_s14 = sshll.u32 %s952_s13, 3  ;;  %v277_v52 = vcombine.high %v269_v40, %v269_v40  ;;  %v619_v53 = vrot.slane %v269_v40, 9 }
   0xf   : > { %s165_s17 = scalar_lea.vmem %s939_s0, %s652_s14  ;;  %s880_s16 = scalar_lea.vmem %s942_s3, %s652_s14 }
  0x10   : > { %v172_v6 = vld [vmem:[%s165_s17] sm:$0x3]  ;;  %v173_v7 = vld [vmem:[%s165_s17 + $0x2] sm:$0x3]  ;;  %v174_v8 = vld [vmem:[%s165_s17 + $0x4] sm:$0x3] }
  0x11   : > { %v175_v10 = vld [vmem:[%s165_s17 + $0x6] sm:$0x3]  ;;  %v184_v11 = vshrl.u32 %v172_v6, 16  ;;  %v187_v12 = vshll.u32 %v172_v6, 16  ;;  %v191_v13 = vshrl.u32 %v173_v7, 16  ;;  %v194_v14 = vshll.u32 %v173_v7, 16 }
  0x12   : > { %v198_v15 = vshrl.u32 %v174_v8, 16  ;;  %v201_v16 = vshll.u32 %v174_v8, 16  ;;  %v205_v17 = vshrl.u32 %v175_v10, 16  ;;  %v208_v18 = vshll.u32 %v175_v10, 16 }
  0x13   : > { %v186_v20 = vrot.slane %v184_v11, 7  ;;  %v193_v21 = vrot.slane %v191_v13, 7  ;;  %v232_v22 = vunpack.c.l.bf16 %v172_v6  ;;  %v233_v23 = vunpack.c.l.bf16 %v173_v7 }
  0x14   : > { %v200_v24 = vrot.slane %v198_v15, 7  ;;  %v207_v25 = vrot.slane %v205_v17, 7  ;;  %v234_v26 = vunpack.c.l.bf16 %v174_v8  ;;  %v235_v27 = vunpack.c.l.bf16 %v175_v10  ;;  %v785_v17 = vld [vmem:[%s940_s1 + $0x4] ss:$0 sm:$0xff] }
  0x15   : > { %v189_v29 = vor.u32 %v187_v12, %v186_v20  ;;  %v196_v30 = vor.u32 %v194_v14, %v193_v21  ;;  %v243_v31 = vadd.f32 %v616_v19, %v232_v22  ;;  %v244_v34 = vadd.f32 %v616_v19, %v233_v23  ;;  %v780_v12 = vld [vmem:[%s940_s1 + $0x3] ss:$0 sm:$0xff]  ;;  %v805_v23 = vld [vmem:[%s940_s1 + $0x7] ss:$0 sm:$0xff] }
  0x16   : > { %v203_v32 = vor.u32 %v201_v16, %v200_v24  ;;  %v210_v33 = vor.u32 %v208_v18, %v207_v25  ;;  %v245_v35 = vadd.f32 %v616_v19, %v234_v26  ;;  %v246_v39 = vadd.f32 %v616_v19, %v235_v27  ;;  %v790_v18 = vld [vmem:[%s940_s1 + $0x5] ss:$0 sm:$0xff]  ;;  %v810_v24 = vld [vmem:[%s940_s1 + $0x8] ss:$0 sm:$0xff] }
  0x17   : > { %v220_v37 = vsel %vm700_vm3, 0, %v189_v29  ;;  %v221_v38 = vsel %vm700_vm3, 0, %v196_v30  ;;  %v286_v61 = vrot.slane %v277_v52, 5  ;;  %v260_v63 = vadd.f32 %v256_v48, %v243_v31 }
  0x18   : > { %v222_v41 = vsel %vm700_vm3, 0, %v203_v32  ;;  %v223_v42 = vsel %vm700_vm3, 0, %v210_v33  ;;  %v228_v43 = vsel %vm707_vm5, %v220_v37, 0  ;;  %v229_v44 = vsel %vm707_vm5, %v221_v38, 0 }
  0x19   : > { %v230_v45 = vsel %vm707_vm5, %v222_v41, 0  ;;  %v747_v46 = vunpack.c.l.bf16 %v228_v43  ;;  %v749_v47 = vunpack.c.l.bf16 %v229_v44  ;;  %v231_v50 = vsel %vm707_vm5, %v223_v42, 0 }
  0x1a   : > { %v759_v51 = vunpack.c.l.bf16 %v230_v45  ;;  %v287_v5 = vsel %vm767_vm9, %v619_v53, %v286_v61  ;;  %v321_v15 = vcombine.high %v313_v62, %v313_v62  ;;  %v624_v16 = vrot.slane %v313_v62, 10 }
  0x1b   : > { %v257_v54 = vmul.f32 %v617_v36, %v747_v46  ;;  %v258_v55 = vmul.f32 %v617_v36, %v749_v47  ;;  %v270_v56 = vmul.f32 %v618_v28, %v747_v46  ;;  %v271_v57 = vmul.f32 %v618_v28, %v749_v47 }
  0x1c   : > { %v259_v59 = vmul.f32 %v617_v36, %v759_v51  ;;  %v272_v60 = vmul.f32 %v618_v28, %v759_v51  ;;  %v304_v21 = vadd.f32 %v287_v5, %v260_v63  ;;  %v330_v26 = vrot.slane %v321_v15, 6 }
  0x1d   : > { %v261_v0 = vadd.f32 %v257_v54, %v244_v34  ;;  %v278_v1 = vcombine.high %v270_v56, %v270_v56  ;;  %v279_v2 = vcombine.high %v271_v57, %v271_v57  ;;  %v262_v3 = vadd.f32 %v258_v55, %v245_v35  ;;  %v831_v35 = vld [vmem:[%s940_s1 + $0x6] ss:$0 sm:$0xff] }
  0x1e   : > { %v280_v4 = vcombine.high %v272_v60, %v272_v60  ;;  %v620_v6 = vrot.slane %v270_v56, 9  ;;  %v621_v8 = vrot.slane %v271_v57, 9  ;;  %v622_v11 = vrot.slane %v272_v60, 9 }
  0x1f   : > { %v290_v7 = vrot.slane %v278_v1, 5  ;;  %v294_v10 = vrot.slane %v279_v2, 5  ;;  %v263_v13 = vadd.f32 %v259_v59, %v246_v39  ;;  %v814_v27 = vunpack.c.l.bf16 %v231_v50 }
  0x20   : > { %v298_v14 = vrot.slane %v280_v4, 5  ;;  %v358_v28 = vmul.f32 %v780_v12, %v747_v46  ;;  %v371_v31 = vmul.f32 %v785_v17, %v747_v46  ;;  %v412_v32 = vmul.f32 %v790_v18, %v747_v46 }
  0x21   : > { %v291_v19 = vsel %vm767_vm9, %v620_v6, %v290_v7  ;;  %v295_v20 = vsel %vm767_vm9, %v621_v8, %v294_v10  ;;  %v331_v34 = vsel %vm798_vm10, %v624_v16, %v330_v26  ;;  %v466_v36 = vmul.f32 %v805_v23, %v749_v47 }
  0x22   : > { %v299_v25 = vsel %vm767_vm9, %v622_v11, %v298_v14  ;;  %v305_v29 = vadd.f32 %v291_v19, %v261_v0  ;;  %v818_v30 = vadd.f32 %v295_v20, %v262_v3  ;;  %v507_v37 = vmul.f32 %v810_v24, %v749_v47 }
  0x23   : > { %v824_v33 = vadd.f32 %v299_v25, %v263_v13  ;;  %v348_v38 = vadd.f32 %v331_v34, %v304_v21  ;;  %v379_v39 = vcombine.high %v371_v31, %v371_v31  ;;  %v630_v40 = vrot.slane %v371_v31, 9 }
  0x24   : > { %v420_v41 = vcombine.high %v412_v32, %v412_v32  ;;  %v635_v42 = vrot.slane %v412_v32, 10  ;;  %v474_v43 = vcombine.high %v466_v36, %v466_v36  ;;  %v641_v44 = vrot.slane %v466_v36, 9 }
  0x25   : > { %v515_v45 = vcombine.high %v507_v37, %v507_v37  ;;  %v362_v48 = vadd.f32 %v358_v28, %v348_v38  ;;  %v385_v50 = vrot.slane %v379_v39, 5  ;;  %v453_v53 = vmul.f32 %v831_v35, %v749_v47 }
  0x26   : > { %v426_v52 = vrot.slane %v420_v41, 6  ;;  %v480_v54 = vrot.slane %v474_v43, 5  ;;  %v646_v55 = vrot.slane %v507_v37, 10  ;;  %v314_v57 = vmul.f32 %v755_v49, %v747_v46 }
  0x27   : > { %v521_v56 = vrot.slane %v515_v45, 6  ;;  %v386_v59 = vsel %vm767_vm9, %v630_v40, %v385_v50  ;;  %v372_v61 = vmul.f32 %v785_v17, %v749_v47  ;;  %v413_v62 = vmul.f32 %v790_v18, %v749_v47 }
  0x28   : > { %v427_v60 = vsel %vm798_vm10, %v635_v42, %v426_v52  ;;  %v403_v63 = vadd.f32 %v386_v59, %v362_v48  ;;  %v481_v0 = vsel %vm767_vm9, %v641_v44, %v480_v54  ;;  %v322_v1 = vcombine.high %v314_v57, %v314_v57 }
  0x29   : > { %v359_v46 = vmul.f32 %v780_v12, %v749_v47  ;;  %v625_v2 = vrot.slane %v314_v57, 10  ;;  %v380_v3 = vcombine.high %v372_v61, %v372_v61  ;;  %v631_v4 = vrot.slane %v372_v61, 9 }
  0x2a   : > { %v421_v5 = vcombine.high %v413_v62, %v413_v62  ;;  %v444_v6 = vadd.f32 %v427_v60, %v403_v63  ;;  %v522_v7 = vsel %vm798_vm10, %v646_v55, %v521_v56  ;;  %v334_v8 = vrot.slane %v322_v1, 6 }
  0x2b   : > { %v636_v10 = vrot.slane %v413_v62, 10  ;;  %v389_v11 = vrot.slane %v380_v3, 5  ;;  %v467_v14 = vmul.f32 %v805_v23, %v759_v51  ;;  %v508_v15 = vmul.f32 %v810_v24, %v759_v51 }
  0x2c   : > { %v430_v13 = vrot.slane %v421_v5, 6  ;;  %v457_v16 = vadd.f32 %v453_v53, %v444_v6  ;;  %v335_v19 = vsel %vm798_vm10, %v625_v2, %v334_v8  ;;  %v454_v20 = vmul.f32 %v831_v35, %v759_v51 }
  0x2d   : > { %v315_v21 = vmul.f32 %v755_v49, %v749_v47  ;;  %v349_v25 = vadd.f32 %v335_v19, %v305_v29  ;;  %v390_v26 = vsel %vm767_vm9, %v631_v4, %v389_v11  ;;  %v475_v28 = vcombine.high %v467_v14, %v467_v14 }
  0x2e   : > { %v360_v31 = vmul.f32 %v780_v12, %v759_v51  ;;  %v498_v32 = vadd.f32 %v481_v0, %v457_v16  ;;  %v431_v34 = vsel %vm798_vm10, %v636_v10, %v430_v13  ;;  %v642_v36 = vrot.slane %v467_v14, 9 }
  0x2f   : > { %v516_v37 = vcombine.high %v508_v15, %v508_v15  ;;  %v363_v38 = vadd.f32 %v359_v46, %v349_v25  ;;  %v484_v39 = vrot.slane %v475_v28, 5  ;;  %v323_v40 = vcombine.high %v315_v21, %v315_v21 }
  0x30   : > { %v626_v41 = vrot.slane %v315_v21, 10  ;;  %v539_v47 = vadd.f32 %v522_v7, %v498_v32  ;;  %v647_v29 = vrot.slane %v508_v15, 10  ;;  %v373_v42 = vmul.f32 %v785_v17, %v759_v51 }
  0x31   : > { %v414_v43 = vmul.f32 %v790_v18, %v759_v51  ;;  %v404_v44 = vadd.f32 %v390_v26, %v363_v38  ;;  %v485_v45 = vsel %vm767_vm9, %v642_v36, %v484_v39  ;;  %v525_v48 = vrot.slane %v516_v37, 6 }
  0x32   : > { %v338_v50 = vrot.slane %v323_v40, 6  ;;  %v543_v52 = vpack.c.bf16 %v539_v47, %v539_v47  ;;  %v381_v53 = vcombine.high %v373_v42, %v373_v42  ;;  %v632_v54 = vrot.slane %v373_v42, 9 }
  0x33   : > { %v455_v55 = vmul.f32 %v831_v35, %v814_v27  ;;  %v445_v56 = vadd.f32 %v431_v34, %v404_v44  ;;  %v422_v59 = vcombine.high %v414_v43, %v414_v43  ;;  %v637_v60 = vrot.slane %v414_v43, 10 }
  0x34   : > { %v339_v57 = vsel %vm798_vm10, %v626_v41, %v338_v50  ;;  %548 = vst.msk [vmem:[%s880_s16] sm:$0x3] %vm547_vm11, %v543_v52  ;;  %v393_v62 = vrot.slane %v381_v53, 5  ;;  %v468_v63 = vmul.f32 %v805_v23, %v814_v27  ;;  %v509_v0 = vmul.f32 %v810_v24, %v814_v27 }
  0x35   : > { %v350_v61 = vadd.f32 %v339_v57, %v818_v30  ;;  %v458_v1 = vadd.f32 %v454_v20, %v445_v56  ;;  %v526_v46 = vsel %vm798_vm10, %v647_v29, %v525_v48  ;;  %v434_v2 = vrot.slane %v422_v59, 6 }
  0x36   : > { %v316_v3 = vmul.f32 %v755_v49, %v759_v51  ;;  %v394_v5 = vsel %vm767_vm9, %v632_v54, %v393_v62  ;;  %v476_v30 = vcombine.high %v468_v63, %v468_v63  ;;  %v643_v6 = vrot.slane %v468_v63, 9 }
  0x37   : > { %v364_v4 = vadd.f32 %v360_v31, %v350_v61  ;;  %v499_v7 = vadd.f32 %v485_v45, %v458_v1  ;;  %v435_v8 = vsel %vm798_vm10, %v637_v60, %v434_v2  ;;  %v517_v10 = vcombine.high %v509_v0, %v509_v0 }
  0x38   : > { %v648_v11 = vrot.slane %v509_v0, 10  ;;  %v488_v14 = vrot.slane %v476_v30, 5  ;;  %v324_v15 = vcombine.high %v316_v3, %v316_v3  ;;  %v627_v16 = vrot.slane %v316_v3, 10 }
  0x39   : > { %v405_v13 = vadd.f32 %v394_v5, %v364_v4  ;;  %v540_v19 = vadd.f32 %v526_v46, %v499_v7  ;;  %v529_v20 = vrot.slane %v517_v10, 6  ;;  %v374_v49 = vmul.f32 %v785_v17, %v814_v27 }
  0x3a   : > { %v415_v51 = vmul.f32 %v790_v18, %v814_v27  ;;  %v489_v25 = vsel %vm767_vm9, %v643_v6, %v488_v14  ;;  %v342_v26 = vrot.slane %v324_v15, 6  ;;  %v361_v28 = vmul.f32 %v780_v12, %v814_v27 }
  0x3b   : > { %v446_v21 = vadd.f32 %v435_v8, %v405_v13  ;;  %v544_v31 = vpack.c.bf16 %v540_v19, %v540_v19  ;;  %v530_v32 = vsel %vm798_vm10, %v648_v11, %v529_v20  ;;  %v382_v34 = vcombine.high %v374_v49, %v374_v49 }
  0x3c   : > { %v633_v36 = vrot.slane %v374_v49, 9  ;;  %v343_v17 = vsel %vm798_vm10, %v627_v16, %v342_v26  ;;  %v423_v38 = vcombine.high %v415_v51, %v415_v51  ;;  %v638_v18 = vrot.slane %v415_v51, 10 }
  0x3d   : > { %v459_v37 = vadd.f32 %v455_v55, %v446_v21  ;;  %549 = vst.msk [vmem:[%s880_s16 + $0x2] sm:$0x3] %vm547_vm11, %v544_v31  ;;  %v351_v39 = vadd.f32 %v343_v17, %v824_v33  ;;  %v397_v40 = vrot.slane %v382_v34, 5  ;;  %v469_v12 = vmul.f32 %v805_v23, %v721_v9 }
  0x3e   : > { %v510_v27 = vmul.f32 %v810_v24, %v721_v9  ;;  %v438_v47 = vrot.slane %v423_v38, 6  ;;  %v456_v23 = vmul.f32 %v831_v35, %v721_v9 }
  0x3f   : > { %v500_v41 = vadd.f32 %v489_v25, %v459_v37  ;;  %v365_v29 = vadd.f32 %v361_v28, %v351_v39  ;;  %v398_v42 = vsel %vm767_vm9, %v633_v36, %v397_v40  ;;  %v477_v43 = vcombine.high %v469_v12, %v469_v12 }
  0x40   : > { %v439_v45 = vsel %vm798_vm10, %v638_v18, %v438_v47  ;;  %v644_v33 = vrot.slane %v469_v12, 9  ;;  %v518_v48 = vcombine.high %v510_v27, %v510_v27  ;;  %v649_v53 = vrot.slane %v510_v27, 10 }
  0x41   : > { %v541_v44 = vadd.f32 %v530_v32, %v500_v41  ;;  %v406_v50 = vadd.f32 %v398_v42, %v365_v29  ;;  %v492_v24 = vrot.slane %v477_v43, 5 }
  0x42   : > { %v533_v54 = vrot.slane %v518_v48, 6 }
  0x43   : > { %v545_v52 = vpack.c.bf16 %v541_v44, %v541_v44  ;;  %v447_v55 = vadd.f32 %v439_v45, %v406_v50  ;;  %v493_v56 = vsel %vm767_vm9, %v644_v33, %v492_v24 }
  0x44   : > { %v534_v59 = vsel %vm798_vm10, %v649_v53, %v533_v54 }
  0x45   : > { %550 = vst.msk [vmem:[%s880_s16 + $0x4] sm:$0x3] %vm547_vm11, %v545_v52  ;;  %v460_v57 = vadd.f32 %v456_v23, %v447_v55 }
  0x47   : > { %v501_v60 = vadd.f32 %v493_v56, %v460_v57 }
  0x49   : > { %v542_v61 = vadd.f32 %v534_v59, %v501_v60 }
  0x4b   : > { %v546_v62 = vpack.c.bf16 %v542_v61, %v542_v61 }
  0x4d   : > { %551 = vst.msk [vmem:[%s880_s16 + $0x6] sm:$0x3] %vm547_vm11, %v546_v62 }
  0x4e PF: > { %s13_s12 = sadd.s32 1, %s669_s12  }
  0x4f   : > { %p10_p4 = scmp.ge.s32.totalorder %s13_s12, 4  }
  0x51   :  { %12 = sbr.rel (!%p10_p4) target bundleno = 1 (0x1), region = 62 }

// kernel: _lambda_.51
= control target key start
LH: loop header
LB: loop body
LE: loop exit
PB: predicated region body
PF: predicated region fallthrough
CT: control target
= control target key end

     0   :  { %vm29_vm0 = vcmask 523264   ;;  %v316_v38 = vmov 0   ;;  %s428_s0 = inlined_call_operand.vmem [shape: bf16[32,64], index: 0, kind: input, shape index: {}]   ;;  %s429_s3 = inlined_call_operand.vmem [shape: bf16[64,256], index: 3, kind: input, shape index: {}]   ;;  %s430_s1 = inlined_call_operand.vmem [shape: f32[1,64], index: 1, kind: input, shape index: {}]   ;;  %s431_s2 = inlined_call_operand.vmem [shape: f32[1,64], index: 2, kind: input, shape index: {}]   ;;  %s432_s4 = inlined_call_operand.vmem [shape: f32[1,256], index: 4, kind: input, shape index: {}]   ;;  %s433_s5 = inlined_call_operand.vmem [shape: bf16[32,256], index: 5, kind: output, shape index: {}]  }
   0x1   :  { %v279_v0 = vld [vmem:[%s428_s0] sm:$0xff]   ;;  %v286_v1 = vld [vmem:[%s428_s0 + $0x8] sm:$0xff]   ;;  %v299_v32 = vld [vmem:[%s429_s3 + $0x14] ss:$8 sps:$4 sm:$0xff]   ;;  %205 = vmatprep.mubr.bf16.mxu0 %v316_v38  ;;  %215 = vmatprep.mubr.bf16.mxu1 %v316_v38 }
   0x2   :  { %v280_v2 = vunpack.c.l.bf16 %v279_v0  ;;  %v284_v3 = vunpack.c.l.bf16 %v286_v1  ;;  %v281_v4 = vunpack.c.h.bf16 %v279_v0  ;;  %v285_v5 = vunpack.c.h.bf16 %v286_v1  ;;  %v296_v30 = vld [vmem:[%s429_s3 + $0x4] ss:$8 sps:$4 sm:$0xff]   ;;  %v298_v31 = vld [vmem:[%s429_s3] ss:$8 sps:$4 sm:$0xff]   ;;  %v301_v33 = vld [vmem:[%s429_s3 + $0x10] ss:$8 sps:$4 sm:$0xff]  }
   0x3   :  { %173 = vmatprep.subr.bf16.mxu0 %v296_v30  ;;  %287 = vmatprep.subr.bf16.mxu1 %v296_v30  ;;  %v302_v34 = vld [vmem:[%s429_s3 + $0x24] ss:$8 sps:$4 sm:$0xff]   ;;  %v304_v35 = vld [vmem:[%s429_s3 + $0x20] ss:$8 sps:$4 sm:$0xff]   ;;  %v305_v36 = vld [vmem:[%s429_s3 + $0x34] ss:$8 sps:$4 sm:$0xff]  }
   0x4   :  { %v30_v6 = vsel %vm29_vm0, %v280_v2, 0.0  ;;  %v36_v7 = vsel %vm29_vm0, %v284_v3, 0.0  ;;  %v33_v8 = vsel %vm29_vm0, %v281_v4, 0.0  ;;  %v39_v9 = vsel %vm29_vm0, %v285_v5, 0.0  ;;  %174 = vmatpush1.bf16.msra.mxu0 %v298_v31  ;;  %291 = vmatpush1.bf16.msra.mxu1 %v298_v31  ;;  %v307_v37 = vld [vmem:[%s429_s3 + $0x30] ss:$8 sps:$4 sm:$0xff]  }
   0x5   :  { %31 = vadd.xlane.f32.xlu0 %v30_v6  ;;  %37 = vadd.xlane.f32.xlu1 %v36_v7  ;;  %v258_v53 = vld [vmem:[%s430_s1] ss:$0 sm:$0xff]  ;;  %v117_v7 = vlaneseq }
   0x6   :  { %175 = vmatprep.subr.bf16.mxu0 %v299_v32  ;;  %288 = vmatprep.subr.bf16.mxu1 %v299_v32  ;;  %v259_v59 = vld [vmem:[%s431_s2] ss:$0 sm:$0xff] }
   0x8   :  { %176 = vmatpush1.bf16.msra.mxu0 %v301_v33  ;;  %292 = vmatpush1.bf16.msra.mxu1 %v301_v33 }
   0x9   :  { %34 = vadd.xlane.f32.xlu0 %v33_v8  ;;  %40 = vadd.xlane.f32.xlu1 %v39_v9  ;;  %v118_v8 = vshrl.u32 %v117_v7, 7 }
   0xa   :  { %177 = vmatprep.subr.bf16.mxu0 %v302_v34  ;;  %289 = vmatprep.subr.bf16.mxu1 %v302_v34 }
   0xb   :  { %v119_v9 = vsub.s32 0, %v118_v8 }
   0xc   :  { %178 = vmatpush1.bf16.msra.mxu0 %v304_v35  ;;  %293 = vmatpush1.bf16.msra.mxu1 %v304_v35 }
   0xd   :  { %179 = vmatprep.subr.bf16.mxu0 %v305_v36  ;;  %290 = vmatprep.subr.bf16.mxu1 %v305_v36 }
  0x10   :  { %180 = vmatpush1.bf16.msra.mxu0 %v307_v37  ;;  %294 = vmatpush1.bf16.msra.mxu1 %v307_v37 }
  0x92   :  { %v32_v10 = vpop.xlane.xlu0 %31  ;;  %v38_v11 = vpop.xlane.xlu1 %37 }
  0x93   :  { %v43_v12 = vmul.f32 0.015625, %v32_v10  ;;  %v45_v13 = vmul.f32 0.015625, %v38_v11  ;;  %v115_v10 = vld [vmem:[%s432_s4] sm:$0x3]  ;;  %v123_v11 = vsub.s32 1, %v118_v8 }
  0x95   :  { %v357_v14 = vsub.f32 %v280_v2, %v43_v12  ;;  %v359_v15 = vsub.f32 %v284_v3, %v45_v13  ;;  %v120_v12 = vrot.slane %v115_v10, %v119_v9  ;;  %v124_v13 = vrot.slane %v115_v10, %v123_v11 }
  0x96   :  { %v35_v16 = vpop.xlane.xlu0 %34  ;;  %v41_v17 = vpop.xlane.xlu1 %40 }
  0x97   :  { %v44_v18 = vmul.f32 0.015625, %v35_v16  ;;  %v46_v19 = vmul.f32 0.015625, %v41_v17  ;;  %v51_v20 = vmul.f32 %v357_v14, %v357_v14  ;;  %v53_v21 = vmul.f32 %v359_v15, %v359_v15 }
  0x99   :  { %v365_v22 = vsub.f32 %v281_v4, %v44_v18  ;;  %v367_v23 = vsub.f32 %v285_v5, %v46_v19  ;;  %v55_v24 = vsel %vm29_vm0, %v51_v20, 0.0  ;;  %v61_v25 = vsel %vm29_vm0, %v53_v21, 0.0 }
  0x9a   :  { %56 = vadd.xlane.f32.xlu0 %v55_v24 }
  0x9b   :  { %v52_v26 = vmul.f32 %v365_v22, %v365_v22  ;;  %v54_v27 = vmul.f32 %v367_v23, %v367_v23 }
  0x9d   :  { %v58_v28 = vsel %vm29_vm0, %v52_v26, 0.0  ;;  %v64_v29 = vsel %vm29_vm0, %v54_v27, 0.0 }
  0x9e   :  { %62 = vadd.xlane.f32.xlu0 %v61_v25  ;;  %59 = vadd.xlane.f32.xlu1 %v58_v28 }
  0xa2   :  { %65 = vadd.xlane.f32.xlu1 %v64_v29 }
 0x127   :  { %v57_v39 = vpop.xlane.xlu0 %56 }
 0x128   :  { %v67_v40 = vmul.f32 0.015625, %v57_v39 }
 0x12a   :  { %v71_v41 = vadd.f32 1e-05, %v67_v40 }
 0x12b   :  { %v60_v42 = vpop.xlane.xlu1 %59  ;;  %v63_v43 = vpop.xlane.xlu0 %62 }
 0x12c   :  { %308 = vrsqrt.f32 %v71_v41  ;;  %v68_v44 = vmul.f32 0.015625, %v60_v42  ;;  %v69_v45 = vmul.f32 0.015625, %v63_v43 }
 0x12e   :  { %v72_v46 = vadd.f32 1e-05, %v68_v44  ;;  %v73_v47 = vadd.f32 1e-05, %v69_v45 }
 0x12f   :  { %v66_v48 = vpop.xlane.xlu1 %65 }
 0x130   :  { %310 = vrsqrt.f32 %v72_v46  ;;  %v70_v49 = vmul.f32 0.015625, %v66_v48 }
 0x131   :  { %312 = vrsqrt.f32 %v73_v47 }
 0x132   :  { %v74_v50 = vadd.f32 1e-05, %v70_v49 }
 0x134   :  { %314 = vrsqrt.f32 %v74_v50 }
 0x136   :  { %v309_v51 = vpop.eup %308 }
 0x137   :  { %v79_v52 = vmul.f32 %v309_v51, %v357_v14 }
 0x139   :  { %v90_v57 = vmul.f32 %v258_v53, %v79_v52 }
 0x13a   :  { %v311_v54 = vpop.eup %310 }
 0x13b   :  { %v313_v55 = vpop.eup %312  ;;  %v80_v56 = vmul.f32 %v311_v54, %v365_v22  ;;  %v101_v63 = vadd.f32 %v259_v59, %v90_v57 }
 0x13c   :  { %v81_v58 = vmul.f32 %v313_v55, %v359_v15 }
 0x13d   :  { %v91_v60 = vmul.f32 %v258_v53, %v80_v56 }
 0x13e   :  { %v315_v61 = vpop.eup %314  ;;  %v92_v1 = vmul.f32 %v258_v53, %v81_v58 }
 0x13f   :  { %v82_v62 = vmul.f32 %v315_v61, %v367_v23  ;;  %v102_v0 = vadd.f32 %v259_v59, %v91_v60 }
 0x140   :  { %v103_v4 = vadd.f32 %v259_v59, %v92_v1 }
 0x141   :  { %v105_v2 = vpack.c.bf16 %v102_v0, %v101_v63  ;;  %v93_v3 = vmul.f32 %v258_v53, %v82_v62 }
 0x143   :  { %268 = vmatmul.mubr.msk.bf16.vlgmr.msra.gmra.mrb[0].mxu0 %vm29_vm0, %v105_v2  ;;  %v104_v5 = vadd.f32 %v259_v59, %v93_v3 }
 0x145   :  { %v106_v6 = vpack.c.bf16 %v104_v5, %v103_v4 }
 0x147   :  { %269 = vmatmul.mubr.msk.bf16.vlgmr.msra.gmra.mrb[0].mxu1 %vm29_vm0, %v106_v6 }
 0x216   :  { %v207_v14 = vpop.f32.mrb[0].mxu0 }
 0x217   :  { %v208_v15 = vadd.f32 %v207_v14, %v120_v12  ;;  %v209_v16 = vpop.f32.mrb[1].mxu0 }
 0x218   :  { %v210_v17 = vadd.f32 %v209_v16, %v124_v13  ;;  %v211_v18 = vpop.f32.mrb[2].mxu0 }
 0x219   :  { %v212_v19 = vadd.f32 %v211_v18, %v120_v12  ;;  %v213_v20 = vpop.f32.mrb[3].mxu0 }
 0x21a   :  { %v274_v21 = vpack.c.bf16 %v210_v17, %v208_v15  ;;  %v214_v22 = vadd.f32 %v213_v20, %v124_v13  ;;  %v217_v23 = vpop.f32.mrb[0].mxu1 }
 0x21b   :  { %v218_v24 = vadd.f32 %v217_v23, %v120_v12  ;;  %v219_v25 = vpop.f32.mrb[1].mxu1 }
 0x21c   :  { %250 = vst [vmem:[%s433_s5] sm:$0xff] %v274_v21  ;;  %v275_v26 = vpack.c.bf16 %v214_v22, %v212_v19  ;;  %v220_v27 = vadd.f32 %v219_v25, %v124_v13  ;;  %v221_v28 = vpop.f32.mrb[2].mxu1 }
 0x21d   :  { %v222_v29 = vadd.f32 %v221_v28, %v120_v12  ;;  %v223_v30 = vpop.f32.mrb[3].mxu1 }
 0x21e   :  { %251 = vst [vmem:[%s433_s5 + $0x8] sm:$0xff] %v275_v26  ;;  %v276_v31 = vpack.c.bf16 %v220_v27, %v218_v24  ;;  %v224_v32 = vadd.f32 %v223_v30, %v124_v13 }
 0x220   :  { %252 = vst [vmem:[%s433_s5 + $0x10] sm:$0xff] %v276_v31  ;;  %v277_v33 = vpack.c.bf16 %v224_v32, %v222_v29 }
 0x222   :  { %253 = vst [vmem:[%s433_s5 + $0x18] sm:$0xff] %v277_v33 }

// kernel: _lambda_.52
= control target key start
LH: loop header
LB: loop body
LE: loop exit
PB: predicated region body
PF: predicated region fallthrough
CT: control target
= control target key end

     0   :  { %v1334_v3 = vmov 0.0   ;;  %vm1335_vm0 = vmmov 0   ;;  %s1336_s14 = smov 64   ;;  %vm20_vm1 = vcmask 130048   ;;  %s1338_s15 = smov 112   ;;  %vm1068_vm2 = vcmask 261120   ;;  %s1597_s0 = inlined_call_operand.vmem [shape: bf16[2,16,192], index: 0, kind: input, shape index: {}]   ;;  %s1598_s1 = inlined_call_operand.vmem [shape: bf16[2,16,64], index: 1, kind: output, shape index: {}]  }
   0x1   :  { %v1356_v0 = vld [vmem:[%s1597_s0] sm:$0xff]  ;;  %v1361_v1 = vld [vmem:[%s1597_s0 + $0x8] sm:$0xff]  ;;  %v1366_v2 = vld [vmem:[%s1597_s0 + $0x10] sm:$0xff]  ;;  %1163 = vmatprep.subr.bf16.mxu0 %v1334_v3  ;;  %1169 = vmatprep.subr.bf16.mxu1 %v1334_v3  ;;  %s1339_s16 = smov 32   ;;  %s1340_s17 = smov 96   ;;  %vm1073_vm3 = vcmask 392192  }
   0x2   :  { %v1372_v4 = vcombine.low %v1356_v0, %v1361_v1  ;;  %v1377_v5 = vld [vmem:[%s1597_s0 + $0x18] sm:$0xff]  ;;  %1165 = vmatprep.mubr.msk.bf16.mxu0 %vm1335_vm0, %v1334_v3  ;;  %1171 = vmatprep.mubr.msk.bf16.mxu1 %vm1335_vm0, %v1334_v3  ;;  %s1337_s0 = smov 48   ;;  %v168_v43 = vrot.slane %v1356_v0, 4  ;;  %v169_v44 = vrot.slane %v1361_v1, 4  ;;  %v218_v46 = vrot.slane %v1366_v2, 4  ;;  %s1341_s18 = smov 16  }
   0x3   :  { %v1386_v6 = vcombine.low %v1366_v2, %v1377_v5  ;;  %v219_v47 = vrot.slane %v1377_v5, 4  ;;  %s1342_s19 = smov 80   ;;  %vm1092_vm4 = vcmask 519168  }
   0x4   :  { %18 = vrot.lane.b32.xlu0 %v1372_v4, %s1336_s14  ;;  %v1105_v45 = vcombine.low %v168_v43, %v169_v44 }
   0x5   :  { %v1107_v48 = vcombine.low %v218_v46, %v219_v47 }
   0x8   :  { %73 = vrot.lane.b32.xlu0 %v1386_v6, %s1336_s14 }
  0x76   :  { %v19_v7 = vpop.permute.xlu0 %18 }
  0x77   :  { %v25_v8 = vsel %vm20_vm1, %v19_v7, 0 }
  0x78   :  { %1164 = vmatpush3.bf16.xpose.msra.mxu0 %v25_v8 }
  0x79   :  { %1175 = vmatprep.subr.bf16.mxu0 %v1334_v3 }
  0x7a   :  { %v74_v9 = vpop.permute.xlu0 %73 }
  0x7b   :  { %v79_v10 = vsel %vm20_vm1, %v74_v9, 0 }
  0x7c   :  { %1170 = vmatpush3.bf16.xpose.msra.mxu1 %v79_v10 }
  0x7d   :  { %1181 = vmatprep.subr.bf16.mxu1 %v1334_v3 }
  0x7f   :  { %1166 = vmatmul.mubr.msk.bf16.vlgmr.msra.gmra.mrb[0].mxu0 %vm20_vm1, %v1372_v4 }
  0x80   :  { %1177 = vmatprep.mubr.msk.bf16.mxu0 %vm1335_vm0, %v1334_v3  ;;  %1176 = vmatpush3.bf16.msra.mxu0 %v1105_v45 }
  0x81   :  { %1187 = vmatprep.subr.bf16.mxu0 %v1334_v3 }
  0x83   :  { %1172 = vmatmul.mubr.msk.bf16.vlgmr.msra.gmra.mrb[0].mxu1 %vm20_vm1, %v1386_v6 }
  0x84   :  { %1183 = vmatprep.mubr.msk.bf16.mxu1 %vm1335_vm0, %v1334_v3  ;;  %1182 = vmatpush3.bf16.msra.mxu1 %v1107_v48 }
  0x85   :  { %1193 = vmatprep.subr.bf16.mxu1 %v1334_v3 }
 0x152   :  { %v61_v11 = vpop.f32.mrb[0].mxu0 }
 0x153   :  { %v1167_v12 = vpop.f32.mrb[1].mxu0  ;;  %v122_v13 = vsel %vm20_vm1, %v61_v11, -inf }
 0x154   :  { %123 = vmax.xlane.f32.xlu1 %v122_v13  ;;  %v64_v14 = vpop.f32.mrb[2].mxu0 }
 0x155   :  { %v1168_v15 = vpop.f32.mrb[3].mxu0  ;;  %v125_v18 = vsel %vm20_vm1, %v64_v14, -inf }
 0x156   :  { %v115_v16 = vpop.f32.mrb[0].mxu1 }
 0x157   :  { %v1173_v17 = vpop.f32.mrb[1].mxu1  ;;  %v128_v19 = vsel %vm20_vm1, %v115_v16, -inf }
 0x158   :  { %126 = vmax.xlane.f32.xlu1 %v125_v18  ;;  %129 = vmax.xlane.f32.xlu0 %v128_v19  ;;  %v118_v20 = vpop.f32.mrb[2].mxu1 }
 0x159   :  { %v1174_v21 = vpop.f32.mrb[3].mxu1  ;;  %v131_v22 = vsel %vm20_vm1, %v118_v20, -inf }
 0x15c   :  { %132 = vmax.xlane.f32.xlu1 %v131_v22 }
 0x16d   :  { %272 = vrot.lane.b32.xlu1 %v1372_v4, %s1337_s0 }
 0x16e   :  { %323 = vrot.lane.b32.xlu0 %v1386_v6, %s1337_s0 }
 0x1e1   :  { %v124_v23 = vpop.xlane.xlu1 %123 }
 0x1e2   :  { %v134_v24 = vsub.f32 %v61_v11, %v124_v23 }
 0x1e4   :  { %v138_v25 = vmul.f32 1.442695, %v134_v24 }
 0x1e5   :  { %v127_v26 = vpop.xlane.xlu1 %126  ;;  %v130_v27 = vpop.xlane.xlu0 %129 }
 0x1e6   :  { %1270 = vpow2.f32 %v138_v25  ;;  %v135_v28 = vsub.f32 %v64_v14, %v127_v26  ;;  %v136_v29 = vsub.f32 %v115_v16, %v130_v27 }
 0x1e8   :  { %v142_v30 = vmul.f32 1.442695, %v136_v29  ;;  %v140_v31 = vmul.f32 1.442695, %v135_v28 }
 0x1e9   :  { %v133_v32 = vpop.xlane.xlu1 %132  ;;  %v324_v61 = vpop.permute.xlu0 %323 }
 0x1ea   :  { %v137_v33 = vsub.f32 %v118_v20, %v133_v32  ;;  %1272 = vpow2.f32 %v142_v30  ;;  %v329_v8 = vsel %vm20_vm1, %v324_v61, 0 }
 0x1eb   :  { %1274 = vpow2.f32 %v140_v31 }
 0x1ec   :  { %v144_v34 = vmul.f32 1.442695, %v137_v33 }
 0x1ed   :  { %v273_v49 = vpop.permute.xlu1 %272 }
 0x1ee   :  { %1276 = vpow2.f32 %v144_v34  ;;  %v278_v62 = vsel %vm20_vm1, %v273_v49, 0 }
 0x1f0   :  { %v1271_v35 = vpop.eup %1270 }
 0x1f1   :  { %v146_v36 = vsel %vm20_vm1, %v1271_v35, 0.0 }
 0x1f2   :  { %147 = vadd.xlane.f32.xlu1 %v146_v36 }
 0x1f4   :  { %v1273_v37 = vpop.eup %1272 }
 0x1f5   :  { %v152_v38 = vsel %vm20_vm1, %v1273_v37, 0.0  ;;  %v1275_v39 = vpop.eup %1274 }
 0x1f6   :  { %153 = vadd.xlane.f32.xlu1 %v152_v38  ;;  %v149_v40 = vsel %vm20_vm1, %v1275_v39, 0.0 }
 0x1f8   :  { %v1277_v41 = vpop.eup %1276 }
 0x1f9   :  { %v155_v42 = vsel %vm20_vm1, %v1277_v41, 0.0 }
 0x1fa   :  { %150 = vadd.xlane.f32.xlu1 %v149_v40 }
 0x1fe   :  { %156 = vadd.xlane.f32.xlu1 %v155_v42 }
 0x20f   :  { %270 = vrot.lane.b32.xlu1 %v1372_v4, %s1338_s15 }
 0x213   :  { %321 = vrot.lane.b32.xlu1 %v1386_v6, %s1338_s15 }
 0x27f   :  { %v148_v50 = vpop.xlane.xlu1 %147 }
 0x280   :  { %1278 = vrcp.f32 %v148_v50 }
 0x283   :  { %v154_v51 = vpop.xlane.xlu1 %153 }
 0x287   :  { %v151_v52 = vpop.xlane.xlu1 %150 }
 0x288   :  { %1280 = vrcp.f32 %v151_v52 }
 0x289   :  { %1282 = vrcp.f32 %v154_v51 }
 0x28a   :  { %v1279_v54 = vpop.eup %1278 }
 0x28b   :  { %v157_v53 = vpop.xlane.xlu1 %156  ;;  %v159_v56 = vmul.f32 %v1279_v54, %v1271_v35 }
 0x28c   :  { %1284 = vrcp.f32 %v157_v53 }
 0x28f   :  { %v271_v10 = vpop.permute.xlu1 %270 }
 0x292   :  { %v1281_v55 = vpop.eup %1280 }
 0x293   :  { %v161_v57 = vmul.f32 %v1281_v55, %v1275_v39  ;;  %v1283_v58 = vpop.eup %1282  ;;  %v322_v11 = vpop.permute.xlu1 %321 }
 0x294   :  { %v163_v63 = vmul.f32 %v1283_v58, %v1273_v37 }
 0x295   :  { %v166_v59 = vpack.c.bf16 %v161_v57, %v159_v56 }
 0x296   :  { %v1285_v60 = vpop.eup %1284 }
 0x297   :  { %v165_v7 = vmul.f32 %v1285_v60, %v1277_v41  ;;  %1178 = vmatmul.mubr.msk.bf16.vlgmr.msra.gmra.mrb[4].mxu0 %vm20_vm1, %v166_v59 }
 0x298   :  { %1188 = vmatpush3.bf16.xpose.msra.mxu0 %v278_v62  ;;  %1189 = vmatprep.mubr.msk.bf16.mxu0 %vm1335_vm0, %v1334_v3 }
 0x299   :  { %v167_v9 = vpack.c.bf16 %v165_v7, %v163_v63  ;;  %1199 = vmatprep.subr.bf16.mxu0 %v1334_v3 }
 0x29b   :  { %1184 = vmatmul.mubr.msk.bf16.vlgmr.msra.gmra.mrb[4].mxu1 %vm20_vm1, %v167_v9 }
 0x29c   :  { %1194 = vmatpush3.bf16.xpose.msra.mxu1 %v329_v8  ;;  %1195 = vmatprep.mubr.msk.bf16.mxu1 %vm1335_vm0, %v1334_v3 }
 0x29d   :  { %1205 = vmatprep.subr.bf16.mxu1 %v1334_v3 }
 0x29f   :  { %1190 = vmatmul.mubr.msk.bf16.vlgmr.msra.gmra.mrb[8].mxu0 %vm20_vm1, %v271_v10 }
 0x2a0   :  { %1201 = vmatprep.mubr.msk.bf16.mxu0 %vm1335_vm0, %v1334_v3 }
 0x2a3   :  { %1196 = vmatmul.mubr.msk.bf16.vlgmr.msra.gmra.mrb[8].mxu1 %vm20_vm1, %v322_v11 }
 0x2a4   :  { %1207 = vmatprep.mubr.msk.bf16.mxu1 %vm1335_vm0, %v1334_v3 }
 0x36a   :  { %v1439_v12 = vpop.f32.mrb[4].mxu0 }
 0x36b   :  { %v1179_v13 = vpop.f32.mrb[5].mxu0 }
 0x36c   :  { %v1441_v14 = vpop.f32.mrb[6].mxu0 }
 0x36d   :  { %v268_v15 = vpack.c.bf16 %v1441_v14, %v1439_v12  ;;  %v1180_v16 = vpop.f32.mrb[7].mxu0 }
 0x36e   :  { %v1445_v17 = vpop.f32.mrb[4].mxu1 }
 0x36f   :  { %v1185_v18 = vpop.f32.mrb[5].mxu1 }
 0x370   :  { %v1447_v19 = vpop.f32.mrb[6].mxu1 }
 0x371   :  { %v269_v20 = vpack.c.bf16 %v1447_v19, %v1445_v17  ;;  %v1186_v21 = vpop.f32.mrb[7].mxu1 }
 0x372   :  { %v314_v22 = vpop.f32.mrb[8].mxu0 }
 0x373   :  { %v1191_v23 = vpop.f32.mrb[9].mxu0  ;;  %v372_v24 = vsel %vm20_vm1, %v314_v22, -inf }
 0x374   :  { %373 = vmax.xlane.f32.xlu1 %v372_v24  ;;  %v317_v25 = vpop.f32.mrb[10].mxu0 }
 0x375   :  { %v1192_v26 = vpop.f32.mrb[11].mxu0  ;;  %v375_v27 = vsel %vm20_vm1, %v317_v25, -inf }
 0x376   :  { %376 = vmax.xlane.f32.xlu0 %v375_v27  ;;  %v365_v28 = vpop.f32.mrb[8].mxu1 }
 0x377   :  { %v1197_v29 = vpop.f32.mrb[9].mxu1  ;;  %v378_v30 = vsel %vm20_vm1, %v365_v28, -inf }
 0x378   :  { %379 = vmax.xlane.f32.xlu1 %v378_v30  ;;  %v368_v31 = vpop.f32.mrb[10].mxu1 }
 0x379   :  { %v1198_v32 = vpop.f32.mrb[11].mxu1  ;;  %v381_v33 = vsel %vm20_vm1, %v368_v31, -inf }
 0x37a   :  { %382 = vmax.xlane.f32.xlu0 %v381_v33 }
 0x389   :  { %418 = vrot.lane.b32.xlu1 %v1356_v0, %s1338_s15 }
 0x38d   :  { %472 = vrot.lane.b32.xlu1 %v1366_v2, %s1338_s15 }
 0x390   :  { %420 = vrot.lane.b32.xlu0 %v1361_v1, %s1338_s15 }
 0x391   :  { %474 = vrot.lane.b32.xlu1 %v1377_v5, %s1338_s15 }
 0x401   :  { %v374_v34 = vpop.xlane.xlu1 %373 }
 0x402   :  { %v384_v35 = vsub.f32 %v314_v22, %v374_v34 }
 0x403   :  { %v377_v36 = vpop.xlane.xlu0 %376 }
 0x404   :  { %v388_v37 = vmul.f32 1.442695, %v384_v35  ;;  %v385_v38 = vsub.f32 %v317_v25, %v377_v36 }
 0x405   :  { %v380_v39 = vpop.xlane.xlu1 %379 }
 0x406   :  { %1286 = vpow2.f32 %v388_v37  ;;  %v390_v40 = vmul.f32 1.442695, %v385_v38  ;;  %v386_v41 = vsub.f32 %v365_v28, %v380_v39 }
 0x407   :  { %v383_v42 = vpop.xlane.xlu0 %382 }
 0x408   :  { %1288 = vpow2.f32 %v390_v40  ;;  %v392_v43 = vmul.f32 1.442695, %v386_v41  ;;  %v387_v44 = vsub.f32 %v368_v31, %v383_v42 }
 0x409   :  { %v419_v45 = vpop.permute.xlu1 %418 }
 0x40a   :  { %1290 = vpow2.f32 %v392_v43  ;;  %v394_v46 = vmul.f32 1.442695, %v387_v44  ;;  %v422_v47 = vrot.slane %v419_v45, 4 }
 0x40b   :  { %v421_v48 = vpop.permute.xlu0 %420 }
 0x40c   :  { %1292 = vpow2.f32 %v394_v46  ;;  %v423_v49 = vrot.slane %v421_v48, 4 }
 0x40d   :  { %v473_v50 = vpop.permute.xlu1 %472 }
 0x40e   :  { %v1111_v51 = vcombine.low %v422_v47, %v423_v49  ;;  %v476_v53 = vrot.slane %v473_v50, 4 }
 0x410   :  { %v1287_v52 = vpop.eup %1286  ;;  %1200 = vmatpush3.bf16.msra.mxu0 %v1111_v51 }
 0x411   :  { %v396_v54 = vsel %vm20_vm1, %v1287_v52, 0.0  ;;  %v475_v55 = vpop.permute.xlu1 %474  ;;  %1211 = vmatprep.subr.bf16.mxu0 %v1334_v3 }
 0x412   :  { %v1289_v56 = vpop.eup %1288  ;;  %397 = vadd.xlane.f32.xlu1 %v396_v54  ;;  %v477_v57 = vrot.slane %v475_v55, 4 }
 0x413   :  { %v399_v58 = vsel %vm20_vm1, %v1289_v56, 0.0 }
 0x414   :  { %v1291_v59 = vpop.eup %1290  ;;  %400 = vadd.xlane.f32.xlu0 %v399_v58  ;;  %v1113_v60 = vcombine.low %v476_v53, %v477_v57 }
 0x415   :  { %v402_v61 = vsel %vm20_vm1, %v1291_v59, 0.0 }
 0x416   :  { %v1293_v62 = vpop.eup %1292  ;;  %403 = vadd.xlane.f32.xlu1 %v402_v61  ;;  %1206 = vmatpush3.bf16.msra.mxu1 %v1113_v60 }
 0x417   :  { %v405_v63 = vsel %vm20_vm1, %v1293_v62, 0.0  ;;  %1217 = vmatprep.subr.bf16.mxu1 %v1334_v3 }
 0x418   :  { %406 = vadd.xlane.f32.xlu0 %v405_v63 }
 0x427   :  { %581 = vrot.lane.b32.xlu1 %v1386_v6, %s1339_s16 }
 0x42b   :  { %579 = vrot.lane.b32.xlu1 %v1386_v6, %s1340_s17 }
 0x42e   :  { %530 = vrot.lane.b32.xlu0 %v1372_v4, %s1339_s16 }
 0x432   :  { %528 = vrot.lane.b32.xlu0 %v1372_v4, %s1340_s17 }
 0x49f   :  { %v398_v7 = vpop.xlane.xlu1 %397 }
 0x4a0   :  { %1294 = vrcp.f32 %v398_v7 }
 0x4a1   :  { %v401_v8 = vpop.xlane.xlu0 %400 }
 0x4a2   :  { %1296 = vrcp.f32 %v401_v8 }
 0x4a3   :  { %v404_v9 = vpop.xlane.xlu1 %403 }
 0x4a4   :  { %1298 = vrcp.f32 %v404_v9 }
 0x4a5   :  { %v407_v10 = vpop.xlane.xlu0 %406 }
 0x4a6   :  { %1300 = vrcp.f32 %v407_v10 }
 0x4a7   :  { %v582_v26 = vpop.permute.xlu1 %581 }
 0x4a8   :  { %v587_v29 = vsel %vm20_vm1, %v582_v26, 0 }
 0x4a9   :  { %v531_v16 = vpop.permute.xlu0 %530 }
 0x4aa   :  { %v1295_v11 = vpop.eup %1294  ;;  %v536_v23 = vsel %vm20_vm1, %v531_v16, 0 }
 0x4ab   :  { %v409_v18 = vmul.f32 %v1295_v11, %v1287_v52  ;;  %v580_v32 = vpop.permute.xlu1 %579 }
 0x4ac   :  { %v1297_v13 = vpop.eup %1296 }
 0x4ad   :  { %v411_v21 = vmul.f32 %v1297_v13, %v1289_v56  ;;  %v529_v31 = vpop.permute.xlu0 %528 }
 0x4ae   :  { %v1299_v22 = vpop.eup %1298 }
 0x4af   :  { %v416_v24 = vpack.c.bf16 %v411_v21, %v409_v18  ;;  %v413_v27 = vmul.f32 %v1299_v22, %v1291_v59 }
 0x4b0   :  { %v1301_v25 = vpop.eup %1300 }
 0x4b1   :  { %v415_v28 = vmul.f32 %v1301_v25, %v1293_v62  ;;  %1202 = vmatmul.mubr.msk.bf16.vlgmr.msra.gmra.mrb[12].mxu0 %vm20_vm1, %v416_v24 }
 0x4b2   :  { %1212 = vmatpush3.bf16.xpose.msra.mxu0 %v536_v23  ;;  %1213 = vmatprep.mubr.msk.bf16.mxu0 %vm1335_vm0, %v1334_v3 }
 0x4b3   :  { %v417_v30 = vpack.c.bf16 %v415_v28, %v413_v27  ;;  %1223 = vmatprep.subr.bf16.mxu0 %v1334_v3 }
 0x4b5   :  { %1208 = vmatmul.mubr.msk.bf16.vlgmr.msra.gmra.mrb[12].mxu1 %vm20_vm1, %v417_v30 }
 0x4b6   :  { %1218 = vmatpush3.bf16.xpose.msra.mxu1 %v587_v29  ;;  %1219 = vmatprep.mubr.msk.bf16.mxu1 %vm1335_vm0, %v1334_v3 }
 0x4b7   :  { %1229 = vmatprep.subr.bf16.mxu1 %v1334_v3 }
 0x4b9   :  { %1214 = vmatmul.mubr.msk.bf16.vlgmr.msra.gmra.mrb[16].mxu0 %vm20_vm1, %v529_v31 }
 0x4ba   :  { %1225 = vmatprep.mubr.msk.bf16.mxu0 %vm1335_vm0, %v1334_v3 }
 0x4bd   :  { %1220 = vmatmul.mubr.msk.bf16.vlgmr.msra.gmra.mrb[16].mxu1 %vm20_vm1, %v580_v32 }
 0x4be   :  { %1231 = vmatprep.mubr.msk.bf16.mxu1 %vm1335_vm0, %v1334_v3 }
 0x584   :  { %v1493_v33 = vpop.f32.mrb[12].mxu0 }
 0x585   :  { %v1203_v34 = vpop.f32.mrb[13].mxu0 }
 0x586   :  { %v1495_v35 = vpop.f32.mrb[14].mxu0 }
 0x587   :  { %v526_v36 = vpack.c.bf16 %v1495_v35, %v1493_v33  ;;  %v1204_v37 = vpop.f32.mrb[15].mxu0 }
 0x588   :  { %v1499_v38 = vpop.f32.mrb[12].mxu1 }
 0x589   :  { %v1209_v39 = vpop.f32.mrb[13].mxu1 }
 0x58a   :  { %v1501_v40 = vpop.f32.mrb[14].mxu1 }
 0x58b   :  { %v527_v41 = vpack.c.bf16 %v1501_v40, %v1499_v38  ;;  %v1210_v42 = vpop.f32.mrb[15].mxu1 }
 0x58c   :  { %v572_v43 = vpop.f32.mrb[16].mxu0 }
 0x58d   :  { %v1215_v44 = vpop.f32.mrb[17].mxu0  ;;  %v630_v45 = vsel %vm20_vm1, %v572_v43, -inf }
 0x58e   :  { %631 = vmax.xlane.f32.xlu0 %v630_v45  ;;  %v575_v46 = vpop.f32.mrb[18].mxu0 }
 0x58f   :  { %v1216_v47 = vpop.f32.mrb[19].mxu0  ;;  %v633_v48 = vsel %vm20_vm1, %v575_v46, -inf }
 0x590   :  { %634 = vmax.xlane.f32.xlu1 %v633_v48  ;;  %v623_v49 = vpop.f32.mrb[16].mxu1 }
 0x591   :  { %v1221_v50 = vpop.f32.mrb[17].mxu1  ;;  %v636_v51 = vsel %vm20_vm1, %v623_v49, -inf }
 0x592   :  { %637 = vmax.xlane.f32.xlu0 %v636_v51  ;;  %v626_v52 = vpop.f32.mrb[18].mxu1 }
 0x593   :  { %v1222_v53 = vpop.f32.mrb[19].mxu1  ;;  %v639_v54 = vsel %vm20_vm1, %v626_v52, -inf }
 0x596   :  { %640 = vmax.xlane.f32.xlu0 %v639_v54 }
 0x5a1   :  { %676 = vrot.lane.b32.xlu1 %v1356_v0, %s1340_s17 }
 0x5a5   :  { %730 = vrot.lane.b32.xlu1 %v1366_v2, %s1340_s17 }
 0x5a9   :  { %732 = vrot.lane.b32.xlu1 %v1377_v5, %s1340_s17 }
 0x5ac   :  { %678 = vrot.lane.b32.xlu0 %v1361_v1, %s1340_s17 }
 0x61b   :  { %v632_v55 = vpop.xlane.xlu0 %631 }
 0x61c   :  { %v642_v56 = vsub.f32 %v572_v43, %v632_v55 }
 0x61d   :  { %v635_v57 = vpop.xlane.xlu1 %634 }
 0x61e   :  { %v646_v58 = vmul.f32 1.442695, %v642_v56  ;;  %v643_v59 = vsub.f32 %v575_v46, %v635_v57 }
 0x61f   :  { %v638_v60 = vpop.xlane.xlu0 %637 }
 0x620   :  { %1302 = vpow2.f32 %v646_v58  ;;  %v648_v61 = vmul.f32 1.442695, %v643_v59  ;;  %v644_v62 = vsub.f32 %v623_v49, %v638_v60 }
 0x621   :  { %v677_v63 = vpop.permute.xlu1 %676 }
 0x622   :  { %1304 = vpow2.f32 %v648_v61  ;;  %v650_v7 = vmul.f32 1.442695, %v644_v62  ;;  %v680_v13 = vrot.slane %v677_v63, 4 }
 0x623   :  { %v641_v8 = vpop.xlane.xlu0 %640 }
 0x624   :  { %1306 = vpow2.f32 %v650_v7  ;;  %v645_v9 = vsub.f32 %v626_v52, %v641_v8 }
 0x625   :  { %v731_v10 = vpop.permute.xlu1 %730 }
 0x626   :  { %v652_v11 = vmul.f32 1.442695, %v645_v9  ;;  %v734_v18 = vrot.slane %v731_v10, 4 }
 0x627   :  { %v679_v16 = vpop.permute.xlu0 %678 }
 0x628   :  { %1308 = vpow2.f32 %v652_v11  ;;  %v681_v21 = vrot.slane %v679_v16, 4 }
 0x629   :  { %v733_v22 = vpop.permute.xlu1 %732 }
 0x62a   :  { %v1303_v23 = vpop.eup %1302  ;;  %v1117_v24 = vcombine.low %v680_v13, %v681_v21  ;;  %v735_v25 = vrot.slane %v733_v22, 4 }
 0x62b   :  { %v654_v26 = vsel %vm20_vm1, %v1303_v23, 0.0 }
 0x62c   :  { %v1305_v27 = vpop.eup %1304  ;;  %655 = vadd.xlane.f32.xlu1 %v654_v26  ;;  %v1119_v28 = vcombine.low %v734_v18, %v735_v25  ;;  %1224 = vmatpush3.bf16.msra.mxu0 %v1117_v24 }
 0x62d   :  { %v657_v29 = vsel %vm20_vm1, %v1305_v27, 0.0  ;;  %1235 = vmatprep.subr.bf16.mxu0 %v1334_v3 }
 0x62e   :  { %v1307_v30 = vpop.eup %1306  ;;  %658 = vadd.xlane.f32.xlu0 %v657_v29  ;;  %1230 = vmatpush3.bf16.msra.mxu1 %v1119_v28 }
 0x62f   :  { %v660_v31 = vsel %vm20_vm1, %v1307_v30, 0.0  ;;  %1241 = vmatprep.subr.bf16.mxu1 %v1334_v3 }
 0x630   :  { %661 = vadd.xlane.f32.xlu1 %v660_v31 }
 0x632   :  { %v1309_v32 = vpop.eup %1308 }
 0x633   :  { %v663_v34 = vsel %vm20_vm1, %v1309_v32, 0.0 }
 0x634   :  { %664 = vadd.xlane.f32.xlu0 %v663_v34 }
 0x641   :  { %839 = vrot.lane.b32.xlu1 %v1386_v6, %s1341_s18 }
 0x645   :  { %837 = vrot.lane.b32.xlu1 %v1386_v6, %s1342_s19 }
 0x64a   :  { %788 = vrot.lane.b32.xlu0 %v1372_v4, %s1341_s18 }
 0x64e   :  { %786 = vrot.lane.b32.xlu0 %v1372_v4, %s1342_s19 }
 0x6b9   :  { %v656_v37 = vpop.xlane.xlu1 %655 }
 0x6ba   :  { %1310 = vrcp.f32 %v656_v37 }
 0x6bb   :  { %v659_v39 = vpop.xlane.xlu0 %658 }
 0x6bc   :  { %1312 = vrcp.f32 %v659_v39 }
 0x6bd   :  { %v662_v42 = vpop.xlane.xlu1 %661 }
 0x6be   :  { %1314 = vrcp.f32 %v662_v42 }
 0x6c1   :  { %v665_v43 = vpop.xlane.xlu0 %664  ;;  %v840_v51 = vpop.permute.xlu1 %839 }
 0x6c2   :  { %1316 = vrcp.f32 %v665_v43  ;;  %v845_v54 = vsel %vm20_vm1, %v840_v51, 0 }
 0x6c4   :  { %v1311_v44 = vpop.eup %1310 }
 0x6c5   :  { %v789_v46 = vpop.permute.xlu0 %788  ;;  %v667_v47 = vmul.f32 %v1311_v44, %v1303_v23  ;;  %v838_v57 = vpop.permute.xlu1 %837 }
 0x6c6   :  { %v1313_v45 = vpop.eup %1312  ;;  %v794_v6 = vsel %vm20_vm1, %v789_v46, 0 }
 0x6c7   :  { %v669_v48 = vmul.f32 %v1313_v45, %v1305_v27 }
 0x6c8   :  { %v1315_v50 = vpop.eup %1314 }
 0x6c9   :  { %v674_v49 = vpack.c.bf16 %v669_v48, %v667_v47  ;;  %v671_v52 = vmul.f32 %v1315_v50, %v1307_v30  ;;  %v787_v56 = vpop.permute.xlu0 %786 }
 0x6cb   :  { %1226 = vmatmul.mubr.msk.bf16.vlgmr.msra.gmra.mrb[20].mxu0 %vm20_vm1, %v674_v49 }
 0x6cc   :  { %v1317_v4 = vpop.eup %1316  ;;  %1236 = vmatpush3.bf16.xpose.msra.mxu0 %v794_v6  ;;  %1237 = vmatprep.mubr.msk.bf16.mxu0 %vm1335_vm0, %v1334_v3 }
 0x6cd   :  { %v673_v53 = vmul.f32 %v1317_v4, %v1309_v32  ;;  %1247 = vmatprep.subr.bf16.mxu0 %v1334_v3 }
 0x6cf   :  { %v675_v55 = vpack.c.bf16 %v673_v53, %v671_v52 }
 0x6d1   :  { %1232 = vmatmul.mubr.msk.bf16.vlgmr.msra.gmra.mrb[20].mxu1 %vm20_vm1, %v675_v55 }
 0x6d2   :  { %1242 = vmatpush3.bf16.xpose.msra.mxu1 %v845_v54  ;;  %1243 = vmatprep.mubr.msk.bf16.mxu1 %vm1335_vm0, %v1334_v3 }
 0x6d3   :  { %1238 = vmatmul.mubr.msk.bf16.vlgmr.msra.gmra.mrb[24].mxu0 %vm20_vm1, %v787_v56  ;;  %1253 = vmatprep.subr.bf16.mxu1 %v1334_v3 }
 0x6d4   :  { %1249 = vmatprep.mubr.msk.bf16.mxu0 %vm1335_vm0, %v1334_v3 }
 0x6d9   :  { %1244 = vmatmul.mubr.msk.bf16.vlgmr.msra.gmra.mrb[24].mxu1 %vm20_vm1, %v838_v57 }
 0x6da   :  { %1255 = vmatprep.mubr.msk.bf16.mxu1 %vm1335_vm0, %v1334_v3 }
 0x79e   :  { %v723_v58 = vpop.f32.mrb[20].mxu0 }
 0x79f   :  { %v1227_v59 = vpop.f32.mrb[21].mxu0 }
 0x7a0   :  { %v726_v60 = vpop.f32.mrb[22].mxu0 }
 0x7a1   :  { %v784_v61 = vpack.c.bf16 %v726_v60, %v723_v58  ;;  %v1228_v62 = vpop.f32.mrb[23].mxu0 }
 0x7a4   :  { %v777_v63 = vpop.f32.mrb[20].mxu1 }
 0x7a5   :  { %v1233_v7 = vpop.f32.mrb[21].mxu1 }
 0x7a6   :  { %v780_v8 = vpop.f32.mrb[22].mxu1  ;;  %v830_v9 = vpop.f32.mrb[24].mxu0 }
 0x7a7   :  { %v785_v10 = vpack.c.bf16 %v780_v8, %v777_v63  ;;  %v1234_v11 = vpop.f32.mrb[23].mxu1  ;;  %v1239_v13 = vpop.f32.mrb[25].mxu0  ;;  %v888_v16 = vsel %vm20_vm1, %v830_v9, -inf }
 0x7a8   :  { %889 = vmax.xlane.f32.xlu0 %v888_v16  ;;  %v833_v18 = vpop.f32.mrb[26].mxu0 }
 0x7a9   :  { %v1240_v21 = vpop.f32.mrb[27].mxu0  ;;  %v891_v22 = vsel %vm20_vm1, %v833_v18, -inf }
 0x7aa   :  { %892 = vmax.xlane.f32.xlu1 %v891_v22 }
 0x7ac   :  { %v881_v3 = vpop.f32.mrb[24].mxu1 }
 0x7ad   :  { %v1245_v23 = vpop.f32.mrb[25].mxu1  ;;  %v894_v24 = vsel %vm20_vm1, %v881_v3, -inf }
 0x7ae   :  { %895 = vmax.xlane.f32.xlu0 %v894_v24  ;;  %v884_v25 = vpop.f32.mrb[26].mxu1 }
 0x7af   :  { %v1246_v26 = vpop.f32.mrb[27].mxu1  ;;  %v897_v27 = vsel %vm20_vm1, %v884_v25, -inf }
 0x7b2   :  { %898 = vmax.xlane.f32.xlu0 %v897_v27 }
 0x7bb   :  { %934 = vrot.lane.b32.xlu1 %v1356_v0, %s1342_s19 }
 0x835   :  { %v890_v28 = vpop.xlane.xlu0 %889 }
 0x836   :  { %v900_v29 = vsub.f32 %v830_v9, %v890_v28 }
 0x837   :  { %v893_v30 = vpop.xlane.xlu1 %892 }
 0x838   :  { %v904_v31 = vmul.f32 1.442695, %v900_v29  ;;  %v901_v32 = vsub.f32 %v833_v18, %v893_v30 }
 0x83a   :  { %1318 = vpow2.f32 %v904_v31  ;;  %v906_v34 = vmul.f32 1.442695, %v901_v32 }
 0x83b   :  { %v896_v37 = vpop.xlane.xlu0 %895 }
 0x83c   :  { %1320 = vpow2.f32 %v906_v34  ;;  %v902_v39 = vsub.f32 %v881_v3, %v896_v37 }
 0x83e   :  { %v908_v42 = vmul.f32 1.442695, %v902_v39 }
 0x83f   :  { %v899_v43 = vpop.xlane.xlu0 %898 }
 0x840   :  { %1322 = vpow2.f32 %v908_v42  ;;  %v903_v44 = vsub.f32 %v884_v25, %v899_v43 }
 0x842   :  { %v910_v45 = vmul.f32 1.442695, %v903_v44 }
 0x844   :  { %v1319_v46 = vpop.eup %1318  ;;  %1324 = vpow2.f32 %v910_v45 }
 0x845   :  { %v912_v47 = vsel %vm20_vm1, %v1319_v46, 0.0 }
 0x846   :  { %v1321_v0 = vpop.eup %1320  ;;  %913 = vadd.xlane.f32.xlu1 %v912_v47 }
 0x847   :  { %v915_v48 = vsel %vm20_vm1, %v1321_v0, 0.0 }
 0x848   :  { %916 = vadd.xlane.f32.xlu0 %v915_v48 }
 0x84a   :  { %v1323_v6 = vpop.eup %1322 }
 0x84b   :  { %v918_v49 = vsel %vm20_vm1, %v1323_v6, 0.0 }
 0x84c   :  { %919 = vadd.xlane.f32.xlu1 %v918_v49 }
 0x84e   :  { %v1325_v50 = vpop.eup %1324 }
 0x84f   :  { %v921_v4 = vsel %vm20_vm1, %v1325_v50, 0.0 }
 0x850   :  { %922 = vadd.xlane.f32.xlu0 %v921_v4 }
 0x85d   :  { %988 = vrot.lane.b32.xlu1 %v1366_v2, %s1342_s19  ;;  %v935_v2 = vpop.permute.xlu1 %934 }
 0x85e   :  { %v938_v56 = vrot.slane %v935_v2, 4 }
 0x861   :  { %990 = vrot.lane.b32.xlu1 %v1377_v5, %s1342_s19 }
 0x865   :  { %1048 = vrot.lane.b32.xlu1 %v527_v41, %s1341_s18 }
 0x866   :  { %936 = vrot.lane.b32.xlu0 %v1361_v1, %s1342_s19 }
 0x869   :  { %1054 = vrot.lane.b32.xlu1 %v785_v10, %s1339_s16 }
 0x86a   :  { %1046 = vrot.lane.b32.xlu0 %v526_v36, %s1341_s18 }
 0x86e   :  { %1052 = vrot.lane.b32.xlu0 %v784_v61, %s1339_s16 }
 0x8d3   :  { %v914_v51 = vpop.xlane.xlu1 %913 }
 0x8d5   :  { %v917_v5 = vpop.xlane.xlu0 %916 }
 0x8d6   :  { %1326 = vrcp.f32 %v917_v5 }
 0x8d7   :  { %1328 = vrcp.f32 %v914_v51 }
 0x8d9   :  { %v920_v52 = vpop.xlane.xlu1 %919 }
 0x8da   :  { %1330 = vrcp.f32 %v920_v52 }
 0x8dd   :  { %v989_v38 = vpop.permute.xlu1 %988  ;;  %v923_v40 = vpop.xlane.xlu0 %922 }
 0x8de   :  { %1332 = vrcp.f32 %v923_v40  ;;  %v992_v41 = vrot.slane %v989_v38, 4 }
 0x8e0   :  { %v1327_v1 = vpop.eup %1326 }
 0x8e1   :  { %v991_v53 = vpop.permute.xlu1 %990  ;;  %v937_v54 = vpop.permute.xlu0 %936  ;;  %v927_v36 = vmul.f32 %v1327_v1, %v1321_v0 }
 0x8e2   :  { %v1329_v55 = vpop.eup %1328  ;;  %v993_v33 = vrot.slane %v991_v53, 4  ;;  %v939_v35 = vrot.slane %v937_v54, 4 }
 0x8e3   :  { %v925_v59 = vmul.f32 %v1329_v55, %v1319_v46 }
 0x8e4   :  { %v1125_v57 = vcombine.low %v992_v41, %v993_v33  ;;  %v1123_v58 = vcombine.low %v938_v56, %v939_v35  ;;  %v1331_v60 = vpop.eup %1330 }
 0x8e5   :  { %v932_v61 = vpack.c.bf16 %v927_v36, %v925_v59  ;;  %v929_v63 = vmul.f32 %v1331_v60, %v1323_v6  ;;  %v1047_v24 = vpop.permute.xlu0 %1046  ;;  %v1049_v25 = vpop.permute.xlu1 %1048 }
 0x8e6   :  { %1248 = vmatpush3.bf16.msra.mxu0 %v1123_v58  ;;  %1254 = vmatpush3.bf16.msra.mxu1 %v1125_v57  ;;  %v1064_v27 = vsel %vm20_vm1, %v268_v15, %v1047_v24  ;;  %v1067_v37 = vsel %vm20_vm1, %v269_v20, %v1049_v25 }
 0x8e8   :  { %v1333_v62 = vpop.eup %1332 }
 0x8e9   :  { %v931_v7 = vmul.f32 %v1333_v62, %v1325_v50  ;;  %1250 = vmatmul.mubr.msk.bf16.vlgmr.msra.gmra.mrb[28].mxu0 %vm20_vm1, %v932_v61  ;;  %v1053_v26 = vpop.permute.xlu0 %1052  ;;  %v1055_v28 = vpop.permute.xlu1 %1054 }
 0x8ea   :  { %v1070_v29 = vsel %vm1068_vm2, %v1064_v27, %v1053_v26  ;;  %v1072_v39 = vsel %vm1068_vm2, %v1067_v37, %v1055_v28 }
 0x8eb   :  { %v933_v8 = vpack.c.bf16 %v931_v7, %v929_v63 }
 0x8ed   :  { %1256 = vmatmul.mubr.msk.bf16.vlgmr.msra.gmra.mrb[28].mxu1 %vm20_vm1, %v933_v8 }
 0x9bc   :  { %v981_v9 = vpop.f32.mrb[28].mxu0 }
 0x9bd   :  { %v1251_v10 = vpop.f32.mrb[29].mxu0 }
 0x9be   :  { %v984_v11 = vpop.f32.mrb[30].mxu0 }
 0x9bf   :  { %v1042_v13 = vpack.c.bf16 %v984_v11, %v981_v9  ;;  %v1252_v16 = vpop.f32.mrb[31].mxu0 }
 0x9c0   :  { %v1035_v18 = vpop.f32.mrb[28].mxu1 }
 0x9c1   :  { %1058 = vrot.lane.b32.xlu0 %v1042_v13, %s1337_s0  ;;  %v1257_v21 = vpop.f32.mrb[29].mxu1 }
 0x9c2   :  { %v1038_v22 = vpop.f32.mrb[30].mxu1 }
 0x9c3   :  { %v1043_v3 = vpack.c.bf16 %v1038_v22, %v1035_v18  ;;  %v1258_v23 = vpop.f32.mrb[31].mxu1 }
 0x9c5   :  { %1060 = vrot.lane.b32.xlu1 %v1043_v3, %s1337_s0 }
 0xa33   :  { %v1059_v30 = vpop.permute.xlu0 %1058 }
 0xa34   :  { %v1075_v31 = vsel %vm1073_vm3, %v1070_v29, %v1059_v30 }
 0xa35   :  { %v1127_v32 = vcombine.low %v1075_v31, %v1075_v31  ;;  %v1128_v34 = vcombine.high %v1075_v31, %v1075_v31 }
 0xa37   :  { %1093 = vst.msk [vmem:[%s1598_s1] sm:$0xf] %vm1092_vm4, %v1127_v32  ;;  %1094 = vst.msk [vmem:[%s1598_s1 + $0x4] sm:$0xf] %vm1092_vm4, %v1128_v34  ;;  %v1061_v12 = vpop.permute.xlu1 %1060 }
 0xa38   :  { %v1077_v14 = vsel %vm1073_vm3, %v1072_v39, %v1061_v12 }
 0xa39   :  { %v1129_v15 = vcombine.low %v1077_v14, %v1077_v14  ;;  %v1130_v42 = vcombine.high %v1077_v14, %v1077_v14 }
 0xa3b   :  { %1095 = vst.msk [vmem:[%s1598_s1 + $0x8] sm:$0xf] %vm1092_vm4, %v1129_v15  ;;  %1096 = vst.msk [vmem:[%s1598_s1 + $0xc] sm:$0xf] %vm1092_vm4, %v1130_v42 }

// kernel: _lambda_.53
= control target key start
LH: loop header
LB: loop body
LE: loop exit
PB: predicated region body
PF: predicated region fallthrough
CT: control target
= control target key end

     0   :  { %vm71_vm0 = vcmask 523264   ;;  %s282_s1 = inlined_call_operand.vmem [shape: bf16[64,128], index: 1, kind: input, shape index: {}]   ;;  %s283_s0 = inlined_call_operand.vmem [shape: bf16[32,64], index: 0, kind: input, shape index: {}]   ;;  %s284_s2 = inlined_call_operand.vmem [shape: f32[1,128], index: 2, kind: input, shape index: {}]   ;;  %s285_s3 = inlined_call_operand.vmem [shape: bf16[32,128], index: 3, kind: input, shape index: {}]   ;;  %s286_s4 = inlined_call_operand.vmem [shape: bf16[32,128], index: 4, kind: output, shape index: {}]  }
   0x1   :  { %v218_v0 = vld [vmem:[%s282_s1] sm:$0xff]   ;;  %v219_v1 = vld [vmem:[%s282_s1 + $0x8] sm:$0xff]   ;;  %v220_v2 = vld [vmem:[%s282_s1 + $0x10] sm:$0xff]  }
   0x2   :  { %206 = vmatprep.subr.bf16.mxu0 %v218_v0  ;;  %v222_v3 = vld [vmem:[%s283_s0] sm:$0xff]   ;;  %v221_v4 = vld [vmem:[%s282_s1 + $0x18] sm:$0xff]   ;;  %v223_v5 = vld [vmem:[%s283_s0 + $0x8] sm:$0xff]  }
   0x3   :  { %207 = vmatpush3.bf16.msra.mxu0 %v218_v0  ;;  %214 = vmatprep.mubr.msk.bf16.mxu0 %vm71_vm0, %v222_v3  ;;  %v163_v6 = vld [vmem:[%s284_s2] ss:$0 sm:$0xff]  ;;  %v198_v7 = vld [vmem:[%s285_s3 + $0x8] sm:$0xff]  }
   0x4   :  { %208 = vmatprep.subr.bf16.mxu0 %v219_v1  ;;  %v181_v8 = vld [vmem:[%s285_s3] sm:$0xff]   ;;  %v186_v11 = vunpack.c.l.bf16 %v198_v7  ;;  %v187_v13 = vunpack.c.h.bf16 %v198_v7 }
   0x5   :  { %v182_v15 = vunpack.c.l.bf16 %v181_v8  ;;  %v183_v17 = vunpack.c.h.bf16 %v181_v8 }
   0x7   :  { %209 = vmatpush3.bf16.msra.mxu0 %v219_v1 }
   0x8   :  { %210 = vmatprep.subr.bf16.mxu0 %v220_v2 }
   0xb   :  { %211 = vmatpush3.bf16.msra.mxu0 %v220_v2 }
   0xc   :  { %212 = vmatprep.subr.bf16.mxu0 %v221_v4 }
   0xf   :  { %213 = vmatpush3.bf16.msra.mxu0 %v221_v4 }
  0x12   :  { %215 = vmatmul.mubr.msk.bf16.vlgmr.msra.gmra.mrb[0].mxu0 %vm71_vm0, %v223_v5 }
  0xe5   :  { %v216_v9 = vpop.f32.mrb[0].mxu0 }
  0xe6   :  { %v121_v10 = vadd.f32 %v216_v9, %v163_v6  ;;  %v112_v12 = vpop.f32.mrb[1].mxu0 }
  0xe7   :  { %v113_v14 = vadd.f32 %v163_v6, %v112_v12  ;;  %v217_v16 = vpop.f32.mrb[2].mxu0 }
  0xe8   :  { %v124_v18 = vadd.f32 %v217_v16, %v163_v6  ;;  %v115_v19 = vpop.f32.mrb[3].mxu0  ;;  %v137_v21 = vadd.f32 %v186_v11, %v121_v10 }
  0xe9   :  { %v116_v20 = vadd.f32 %v163_v6, %v115_v19  ;;  %v135_v23 = vadd.f32 %v182_v15, %v113_v14 }
  0xea   :  { %v138_v22 = vadd.f32 %v187_v13, %v124_v18 }
  0xeb   :  { %v136_v24 = vadd.f32 %v183_v17, %v116_v20 }
  0xec   :  { %v196_v25 = vpack.c.bf16 %v138_v22, %v137_v21 }
  0xed   :  { %v191_v26 = vpack.c.bf16 %v136_v24, %v135_v23 }
  0xee   :  { %199 = vst [vmem:[%s286_s4 + $0x8] sm:$0xff] %v196_v25  }
  0xef   :  { %192 = vst [vmem:[%s286_s4] sm:$0xff] %v191_v26  }

// kernel: _lambda_.56
= control target key start
LH: loop header
LB: loop body
LE: loop exit
PB: predicated region body
PF: predicated region fallthrough
CT: control target
= control target key end

     0   :  { %s477_s1 = inlined_call_operand.vmem [shape: bf16[256,128], index: 1, kind: input, shape index: {}]   ;;  %s478_s0 = inlined_call_operand.vmem [shape: bf16[32,256], index: 0, kind: input, shape index: {}]   ;;  %s479_s3 = inlined_call_operand.vmem [shape: bf16[32,128], index: 3, kind: input, shape index: {}]   ;;  %s480_s2 = inlined_call_operand.vmem [shape: f32[1,128], index: 2, kind: input, shape index: {}]   ;;  %s481_s4 = inlined_call_operand.vmem [shape: bf16[32,128], index: 4, kind: output, shape index: {}]  }
   0x1   :  { %v355_v0 = vld [vmem:[%s477_s1 + $0x40] sm:$0xff]   ;;  %v357_v2 = vld [vmem:[%s477_s1 + $0x48] sm:$0xff]   ;;  %v359_v4 = vld [vmem:[%s477_s1 + $0x50] sm:$0xff]  }
   0x2   :  { %v356_v1 = vld [vmem:[%s477_s1] sm:$0xff]   ;;  %311 = vmatprep.subr.bf16.mxu0 %v355_v0  ;;  %339 = vmatprep.subr.bf16.mxu1 %v355_v0  ;;  %v358_v3 = vld [vmem:[%s477_s1 + $0x8] sm:$0xff]   ;;  %v360_v5 = vld [vmem:[%s477_s1 + $0x10] sm:$0xff]  }
   0x3   :  { %312 = vmatpush3.bf16.msra.mxu0 %v356_v1  ;;  %347 = vmatpush3.bf16.msra.mxu1 %v356_v1  ;;  %v361_v6 = vld [vmem:[%s477_s1 + $0x58] sm:$0xff]   ;;  %v363_v8 = vld [vmem:[%s477_s1 + $0x60] sm:$0xff]   ;;  %v365_v10 = vld [vmem:[%s477_s1 + $0x68] sm:$0xff]  }
   0x4   :  { %313 = vmatprep.subr.bf16.mxu0 %v357_v2  ;;  %340 = vmatprep.subr.bf16.mxu1 %v357_v2  ;;  %v362_v7 = vld [vmem:[%s477_s1 + $0x18] sm:$0xff]   ;;  %v364_v9 = vld [vmem:[%s477_s1 + $0x20] sm:$0xff]   ;;  %v366_v13 = vld [vmem:[%s477_s1 + $0x28] sm:$0xff]  }
   0x5   :  { %v373_v11 = vld [vmem:[%s478_s0 + $0x4] ss:$8 sps:$4 sm:$0xff]   ;;  %v376_v12 = vld [vmem:[%s478_s0 + $0x14] ss:$8 sps:$4 sm:$0xff]   ;;  %v371_v18 = vld [vmem:[%s478_s0] ss:$8 sps:$4 sm:$0xff]  }
   0x6   :  { %v367_v14 = vld [vmem:[%s477_s1 + $0x70] sm:$0xff]   ;;  %209 = vmatprep.mubr.bf16.mxu0 %v373_v11  ;;  %217 = vmatprep.mubr.bf16.mxu1 %v376_v12  ;;  %v369_v16 = vld [vmem:[%s477_s1 + $0x78] sm:$0xff]   ;;  %v292_v22 = vld [vmem:[%s479_s3] sm:$0xff]  }
   0x7   :  { %314 = vmatpush3.bf16.msra.mxu0 %v358_v3  ;;  %348 = vmatpush3.bf16.msra.mxu1 %v358_v3  ;;  %v368_v15 = vld [vmem:[%s477_s1 + $0x30] sm:$0xff]   ;;  %v370_v17 = vld [vmem:[%s477_s1 + $0x38] sm:$0xff]   ;;  %v309_v23 = vld [vmem:[%s479_s3 + $0x8] sm:$0xff]   ;;  %v293_v31 = vunpack.c.l.bf16 %v292_v22  ;;  %v294_v34 = vunpack.c.h.bf16 %v292_v22 }
   0x8   :  { %315 = vmatprep.subr.bf16.mxu0 %v359_v4  ;;  %341 = vmatprep.subr.bf16.mxu1 %v359_v4  ;;  %v374_v19 = vld [vmem:[%s478_s0 + $0x10] ss:$8 sps:$4 sm:$0xff]   ;;  %v262_v24 = vld [vmem:[%s480_s2] ss:$0 sm:$0xff]  ;;  %v297_v32 = vunpack.c.l.bf16 %v309_v23  ;;  %v298_v36 = vunpack.c.h.bf16 %v309_v23 }
   0xb   :  { %316 = vmatpush3.bf16.msra.mxu0 %v360_v5  ;;  %349 = vmatpush3.bf16.msra.mxu1 %v360_v5 }
   0xc   :  { %317 = vmatprep.subr.bf16.mxu0 %v361_v6  ;;  %342 = vmatprep.subr.bf16.mxu1 %v361_v6 }
   0xf   :  { %318 = vmatpush3.bf16.msra.mxu0 %v362_v7  ;;  %350 = vmatpush3.bf16.msra.mxu1 %v362_v7 }
  0x10   :  { %319 = vmatprep.subr.bf16.mxu0 %v363_v8  ;;  %343 = vmatprep.subr.bf16.mxu1 %v363_v8 }
  0x13   :  { %320 = vmatpush3.bf16.msra.mxu0 %v364_v9  ;;  %351 = vmatpush3.bf16.msra.mxu1 %v364_v9 }
  0x14   :  { %321 = vmatprep.subr.bf16.mxu0 %v365_v10  ;;  %344 = vmatprep.subr.bf16.mxu1 %v365_v10 }
  0x17   :  { %322 = vmatpush3.bf16.msra.mxu0 %v366_v13  ;;  %352 = vmatpush3.bf16.msra.mxu1 %v366_v13 }
  0x18   :  { %323 = vmatprep.subr.bf16.mxu0 %v367_v14  ;;  %345 = vmatprep.subr.bf16.mxu1 %v367_v14 }
  0x1b   :  { %324 = vmatpush3.bf16.msra.mxu0 %v368_v15  ;;  %353 = vmatpush3.bf16.msra.mxu1 %v368_v15 }
  0x1c   :  { %325 = vmatprep.subr.bf16.mxu0 %v369_v16  ;;  %346 = vmatprep.subr.bf16.mxu1 %v369_v16 }
  0x1f   :  { %326 = vmatpush3.bf16.msra.mxu0 %v370_v17  ;;  %354 = vmatpush3.bf16.msra.mxu1 %v370_v17 }
  0x22   :  { %210 = vmatmul.mubr.bf16.vlgmr.msra.gmra.mrb[0].mxu0 %v371_v18  ;;  %218 = vmatmul.mubr.bf16.vlgmr.msra.gmra.mrb[0].mxu1 %v374_v19 }
  0xf5   :  { %v327_v20 = vpop.f32.mrb[0].mxu0  ;;  %v333_v21 = vpop.f32.mrb[0].mxu1 }
  0xf6   :  { %v328_v25 = vpop.f32.mrb[1].mxu0  ;;  %v334_v26 = vpop.f32.mrb[1].mxu1 }
  0xf7   :  { %v329_v27 = vadd.f32 %v328_v25, %v327_v20  ;;  %v335_v28 = vadd.f32 %v334_v26, %v333_v21  ;;  %v330_v29 = vpop.f32.mrb[2].mxu0  ;;  %v336_v30 = vpop.f32.mrb[2].mxu1 }
  0xf8   :  { %v331_v33 = vpop.f32.mrb[3].mxu0  ;;  %v337_v35 = vpop.f32.mrb[3].mxu1 }
  0xf9   :  { %v212_v37 = vadd.f32 %v329_v27, %v262_v24  ;;  %v220_v38 = vadd.f32 %v335_v28, %v262_v24  ;;  %v332_v39 = vadd.f32 %v331_v33, %v330_v29  ;;  %v338_v40 = vadd.f32 %v337_v35, %v336_v30 }
  0xfb   :  { %v215_v41 = vadd.f32 %v332_v39, %v262_v24  ;;  %v223_v42 = vadd.f32 %v338_v40, %v262_v24  ;;  %v234_v43 = vadd.f32 %v293_v31, %v212_v37  ;;  %v236_v44 = vadd.f32 %v297_v32, %v220_v38 }
  0xfd   :  { %v235_v45 = vadd.f32 %v294_v34, %v215_v41  ;;  %v237_v46 = vadd.f32 %v298_v36, %v223_v42 }
  0xff   :  { %v302_v47 = vpack.c.bf16 %v235_v45, %v234_v43  ;;  %v307_v48 = vpack.c.bf16 %v237_v46, %v236_v44 }
 0x101   :  { %303 = vst [vmem:[%s481_s4] sm:$0xff] %v302_v47   ;;  %310 = vst [vmem:[%s481_s4 + $0x8] sm:$0xff] %v307_v48  }

// kernel: _lambda_.59
= control target key start
LH: loop header
LB: loop body
LE: loop exit
PB: predicated region body
PF: predicated region fallthrough
CT: control target
= control target key end

     0   :  { %s965_s6 = smov 0   ;;  %s1080_s0 = inlined_call_operand.vmem [shape: bf16[2,16,192], index: 0, kind: input, shape index: {}]   ;;  %s1081_s1 = inlined_call_operand.vmem [shape: bf16[2,16,64], index: 1, kind: output, shape index: {}]  }
   0x1 LB: > { %s795_s7 = sadd.s32 4294967295, %s944_s6   ;;  %p799_p0 = scmp.ge.s32.totalorder %s944_s6, 1  ;;  %s944_s6 = sphi %s965_s6, %s11_s6  }
   0x2   : > { %p87_p1 = scmp.lt.s32.totalorder %s944_s6, 3 }
   0x4   : > { %p88_p2 = pnand %p799_p0, %p87_p1 }
   0x5   : > { %p107_p3 = scmp.lt.s32.totalorder (!%p88_p2), %s795_s7, 1  ;;  %v946_v0 = vmov (!%p88_p2), 0.0   ;;  %vm947_vm0 = vmmov (!%p88_p2), 0   ;;  %s948_s12 = smov (!%p88_p2), 112   ;;  %vm145_vm1 = vcmask (!%p88_p2), 130048   ;;  %vm724_vm2 = vcmask (!%p88_p2), 261120  }
   0x6   : > { %91 = sbr.rel (%p88_p2) target bundleno = 1173 (0x495), region = 24  ;;  %839 = vmatprep.subr.bf16.mxu0 (!%p88_p2), %v946_v0  ;;  %841 = vmatprep.mubr.msk.bf16.mxu0 (!%p88_p2), %vm947_vm0, %v946_v0  ;;  %s949_s13 = smov (!%p88_p2), 80   ;;  %vm727_vm3 = vcmask (!%p88_p2), 392192   ;;  %vm737_vm4 = vcmask (!%p88_p2), 519168  }
   0x7   : > { %845 = vmatprep.subr.bf16.mxu1 (!%p88_p2), %v946_v0  ;;  %847 = vmatprep.mubr.msk.bf16.mxu1 (!%p88_p2), %vm947_vm0, %v946_v0  ;;  %s950_s14 = smov (!%p88_p2), 96   ;;  %s951_s15 = smov (!%p88_p2), 64  }
   0x8   : > { %s952_s16 = smov (!%p88_p2), 48   ;;  %s953_s17 = smov (!%p88_p2), 32  }
   0x9   : > { %s954_s18 = smov (!%p88_p2), 16  }
   0xd   : > { %s1083_s7 = smov (!%p107_p3, %s795_s7), 1 }
   0xe   : > { %s821_s8 = sshll.u32 %s1083_s7, 4  ;;  %s822_s19 = sshll.u32 %s1083_s7, 3 }
   0xf   : > { %s111_s11 = scalar_lea.vmem %s1080_s0, %s821_s8  ;;  %s116_s22 = scalar_lea.vmem %s1081_s1, %s822_s19 }
  0x10   : > { %v982_v1 = vld [vmem:[%s111_s11] sm:$0xff]  ;;  %v984_v2 = vld [vmem:[%s111_s11 + $0x8] sm:$0xff] }
  0x11   : > { %v804_v3 = vcombine.low %v982_v1, %v984_v2 }
  0x13   : > { %268 = vrot.lane.b32.xlu0 %v804_v3, %s948_s12  ;;  %564 = vrot.lane.b32.xlu1 %v804_v3, %s949_s13 }
  0x17   : > { %416 = vrot.lane.b32.xlu0 %v804_v3, %s950_s14  ;;  %142 = vrot.lane.b32.xlu1 %v804_v3, %s951_s15 }
  0x1b   : > { %287 = vrot.lane.b32.xlu0 %v804_v3, %s952_s16  ;;  %435 = vrot.lane.b32.xlu1 %v804_v3, %s953_s17 }
  0x1f   : > { %583 = vrot.lane.b32.xlu1 %v804_v3, %s954_s18 }
  0x39   : > { %126 = vxpose.xlu0.c.b16.start.end [1/1] (short) (narrow) %v804_v3, 16 }
  0x85   : > { %v269_v4 = vpop.permute.xlu0 %268  ;;  %v565_v5 = vpop.permute.xlu1 %564 }
  0x86   : > { %271 = vxpose.xlu1.c.b16.start.end [1/1] (short) (narrow) %v269_v4, 16 }
  0x89   : > { %v417_v6 = vpop.permute.xlu0 %416  ;;  %v143_v7 = vpop.permute.xlu1 %142 }
  0x8a   : > { %419 = vxpose.xlu0.c.b16.start.end [1/1] (short) (narrow) %v417_v6, 16  ;;  %840 = vmatpush3.bf16.msra.mxu0 %v143_v7 }
  0x8b   : > { %851 = vmatprep.subr.bf16.mxu0 %v946_v0 }
  0x8d   : > { %v288_v8 = vpop.permute.xlu0 %287  ;;  %v436_v10 = vpop.permute.xlu1 %435 }
  0x8e   : > { %567 = vxpose.xlu0.c.b16.start.end [1/1] (short) (narrow) %v565_v5, 16 }
  0x91   : > { %v584_v11 = vpop.permute.xlu1 %583 }
  0x9f   : > { %v134_v9 = vpop.trf.xlu0 }
  0xa0   : > { %842 = vmatmul.mubr.msk.bf16.vlgmr.msra.gmra.mrb[0].mxu0 %vm145_vm1, %v134_v9 }
  0xa1   : > { %852 = vmatpush3.bf16.msra.mxu0 %v288_v8  ;;  %853 = vmatprep.mubr.msk.bf16.mxu0 %vm947_vm0, %v946_v0 }
  0xa2   : > { %863 = vmatprep.subr.bf16.mxu0 %v946_v0 }
  0xec   : > { %v279_v12 = vpop.trf.xlu1 }
  0xed   : > { %854 = vmatmul.mubr.msk.bf16.vlgmr.msra.gmra.mrb[4].mxu0 %vm145_vm1, %v279_v12 }
  0xee   : > { %864 = vmatpush3.bf16.msra.mxu0 %v436_v10  ;;  %865 = vmatprep.mubr.msk.bf16.mxu0 %vm947_vm0, %v946_v0 }
  0xef   : > { %875 = vmatprep.subr.bf16.mxu0 %v946_v0 }
  0xf0   : > { %v427_v13 = vpop.trf.xlu0 }
  0xf4   : > { %v575_v14 = vpop.trf.xlu0 }
  0xf5   : > { %866 = vmatmul.mubr.msk.bf16.vlgmr.msra.gmra.mrb[8].mxu0 %vm145_vm1, %v427_v13 }
  0xf6   : > { %876 = vmatpush3.bf16.msra.mxu0 %v584_v11  ;;  %877 = vmatprep.mubr.msk.bf16.mxu0 %vm947_vm0, %v946_v0 }
  0xfd   : > { %878 = vmatmul.mubr.msk.bf16.vlgmr.msra.gmra.mrb[12].mxu0 %vm145_vm1, %v575_v14 }
 0x173   : > { %v183_v15 = vpop.f32.mrb[0].mxu0 }
 0x174   : > { %v190_v16 = vmul.f32 0.25, %v183_v15  ;;  %v843_v17 = vpop.f32.mrb[1].mxu0 }
 0x175   : > { %v186_v18 = vpop.f32.mrb[2].mxu0 }
 0x176   : > { %v191_v19 = vmul.f32 0.25, %v186_v18  ;;  %v192_v20 = vsel %vm145_vm1, %v190_v16, -inf  ;;  %v844_v21 = vpop.f32.mrb[3].mxu0 }
 0x177   : > { %193 = vmax.xlane.f32.xlu0 %v192_v20 }
 0x178   : > { %v195_v22 = vsel %vm145_vm1, %v191_v19, -inf }
 0x179   : > { %196 = vmax.xlane.f32.xlu1 %v195_v22 }
 0x1c0   : > { %v327_v23 = vpop.f32.mrb[4].mxu0 }
 0x1c1   : > { %v334_v24 = vmul.f32 0.25, %v327_v23  ;;  %v855_v25 = vpop.f32.mrb[5].mxu0 }
 0x1c2   : > { %v330_v26 = vpop.f32.mrb[6].mxu0 }
 0x1c3   : > { %v335_v27 = vmul.f32 0.25, %v330_v26  ;;  %v856_v28 = vpop.f32.mrb[7].mxu0  ;;  %v336_v29 = vsel %vm145_vm1, %v334_v24, -inf }
 0x1c4   : > { %337 = vmax.xlane.f32.xlu0 %v336_v29 }
 0x1c5   : > { %v339_v30 = vsel %vm145_vm1, %v335_v27, -inf }
 0x1c6   : > { %340 = vmax.xlane.f32.xlu1 %v339_v30 }
 0x1c8   : > { %v475_v31 = vpop.f32.mrb[8].mxu0 }
 0x1c9   : > { %v482_v32 = vmul.f32 0.25, %v475_v31  ;;  %v867_v33 = vpop.f32.mrb[9].mxu0 }
 0x1ca   : > { %v478_v34 = vpop.f32.mrb[10].mxu0 }
 0x1cb   : > { %v483_v35 = vmul.f32 0.25, %v478_v34  ;;  %v868_v36 = vpop.f32.mrb[11].mxu0  ;;  %v484_v37 = vsel %vm145_vm1, %v482_v32, -inf  ;;  %v215_v34 = vrot.slane %v982_v1, 4 }
 0x1cc   : > { %485 = vmax.xlane.f32.xlu0 %v484_v37 }
 0x1cd   : > { %v487_v38 = vsel %vm145_vm1, %v483_v35, -inf }
 0x1ce   : > { %488 = vmax.xlane.f32.xlu1 %v487_v38 }
 0x1d0   : > { %v623_v39 = vpop.f32.mrb[12].mxu0 }
 0x1d1   : > { %v630_v40 = vmul.f32 0.25, %v623_v39  ;;  %v879_v41 = vpop.f32.mrb[13].mxu0 }
 0x1d2   : > { %v626_v42 = vpop.f32.mrb[14].mxu0 }
 0x1d3   : > { %v631_v43 = vmul.f32 0.25, %v626_v42  ;;  %v632_v44 = vsel %vm145_vm1, %v630_v40, -inf  ;;  %v880_v45 = vpop.f32.mrb[15].mxu0 }
 0x1d4   : > { %633 = vmax.xlane.f32.xlu0 %v632_v44 }
 0x1d5   : > { %v635_v46 = vsel %vm145_vm1, %v631_v43, -inf }
 0x1d6   : > { %636 = vmax.xlane.f32.xlu1 %v635_v46 }
 0x204   : > { %v194_v47 = vpop.xlane.xlu0 %193 }
 0x205   : > { %v198_v48 = vsub.f32 %v190_v16, %v194_v47 }
 0x206   : > { %v197_v49 = vpop.xlane.xlu1 %196 }
 0x207   : > { %v200_v50 = vmul.f32 1.442695, %v198_v48  ;;  %v199_v51 = vsub.f32 %v191_v19, %v197_v49 }
 0x209   : > { %906 = vpow2.f32 %v200_v50  ;;  %v202_v52 = vmul.f32 1.442695, %v199_v51 }
 0x20b   : > { %908 = vpow2.f32 %v202_v52 }
 0x213   : > { %v907_v53 = vpop.eup %906 }
 0x214   : > { %v204_v54 = vsel %vm145_vm1, %v907_v53, 0.0 }
 0x215   : > { %v909_v55 = vpop.eup %908  ;;  %205 = vadd.xlane.f32.xlu0 %v204_v54 }
 0x216   : > { %v207_v56 = vsel %vm145_vm1, %v909_v55, 0.0 }
 0x217   : > { %208 = vadd.xlane.f32.xlu1 %v207_v56 }
 0x228   : > { %361 = vrot.lane.b32.xlu1 %v984_v2, %s948_s12 }
 0x251   : > { %v338_v57 = vpop.xlane.xlu0 %337 }
 0x252   : > { %v342_v58 = vsub.f32 %v334_v24, %v338_v57 }
 0x253   : > { %v341_v59 = vpop.xlane.xlu1 %340 }
 0x254   : > { %v344_v60 = vmul.f32 1.442695, %v342_v58  ;;  %v343_v61 = vsub.f32 %v335_v27, %v341_v59 }
 0x256   : > { %910 = vpow2.f32 %v344_v60  ;;  %v346_v62 = vmul.f32 1.442695, %v343_v61 }
 0x258   : > { %912 = vpow2.f32 %v346_v62 }
 0x259   : > { %v486_v11 = vpop.xlane.xlu0 %485 }
 0x25a   : > { %v490_v12 = vsub.f32 %v482_v32, %v486_v11 }
 0x25b   : > { %v489_v63 = vpop.xlane.xlu1 %488 }
 0x25c   : > { %v491_v3 = vsub.f32 %v483_v35, %v489_v63  ;;  %v492_v14 = vmul.f32 1.442695, %v490_v12  ;;  %v216_v35 = vrot.slane %v984_v2, 4 }
 0x25e   : > { %v494_v4 = vmul.f32 1.442695, %v491_v3  ;;  %v806_v36 = vcombine.low %v215_v34, %v216_v35 }
 0x260   : > { %v911_v5 = vpop.eup %910  ;;  %914 = vpow2.f32 %v494_v4 }
 0x261   : > { %v348_v6 = vsel %vm145_vm1, %v911_v5, 0.0  ;;  %v634_v13 = vpop.xlane.xlu0 %633  ;;  %916 = vpow2.f32 %v492_v14 }
 0x262   : > { %v913_v7 = vpop.eup %912  ;;  %349 = vadd.xlane.f32.xlu0 %v348_v6  ;;  %v638_v15 = vsub.f32 %v630_v40, %v634_v13 }
 0x263   : > { %v351_v8 = vsel %vm145_vm1, %v913_v7, 0.0  ;;  %v637_v16 = vpop.xlane.xlu1 %636 }
 0x264   : > { %352 = vadd.xlane.f32.xlu1 %v351_v8  ;;  %v640_v17 = vmul.f32 1.442695, %v638_v15  ;;  %v639_v18 = vsub.f32 %v631_v43, %v637_v16 }
 0x266   : > { %918 = vpow2.f32 %v640_v17  ;;  %v642_v19 = vmul.f32 1.442695, %v639_v18 }
 0x268   : > { %920 = vpow2.f32 %v642_v19 }
 0x26a   : > { %v1024_v9 = vpop.eup %914 }
 0x26b   : > { %v499_v10 = vsel %vm145_vm1, %v1024_v9, 0.0  ;;  %v917_v20 = vpop.eup %916 }
 0x26c   : > { %500 = vadd.xlane.f32.xlu1 %v499_v10  ;;  %v496_v21 = vsel %vm145_vm1, %v917_v20, 0.0 }
 0x270   : > { %v1033_v22 = vpop.eup %918 }
 0x271   : > { %v644_v23 = vsel %vm145_vm1, %v1033_v22, 0.0 }
 0x272   : > { %v1037_v24 = vpop.eup %920 }
 0x273   : > { %v647_v25 = vsel %vm145_vm1, %v1037_v24, 0.0 }
 0x278   : > { %359 = vrot.lane.b32.xlu0 %v982_v1, %s948_s12 }
 0x27d   : > { %507 = vrot.lane.b32.xlu1 %v982_v1, %s950_s14 }
 0x297   : > { %497 = vadd.xlane.f32.xlu0 %v496_v21 }
 0x29b   : > { %645 = vadd.xlane.f32.xlu0 %v644_v23 }
 0x2a1   : > { %648 = vadd.xlane.f32.xlu1 %v647_v25 }
 0x2a2   : > { %v206_v26 = vpop.xlane.xlu0 %205 }
 0x2a3   : > { %922 = vrcp.f32 %v206_v26 }
 0x2a4   : > { %v209_v27 = vpop.xlane.xlu1 %208 }
 0x2a5   : > { %924 = vrcp.f32 %v209_v27 }
 0x2a8   : > { %v362_v37 = vpop.permute.xlu1 %361 }
 0x2a9   : > { %v364_v46 = vrot.slane %v362_v37, 4 }
 0x2ad   : > { %v923_v28 = vpop.eup %922 }
 0x2ae   : > { %v211_v30 = vmul.f32 %v923_v28, %v907_v53 }
 0x2af   : > { %v925_v29 = vpop.eup %924 }
 0x2b0   : > { %v213_v31 = vmul.f32 %v925_v29, %v909_v55 }
 0x2b1   : > { %509 = vrot.lane.b32.xlu0 %v984_v2, %s950_s14 }
 0x2b2   : > { %v214_v32 = vpack.c.bf16 %v213_v31, %v211_v30  ;;  %655 = vrot.lane.b32.xlu1 %v982_v1, %s949_s13 }
 0x2b4   : > { %v224_v33 = vsel %vm145_vm1, %v214_v32, 0 }
 0x2b5   : > { %846 = vmatpush3.bf16.xpose.msra.mxu1 %v224_v33  ;;  %657 = vrot.lane.b32.xlu0 %v984_v2, %s949_s13 }
 0x2b6   : > { %857 = vmatprep.subr.bf16.mxu1 %v946_v0 }
 0x2bc   : > { %848 = vmatmul.mubr.msk.bf16.vlgmr.msra.gmra.mrb[0].mxu1 %vm145_vm1, %v806_v36 }
 0x2bd   : > { %859 = vmatprep.mubr.msk.bf16.mxu1 %vm947_vm0, %v946_v0 }
 0x2ef   : > { %v350_v38 = vpop.xlane.xlu0 %349 }
 0x2f0   : > { %926 = vrcp.f32 %v350_v38 }
 0x2f1   : > { %v353_v39 = vpop.xlane.xlu1 %352 }
 0x2f2   : > { %928 = vrcp.f32 %v353_v39 }
 0x2f3   : > { %v360_v44 = vpop.permute.xlu0 %359 }
 0x2f4   : > { %v363_v45 = vrot.slane %v360_v44, 4 }
 0x2f6   : > { %v809_v47 = vcombine.low %v363_v45, %v364_v46 }
 0x2f9   : > { %v501_v48 = vpop.xlane.xlu1 %500 }
 0x2fa   : > { %v927_v1 = vpop.eup %926  ;;  %930 = vrcp.f32 %v501_v48 }
 0x2fb   : > { %v355_v41 = vmul.f32 %v927_v1, %v911_v5 }
 0x2fc   : > { %v929_v40 = vpop.eup %928 }
 0x2fd   : > { %v357_v42 = vmul.f32 %v929_v40, %v913_v7  ;;  %v508_v50 = vpop.permute.xlu1 %507 }
 0x2fe   : > { %v511_v62 = vrot.slane %v508_v50, 4 }
 0x2ff   : > { %v358_v43 = vpack.c.bf16 %v357_v42, %v355_v41 }
 0x301   : > { %v372_v2 = vsel %vm145_vm1, %v358_v43, 0 }
 0x302   : > { %858 = vmatpush3.bf16.xpose.msra.mxu1 %v372_v2 }
 0x303   : > { %869 = vmatprep.subr.bf16.mxu1 %v946_v0 }
 0x304   : > { %v931_v52 = vpop.eup %930 }
 0x305   : > { %v505_v56 = vmul.f32 %v931_v52, %v1024_v9 }
 0x309   : > { %860 = vmatmul.mubr.msk.bf16.vlgmr.msra.gmra.mrb[4].mxu1 %vm145_vm1, %v809_v47 }
 0x30a   : > { %871 = vmatprep.mubr.msk.bf16.mxu1 %vm947_vm0, %v946_v0 }
 0x324   : > { %v498_v49 = vpop.xlane.xlu0 %497 }
 0x325   : > { %932 = vrcp.f32 %v498_v49 }
 0x328   : > { %v646_v51 = vpop.xlane.xlu0 %645 }
 0x329   : > { %934 = vrcp.f32 %v646_v51 }
 0x32c   : > { %v510_v58 = vpop.permute.xlu0 %509 }
 0x32d   : > { %v512_v60 = vrot.slane %v510_v58, 4 }
 0x32e   : > { %v649_v53 = vpop.xlane.xlu1 %648 }
 0x32f   : > { %v933_v54 = vpop.eup %932  ;;  %936 = vrcp.f32 %v649_v53  ;;  %v812_v3 = vcombine.low %v511_v62, %v512_v60 }
 0x330   : > { %v503_v55 = vmul.f32 %v933_v54, %v917_v20  ;;  %v658_v7 = vpop.permute.xlu0 %657 }
 0x331   : > { %v660_v11 = vrot.slane %v658_v7, 4 }
 0x332   : > { %v506_v57 = vpack.c.bf16 %v505_v56, %v503_v55  ;;  %v656_v6 = vpop.permute.xlu1 %655 }
 0x333   : > { %v935_v61 = vpop.eup %934  ;;  %v659_v10 = vrot.slane %v656_v6, 4 }
 0x334   : > { %v520_v59 = vsel %vm145_vm1, %v506_v57, 0  ;;  %v651_v4 = vmul.f32 %v935_v61, %v1033_v22 }
 0x335   : > { %870 = vmatpush3.bf16.xpose.msra.mxu1 %v520_v59  ;;  %v815_v12 = vcombine.low %v659_v10, %v660_v11 }
 0x336   : > { %881 = vmatprep.subr.bf16.mxu1 %v946_v0 }
 0x339   : > { %v937_v63 = vpop.eup %936 }
 0x33a   : > { %v653_v5 = vmul.f32 %v937_v63, %v1037_v24 }
 0x33c   : > { %872 = vmatmul.mubr.msk.bf16.vlgmr.msra.gmra.mrb[8].mxu1 %vm145_vm1, %v812_v3  ;;  %v654_v8 = vpack.c.bf16 %v653_v5, %v651_v4 }
 0x33d   : > { %883 = vmatprep.mubr.msk.bf16.mxu1 %vm947_vm0, %v946_v0 }
 0x33e   : > { %v668_v9 = vsel %vm145_vm1, %v654_v8, 0 }
 0x33f   : > { %882 = vmatpush3.bf16.xpose.msra.mxu1 %v668_v9 }
 0x346   : > { %884 = vmatmul.mubr.msk.bf16.vlgmr.msra.gmra.mrb[12].mxu1 %vm145_vm1, %v815_v12 }
 0x38f   : > { %v260_v13 = vpop.f32.mrb[0].mxu1 }
 0x390   : > { %v849_v14 = vpop.f32.mrb[1].mxu1 }
 0x391   : > { %v263_v15 = vpop.f32.mrb[2].mxu1 }
 0x392   : > { %v267_v16 = vpack.c.bf16 %v263_v15, %v260_v13  ;;  %v850_v17 = vpop.f32.mrb[3].mxu1 }
 0x3dc   : > { %v408_v18 = vpop.f32.mrb[4].mxu1 }
 0x3dd   : > { %v861_v19 = vpop.f32.mrb[5].mxu1 }
 0x3de   : > { %v411_v20 = vpop.f32.mrb[6].mxu1 }
 0x3df   : > { %v415_v21 = vpack.c.bf16 %v411_v20, %v408_v18  ;;  %v862_v22 = vpop.f32.mrb[7].mxu1 }
 0x3e1   : > { %713 = vrot.lane.b32.xlu1 %v415_v21, %s954_s18 }
 0x40f   : > { %v556_v0 = vpop.f32.mrb[8].mxu1 }
 0x410   : > { %v873_v23 = vpop.f32.mrb[9].mxu1 }
 0x411   : > { %v559_v24 = vpop.f32.mrb[10].mxu1 }
 0x412   : > { %v563_v25 = vpack.c.bf16 %v559_v24, %v556_v0  ;;  %v874_v26 = vpop.f32.mrb[11].mxu1 }
 0x414   : > { %716 = vrot.lane.b32.xlu0 %v563_v25, %s953_s17 }
 0x419   : > { %v704_v27 = vpop.f32.mrb[12].mxu1 }
 0x41a   : > { %v885_v28 = vpop.f32.mrb[13].mxu1 }
 0x41b   : > { %v707_v29 = vpop.f32.mrb[14].mxu1 }
 0x41c   : > { %v711_v30 = vpack.c.bf16 %v707_v29, %v704_v27  ;;  %v886_v31 = vpop.f32.mrb[15].mxu1 }
 0x41e   : > { %719 = vrot.lane.b32.xlu1 %v711_v30, %s952_s16 }
 0x453   : > { %v714_v32 = vpop.permute.xlu1 %713 }
 0x454   : > { %v723_v34 = vsel %vm145_vm1, %v267_v16, %v714_v32 }
 0x486   : > { %v717_v33 = vpop.permute.xlu0 %716 }
 0x487   : > { %v726_v35 = vsel %vm724_vm2, %v723_v34, %v717_v33 }
 0x490   : > { %v720_v36 = vpop.permute.xlu1 %719 }
 0x491   : > { %v729_v37 = vsel %vm727_vm3, %v726_v35, %v720_v36 }
 0x492   : > { %v817_v38 = vcombine.low %v729_v37, %v729_v37  ;;  %v818_v39 = vcombine.high %v729_v37, %v729_v37 }
 0x494   : > { %738 = vst.msk [vmem:[%s116_s22] sm:$0xf] %vm737_vm4, %v817_v38  ;;  %739 = vst.msk [vmem:[%s116_s22 + $0x4] sm:$0xf] %vm737_vm4, %v818_v39 }
 0x495 PF: > { %s11_s6 = sadd.s32 1, %s944_s6  }
 0x496   : > { %p8_p4 = scmp.ge.s32.totalorder %s11_s6, 4  }
 0x498   :  { %10 = sbr.rel (!%p8_p4) target bundleno = 1 (0x1), region = 54 }

// kernel: _lambda_.55
= control target key start
LH: loop header
LB: loop body
LE: loop exit
PB: predicated region body
PF: predicated region fallthrough
CT: control target
= control target key end

     0   :  { %vm29_vm0 = vcmask 523264   ;;  %v564_v38 = vmov 0   ;;  %s809_s0 = inlined_call_operand.vmem [shape: bf16[32,64], index: 0, kind: input, shape index: {}]   ;;  %s810_s3 = inlined_call_operand.vmem [shape: bf16[64,256], index: 3, kind: input, shape index: {}]   ;;  %s811_s1 = inlined_call_operand.vmem [shape: f32[1,64], index: 1, kind: input, shape index: {}]   ;;  %s812_s2 = inlined_call_operand.vmem [shape: f32[1,64], index: 2, kind: input, shape index: {}]   ;;  %s813_s4 = inlined_call_operand.vmem [shape: f32[1,256], index: 4, kind: input, shape index: {}]   ;;  %s814_s5 = inlined_call_operand.vmem [shape: bf16[32,256], index: 5, kind: output, shape index: {}]  }
   0x1   :  { %v495_v0 = vld [vmem:[%s809_s0] sm:$0xff]   ;;  %v502_v1 = vld [vmem:[%s809_s0 + $0x8] sm:$0xff]   ;;  %v515_v32 = vld [vmem:[%s810_s3 + $0x14] ss:$8 sps:$4 sm:$0xff]   ;;  %205 = vmatprep.mubr.bf16.mxu0 %v564_v38  ;;  %215 = vmatprep.mubr.bf16.mxu1 %v564_v38 }
   0x2   :  { %v496_v2 = vunpack.c.l.bf16 %v495_v0  ;;  %v500_v3 = vunpack.c.l.bf16 %v502_v1  ;;  %v497_v4 = vunpack.c.h.bf16 %v495_v0  ;;  %v501_v5 = vunpack.c.h.bf16 %v502_v1  ;;  %v512_v30 = vld [vmem:[%s810_s3 + $0x4] ss:$8 sps:$4 sm:$0xff]   ;;  %v514_v31 = vld [vmem:[%s810_s3] ss:$8 sps:$4 sm:$0xff]   ;;  %v517_v33 = vld [vmem:[%s810_s3 + $0x10] ss:$8 sps:$4 sm:$0xff]  }
   0x3   :  { %173 = vmatprep.subr.bf16.mxu0 %v512_v30  ;;  %503 = vmatprep.subr.bf16.mxu1 %v512_v30  ;;  %v518_v34 = vld [vmem:[%s810_s3 + $0x24] ss:$8 sps:$4 sm:$0xff]   ;;  %v520_v35 = vld [vmem:[%s810_s3 + $0x20] ss:$8 sps:$4 sm:$0xff]   ;;  %v521_v36 = vld [vmem:[%s810_s3 + $0x34] ss:$8 sps:$4 sm:$0xff]  }
   0x4   :  { %v30_v6 = vsel %vm29_vm0, %v496_v2, 0.0  ;;  %v36_v7 = vsel %vm29_vm0, %v500_v3, 0.0  ;;  %v33_v8 = vsel %vm29_vm0, %v497_v4, 0.0  ;;  %v39_v9 = vsel %vm29_vm0, %v501_v5, 0.0  ;;  %174 = vmatpush1.bf16.msra.mxu0 %v514_v31  ;;  %507 = vmatpush1.bf16.msra.mxu1 %v514_v31  ;;  %v523_v37 = vld [vmem:[%s810_s3 + $0x30] ss:$8 sps:$4 sm:$0xff]  }
   0x5   :  { %31 = vadd.xlane.f32.xlu0 %v30_v6  ;;  %37 = vadd.xlane.f32.xlu1 %v36_v7  ;;  %v474_v53 = vld [vmem:[%s811_s1] ss:$0 sm:$0xff]  ;;  %v117_v7 = vlaneseq }
   0x6   :  { %175 = vmatprep.subr.bf16.mxu0 %v515_v32  ;;  %504 = vmatprep.subr.bf16.mxu1 %v515_v32  ;;  %v475_v59 = vld [vmem:[%s812_s2] ss:$0 sm:$0xff] }
   0x8   :  { %176 = vmatpush1.bf16.msra.mxu0 %v517_v33  ;;  %508 = vmatpush1.bf16.msra.mxu1 %v517_v33 }
   0x9   :  { %34 = vadd.xlane.f32.xlu0 %v33_v8  ;;  %40 = vadd.xlane.f32.xlu1 %v39_v9  ;;  %v118_v8 = vshrl.u32 %v117_v7, 7 }
   0xa   :  { %177 = vmatprep.subr.bf16.mxu0 %v518_v34  ;;  %505 = vmatprep.subr.bf16.mxu1 %v518_v34 }
   0xb   :  { %v119_v9 = vsub.s32 0, %v118_v8 }
   0xc   :  { %178 = vmatpush1.bf16.msra.mxu0 %v520_v35  ;;  %509 = vmatpush1.bf16.msra.mxu1 %v520_v35 }
   0xd   :  { %179 = vmatprep.subr.bf16.mxu0 %v521_v36  ;;  %506 = vmatprep.subr.bf16.mxu1 %v521_v36 }
  0x10   :  { %180 = vmatpush1.bf16.msra.mxu0 %v523_v37  ;;  %510 = vmatpush1.bf16.msra.mxu1 %v523_v37 }
  0x92   :  { %v32_v10 = vpop.xlane.xlu0 %31  ;;  %v38_v11 = vpop.xlane.xlu1 %37 }
  0x93   :  { %v43_v12 = vmul.f32 0.015625, %v32_v10  ;;  %v45_v13 = vmul.f32 0.015625, %v38_v11  ;;  %v115_v10 = vld [vmem:[%s813_s4] sm:$0x3]  ;;  %v123_v11 = vsub.s32 1, %v118_v8 }
  0x95   :  { %v605_v14 = vsub.f32 %v496_v2, %v43_v12  ;;  %v607_v15 = vsub.f32 %v500_v3, %v45_v13  ;;  %v120_v12 = vrot.slane %v115_v10, %v119_v9  ;;  %v124_v13 = vrot.slane %v115_v10, %v123_v11 }
  0x96   :  { %v35_v16 = vpop.xlane.xlu0 %34  ;;  %v41_v17 = vpop.xlane.xlu1 %40 }
  0x97   :  { %v44_v18 = vmul.f32 0.015625, %v35_v16  ;;  %v46_v19 = vmul.f32 0.015625, %v41_v17  ;;  %v51_v20 = vmul.f32 %v605_v14, %v605_v14  ;;  %v53_v21 = vmul.f32 %v607_v15, %v607_v15 }
  0x99   :  { %v613_v22 = vsub.f32 %v497_v4, %v44_v18  ;;  %v615_v23 = vsub.f32 %v501_v5, %v46_v19  ;;  %v55_v24 = vsel %vm29_vm0, %v51_v20, 0.0  ;;  %v61_v25 = vsel %vm29_vm0, %v53_v21, 0.0 }
  0x9a   :  { %56 = vadd.xlane.f32.xlu0 %v55_v24 }
  0x9b   :  { %v52_v26 = vmul.f32 %v613_v22, %v613_v22  ;;  %v54_v27 = vmul.f32 %v615_v23, %v615_v23 }
  0x9d   :  { %v58_v28 = vsel %vm29_vm0, %v52_v26, 0.0  ;;  %v64_v29 = vsel %vm29_vm0, %v54_v27, 0.0 }
  0x9e   :  { %62 = vadd.xlane.f32.xlu0 %v61_v25  ;;  %59 = vadd.xlane.f32.xlu1 %v58_v28 }
  0xa2   :  { %65 = vadd.xlane.f32.xlu1 %v64_v29 }
 0x127   :  { %v57_v39 = vpop.xlane.xlu0 %56 }
 0x128   :  { %v67_v40 = vmul.f32 0.015625, %v57_v39 }
 0x12a   :  { %v71_v41 = vadd.f32 1e-05, %v67_v40 }
 0x12b   :  { %v60_v42 = vpop.xlane.xlu1 %59  ;;  %v63_v43 = vpop.xlane.xlu0 %62 }
 0x12c   :  { %524 = vrsqrt.f32 %v71_v41  ;;  %v68_v44 = vmul.f32 0.015625, %v60_v42  ;;  %v69_v45 = vmul.f32 0.015625, %v63_v43 }
 0x12e   :  { %v72_v46 = vadd.f32 1e-05, %v68_v44  ;;  %v73_v47 = vadd.f32 1e-05, %v69_v45 }
 0x12f   :  { %v66_v48 = vpop.xlane.xlu1 %65 }
 0x130   :  { %526 = vrsqrt.f32 %v72_v46  ;;  %v70_v49 = vmul.f32 0.015625, %v66_v48 }
 0x131   :  { %528 = vrsqrt.f32 %v73_v47 }
 0x132   :  { %v74_v50 = vadd.f32 1e-05, %v70_v49 }
 0x134   :  { %530 = vrsqrt.f32 %v74_v50 }
 0x136   :  { %v525_v51 = vpop.eup %524 }
 0x137   :  { %v79_v52 = vmul.f32 %v525_v51, %v605_v14 }
 0x139   :  { %v90_v57 = vmul.f32 %v474_v53, %v79_v52 }
 0x13a   :  { %v527_v54 = vpop.eup %526 }
 0x13b   :  { %v529_v55 = vpop.eup %528  ;;  %v80_v56 = vmul.f32 %v527_v54, %v613_v22  ;;  %v101_v63 = vadd.f32 %v475_v59, %v90_v57 }
 0x13c   :  { %v81_v58 = vmul.f32 %v529_v55, %v607_v15 }
 0x13d   :  { %v91_v60 = vmul.f32 %v474_v53, %v80_v56 }
 0x13e   :  { %v531_v61 = vpop.eup %530  ;;  %v92_v1 = vmul.f32 %v474_v53, %v81_v58 }
 0x13f   :  { %v82_v62 = vmul.f32 %v531_v61, %v615_v23  ;;  %v102_v0 = vadd.f32 %v475_v59, %v91_v60 }
 0x140   :  { %v103_v4 = vadd.f32 %v475_v59, %v92_v1 }
 0x141   :  { %v105_v2 = vpack.c.bf16 %v102_v0, %v101_v63  ;;  %v93_v3 = vmul.f32 %v474_v53, %v82_v62 }
 0x143   :  { %484 = vmatmul.mubr.msk.bf16.vlgmr.msra.gmra.mrb[0].mxu0 %vm29_vm0, %v105_v2  ;;  %v104_v5 = vadd.f32 %v475_v59, %v93_v3 }
 0x145   :  { %v106_v6 = vpack.c.bf16 %v104_v5, %v103_v4 }
 0x147   :  { %485 = vmatmul.mubr.msk.bf16.vlgmr.msra.gmra.mrb[0].mxu1 %vm29_vm0, %v106_v6 }
 0x216   :  { %v207_v14 = vpop.f32.mrb[0].mxu0 }
 0x217   :  { %v208_v15 = vadd.f32 %v207_v14, %v120_v12  ;;  %v209_v16 = vpop.f32.mrb[1].mxu0 }
 0x218   :  { %v664_v17 = vadd.f32 %v209_v16, %v124_v13  ;;  %v211_v18 = vpop.f32.mrb[2].mxu0 }
 0x219   :  { %v666_v19 = vmul.f32 0.70710677, %v208_v15  ;;  %v668_v20 = vadd.f32 %v211_v18, %v120_v12  ;;  %v213_v21 = vpop.f32.mrb[3].mxu0  ;;  %v705_v59 = vmul.f32 0.5, %v208_v15 }
 0x21a   :  { %v671_v22 = vmul.f32 0.70710677, %v664_v17  ;;  %v673_v23 = vadd.f32 %v213_v21, %v124_v13  ;;  %v217_v24 = vpop.f32.mrb[0].mxu1 }
 0x21b   :  { %v234_v25 = vand.u32 2147483647, %v666_v19  ;;  %v677_v26 = vmul.f32 0.70710677, %v668_v20  ;;  %v219_v35 = vpop.f32.mrb[1].mxu1  ;;  %v685_v42 = vadd.f32 %v217_v24, %v120_v12  ;;  %vm394_vm1 = vcmp.ge.f32.partialorder %v666_v19, 0.0 }
 0x21c   :  { %v235_v27 = vand.u32 2147483647, %v671_v22  ;;  %v681_v28 = vmul.f32 0.70710677, %v673_v23  ;;  %v221_v38 = vpop.f32.mrb[2].mxu1  ;;  %v687_v43 = vadd.f32 %v219_v35, %v124_v13  ;;  %vm395_vm2 = vcmp.ge.f32.partialorder %v671_v22, 0.0 }
 0x21d   :  { %v242_v29 = vmul.f32 0.3275911, %v234_v25  ;;  %v236_v30 = vand.u32 2147483647, %v677_v26  ;;  %v223_v40 = vpop.f32.mrb[3].mxu1  ;;  %v346_v44 = vsub.f32 0.0, %v234_v25  ;;  %v689_v45 = vadd.f32 %v221_v38, %v120_v12 }
 0x21e   :  { %v243_v31 = vmul.f32 0.3275911, %v235_v27  ;;  %v237_v32 = vand.u32 2147483647, %v681_v28  ;;  %v692_v46 = vmul.f32 0.70710677, %v685_v42  ;;  %v700_v50 = vadd.f32 %v223_v40, %v124_v13 }
 0x21f   :  { %v250_v33 = vadd.f32 1.0, %v242_v29  ;;  %v244_v34 = vmul.f32 0.3275911, %v236_v30  ;;  %v695_v47 = vmul.f32 0.70710677, %v687_v43  ;;  %v347_v48 = vsub.f32 0.0, %v235_v27 }
 0x220   :  { %v251_v36 = vadd.f32 1.0, %v243_v31  ;;  %v245_v37 = vmul.f32 0.3275911, %v237_v32  ;;  %v698_v49 = vmul.f32 0.70710677, %v689_v45  ;;  %v348_v51 = vsub.f32 0.0, %v236_v30 }
 0x221   :  { %532 = vrcp.f32 %v250_v33  ;;  %v252_v39 = vadd.f32 1.0, %v244_v34  ;;  %v238_v52 = vand.u32 2147483647, %v692_v46  ;;  %v239_v53 = vand.u32 2147483647, %v695_v47 }
 0x222   :  { %534 = vrcp.f32 %v251_v36  ;;  %v253_v41 = vadd.f32 1.0, %v245_v37  ;;  %v354_v54 = vmul.f32 %v346_v44, %v234_v25  ;;  %v349_v55 = vsub.f32 0.0, %v237_v32 }
 0x223   :  { %536 = vrcp.f32 %v252_v39  ;;  %v240_v56 = vand.u32 2147483647, %v698_v49  ;;  %v246_v57 = vmul.f32 0.3275911, %v238_v52  ;;  %v247_v58 = vmul.f32 0.3275911, %v239_v53 }
 0x224   :  { %538 = vrcp.f32 %v253_v41  ;;  %v355_v60 = vmul.f32 %v347_v48, %v235_v27  ;;  %v708_v62 = vmul.f32 0.70710677, %v700_v50  ;;  %v356_v0 = vmul.f32 %v348_v51, %v236_v30 }
 0x225   :  { %v248_v61 = vmul.f32 0.3275911, %v240_v56  ;;  %v254_v1 = vadd.f32 1.0, %v246_v57  ;;  %v350_v2 = vsub.f32 0.0, %v238_v52  ;;  %v255_v3 = vadd.f32 1.0, %v247_v58 }
 0x226   :  { %v362_v6 = vmul.f32 1.442695, %v354_v54  ;;  %v357_v7 = vmul.f32 %v349_v55, %v237_v32  ;;  %v241_v8 = vand.u32 2147483647, %v708_v62  ;;  %v351_v10 = vsub.f32 0.0, %v239_v53 }
 0x227   :  { %540 = vrcp.f32 %v254_v1  ;;  %v256_v11 = vadd.f32 1.0, %v248_v61  ;;  %v364_v13 = vmul.f32 1.442695, %v355_v60  ;;  %v366_v18 = vmul.f32 1.442695, %v356_v0 }
 0x228   :  { %542 = vrcp.f32 %v255_v3  ;;  %v249_v14 = vmul.f32 0.3275911, %v241_v8  ;;  %v358_v21 = vmul.f32 %v350_v2, %v238_v52  ;;  %v352_v24 = vsub.f32 0.0, %v240_v56 }
 0x229   :  { %v368_v29 = vmul.f32 1.442695, %v357_v7  ;;  %v359_v33 = vmul.f32 %v351_v10, %v239_v53  ;;  %544 = vrcp.f32 %v256_v11  ;;  %v353_v34 = vsub.f32 0.0, %v241_v8 }
 0x22a   :  { %v257_v30 = vadd.f32 1.0, %v249_v14  ;;  %546 = vpow2.f32 %v362_v6  ;;  %v370_v39 = vmul.f32 1.442695, %v358_v21  ;;  %v360_v40 = vmul.f32 %v352_v24, %v240_v56 }
 0x22b   :  { %v710_v63 = vpop.eup %532  ;;  %v372_v52 = vmul.f32 1.442695, %v359_v33  ;;  %v361_v53 = vmul.f32 %v353_v34, %v241_v8  ;;  %v732_v60 = vmul.f32 0.5, %v664_v17  ;;  %v746_v14 = vmul.f32 0.5, %v668_v20 }
 0x22c   :  { %v712_v4 = vpop.eup %534  ;;  %v274_v5 = vmul.f32 1.0614054, %v710_v63  ;;  %548 = vrcp.f32 %v257_v30  ;;  %v374_v61 = vmul.f32 1.442695, %v360_v40  ;;  %vm396_vm3 = vcmp.ge.f32.partialorder %v677_v26, 0.0 }
 0x22d   :  { %v275_v9 = vmul.f32 1.0614054, %v712_v4  ;;  %v717_v15 = vpop.eup %536  ;;  %550 = vpow2.f32 %v364_v13  ;;  %v376_v8 = vmul.f32 1.442695, %v361_v53  ;;  %vm397_vm4 = vcmp.ge.f32.partialorder %v681_v28, 0.0 }
 0x22e   :  { %v282_v12 = vadd.f32 -1.4531521, %v274_v5  ;;  %v276_v27 = vmul.f32 1.0614054, %v717_v15  ;;  %v721_v31 = vpop.eup %538  ;;  %552 = vpow2.f32 %v366_v18  ;;  %vm398_vm5 = vcmp.ge.f32.partialorder %v692_v46, 0.0 }
 0x22f   :  { %v283_v16 = vadd.f32 -1.4531521, %v275_v9  ;;  %v277_v37 = vmul.f32 1.0614054, %v721_v31  ;;  %554 = vpow2.f32 %v368_v29  ;;  %vm399_vm6 = vcmp.ge.f32.partialorder %v695_v47, 0.0 }
 0x230   :  { %v290_v25 = vmul.f32 %v710_v63, %v282_v12  ;;  %v284_v36 = vadd.f32 -1.4531521, %v276_v27  ;;  %556 = vpow2.f32 %v370_v39  ;;  %vm400_vm7 = vcmp.ge.f32.partialorder %v698_v49, 0.0 }
 0x231   :  { %v291_v32 = vmul.f32 %v712_v4, %v283_v16  ;;  %v285_v48 = vadd.f32 -1.4531521, %v277_v37  ;;  %v729_v58 = vpop.eup %540  ;;  %558 = vpow2.f32 %v372_v52  ;;  %vm401_vm8 = vcmp.ge.f32.partialorder %v708_v62, 0.0 }
 0x232   :  { %v298_v35 = vadd.f32 1.4214138, %v290_v25  ;;  %v292_v44 = vmul.f32 %v717_v15, %v284_v36  ;;  %v734_v0 = vpop.eup %542  ;;  %v278_v5 = vmul.f32 1.0614054, %v729_v58  ;;  %560 = vpow2.f32 %v374_v61 }
 0x233   :  { %v299_v38 = vadd.f32 1.4214138, %v291_v32  ;;  %v293_v57 = vmul.f32 %v721_v31, %v285_v48  ;;  %v279_v7 = vmul.f32 1.0614054, %v734_v0  ;;  %v742_v12 = vpop.eup %544  ;;  %562 = vpow2.f32 %v376_v8 }
 0x234   :  { %v306_v41 = vmul.f32 %v710_v63, %v298_v35  ;;  %v300_v55 = vadd.f32 1.4214138, %v292_v44  ;;  %v286_v11 = vadd.f32 -1.4531521, %v278_v5  ;;  %v547_v18 = vpop.eup %546  ;;  %v280_v20 = vmul.f32 1.0614054, %v742_v12 }
 0x235   :  { %v307_v51 = vmul.f32 %v712_v4, %v299_v38  ;;  %v301_v3 = vadd.f32 1.4214138, %v293_v57  ;;  %v287_v16 = vadd.f32 -1.4531521, %v279_v7 }
 0x236   :  { %v314_v54 = vadd.f32 -0.28449672, %v306_v41  ;;  %v308_v2 = vmul.f32 %v717_v15, %v300_v55  ;;  %v294_v27 = vmul.f32 %v729_v58, %v286_v11  ;;  %v752_v29 = vpop.eup %548  ;;  %v288_v40 = vadd.f32 -1.4531521, %v280_v20 }
 0x237   :  { %v315_v56 = vadd.f32 -0.28449672, %v307_v51  ;;  %v309_v10 = vmul.f32 %v721_v31, %v301_v3  ;;  %v295_v32 = vmul.f32 %v734_v0, %v287_v16  ;;  %v551_v33 = vpop.eup %550  ;;  %v281_v41 = vmul.f32 1.0614054, %v752_v29 }
 0x238   :  { %v322_v1 = vmul.f32 %v710_v63, %v314_v54  ;;  %v316_v17 = vadd.f32 -0.28449672, %v308_v2  ;;  %v302_v36 = vadd.f32 1.4214138, %v294_v27  ;;  %v553_v37 = vpop.eup %552  ;;  %v296_v57 = vmul.f32 %v742_v12, %v288_v40 }
 0x239   :  { %v323_v6 = vmul.f32 %v712_v4, %v315_v56  ;;  %v317_v25 = vadd.f32 -0.28449672, %v309_v10  ;;  %v303_v39 = vadd.f32 1.4214138, %v295_v32  ;;  %v289_v56 = vadd.f32 -1.4531521, %v281_v41 }
 0x23a   :  { %v330_v9 = vadd.f32 0.2548296, %v322_v1  ;;  %v324_v24 = vmul.f32 %v717_v15, %v316_v17  ;;  %v310_v52 = vmul.f32 %v729_v58, %v302_v36  ;;  %v304_v7 = vadd.f32 1.4214138, %v296_v57 }
 0x23b   :  { %v331_v13 = vadd.f32 0.2548296, %v323_v6  ;;  %v311_v55 = vmul.f32 %v734_v0, %v303_v39  ;;  %v297_v8 = vmul.f32 %v752_v29, %v289_v56 }
 0x23c   :  { %v338_v21 = vmul.f32 %v710_v63, %v330_v9  ;;  %v332_v35 = vadd.f32 0.2548296, %v324_v24  ;;  %v325_v63 = vmul.f32 %v721_v31, %v317_v25  ;;  %v318_v3 = vadd.f32 -0.28449672, %v310_v52 }
 0x23d   :  { %v339_v30 = vmul.f32 %v712_v4, %v331_v13  ;;  %v555_v4 = vpop.eup %554 }
 0x23e   :  { %v378_v34 = vmul.f32 %v547_v18, %v338_v21  ;;  %v340_v48 = vmul.f32 %v717_v15, %v332_v35  ;;  %v333_v51 = vadd.f32 0.2548296, %v325_v63  ;;  %v557_v53 = vpop.eup %556  ;;  %v319_v15 = vadd.f32 -0.28449672, %v311_v55 }
 0x23f   :  { %v379_v38 = vmul.f32 %v551_v33, %v339_v30  ;;  %v559_v5 = vpop.eup %558  ;;  %v326_v11 = vmul.f32 %v729_v58, %v318_v3  ;;  %v312_v21 = vmul.f32 %v742_v12, %v304_v7 }
 0x240   :  { %v386_v44 = vsub.f32 1.0, %v378_v34  ;;  %v380_v1 = vmul.f32 %v553_v37, %v340_v48  ;;  %v341_v2 = vmul.f32 %v721_v31, %v333_v51  ;;  %v561_v13 = vpop.eup %560  ;;  %v327_v31 = vmul.f32 %v734_v0, %v319_v15 }
 0x241   :  { %v387_v54 = vsub.f32 1.0, %v379_v38  ;;  %v334_v30 = vadd.f32 0.2548296, %v326_v11  ;;  %v563_v32 = vpop.eup %562  ;;  %v320_v33 = vadd.f32 -0.28449672, %v312_v21 }
 0x242   :  { %v402_v61 = vsub.f32 0.0, %v386_v44  ;;  %v388_v17 = vsub.f32 1.0, %v380_v1  ;;  %v381_v10 = vmul.f32 %v555_v4, %v341_v2  ;;  %v335_v20 = vadd.f32 0.2548296, %v327_v31 }
 0x243   :  { %v403_v6 = vsub.f32 0.0, %v387_v54  ;;  %v305_v34 = vadd.f32 1.4214138, %v297_v8  ;;  %v342_v36 = vmul.f32 %v729_v58, %v334_v30  ;;  %v328_v39 = vmul.f32 %v742_v12, %v320_v33 }
 0x244   :  { %v410_v9 = vsel %vm394_vm1, %v386_v44, %v402_v61  ;;  %v404_v25 = vsub.f32 0.0, %v388_v17  ;;  %v389_v27 = vsub.f32 1.0, %v381_v10  ;;  %v343_v38 = vmul.f32 %v734_v0, %v335_v20 }
 0x245   :  { %v426_v16 = vadd.f32 1.0, %v410_v9  ;;  %v411_v18 = vsel %vm395_vm2, %v387_v54, %v403_v6  ;;  %v313_v40 = vmul.f32 %v752_v29, %v305_v34  ;;  %v421_v4 = vmul.f32 0.5, %v673_v23 }
 0x246   :  { %v427_v24 = vadd.f32 1.0, %v411_v18  ;;  %v412_v22 = vsel %vm396_vm3, %v388_v17, %v404_v25  ;;  %v405_v63 = vsub.f32 0.0, %v389_v27  ;;  %v383_v48 = vmul.f32 %v559_v5, %v343_v38 }
 0x247   :  { %v434_v19 = vmul.f32 %v426_v16, %v705_v59  ;;  %v428_v37 = vadd.f32 1.0, %v412_v22  ;;  %v336_v51 = vadd.f32 0.2548296, %v328_v39  ;;  %v321_v0 = vadd.f32 -0.28449672, %v313_v40 }
 0x248   :  { %v435_v35 = vmul.f32 %v427_v24, %v732_v60  ;;  %v413_v59 = vsel %vm397_vm4, %v389_v27, %v405_v63  ;;  %v382_v60 = vmul.f32 %v557_v53, %v342_v36  ;;  %v391_v54 = vsub.f32 1.0, %v383_v48 }
 0x249   :  { %v436_v26 = vmul.f32 %v428_v37, %v746_v14  ;;  %v429_v44 = vadd.f32 1.0, %v413_v59  ;;  %v344_v55 = vmul.f32 %v742_v12, %v336_v51  ;;  %v329_v57 = vmul.f32 %v752_v29, %v321_v0 }
 0x24a   :  { %v490_v41 = vpack.c.bf16 %v435_v35, %v434_v19  ;;  %v390_v58 = vsub.f32 1.0, %v382_v60  ;;  %v407_v14 = vsub.f32 0.0, %v391_v54  ;;  %v422_v1 = vmul.f32 0.5, %v685_v42 }
 0x24b   :  { %v437_v52 = vmul.f32 %v429_v44, %v421_v4  ;;  %v384_v53 = vmul.f32 %v561_v13, %v344_v55  ;;  %v337_v61 = vadd.f32 0.2548296, %v329_v57  ;;  %v423_v5 = vmul.f32 0.5, %v687_v43 }
 0x24c   :  { %466 = vst [vmem:[%s814_s5] sm:$0xff] %v490_v41  ;;  %v406_v28 = vsub.f32 0.0, %v390_v58  ;;  %v415_v12 = vsel %vm399_vm6, %v391_v54, %v407_v14  ;;  %v424_v43 = vmul.f32 0.5, %v689_v45  ;;  %v425_v16 = vmul.f32 0.5, %v700_v50 }
 0x24d   :  { %v491_v23 = vpack.c.bf16 %v437_v52, %v436_v26  ;;  %v392_v3 = vsub.f32 1.0, %v384_v53  ;;  %v431_v6 = vadd.f32 1.0, %v415_v12  ;;  %v345_v46 = vmul.f32 %v752_v29, %v337_v61 }
 0x24e   :  { %v414_v56 = vsel %vm398_vm5, %v390_v58, %v406_v28 }
 0x24f   :  { %467 = vst [vmem:[%s814_s5 + $0x8] sm:$0xff] %v491_v23  ;;  %v430_v2 = vadd.f32 1.0, %v414_v56  ;;  %v408_v7 = vsub.f32 0.0, %v392_v3  ;;  %v439_v8 = vmul.f32 %v431_v6, %v423_v5  ;;  %v385_v47 = vmul.f32 %v563_v32, %v345_v46 }
 0x251   :  { %v438_v15 = vmul.f32 %v430_v2, %v422_v1  ;;  %v416_v9 = vsel %vm400_vm7, %v392_v3, %v408_v7  ;;  %v393_v10 = vsub.f32 1.0, %v385_v47 }
 0x252   :  { %v432_v11 = vadd.f32 1.0, %v416_v9 }
 0x253   :  { %v492_v17 = vpack.c.bf16 %v439_v8, %v438_v15  ;;  %v409_v42 = vsub.f32 0.0, %v393_v10 }
 0x254   :  { %v440_v13 = vmul.f32 %v432_v11, %v424_v43 }
 0x255   :  { %468 = vst [vmem:[%s814_s5 + $0x10] sm:$0xff] %v492_v17  ;;  %v417_v29 = vsel %vm401_vm8, %v393_v10, %v409_v42 }
 0x256   :  { %v433_v18 = vadd.f32 1.0, %v417_v29 }
 0x258   :  { %v441_v49 = vmul.f32 %v433_v18, %v425_v16 }
 0x25a   :  { %v493_v31 = vpack.c.bf16 %v441_v49, %v440_v13 }
 0x25c   :  { %469 = vst [vmem:[%s814_s5 + $0x18] sm:$0xff] %v493_v31 }

</bundles_post_ra>
